<compile_context>
chip_gen: v7x
topology: tpu7x:2x2x1
jax: 0.10.0
libtpu: 0.0.40
codegen_flags: <defaults>
</compile_context>

<pallas_src>
import math
from functools import partial

import numpy as np
import jax
import jax.numpy as jnp
from jax import lax
from jax.experimental import pallas as pl
from jax.experimental.pallas import tpu as pltpu

PAD = 128          # lane-dense padded feature width used inside the kernels
NEG_INF = -1e9
LN_EPS = 1e-5      # TODO(synk): LayerNorm eps of the original EncoderLayer/DecoderLayer
                   # is unknown (source not provided); torch default 1e-5 assumed.


# ----------------------------- in-kernel helpers ----------------------------

def _layernorm_masked(x, g, b, valid, d_true):
    """LayerNorm over the first `d_true` (true) features of a zero-padded row block."""
    mu = jnp.sum(x, axis=-1, keepdims=True) * (1.0 / d_true)
    xc = (x - mu) * valid
    var = jnp.sum(xc * xc, axis=-1, keepdims=True) * (1.0 / d_true)
    return xc * lax.rsqrt(var + LN_EPS) * g + b


def _softmax_rows(s):
    s = s - jnp.max(s, axis=-1, keepdims=True)
    e = jnp.exp(s)
    return e / jnp.sum(e, axis=-1, keepdims=True)


def _masked_softmax(y, m):
    z = jnp.where(m, y, -1e30)
    z = z - jnp.max(z, axis=-1, keepdims=True)
    e = jnp.where(m, jnp.exp(z), 0.0)
    return e / jnp.sum(e, axis=-1, keepdims=True)


def _full_spec(a):
    n = a.ndim
    return pl.BlockSpec(a.shape, lambda *args, n=n: (0,) * n)


# ----------------------------- encoder kernel -------------------------------

def _encoder_kernel(len_ref, x_ref, wq_ref, wk_ref, wv_ref, wo_ref, lnp_ref,
                    w1_ref, b1_ref, w2_ref, o_ref, *,
                    n_layers, L, H, dk, dv, d_enc, d_src):
    # TODO(synk): EncoderLayer source not provided; standard post-LN self-attention
    # + position-wise FFN (bias-free q/k/v/o projections) assumed, key-padding mask
    # derived from labellen, dropout == identity (eval forward).
    b = pl.program_id(0)
    DP = x_ref.shape[-1]
    scale = 1.0 / math.sqrt(dk)

    fcol = lax.broadcasted_iota(jnp.int32, (1, DP), 1)
    feat_valid = (fcol < d_enc).astype(jnp.float32)        # true-feature mask for LN
    src_keep = (fcol < d_src).astype(jnp.float32)          # final cat(src, zeros) residual

    kcol = lax.broadcasted_iota(jnp.int32, (1, L), 1)
    bias = jnp.where(kcol < len_ref[b], 0.0, NEG_INF)      # (1, L) additive key mask

    x0 = x_ref[0]                                          # (L, DP)
    x = x0
    for l in range(n_layers):
        # self-attention: per-head projections (lane offset 0) + per-head W_o accumulation
        att = jnp.zeros((L, DP), jnp.float32)
        for h in range(H):
            qh = jnp.dot(x, wq_ref[l, h], preferred_element_type=jnp.float32)   # (L, dk)
            kh = jnp.dot(x, wk_ref[l, h], preferred_element_type=jnp.float32)   # (L, dk)
            vh = jnp.dot(x, wv_ref[l, h], preferred_element_type=jnp.float32)   # (L, dv)
            s = lax.dot_general(qh, kh, (((1,), (1,)), ((), ())),
                                preferred_element_type=jnp.float32) * scale + bias
            p = _softmax_rows(s)                                                # (L, L)
            att = att + jnp.dot(jnp.dot(p, vh, preferred_element_type=jnp.float32),
                                wo_ref[l, h], preferred_element_type=jnp.float32)
        x = _layernorm_masked(att + x, lnp_ref[l, 0:1], lnp_ref[l, 1:2],
                              feat_valid, d_enc)
        # position-wise FFN
        h1 = jnp.maximum(jnp.dot(x, w1_ref[l], preferred_element_type=jnp.float32)
                         + b1_ref[l], 0.0)
        y = jnp.dot(h1, w2_ref[l], preferred_element_type=jnp.float32) \
            + lnp_ref[l, 4:5] + x
        x = _layernorm_masked(y, lnp_ref[l, 2:3], lnp_ref[l, 3:4],
                              feat_valid, d_enc)

    # Encoder epilogue folded in: enc_output + cat(src_seq, zeros)
    o_ref[0] = x + x0 * src_keep


def pallas_encoder(x_pad, labellen, packed, *, B, L, H, dk, dv, d_enc, d_src, n_layers):
    DP = x_pad.shape[-1]
    tensors = [x_pad, packed['wq'], packed['wk'], packed['wv'], packed['wo'],
               packed['lnp'], packed['w1'], packed['b1'], packed['w2']]
    in_specs = [pl.BlockSpec((1, L, DP), lambda b, *_: (b, 0, 0))] + \
               [_full_spec(t) for t in tensors[1:]]
    gs = pltpu.PrefetchScalarGridSpec(
        num_scalar_prefetch=1, grid=(B,),
        in_specs=in_specs,
        out_specs=pl.BlockSpec((1, L, DP), lambda b, *_: (b, 0, 0)))
    return pl.pallas_call(
        partial(_encoder_kernel, n_layers=n_layers, L=L, H=H, dk=dk, dv=dv,
                d_enc=d_enc, d_src=d_src),
        grid_spec=gs,
        out_shape=jax.ShapeDtypeStruct((B, L, DP), jnp.float32),
        compiler_params=pltpu.CompilerParams(dimension_semantics=("parallel",)),
    )(labellen, *tensors)


# ----------------------------- fused decoder kernel -------------------------

def _decoder_kernel(len_ref, trg0_ref, pos_ref, enc_ref, slf_ref, lnp_ref,
                    cwq_ref, cwk_ref, cwv_ref, cwo_ref, w1_ref, b1_ref, w2_ref,
                    wprj_ref, trg_out_ref, attn_ref, *,
                    n_layers, Ls, T, H, dk, dv, d_dec, d_frame):
    # TODO(synk): DecoderLayer source not provided; standard post-LN layer assumed
    # (single-token self-attn, cross-attn with pad mask from labellen, FFN).  The
    # single-token self-attention softmax is exactly 1, so its output reduces to
    # x @ (Wv @ Wo) and the q/k projections cannot influence the forward result.
    b = pl.program_id(0)
    DP = trg_out_ref.shape[-1]                              # padded feature width (128)
    scale = 1.0 / math.sqrt(dk)

    dcol = lax.broadcasted_iota(jnp.int32, (1, DP), 1)
    dvalid = (dcol < d_dec).astype(jnp.float32)             # LN mask over true dec width
    m0 = dcol < 9
    m1 = jnp.logical_and(dcol >= 9, dcol < 18)
    m2 = jnp.logical_and(dcol >= 18, dcol < d_frame)

    kcol = lax.broadcasted_iota(jnp.int32, (1, Ls), 1)
    cbias = jnp.where(kcol < len_ref[b], 0.0, NEG_INF)      # (1, Ls) additive key mask

    enc = enc_ref[0]                                        # (Ls, 128) padded enc output
    # Encoder-side K/V projections are step-invariant: hoist out of the AR loop.
    enc_k = [[jnp.dot(enc, cwk_ref[l, h], preferred_element_type=jnp.float32)
              for h in range(H)] for l in range(n_layers)]
    enc_v = [[jnp.dot(enc, cwv_ref[l, h], preferred_element_type=jnp.float32)
              for h in range(H)] for l in range(n_layers)]

    attn_ref[...] = jnp.zeros(attn_ref.shape, attn_ref.dtype)   # lane-padded slab
    trg_out_ref[0, 0:1, :] = trg0_ref[0]                        # input token 0 passthrough

    # Fully-unrolled autoregressive loop (T is small & static); carry stays in vregs.
    carry = trg0_ref[0]                                     # (1, DP)
    for i in range(T):
        residual = carry
        # cat(token, pos) in the padded layout: token lives in cols [0,F), pos in [F,2F)
        dec = residual + pos_ref[i:i + 1, :]
        for l in range(n_layers):
            # single-token self-attention folded to one matmul
            sv = jnp.dot(dec, slf_ref[l], preferred_element_type=jnp.float32)
            dec = _layernorm_masked(sv + dec, lnp_ref[l, 0:1], lnp_ref[l, 1:2],
                                    dvalid, d_dec)
            # cross-attention over this batch's encoder keys
            co = jnp.zeros((1, DP), jnp.float32)
            for h in range(H):
                qh = jnp.dot(dec, cwq_ref[l, h], preferred_element_type=jnp.float32)
                s = lax.dot_general(qh, enc_k[l][h], (((1,), (1,)), ((), ())),
                                    preferred_element_type=jnp.float32) * scale + cbias
                p = _softmax_rows(s)                         # (1, Ls)
                co = co + jnp.dot(
                    jnp.dot(p, enc_v[l][h], preferred_element_type=jnp.float32),
                    cwo_ref[l, h], preferred_element_type=jnp.float32)
                if l == n_layers - 1:
                    attn_ref[0, h:h + 1, i, 0:Ls] = p
            dec = _layernorm_masked(co + dec, lnp_ref[l, 2:3], lnp_ref[l, 3:4],
                                    dvalid, d_dec)
            # position-wise FFN
            h1 = jnp.maximum(jnp.dot(dec, w1_ref[l], preferred_element_type=jnp.float32)
                             + b1_ref[l], 0.0)
            y = jnp.dot(h1, w2_ref[l], preferred_element_type=jnp.float32) \
                + lnp_ref[l, 6:7] + dec
            dec = _layernorm_masked(y, lnp_ref[l, 4:5], lnp_ref[l, 5:6],
                                    dvalid, d_dec)

        # output head: trg_word_prj (no bias) + residual;
        # cols 0:9 softmax, 9:18 softmax, 18:F sigmoid, pad stays 0.
        y = jnp.dot(dec, wprj_ref[...], preferred_element_type=jnp.float32) + residual
        out = (jnp.where(m0, _masked_softmax(y, m0), 0.0)
               + jnp.where(m1, _masked_softmax(y, m1), 0.0)
               + jnp.where(m2, 1.0 / (1.0 + jnp.exp(-y)), 0.0))
        trg_out_ref[0, i + 1:i + 2, :] = out
        carry = out


def pallas_decoder(labellen, trg0, pos_slab, enc_pad, packed, *,
                   B, Ls, T, H, dk, dv, d_dec, d_frame, n_layers):
    DP = trg0.shape[-1]
    LSP = PAD
    tensors = [trg0, pos_slab, enc_pad, packed['slf_fold'], packed['lnp'],
               packed['cwq'], packed['cwk'], packed['cwv'], packed['cwo'],
               packed['w1'], packed['b1'], packed['w2'], packed['w_prj']]
    in_specs = [pl.BlockSpec((1, 1, DP), lambda b, *_: (b, 0, 0)),
                _full_spec(pos_slab),
                pl.BlockSpec((1, Ls, enc_pad.shape[-1]), lambda b, *_: (b, 0, 0))] + \
               [_full_spec(t) for t in tensors[3:]]
    out_specs = (pl.BlockSpec((1, T + 1, DP), lambda b, *_: (b, 0, 0)),
                 pl.BlockSpec((1, H, T, LSP), lambda b, *_: (b, 0, 0, 0)))
    gs = pltpu.PrefetchScalarGridSpec(
        num_scalar_prefetch=1, grid=(B,), in_specs=in_specs, out_specs=out_specs)
    return pl.pallas_call(
        partial(_decoder_kernel, n_layers=n_layers, Ls=Ls, T=T, H=H, dk=dk, dv=dv,
                d_dec=d_dec, d_frame=d_frame),
        grid_spec=gs,
        out_shape=(jax.ShapeDtypeStruct((B, T + 1, DP), jnp.float32),
                   jax.ShapeDtypeStruct((B, H, T, LSP), jnp.float32)),
        compiler_params=pltpu.CompilerParams(dimension_semantics=("parallel",)),
    )(labellen, *tensors)


# ----------------------------- weight packing --------------------------------

def _pad_axis(x, axis, target):
    if x.shape[axis] == target:
        return x
    pads = [(0, 0)] * x.ndim
    pads[axis] = (0, target - x.shape[axis])
    return jnp.pad(x, pads)


def _pad_vec(v, target):
    return _pad_axis(v.reshape(-1), 0, target)


def _pad2(w, rows, cols):
    return jnp.pad(w, ((0, rows - w.shape[0]), (0, cols - w.shape[1])))


def _heads_in(w, H, dh):      # (d_in, H*dh) -> (H, PAD, dh)
    wp = _pad_axis(w, 0, PAD)
    return jnp.transpose(wp.reshape(PAD, H, dh), (1, 0, 2))


def _heads_out(w, H, dh):     # (H*dh, d_out) -> (H, dh, PAD)
    wp = _pad_axis(w, 1, PAD)
    return wp.reshape(H, dh, PAD)


def pack_encoder_weights(layers, cfg):
    H, dk, dv = cfg['n_head'], cfg['d_k'], cfg['d_v']
    return dict(
        wq=jnp.stack([_heads_in(l['w_q'], H, dk) for l in layers]),
        wk=jnp.stack([_heads_in(l['w_k'], H, dk) for l in layers]),
        wv=jnp.stack([_heads_in(l['w_v'], H, dv) for l in layers]),
        wo=jnp.stack([_heads_out(l['w_o'], H, dv) for l in layers]),
        lnp=jnp.stack([jnp.stack([_pad_vec(l['ln1_g'], PAD), _pad_vec(l['ln1_b'], PAD),
                                  _pad_vec(l['ln2_g'], PAD), _pad_vec(l['ln2_b'], PAD),
                                  _pad_vec(l['b2'], PAD)]) for l in layers]),
        w1=jnp.stack([_pad_axis(l['w1'], 0, PAD) for l in layers]),
        b1=jnp.stack([l['b1'].reshape(1, -1) for l in layers]),
        w2=jnp.stack([_pad_axis(l['w2'], 1, PAD) for l in layers]))


def pack_decoder_weights(layers, w_prj, cfg):
    H, dk, dv = cfg['n_head'], cfg['d_k'], cfg['d_v']
    return dict(
        # single-token self-attention: softmax == 1 -> fold Wv @ Wo into one matrix
        slf_fold=jnp.stack([_pad2(jnp.dot(l['slf']['w_v'], l['slf']['w_o']), PAD, PAD)
                            for l in layers]),
        lnp=jnp.stack([jnp.stack([_pad_vec(l['slf']['ln_g'], PAD), _pad_vec(l['slf']['ln_b'], PAD),
                                  _pad_vec(l['crs']['ln_g'], PAD), _pad_vec(l['crs']['ln_b'], PAD),
                                  _pad_vec(l['ffn']['ln_g'], PAD), _pad_vec(l['ffn']['ln_b'], PAD),
                                  _pad_vec(l['ffn']['b2'], PAD)]) for l in layers]),
        cwq=jnp.stack([_heads_in(l['crs']['w_q'], H, dk) for l in layers]),
        cwk=jnp.stack([_heads_in(l['crs']['w_k'], H, dk) for l in layers]),
        cwv=jnp.stack([_heads_in(l['crs']['w_v'], H, dv) for l in layers]),
        cwo=jnp.stack([_heads_out(l['crs']['w_o'], H, dv) for l in layers]),
        w1=jnp.stack([_pad_axis(l['ffn']['w1'], 0, PAD) for l in layers]),
        b1=jnp.stack([l['ffn']['b1'].reshape(1, -1) for l in layers]),
        w2=jnp.stack([_pad_axis(l['ffn']['w2'], 1, PAD) for l in layers]),
        w_prj=_pad2(w_prj, PAD, PAD))


# ----------------------------- parameters ------------------------------------

def sinusoid_table(n_position, d_hid):
    def angle_vec(pos):
        return [pos / np.power(10000, 2 * (j // 2) / d_hid) for j in range(d_hid)]
    tab = np.array([angle_vec(p) for p in range(n_position)])
    tab[:, 0::2] = np.sin(tab[:, 0::2])
    tab[:, 1::2] = np.cos(tab[:, 1::2])
    return jnp.asarray(tab, dtype=jnp.float32)


def xavier_uniform(key, shape):
    fan_in, fan_out = shape
    lim = math.sqrt(6.0 / (fan_in + fan_out))
    return jax.random.uniform(key, shape, jnp.float32, -lim, lim)


def init_params(key, cfg):
    d_enc = 2 * cfg['d_model_i']   # PositionalEncoding concat doubles width
    d_dec = 2 * cfg['d_model_o']   # IndexPositionalEncoding concat doubles width
    H, dk, dv, d_inner = cfg['n_head'], cfg['d_k'], cfg['d_v'], cfg['d_inner']
    n_keys = cfg['n_layers_enc'] * 6 + cfg['n_layers_dec'] * 8 + 1
    keys = iter(jax.random.split(key, n_keys))

    def ln(d):
        return jnp.ones((d,), jnp.float32), jnp.zeros((d,), jnp.float32)

    enc_layers = []
    for _ in range(cfg['n_layers_enc']):
        g1, b1 = ln(d_enc)
        g2, b2 = ln(d_enc)
        enc_layers.append(dict(
            w_q=xavier_uniform(next(keys), (d_enc, H * dk)),
            w_k=xavier_uniform(next(keys), (d_enc, H * dk)),
            w_v=xavier_uniform(next(keys), (d_enc, H * dv)),
            w_o=xavier_uniform(next(keys), (H * dv, d_enc)),
            ln1_g=g1, ln1_b=b1,
            w1=xavier_uniform(next(keys), (d_enc, d_inner)),
            b1=jnp.zeros((d_inner,), jnp.float32),
            w2=xavier_uniform(next(keys), (d_inner, d_enc)),
            b2=jnp.zeros((d_enc,), jnp.float32),
            ln2_g=g2, ln2_b=b2))

    dec_layers = []
    for _ in range(cfg['n_layers_dec']):
        sg, sb = ln(d_dec)
        cg, cb = ln(d_dec)
        fg, fb = ln(d_dec)
        dec_layers.append(dict(
            # Self-attn w_q/w_k omitted: a single-token self-attention softmax is
            # exactly 1, so the forward output never depends on them.
            slf=dict(w_v=xavier_uniform(next(keys), (d_dec, H * dv)),
                     w_o=xavier_uniform(next(keys), (H * dv, d_dec)),
                     ln_g=sg, ln_b=sb),
            crs=dict(w_q=xavier_uniform(next(keys), (d_dec, H * dk)),
                     w_k=xavier_uniform(next(keys), (d_enc, H * dk)),
                     w_v=xavier_uniform(next(keys), (d_enc, H * dv)),
                     w_o=xavier_uniform(next(keys), (H * dv, d_dec)),
                     ln_g=cg, ln_b=cb),
            ffn=dict(w1=xavier_uniform(next(keys), (d_dec, d_inner)),
                     b1=jnp.zeros((d_inner,), jnp.float32),
                     w2=xavier_uniform(next(keys), (d_inner, d_dec)),
                     b2=jnp.zeros((d_dec,), jnp.float32),
                     ln_g=fg, ln_b=fb)))

    return dict(
        enc=dict(layers=enc_layers,
                 pos_table=sinusoid_table(cfg['n_position'], cfg['d_model_i'])),
        dec=dict(layers=dec_layers,
                 pos_table=sinusoid_table(cfg['n_position'], cfg['d_model_o']),
                 w_prj=xavier_uniform(next(keys), (d_dec, cfg['d_frame']))))


# ----------------------------- model forward ---------------------------------

def encoder_forward(p, src_seq, labellen, cfg):
    B, L, Dm = src_seq.shape
    d_enc = 2 * Dm
    pos = p['pos_table'][:L, :Dm]
    x = jnp.concatenate([src_seq, jnp.broadcast_to(pos[None], (B, L, Dm))], axis=2)
    x_pad = _pad_axis(x, 2, PAD)                  # dropout == identity (eval forward)
    packed = pack_encoder_weights(p['layers'], cfg)
    # Output is the lane-padded (B, L, 128) encoder output (final residual folded in).
    return pallas_encoder(x_pad, labellen, packed, B=B, L=L, H=cfg['n_head'],
                          dk=cfg['d_k'], dv=cfg['d_v'], d_enc=d_enc, d_src=Dm,
                          n_layers=len(p['layers']))


def decoder_forward(p, trg_seq, enc_pad, labellen, cfg):
    B, _, F = trg_seq.shape
    T = cfg['videomaxlen']
    Ls = enc_pad.shape[1]
    d_dec = 2 * cfg['d_model_o']
    trg0 = _pad_axis(trg_seq[:, 0:1, :], 2, PAD)                    # only token 0 is read
    pos_slab = jnp.pad(p['pos_table'][:T, :F], ((0, 0), (F, PAD - 2 * F)))
    packed = pack_decoder_weights(p['layers'], p['w_prj'], cfg)
    trg_out_pad, attn_pad = pallas_decoder(labellen, trg0, pos_slab, enc_pad, packed,
                                           B=B, Ls=Ls, T=T, H=cfg['n_head'],
                                           dk=cfg['d_k'], dv=cfg['d_v'],
                                           d_dec=d_dec, d_frame=F,
                                           n_layers=len(p['layers']))
    return trg_out_pad[:, :, :F], attn_pad[:, :, :, :Ls]


def transformer_forward(params, src_seq, trg_seq, labellen, framelen, cfg):
    del framelen  # unused by the reference forward
    # get_subsequent_mask(trg_seq) is moot: the decoder attends to one token per step.
    enc_pad = encoder_forward(params['enc'], src_seq, labellen, cfg)
    return decoder_forward(params['dec'], trg_seq, enc_pad, labellen, cfg)


# ----------------------------------- main -------------------------------------

if __name__ == "__main__":
    cfg = dict(d_model_i=51, d_model_o=19, d_frame=19, d_inner=128,
               n_layers_enc=1, n_layers_dec=1, n_head=4, d_k=16, d_v=16,
               n_position=16, videomaxlen=4)

    key = jax.random.PRNGKey(0)
    kp, k1, k2 = jax.random.split(key, 3)
    params = init_params(kp, cfg)

    B, Ls = 2, 6
    src_seq = jax.random.normal(k1, (B, Ls, cfg['d_model_i']), jnp.float32)
    trg_seq = jax.random.normal(k2, (B, cfg['videomaxlen'] + 1, cfg['d_frame']), jnp.float32)
    labellen = jnp.array([4, 6], jnp.int32)
    framelen = jnp.array([cfg['videomaxlen'], cfg['videomaxlen']], jnp.int32)

    fwd = jax.jit(partial(transformer_forward, cfg=cfg))
    dec_out, attn_array = fwd(params, src_seq, trg_seq, labellen, framelen)
    jax.block_until_ready((dec_out, attn_array))

    assert dec_out.shape == (B, cfg['videomaxlen'] + 1, cfg['d_frame'])
    assert attn_array.shape == (B, cfg['n_head'], cfg['videomaxlen'], Ls)
    assert bool(jnp.all(jnp.isfinite(dec_out)))
    assert bool(jnp.all(jnp.isfinite(attn_array)))
    print("KERNEL_OK")
</pallas_src>

<mosaic_0001>
module attributes {stable_mosaic.version = 11 : i64} {
  func.func @_encoder_kernel(%arg0: i32, %arg1: memref<2xi32, #tpu.memory_space<smem>>, %arg2: memref<1x6x128xf32, #tpu.memory_space<vmem>>, %arg3: memref<1x4x128x16xf32, #tpu.memory_space<vmem>>, %arg4: memref<1x4x128x16xf32, #tpu.memory_space<vmem>>, %arg5: memref<1x4x128x16xf32, #tpu.memory_space<vmem>>, %arg6: memref<1x4x16x128xf32, #tpu.memory_space<vmem>>, %arg7: memref<1x5x128xf32, #tpu.memory_space<vmem>>, %arg8: memref<1x128x128xf32, #tpu.memory_space<vmem>>, %arg9: memref<1x1x128xf32, #tpu.memory_space<vmem>>, %arg10: memref<1x128x128xf32, #tpu.memory_space<vmem>>, %arg11: memref<1x6x128xf32, #tpu.memory_space<vmem>>) attributes {dimension_semantics = [#tpu.dimension_semantics<parallel>], iteration_bounds = array<i64: 2>, scalar_prefetch = 1 : i64, scratch_operands = 0 : i64, tpu.core_type = #tpu.core_type<tc>, window_params = [{transform_indices = @transform_0, window_bounds = array<i64: 1, 6, 128>}, {pipeline_mode = #tpu.pipeline_mode<synchronous>, transform_indices = @transform_1, window_bounds = array<i64: 1, 4, 128, 16>}, {pipeline_mode = #tpu.pipeline_mode<synchronous>, transform_indices = @transform_2, window_bounds = array<i64: 1, 4, 128, 16>}, {pipeline_mode = #tpu.pipeline_mode<synchronous>, transform_indices = @transform_3, window_bounds = array<i64: 1, 4, 128, 16>}, {pipeline_mode = #tpu.pipeline_mode<synchronous>, transform_indices = @transform_4, window_bounds = array<i64: 1, 4, 16, 128>}, {pipeline_mode = #tpu.pipeline_mode<synchronous>, transform_indices = @transform_5, window_bounds = array<i64: 1, 5, 128>}, {pipeline_mode = #tpu.pipeline_mode<synchronous>, transform_indices = @transform_6, window_bounds = array<i64: 1, 128, 128>}, {pipeline_mode = #tpu.pipeline_mode<synchronous>, transform_indices = @transform_7, window_bounds = array<i64: 1, 1, 128>}, {pipeline_mode = #tpu.pipeline_mode<synchronous>, transform_indices = @transform_8, window_bounds = array<i64: 1, 128, 128>}, {transform_indices = @transform_9, window_bounds = array<i64: 1, 6, 128>}]} {
    %0 = tpu.iota {dimensions = array<i32: 1>} : vector<1x128xi32>
    %c102_i32 = arith.constant 102 : i32
    %1 = vector.broadcast %c102_i32 : i32 to vector<1x128xi32>
    %2 = arith.cmpi slt, %0, %1 : vector<1x128xi32>
    %3 = arith.extui %2 : vector<1x128xi1> to vector<1x128xi32>
    %4 = arith.sitofp %3 : vector<1x128xi32> to vector<1x128xf32>
    %c51_i32 = arith.constant 51 : i32
    %5 = vector.broadcast %c51_i32 : i32 to vector<1x128xi32>
    %6 = arith.cmpi slt, %0, %5 : vector<1x128xi32>
    %7 = arith.extui %6 : vector<1x128xi1> to vector<1x128xi32>
    %8 = arith.sitofp %7 : vector<1x128xi32> to vector<1x128xf32>
    %9 = tpu.iota {dimensions = array<i32: 1>} : vector<1x6xi32>
    %10 = arith.index_cast %arg0 : i32 to index
    %11 = memref.load %arg1[%10] : memref<2xi32, #tpu.memory_space<smem>>
    %12 = vector.broadcast %11 : i32 to vector<1x6xi32>
    %13 = arith.cmpi slt, %9, %12 : vector<1x6xi32>
    %cst = arith.constant 0.000000e+00 : f32
    %cst_0 = arith.constant -1.000000e+09 : f32
    %14 = vector.broadcast %cst : f32 to vector<1x6xf32>
    %15 = vector.broadcast %cst_0 : f32 to vector<1x6xf32>
    %16 = arith.select %13, %14, %15 : vector<1x6xi1>, vector<1x6xf32>
    %c0 = arith.constant 0 : index
    %c0_1 = arith.constant 0 : index
    %c0_2 = arith.constant 0 : index
    %17 = vector.load %arg2[%c0, %c0_1, %c0_2] : memref<1x6x128xf32, #tpu.memory_space<vmem>>, vector<1x6x128xf32>
    %18 = vector.shape_cast %17 : vector<1x6x128xf32> to vector<6x128xf32>
    %cst_3 = arith.constant 0.000000e+00 : f32
    %19 = vector.broadcast %cst_3 : f32 to vector<6x128xf32>
    %c0_4 = arith.constant 0 : index
    %c0_5 = arith.constant 0 : index
    %c0_6 = arith.constant 0 : index
    %c0_7 = arith.constant 0 : index
    %20 = vector.load %arg3[%c0_4, %c0_5, %c0_6, %c0_7] : memref<1x4x128x16xf32, #tpu.memory_space<vmem>>, vector<1x1x128x16xf32>
    %21 = vector.shape_cast %20 : vector<1x1x128x16xf32> to vector<128x16xf32>
    %cst_8 = arith.constant dense<0.000000e+00> : vector<6x16xf32>
    %22 = tpu.matmul %18, %21, %cst_8 {dimension_numbers = #tpu.dot_dimension_numbers<[1], [0], [0], [1], [0, 0, 1, 1], [], []>} : vector<6x128xf32>, vector<128x16xf32>, vector<6x16xf32> -> vector<6x16xf32>
    %c0_9 = arith.constant 0 : index
    %c0_10 = arith.constant 0 : index
    %c0_11 = arith.constant 0 : index
    %c0_12 = arith.constant 0 : index
    %23 = vector.load %arg4[%c0_9, %c0_10, %c0_11, %c0_12] : memref<1x4x128x16xf32, #tpu.memory_space<vmem>>, vector<1x1x128x16xf32>
    %24 = vector.shape_cast %23 : vector<1x1x128x16xf32> to vector<128x16xf32>
    %cst_13 = arith.constant dense<0.000000e+00> : vector<6x16xf32>
    %25 = tpu.matmul %18, %24, %cst_13 {dimension_numbers = #tpu.dot_dimension_numbers<[1], [0], [0], [1], [0, 0, 1, 1], [], []>} : vector<6x128xf32>, vector<128x16xf32>, vector<6x16xf32> -> vector<6x16xf32>
    %c0_14 = arith.constant 0 : index
    %c0_15 = arith.constant 0 : index
    %c0_16 = arith.constant 0 : index
    %c0_17 = arith.constant 0 : index
    %26 = vector.load %arg5[%c0_14, %c0_15, %c0_16, %c0_17] : memref<1x4x128x16xf32, #tpu.memory_space<vmem>>, vector<1x1x128x16xf32>
    %27 = vector.shape_cast %26 : vector<1x1x128x16xf32> to vector<128x16xf32>
    %cst_18 = arith.constant dense<0.000000e+00> : vector<6x16xf32>
    %28 = tpu.matmul %18, %27, %cst_18 {dimension_numbers = #tpu.dot_dimension_numbers<[1], [0], [0], [1], [0, 0, 1, 1], [], []>} : vector<6x128xf32>, vector<128x16xf32>, vector<6x16xf32> -> vector<6x16xf32>
    %cst_19 = arith.constant dense<0.000000e+00> : vector<6x6xf32>
    %29 = tpu.matmul %22, %25, %cst_19 {dimension_numbers = #tpu.dot_dimension_numbers<[1], [1], [0], [0], [0, 0, 1, 0], [], []>} : vector<6x16xf32>, vector<6x16xf32>, vector<6x6xf32> -> vector<6x6xf32>
    %cst_20 = arith.constant 2.500000e-01 : f32
    %30 = vector.broadcast %cst_20 : f32 to vector<6x6xf32>
    %31 = arith.mulf %29, %30 : vector<6x6xf32>
    %32 = vector.broadcast %16 : vector<1x6xf32> to vector<6x6xf32>
    %33 = arith.addf %31, %32 : vector<6x6xf32>
    %cst_21 = arith.constant dense<0xFF800000> : vector<6xf32>
    %34 = vector.multi_reduction <maximumf>, %33, %cst_21 [1] : vector<6x6xf32> to vector<6xf32>
    %35 = vector.shape_cast %34 : vector<6xf32> to vector<6x1xf32>
    %36 = vector.broadcast %35 : vector<6x1xf32> to vector<6x6xf32>
    %37 = arith.subf %33, %36 : vector<6x6xf32>
    %38 = math.exp %37 : vector<6x6xf32>
    %cst_22 = arith.constant dense<0.000000e+00> : vector<6xf32>
    %39 = vector.multi_reduction <add>, %38, %cst_22 [1] : vector<6x6xf32> to vector<6xf32>
    %40 = vector.shape_cast %39 : vector<6xf32> to vector<6x1xf32>
    %41 = vector.broadcast %40 : vector<6x1xf32> to vector<6x6xf32>
    %42 = arith.divf %38, %41 : vector<6x6xf32>
    %cst_23 = arith.constant dense<0.000000e+00> : vector<6x16xf32>
    %43 = tpu.matmul %42, %28, %cst_23 {dimension_numbers = #tpu.dot_dimension_numbers<[1], [0], [0], [1], [0, 0, 1, 1], [], []>} : vector<6x6xf32>, vector<6x16xf32>, vector<6x16xf32> -> vector<6x16xf32>
    %c0_24 = arith.constant 0 : index
    %c0_25 = arith.constant 0 : index
    %c0_26 = arith.constant 0 : index
    %c0_27 = arith.constant 0 : index
    %44 = vector.load %arg6[%c0_24, %c0_25, %c0_26, %c0_27] : memref<1x4x16x128xf32, #tpu.memory_space<vmem>>, vector<1x1x16x128xf32>
    %45 = vector.shape_cast %44 : vector<1x1x16x128xf32> to vector<16x128xf32>
    %cst_28 = arith.constant dense<0.000000e+00> : vector<6x128xf32>
    %46 = tpu.matmul %43, %45, %cst_28 {dimension_numbers = #tpu.dot_dimension_numbers<[1], [0], [0], [1], [0, 0, 1, 1], [], []>} : vector<6x16xf32>, vector<16x128xf32>, vector<6x128xf32> -> vector<6x128xf32>
    %47 = arith.addf %19, %46 : vector<6x128xf32>
    %c0_29 = arith.constant 0 : index
    %c1 = arith.constant 1 : index
    %c0_30 = arith.constant 0 : index
    %c0_31 = arith.constant 0 : index
    %48 = vector.load %arg3[%c0_29, %c1, %c0_30, %c0_31] : memref<1x4x128x16xf32, #tpu.memory_space<vmem>>, vector<1x1x128x16xf32>
    %49 = vector.shape_cast %48 : vector<1x1x128x16xf32> to vector<128x16xf32>
    %cst_32 = arith.constant dense<0.000000e+00> : vector<6x16xf32>
    %50 = tpu.matmul %18, %49, %cst_32 {dimension_numbers = #tpu.dot_dimension_numbers<[1], [0], [0], [1], [0, 0, 1, 1], [], []>} : vector<6x128xf32>, vector<128x16xf32>, vector<6x16xf32> -> vector<6x16xf32>
    %c0_33 = arith.constant 0 : index
    %c1_34 = arith.constant 1 : index
    %c0_35 = arith.constant 0 : index
    %c0_36 = arith.constant 0 : index
    %51 = vector.load %arg4[%c0_33, %c1_34, %c0_35, %c0_36] : memref<1x4x128x16xf32, #tpu.memory_space<vmem>>, vector<1x1x128x16xf32>
    %52 = vector.shape_cast %51 : vector<1x1x128x16xf32> to vector<128x16xf32>
    %cst_37 = arith.constant dense<0.000000e+00> : vector<6x16xf32>
    %53 = tpu.matmul %18, %52, %cst_37 {dimension_numbers = #tpu.dot_dimension_numbers<[1], [0], [0], [1], [0, 0, 1, 1], [], []>} : vector<6x128xf32>, vector<128x16xf32>, vector<6x16xf32> -> vector<6x16xf32>
    %c0_38 = arith.constant 0 : index
    %c1_39 = arith.constant 1 : index
    %c0_40 = arith.constant 0 : index
    %c0_41 = arith.constant 0 : index
    %54 = vector.load %arg5[%c0_38, %c1_39, %c0_40, %c0_41] : memref<1x4x128x16xf32, #tpu.memory_space<vmem>>, vector<1x1x128x16xf32>
    %55 = vector.shape_cast %54 : vector<1x1x128x16xf32> to vector<128x16xf32>
    %cst_42 = arith.constant dense<0.000000e+00> : vector<6x16xf32>
    %56 = tpu.matmul %18, %55, %cst_42 {dimension_numbers = #tpu.dot_dimension_numbers<[1], [0], [0], [1], [0, 0, 1, 1], [], []>} : vector<6x128xf32>, vector<128x16xf32>, vector<6x16xf32> -> vector<6x16xf32>
    %cst_43 = arith.constant dense<0.000000e+00> : vector<6x6xf32>
    %57 = tpu.matmul %50, %53, %cst_43 {dimension_numbers = #tpu.dot_dimension_numbers<[1], [1], [0], [0], [0, 0, 1, 0], [], []>} : vector<6x16xf32>, vector<6x16xf32>, vector<6x6xf32> -> vector<6x6xf32>
    %cst_44 = arith.constant 2.500000e-01 : f32
    %58 = vector.broadcast %cst_44 : f32 to vector<6x6xf32>
    %59 = arith.mulf %57, %58 : vector<6x6xf32>
    %60 = vector.broadcast %16 : vector<1x6xf32> to vector<6x6xf32>
    %61 = arith.addf %59, %60 : vector<6x6xf32>
    %cst_45 = arith.constant dense<0xFF800000> : vector<6xf32>
    %62 = vector.multi_reduction <maximumf>, %61, %cst_45 [1] : vector<6x6xf32> to vector<6xf32>
    %63 = vector.shape_cast %62 : vector<6xf32> to vector<6x1xf32>
    %64 = vector.broadcast %63 : vector<6x1xf32> to vector<6x6xf32>
    %65 = arith.subf %61, %64 : vector<6x6xf32>
    %66 = math.exp %65 : vector<6x6xf32>
    %cst_46 = arith.constant dense<0.000000e+00> : vector<6xf32>
    %67 = vector.multi_reduction <add>, %66, %cst_46 [1] : vector<6x6xf32> to vector<6xf32>
    %68 = vector.shape_cast %67 : vector<6xf32> to vector<6x1xf32>
    %69 = vector.broadcast %68 : vector<6x1xf32> to vector<6x6xf32>
    %70 = arith.divf %66, %69 : vector<6x6xf32>
    %cst_47 = arith.constant dense<0.000000e+00> : vector<6x16xf32>
    %71 = tpu.matmul %70, %56, %cst_47 {dimension_numbers = #tpu.dot_dimension_numbers<[1], [0], [0], [1], [0, 0, 1, 1], [], []>} : vector<6x6xf32>, vector<6x16xf32>, vector<6x16xf32> -> vector<6x16xf32>
    %c0_48 = arith.constant 0 : index
    %c1_49 = arith.constant 1 : index
    %c0_50 = arith.constant 0 : index
    %c0_51 = arith.constant 0 : index
    %72 = vector.load %arg6[%c0_48, %c1_49, %c0_50, %c0_51] : memref<1x4x16x128xf32, #tpu.memory_space<vmem>>, vector<1x1x16x128xf32>
    %73 = vector.shape_cast %72 : vector<1x1x16x128xf32> to vector<16x128xf32>
    %cst_52 = arith.constant dense<0.000000e+00> : vector<6x128xf32>
    %74 = tpu.matmul %71, %73, %cst_52 {dimension_numbers = #tpu.dot_dimension_numbers<[1], [0], [0], [1], [0, 0, 1, 1], [], []>} : vector<6x16xf32>, vector<16x128xf32>, vector<6x128xf32> -> vector<6x128xf32>
    %75 = arith.addf %47, %74 : vector<6x128xf32>
    %c0_53 = arith.constant 0 : index
    %c2 = arith.constant 2 : index
    %c0_54 = arith.constant 0 : index
    %c0_55 = arith.constant 0 : index
    %76 = vector.load %arg3[%c0_53, %c2, %c0_54, %c0_55] : memref<1x4x128x16xf32, #tpu.memory_space<vmem>>, vector<1x1x128x16xf32>
    %77 = vector.shape_cast %76 : vector<1x1x128x16xf32> to vector<128x16xf32>
    %cst_56 = arith.constant dense<0.000000e+00> : vector<6x16xf32>
    %78 = tpu.matmul %18, %77, %cst_56 {dimension_numbers = #tpu.dot_dimension_numbers<[1], [0], [0], [1], [0, 0, 1, 1], [], []>} : vector<6x128xf32>, vector<128x16xf32>, vector<6x16xf32> -> vector<6x16xf32>
    %c0_57 = arith.constant 0 : index
    %c2_58 = arith.constant 2 : index
    %c0_59 = arith.constant 0 : index
    %c0_60 = arith.constant 0 : index
    %79 = vector.load %arg4[%c0_57, %c2_58, %c0_59, %c0_60] : memref<1x4x128x16xf32, #tpu.memory_space<vmem>>, vector<1x1x128x16xf32>
    %80 = vector.shape_cast %79 : vector<1x1x128x16xf32> to vector<128x16xf32>
    %cst_61 = arith.constant dense<0.000000e+00> : vector<6x16xf32>
    %81 = tpu.matmul %18, %80, %cst_61 {dimension_numbers = #tpu.dot_dimension_numbers<[1], [0], [0], [1], [0, 0, 1, 1], [], []>} : vector<6x128xf32>, vector<128x16xf32>, vector<6x16xf32> -> vector<6x16xf32>
    %c0_62 = arith.constant 0 : index
    %c2_63 = arith.constant 2 : index
    %c0_64 = arith.constant 0 : index
    %c0_65 = arith.constant 0 : index
    %82 = vector.load %arg5[%c0_62, %c2_63, %c0_64, %c0_65] : memref<1x4x128x16xf32, #tpu.memory_space<vmem>>, vector<1x1x128x16xf32>
    %83 = vector.shape_cast %82 : vector<1x1x128x16xf32> to vector<128x16xf32>
    %cst_66 = arith.constant dense<0.000000e+00> : vector<6x16xf32>
    %84 = tpu.matmul %18, %83, %cst_66 {dimension_numbers = #tpu.dot_dimension_numbers<[1], [0], [0], [1], [0, 0, 1, 1], [], []>} : vector<6x128xf32>, vector<128x16xf32>, vector<6x16xf32> -> vector<6x16xf32>
    %cst_67 = arith.constant dense<0.000000e+00> : vector<6x6xf32>
    %85 = tpu.matmul %78, %81, %cst_67 {dimension_numbers = #tpu.dot_dimension_numbers<[1], [1], [0], [0], [0, 0, 1, 0], [], []>} : vector<6x16xf32>, vector<6x16xf32>, vector<6x6xf32> -> vector<6x6xf32>
    %cst_68 = arith.constant 2.500000e-01 : f32
    %86 = vector.broadcast %cst_68 : f32 to vector<6x6xf32>
    %87 = arith.mulf %85, %86 : vector<6x6xf32>
    %88 = vector.broadcast %16 : vector<1x6xf32> to vector<6x6xf32>
    %89 = arith.addf %87, %88 : vector<6x6xf32>
    %cst_69 = arith.constant dense<0xFF800000> : vector<6xf32>
    %90 = vector.multi_reduction <maximumf>, %89, %cst_69 [1] : vector<6x6xf32> to vector<6xf32>
    %91 = vector.shape_cast %90 : vector<6xf32> to vector<6x1xf32>
    %92 = vector.broadcast %91 : vector<6x1xf32> to vector<6x6xf32>
    %93 = arith.subf %89, %92 : vector<6x6xf32>
    %94 = math.exp %93 : vector<6x6xf32>
    %cst_70 = arith.constant dense<0.000000e+00> : vector<6xf32>
    %95 = vector.multi_reduction <add>, %94, %cst_70 [1] : vector<6x6xf32> to vector<6xf32>
    %96 = vector.shape_cast %95 : vector<6xf32> to vector<6x1xf32>
    %97 = vector.broadcast %96 : vector<6x1xf32> to vector<6x6xf32>
    %98 = arith.divf %94, %97 : vector<6x6xf32>
    %cst_71 = arith.constant dense<0.000000e+00> : vector<6x16xf32>
    %99 = tpu.matmul %98, %84, %cst_71 {dimension_numbers = #tpu.dot_dimension_numbers<[1], [0], [0], [1], [0, 0, 1, 1], [], []>} : vector<6x6xf32>, vector<6x16xf32>, vector<6x16xf32> -> vector<6x16xf32>
    %c0_72 = arith.constant 0 : index
    %c2_73 = arith.constant 2 : index
    %c0_74 = arith.constant 0 : index
    %c0_75 = arith.constant 0 : index
    %100 = vector.load %arg6[%c0_72, %c2_73, %c0_74, %c0_75] : memref<1x4x16x128xf32, #tpu.memory_space<vmem>>, vector<1x1x16x128xf32>
    %101 = vector.shape_cast %100 : vector<1x1x16x128xf32> to vector<16x128xf32>
    %cst_76 = arith.constant dense<0.000000e+00> : vector<6x128xf32>
    %102 = tpu.matmul %99, %101, %cst_76 {dimension_numbers = #tpu.dot_dimension_numbers<[1], [0], [0], [1], [0, 0, 1, 1], [], []>} : vector<6x16xf32>, vector<16x128xf32>, vector<6x128xf32> -> vector<6x128xf32>
    %103 = arith.addf %75, %102 : vector<6x128xf32>
    %c0_77 = arith.constant 0 : index
    %c3 = arith.constant 3 : index
    %c0_78 = arith.constant 0 : index
    %c0_79 = arith.constant 0 : index
    %104 = vector.load %arg3[%c0_77, %c3, %c0_78, %c0_79] : memref<1x4x128x16xf32, #tpu.memory_space<vmem>>, vector<1x1x128x16xf32>
    %105 = vector.shape_cast %104 : vector<1x1x128x16xf32> to vector<128x16xf32>
    %cst_80 = arith.constant dense<0.000000e+00> : vector<6x16xf32>
    %106 = tpu.matmul %18, %105, %cst_80 {dimension_numbers = #tpu.dot_dimension_numbers<[1], [0], [0], [1], [0, 0, 1, 1], [], []>} : vector<6x128xf32>, vector<128x16xf32>, vector<6x16xf32> -> vector<6x16xf32>
    %c0_81 = arith.constant 0 : index
    %c3_82 = arith.constant 3 : index
    %c0_83 = arith.constant 0 : index
    %c0_84 = arith.constant 0 : index
    %107 = vector.load %arg4[%c0_81, %c3_82, %c0_83, %c0_84] : memref<1x4x128x16xf32, #tpu.memory_space<vmem>>, vector<1x1x128x16xf32>
    %108 = vector.shape_cast %107 : vector<1x1x128x16xf32> to vector<128x16xf32>
    %cst_85 = arith.constant dense<0.000000e+00> : vector<6x16xf32>
    %109 = tpu.matmul %18, %108, %cst_85 {dimension_numbers = #tpu.dot_dimension_numbers<[1], [0], [0], [1], [0, 0, 1, 1], [], []>} : vector<6x128xf32>, vector<128x16xf32>, vector<6x16xf32> -> vector<6x16xf32>
    %c0_86 = arith.constant 0 : index
    %c3_87 = arith.constant 3 : index
    %c0_88 = arith.constant 0 : index
    %c0_89 = arith.constant 0 : index
    %110 = vector.load %arg5[%c0_86, %c3_87, %c0_88, %c0_89] : memref<1x4x128x16xf32, #tpu.memory_space<vmem>>, vector<1x1x128x16xf32>
    %111 = vector.shape_cast %110 : vector<1x1x128x16xf32> to vector<128x16xf32>
    %cst_90 = arith.constant dense<0.000000e+00> : vector<6x16xf32>
    %112 = tpu.matmul %18, %111, %cst_90 {dimension_numbers = #tpu.dot_dimension_numbers<[1], [0], [0], [1], [0, 0, 1, 1], [], []>} : vector<6x128xf32>, vector<128x16xf32>, vector<6x16xf32> -> vector<6x16xf32>
    %cst_91 = arith.constant dense<0.000000e+00> : vector<6x6xf32>
    %113 = tpu.matmul %106, %109, %cst_91 {dimension_numbers = #tpu.dot_dimension_numbers<[1], [1], [0], [0], [0, 0, 1, 0], [], []>} : vector<6x16xf32>, vector<6x16xf32>, vector<6x6xf32> -> vector<6x6xf32>
    %cst_92 = arith.constant 2.500000e-01 : f32
    %114 = vector.broadcast %cst_92 : f32 to vector<6x6xf32>
    %115 = arith.mulf %113, %114 : vector<6x6xf32>
    %116 = vector.broadcast %16 : vector<1x6xf32> to vector<6x6xf32>
    %117 = arith.addf %115, %116 : vector<6x6xf32>
    %cst_93 = arith.constant dense<0xFF800000> : vector<6xf32>
    %118 = vector.multi_reduction <maximumf>, %117, %cst_93 [1] : vector<6x6xf32> to vector<6xf32>
    %119 = vector.shape_cast %118 : vector<6xf32> to vector<6x1xf32>
    %120 = vector.broadcast %119 : vector<6x1xf32> to vector<6x6xf32>
    %121 = arith.subf %117, %120 : vector<6x6xf32>
    %122 = math.exp %121 : vector<6x6xf32>
    %cst_94 = arith.constant dense<0.000000e+00> : vector<6xf32>
    %123 = vector.multi_reduction <add>, %122, %cst_94 [1] : vector<6x6xf32> to vector<6xf32>
    %124 = vector.shape_cast %123 : vector<6xf32> to vector<6x1xf32>
    %125 = vector.broadcast %124 : vector<6x1xf32> to vector<6x6xf32>
    %126 = arith.divf %122, %125 : vector<6x6xf32>
    %cst_95 = arith.constant dense<0.000000e+00> : vector<6x16xf32>
    %127 = tpu.matmul %126, %112, %cst_95 {dimension_numbers = #tpu.dot_dimension_numbers<[1], [0], [0], [1], [0, 0, 1, 1], [], []>} : vector<6x6xf32>, vector<6x16xf32>, vector<6x16xf32> -> vector<6x16xf32>
    %c0_96 = arith.constant 0 : index
    %c3_97 = arith.constant 3 : index
    %c0_98 = arith.constant 0 : index
    %c0_99 = arith.constant 0 : index
    %128 = vector.load %arg6[%c0_96, %c3_97, %c0_98, %c0_99] : memref<1x4x16x128xf32, #tpu.memory_space<vmem>>, vector<1x1x16x128xf32>
    %129 = vector.shape_cast %128 : vector<1x1x16x128xf32> to vector<16x128xf32>
    %cst_100 = arith.constant dense<0.000000e+00> : vector<6x128xf32>
    %130 = tpu.matmul %127, %129, %cst_100 {dimension_numbers = #tpu.dot_dimension_numbers<[1], [0], [0], [1], [0, 0, 1, 1], [], []>} : vector<6x16xf32>, vector<16x128xf32>, vector<6x128xf32> -> vector<6x128xf32>
    %131 = arith.addf %103, %130 : vector<6x128xf32>
    %132 = arith.addf %131, %18 : vector<6x128xf32>
    %c0_101 = arith.constant 0 : index
    %c0_102 = arith.constant 0 : index
    %c0_103 = arith.constant 0 : index
    %133 = vector.load %arg7[%c0_101, %c0_102, %c0_103] : memref<1x5x128xf32, #tpu.memory_space<vmem>>, vector<1x1x128xf32>
    %134 = vector.shape_cast %133 : vector<1x1x128xf32> to vector<1x128xf32>
    %c0_104 = arith.constant 0 : index
    %c1_105 = arith.constant 1 : index
    %c0_106 = arith.constant 0 : index
    %135 = vector.load %arg7[%c0_104, %c1_105, %c0_106] : memref<1x5x128xf32, #tpu.memory_space<vmem>>, vector<1x1x128xf32>
    %136 = vector.shape_cast %135 : vector<1x1x128xf32> to vector<1x128xf32>
    %cst_107 = arith.constant dense<0.000000e+00> : vector<6xf32>
    %137 = vector.multi_reduction <add>, %132, %cst_107 [1] : vector<6x128xf32> to vector<6xf32>
    %138 = vector.shape_cast %137 : vector<6xf32> to vector<6x1xf32>
    %cst_108 = arith.constant 0.00980392192 : f32
    %139 = vector.broadcast %cst_108 : f32 to vector<6x1xf32>
    %140 = arith.mulf %138, %139 : vector<6x1xf32>
    %141 = vector.broadcast %140 : vector<6x1xf32> to vector<6x128xf32>
    %142 = arith.subf %132, %141 : vector<6x128xf32>
    %143 = vector.broadcast %4 : vector<1x128xf32> to vector<6x128xf32>
    %144 = arith.mulf %142, %143 : vector<6x128xf32>
    %145 = arith.mulf %144, %144 : vector<6x128xf32>
    %cst_109 = arith.constant dense<0.000000e+00> : vector<6xf32>
    %146 = vector.multi_reduction <add>, %145, %cst_109 [1] : vector<6x128xf32> to vector<6xf32>
    %147 = vector.shape_cast %146 : vector<6xf32> to vector<6x1xf32>
    %cst_110 = arith.constant 0.00980392192 : f32
    %148 = vector.broadcast %cst_110 : f32 to vector<6x1xf32>
    %149 = arith.mulf %147, %148 : vector<6x1xf32>
    %cst_111 = arith.constant 9.99999974E-6 : f32
    %150 = vector.broadcast %cst_111 : f32 to vector<6x1xf32>
    %151 = arith.addf %149, %150 : vector<6x1xf32>
    %152 = math.rsqrt %151 : vector<6x1xf32>
    %153 = vector.broadcast %152 : vector<6x1xf32> to vector<6x128xf32>
    %154 = arith.mulf %144, %153 : vector<6x128xf32>
    %155 = vector.broadcast %134 : vector<1x128xf32> to vector<6x128xf32>
    %156 = arith.mulf %154, %155 : vector<6x128xf32>
    %157 = vector.broadcast %136 : vector<1x128xf32> to vector<6x128xf32>
    %158 = arith.addf %156, %157 : vector<6x128xf32>
    %c0_112 = arith.constant 0 : index
    %c0_113 = arith.constant 0 : index
    %c0_114 = arith.constant 0 : index
    %159 = vector.load %arg8[%c0_112, %c0_113, %c0_114] : memref<1x128x128xf32, #tpu.memory_space<vmem>>, vector<1x128x128xf32>
    %160 = vector.shape_cast %159 : vector<1x128x128xf32> to vector<128x128xf32>
    %cst_115 = arith.constant dense<0.000000e+00> : vector<6x128xf32>
    %161 = tpu.matmul %158, %160, %cst_115 {dimension_numbers = #tpu.dot_dimension_numbers<[1], [0], [0], [1], [0, 0, 1, 1], [], []>} : vector<6x128xf32>, vector<128x128xf32>, vector<6x128xf32> -> vector<6x128xf32>
    %c0_116 = arith.constant 0 : index
    %c0_117 = arith.constant 0 : index
    %c0_118 = arith.constant 0 : index
    %162 = vector.load %arg9[%c0_116, %c0_117, %c0_118] : memref<1x1x128xf32, #tpu.memory_space<vmem>>, vector<1x1x128xf32>
    %163 = vector.shape_cast %162 : vector<1x1x128xf32> to vector<1x128xf32>
    %164 = vector.broadcast %163 : vector<1x128xf32> to vector<6x128xf32>
    %165 = arith.addf %161, %164 : vector<6x128xf32>
    %cst_119 = arith.constant 0.000000e+00 : f32
    %166 = vector.broadcast %cst_119 : f32 to vector<6x128xf32>
    %167 = arith.maximumf %165, %166 : vector<6x128xf32>
    %c0_120 = arith.constant 0 : index
    %c0_121 = arith.constant 0 : index
    %c0_122 = arith.constant 0 : index
    %168 = vector.load %arg10[%c0_120, %c0_121, %c0_122] : memref<1x128x128xf32, #tpu.memory_space<vmem>>, vector<1x128x128xf32>
    %169 = vector.shape_cast %168 : vector<1x128x128xf32> to vector<128x128xf32>
    %cst_123 = arith.constant dense<0.000000e+00> : vector<6x128xf32>
    %170 = tpu.matmul %167, %169, %cst_123 {dimension_numbers = #tpu.dot_dimension_numbers<[1], [0], [0], [1], [0, 0, 1, 1], [], []>} : vector<6x128xf32>, vector<128x128xf32>, vector<6x128xf32> -> vector<6x128xf32>
    %c0_124 = arith.constant 0 : index
    %c4 = arith.constant 4 : index
    %c0_125 = arith.constant 0 : index
    %171 = vector.load %arg7[%c0_124, %c4, %c0_125] : memref<1x5x128xf32, #tpu.memory_space<vmem>>, vector<1x1x128xf32>
    %172 = vector.shape_cast %171 : vector<1x1x128xf32> to vector<1x128xf32>
    %173 = vector.broadcast %172 : vector<1x128xf32> to vector<6x128xf32>
    %174 = arith.addf %170, %173 : vector<6x128xf32>
    %175 = arith.addf %174, %158 : vector<6x128xf32>
    %c0_126 = arith.constant 0 : index
    %c2_127 = arith.constant 2 : index
    %c0_128 = arith.constant 0 : index
    %176 = vector.load %arg7[%c0_126, %c2_127, %c0_128] : memref<1x5x128xf32, #tpu.memory_space<vmem>>, vector<1x1x128xf32>
    %177 = vector.shape_cast %176 : vector<1x1x128xf32> to vector<1x128xf32>
    %c0_129 = arith.constant 0 : index
    %c3_130 = arith.constant 3 : index
    %c0_131 = arith.constant 0 : index
    %178 = vector.load %arg7[%c0_129, %c3_130, %c0_131] : memref<1x5x128xf32, #tpu.memory_space<vmem>>, vector<1x1x128xf32>
    %179 = vector.shape_cast %178 : vector<1x1x128xf32> to vector<1x128xf32>
    %cst_132 = arith.constant dense<0.000000e+00> : vector<6xf32>
    %180 = vector.multi_reduction <add>, %175, %cst_132 [1] : vector<6x128xf32> to vector<6xf32>
    %181 = vector.shape_cast %180 : vector<6xf32> to vector<6x1xf32>
    %cst_133 = arith.constant 0.00980392192 : f32
    %182 = vector.broadcast %cst_133 : f32 to vector<6x1xf32>
    %183 = arith.mulf %181, %182 : vector<6x1xf32>
    %184 = vector.broadcast %183 : vector<6x1xf32> to vector<6x128xf32>
    %185 = arith.subf %175, %184 : vector<6x128xf32>
    %186 = vector.broadcast %4 : vector<1x128xf32> to vector<6x128xf32>
    %187 = arith.mulf %185, %186 : vector<6x128xf32>
    %188 = arith.mulf %187, %187 : vector<6x128xf32>
    %cst_134 = arith.constant dense<0.000000e+00> : vector<6xf32>
    %189 = vector.multi_reduction <add>, %188, %cst_134 [1] : vector<6x128xf32> to vector<6xf32>
    %190 = vector.shape_cast %189 : vector<6xf32> to vector<6x1xf32>
    %cst_135 = arith.constant 0.00980392192 : f32
    %191 = vector.broadcast %cst_135 : f32 to vector<6x1xf32>
    %192 = arith.mulf %190, %191 : vector<6x1xf32>
    %cst_136 = arith.constant 9.99999974E-6 : f32
    %193 = vector.broadcast %cst_136 : f32 to vector<6x1xf32>
    %194 = arith.addf %192, %193 : vector<6x1xf32>
    %195 = math.rsqrt %194 : vector<6x1xf32>
    %196 = vector.broadcast %195 : vector<6x1xf32> to vector<6x128xf32>
    %197 = arith.mulf %187, %196 : vector<6x128xf32>
    %198 = vector.broadcast %177 : vector<1x128xf32> to vector<6x128xf32>
    %199 = arith.mulf %197, %198 : vector<6x128xf32>
    %200 = vector.broadcast %179 : vector<1x128xf32> to vector<6x128xf32>
    %201 = arith.addf %199, %200 : vector<6x128xf32>
    %202 = vector.broadcast %8 : vector<1x128xf32> to vector<6x128xf32>
    %203 = arith.mulf %18, %202 : vector<6x128xf32>
    %204 = arith.addf %201, %203 : vector<6x128xf32>
    %c0_137 = arith.constant 0 : index
    %c0_138 = arith.constant 0 : index
    %c0_139 = arith.constant 0 : index
    %205 = vector.load %arg11[%c0_137, %c0_138, %c0_139] : memref<1x6x128xf32, #tpu.memory_space<vmem>>, vector<1x6x128xf32>
    %206 = vector.shape_cast %205 : vector<1x6x128xf32> to vector<6x128xf32>
    %207 = vector.shape_cast %204 : vector<6x128xf32> to vector<1x6x128xf32>
    tpu.vector_store %arg11[%c0_137, %c0_138, %c0_139], %207 {strides = array<i32>} : memref<1x6x128xf32, #tpu.memory_space<vmem>>, vector<1x6x128xf32>,
    return
  }
  func.func @transform_0(%arg0: i32, %arg1: memref<2xi32, #tpu.memory_space<smem>>) -> (i32, i32, i32) {
    %c0_i32 = arith.constant 0 : i32
    %c0_i32_0 = arith.constant 0 : i32
    %c0_i32_1 = arith.constant 0 : i32
    return %arg0, %c0_i32, %c0_i32_0 : i32, i32, i32
  }
  func.func @transform_1(%arg0: i32, %arg1: memref<2xi32, #tpu.memory_space<smem>>) -> (i32, i32, i32, i32) {
    %c0_i32 = arith.constant 0 : i32
    %c0_i32_0 = arith.constant 0 : i32
    %c0_i32_1 = arith.constant 0 : i32
    %c0_i32_2 = arith.constant 0 : i32
    %c0_i32_3 = arith.constant 0 : i32
    return %c0_i32, %c0_i32_0, %c0_i32_1, %c0_i32_2 : i32, i32, i32, i32
  }
  func.func @transform_2(%arg0: i32, %arg1: memref<2xi32, #tpu.memory_space<smem>>) -> (i32, i32, i32, i32) {
    %c0_i32 = arith.constant 0 : i32
    %c0_i32_0 = arith.constant 0 : i32
    %c0_i32_1 = arith.constant 0 : i32
    %c0_i32_2 = arith.constant 0 : i32
    %c0_i32_3 = arith.constant 0 : i32
    return %c0_i32, %c0_i32_0, %c0_i32_1, %c0_i32_2 : i32, i32, i32, i32
  }
  func.func @transform_3(%arg0: i32, %arg1: memref<2xi32, #tpu.memory_space<smem>>) -> (i32, i32, i32, i32) {
    %c0_i32 = arith.constant 0 : i32
    %c0_i32_0 = arith.constant 0 : i32
    %c0_i32_1 = arith.constant 0 : i32
    %c0_i32_2 = arith.constant 0 : i32
    %c0_i32_3 = arith.constant 0 : i32
    return %c0_i32, %c0_i32_0, %c0_i32_1, %c0_i32_2 : i32, i32, i32, i32
  }
  func.func @transform_4(%arg0: i32, %arg1: memref<2xi32, #tpu.memory_space<smem>>) -> (i32, i32, i32, i32) {
    %c0_i32 = arith.constant 0 : i32
    %c0_i32_0 = arith.constant 0 : i32
    %c0_i32_1 = arith.constant 0 : i32
    %c0_i32_2 = arith.constant 0 : i32
    %c0_i32_3 = arith.constant 0 : i32
    return %c0_i32, %c0_i32_0, %c0_i32_1, %c0_i32_2 : i32, i32, i32, i32
  }
  func.func @transform_5(%arg0: i32, %arg1: memref<2xi32, #tpu.memory_space<smem>>) -> (i32, i32, i32) {
    %c0_i32 = arith.constant 0 : i32
    %c0_i32_0 = arith.constant 0 : i32
    %c0_i32_1 = arith.constant 0 : i32
    %c0_i32_2 = arith.constant 0 : i32
    return %c0_i32, %c0_i32_0, %c0_i32_1 : i32, i32, i32
  }
  func.func @transform_6(%arg0: i32, %arg1: memref<2xi32, #tpu.memory_space<smem>>) -> (i32, i32, i32) {
    %c0_i32 = arith.constant 0 : i32
    %c0_i32_0 = arith.constant 0 : i32
    %c0_i32_1 = arith.constant 0 : i32
    %c0_i32_2 = arith.constant 0 : i32
    return %c0_i32, %c0_i32_0, %c0_i32_1 : i32, i32, i32
  }
  func.func @transform_7(%arg0: i32, %arg1: memref<2xi32, #tpu.memory_space<smem>>) -> (i32, i32, i32) {
    %c0_i32 = arith.constant 0 : i32
    %c0_i32_0 = arith.constant 0 : i32
    %c0_i32_1 = arith.constant 0 : i32
    %c0_i32_2 = arith.constant 0 : i32
    return %c0_i32, %c0_i32_0, %c0_i32_1 : i32, i32, i32
  }
  func.func @transform_8(%arg0: i32, %arg1: memref<2xi32, #tpu.memory_space<smem>>) -> (i32, i32, i32) {
    %c0_i32 = arith.constant 0 : i32
    %c0_i32_0 = arith.constant 0 : i32
    %c0_i32_1 = arith.constant 0 : i32
    %c0_i32_2 = arith.constant 0 : i32
    return %c0_i32, %c0_i32_0, %c0_i32_1 : i32, i32, i32
  }
  func.func @transform_9(%arg0: i32, %arg1: memref<2xi32, #tpu.memory_space<smem>>) -> (i32, i32, i32) {
    %c0_i32 = arith.constant 0 : i32
    %c0_i32_0 = arith.constant 0 : i32
    %c0_i32_1 = arith.constant 0 : i32
    return %arg0, %c0_i32, %c0_i32_0 : i32, i32, i32
  }
}

module attributes {stable_mosaic.version = 11 : i64} {
  func.func @_decoder_kernel(%arg0: i32, %arg1: memref<2xi32, #tpu.memory_space<smem>>, %arg2: memref<1x1x128xf32, #tpu.memory_space<vmem>>, %arg3: memref<4x128xf32, #tpu.memory_space<vmem>>, %arg4: memref<1x6x128xf32, #tpu.memory_space<vmem>>, %arg5: memref<1x128x128xf32, #tpu.memory_space<vmem>>, %arg6: memref<1x7x128xf32, #tpu.memory_space<vmem>>, %arg7: memref<1x4x128x16xf32, #tpu.memory_space<vmem>>, %arg8: memref<1x4x128x16xf32, #tpu.memory_space<vmem>>, %arg9: memref<1x4x128x16xf32, #tpu.memory_space<vmem>>, %arg10: memref<1x4x16x128xf32, #tpu.memory_space<vmem>>, %arg11: memref<1x128x128xf32, #tpu.memory_space<vmem>>, %arg12: memref<1x1x128xf32, #tpu.memory_space<vmem>>, %arg13: memref<1x128x128xf32, #tpu.memory_space<vmem>>, %arg14: memref<128x128xf32, #tpu.memory_space<vmem>>, %arg15: memref<1x5x128xf32, #tpu.memory_space<vmem>>, %arg16: memref<1x4x4x128xf32, #tpu.memory_space<vmem>>) attributes {dimension_semantics = [#tpu.dimension_semantics<parallel>], iteration_bounds = array<i64: 2>, scalar_prefetch = 1 : i64, scratch_operands = 0 : i64, tpu.core_type = #tpu.core_type<tc>, window_params = [{transform_indices = @transform_0, window_bounds = array<i64: 1, 1, 128>}, {pipeline_mode = #tpu.pipeline_mode<synchronous>, transform_indices = @transform_1, window_bounds = array<i64: 4, 128>}, {transform_indices = @transform_2, window_bounds = array<i64: 1, 6, 128>}, {pipeline_mode = #tpu.pipeline_mode<synchronous>, transform_indices = @transform_3, window_bounds = array<i64: 1, 128, 128>}, {pipeline_mode = #tpu.pipeline_mode<synchronous>, transform_indices = @transform_4, window_bounds = array<i64: 1, 7, 128>}, {pipeline_mode = #tpu.pipeline_mode<synchronous>, transform_indices = @transform_5, window_bounds = array<i64: 1, 4, 128, 16>}, {pipeline_mode = #tpu.pipeline_mode<synchronous>, transform_indices = @transform_6, window_bounds = array<i64: 1, 4, 128, 16>}, {pipeline_mode = #tpu.pipeline_mode<synchronous>, transform_indices = @transform_7, window_bounds = array<i64: 1, 4, 128, 16>}, {pipeline_mode = #tpu.pipeline_mode<synchronous>, transform_indices = @transform_8, window_bounds = array<i64: 1, 4, 16, 128>}, {pipeline_mode = #tpu.pipeline_mode<synchronous>, transform_indices = @transform_9, window_bounds = array<i64: 1, 128, 128>}, {pipeline_mode = #tpu.pipeline_mode<synchronous>, transform_indices = @transform_10, window_bounds = array<i64: 1, 1, 128>}, {pipeline_mode = #tpu.pipeline_mode<synchronous>, transform_indices = @transform_11, window_bounds = array<i64: 1, 128, 128>}, {pipeline_mode = #tpu.pipeline_mode<synchronous>, transform_indices = @transform_12, window_bounds = array<i64: 128, 128>}, {transform_indices = @transform_13, window_bounds = array<i64: 1, 5, 128>}, {transform_indices = @transform_14, window_bounds = array<i64: 1, 4, 4, 128>}]} {
    %0 = tpu.iota {dimensions = array<i32: 1>} : vector<1x128xi32>
    %c38_i32 = arith.constant 38 : i32
    %1 = vector.broadcast %c38_i32 : i32 to vector<1x128xi32>
    %2 = arith.cmpi slt, %0, %1 : vector<1x128xi32>
    %3 = arith.extui %2 : vector<1x128xi1> to vector<1x128xi32>
    %4 = arith.sitofp %3 : vector<1x128xi32> to vector<1x128xf32>
    %c9_i32 = arith.constant 9 : i32
    %5 = vector.broadcast %c9_i32 : i32 to vector<1x128xi32>
    %6 = arith.cmpi slt, %0, %5 : vector<1x128xi32>
    %c9_i32_0 = arith.constant 9 : i32
    %7 = vector.broadcast %c9_i32_0 : i32 to vector<1x128xi32>
    %8 = arith.cmpi sge, %0, %7 : vector<1x128xi32>
    %c18_i32 = arith.constant 18 : i32
    %9 = vector.broadcast %c18_i32 : i32 to vector<1x128xi32>
    %10 = arith.cmpi slt, %0, %9 : vector<1x128xi32>
    %11 = arith.andi %8, %10 : vector<1x128xi1>
    %c18_i32_1 = arith.constant 18 : i32
    %12 = vector.broadcast %c18_i32_1 : i32 to vector<1x128xi32>
    %13 = arith.cmpi sge, %0, %12 : vector<1x128xi32>
    %c19_i32 = arith.constant 19 : i32
    %14 = vector.broadcast %c19_i32 : i32 to vector<1x128xi32>
    %15 = arith.cmpi slt, %0, %14 : vector<1x128xi32>
    %16 = arith.andi %13, %15 : vector<1x128xi1>
    %17 = tpu.iota {dimensions = array<i32: 1>} : vector<1x6xi32>
    %18 = arith.index_cast %arg0 : i32 to index
    %19 = memref.load %arg1[%18] : memref<2xi32, #tpu.memory_space<smem>>
    %20 = vector.broadcast %19 : i32 to vector<1x6xi32>
    %21 = arith.cmpi slt, %17, %20 : vector<1x6xi32>
    %cst = arith.constant 0.000000e+00 : f32
    %cst_2 = arith.constant -1.000000e+09 : f32
    %22 = vector.broadcast %cst : f32 to vector<1x6xf32>
    %23 = vector.broadcast %cst_2 : f32 to vector<1x6xf32>
    %24 = arith.select %21, %22, %23 : vector<1x6xi1>, vector<1x6xf32>
    %c0 = arith.constant 0 : index
    %c0_3 = arith.constant 0 : index
    %c0_4 = arith.constant 0 : index
    %25 = vector.load %arg4[%c0, %c0_3, %c0_4] : memref<1x6x128xf32, #tpu.memory_space<vmem>>, vector<1x6x128xf32>
    %26 = vector.shape_cast %25 : vector<1x6x128xf32> to vector<6x128xf32>
    %c0_5 = arith.constant 0 : index
    %c0_6 = arith.constant 0 : index
    %c0_7 = arith.constant 0 : index
    %c0_8 = arith.constant 0 : index
    %27 = vector.load %arg8[%c0_5, %c0_6, %c0_7, %c0_8] : memref<1x4x128x16xf32, #tpu.memory_space<vmem>>, vector<1x1x128x16xf32>
    %28 = vector.shape_cast %27 : vector<1x1x128x16xf32> to vector<128x16xf32>
    %cst_9 = arith.constant dense<0.000000e+00> : vector<6x16xf32>
    %29 = tpu.matmul %26, %28, %cst_9 {dimension_numbers = #tpu.dot_dimension_numbers<[1], [0], [0], [1], [0, 0, 1, 1], [], []>} : vector<6x128xf32>, vector<128x16xf32>, vector<6x16xf32> -> vector<6x16xf32>
    %c0_10 = arith.constant 0 : index
    %c1 = arith.constant 1 : index
    %c0_11 = arith.constant 0 : index
    %c0_12 = arith.constant 0 : index
    %30 = vector.load %arg8[%c0_10, %c1, %c0_11, %c0_12] : memref<1x4x128x16xf32, #tpu.memory_space<vmem>>, vector<1x1x128x16xf32>
    %31 = vector.shape_cast %30 : vector<1x1x128x16xf32> to vector<128x16xf32>
    %cst_13 = arith.constant dense<0.000000e+00> : vector<6x16xf32>
    %32 = tpu.matmul %26, %31, %cst_13 {dimension_numbers = #tpu.dot_dimension_numbers<[1], [0], [0], [1], [0, 0, 1, 1], [], []>} : vector<6x128xf32>, vector<128x16xf32>, vector<6x16xf32> -> vector<6x16xf32>
    %c0_14 = arith.constant 0 : index
    %c2 = arith.constant 2 : index
    %c0_15 = arith.constant 0 : index
    %c0_16 = arith.constant 0 : index
    %33 = vector.load %arg8[%c0_14, %c2, %c0_15, %c0_16] : memref<1x4x128x16xf32, #tpu.memory_space<vmem>>, vector<1x1x128x16xf32>
    %34 = vector.shape_cast %33 : vector<1x1x128x16xf32> to vector<128x16xf32>
    %cst_17 = arith.constant dense<0.000000e+00> : vector<6x16xf32>
    %35 = tpu.matmul %26, %34, %cst_17 {dimension_numbers = #tpu.dot_dimension_numbers<[1], [0], [0], [1], [0, 0, 1, 1], [], []>} : vector<6x128xf32>, vector<128x16xf32>, vector<6x16xf32> -> vector<6x16xf32>
    %c0_18 = arith.constant 0 : index
    %c3 = arith.constant 3 : index
    %c0_19 = arith.constant 0 : index
    %c0_20 = arith.constant 0 : index
    %36 = vector.load %arg8[%c0_18, %c3, %c0_19, %c0_20] : memref<1x4x128x16xf32, #tpu.memory_space<vmem>>, vector<1x1x128x16xf32>
    %37 = vector.shape_cast %36 : vector<1x1x128x16xf32> to vector<128x16xf32>
    %cst_21 = arith.constant dense<0.000000e+00> : vector<6x16xf32>
    %38 = tpu.matmul %26, %37, %cst_21 {dimension_numbers = #tpu.dot_dimension_numbers<[1], [0], [0], [1], [0, 0, 1, 1], [], []>} : vector<6x128xf32>, vector<128x16xf32>, vector<6x16xf32> -> vector<6x16xf32>
    %c0_22 = arith.constant 0 : index
    %c0_23 = arith.constant 0 : index
    %c0_24 = arith.constant 0 : index
    %c0_25 = arith.constant 0 : index
    %39 = vector.load %arg9[%c0_22, %c0_23, %c0_24, %c0_25] : memref<1x4x128x16xf32, #tpu.memory_space<vmem>>, vector<1x1x128x16xf32>
    %40 = vector.shape_cast %39 : vector<1x1x128x16xf32> to vector<128x16xf32>
    %cst_26 = arith.constant dense<0.000000e+00> : vector<6x16xf32>
    %41 = tpu.matmul %26, %40, %cst_26 {dimension_numbers = #tpu.dot_dimension_numbers<[1], [0], [0], [1], [0, 0, 1, 1], [], []>} : vector<6x128xf32>, vector<128x16xf32>, vector<6x16xf32> -> vector<6x16xf32>
    %c0_27 = arith.constant 0 : index
    %c1_28 = arith.constant 1 : index
    %c0_29 = arith.constant 0 : index
    %c0_30 = arith.constant 0 : index
    %42 = vector.load %arg9[%c0_27, %c1_28, %c0_29, %c0_30] : memref<1x4x128x16xf32, #tpu.memory_space<vmem>>, vector<1x1x128x16xf32>
    %43 = vector.shape_cast %42 : vector<1x1x128x16xf32> to vector<128x16xf32>
    %cst_31 = arith.constant dense<0.000000e+00> : vector<6x16xf32>
    %44 = tpu.matmul %26, %43, %cst_31 {dimension_numbers = #tpu.dot_dimension_numbers<[1], [0], [0], [1], [0, 0, 1, 1], [], []>} : vector<6x128xf32>, vector<128x16xf32>, vector<6x16xf32> -> vector<6x16xf32>
    %c0_32 = arith.constant 0 : index
    %c2_33 = arith.constant 2 : index
    %c0_34 = arith.constant 0 : index
    %c0_35 = arith.constant 0 : index
    %45 = vector.load %arg9[%c0_32, %c2_33, %c0_34, %c0_35] : memref<1x4x128x16xf32, #tpu.memory_space<vmem>>, vector<1x1x128x16xf32>
    %46 = vector.shape_cast %45 : vector<1x1x128x16xf32> to vector<128x16xf32>
    %cst_36 = arith.constant dense<0.000000e+00> : vector<6x16xf32>
    %47 = tpu.matmul %26, %46, %cst_36 {dimension_numbers = #tpu.dot_dimension_numbers<[1], [0], [0], [1], [0, 0, 1, 1], [], []>} : vector<6x128xf32>, vector<128x16xf32>, vector<6x16xf32> -> vector<6x16xf32>
    %c0_37 = arith.constant 0 : index
    %c3_38 = arith.constant 3 : index
    %c0_39 = arith.constant 0 : index
    %c0_40 = arith.constant 0 : index
    %48 = vector.load %arg9[%c0_37, %c3_38, %c0_39, %c0_40] : memref<1x4x128x16xf32, #tpu.memory_space<vmem>>, vector<1x1x128x16xf32>
    %49 = vector.shape_cast %48 : vector<1x1x128x16xf32> to vector<128x16xf32>
    %cst_41 = arith.constant dense<0.000000e+00> : vector<6x16xf32>
    %50 = tpu.matmul %26, %49, %cst_41 {dimension_numbers = #tpu.dot_dimension_numbers<[1], [0], [0], [1], [0, 0, 1, 1], [], []>} : vector<6x128xf32>, vector<128x16xf32>, vector<6x16xf32> -> vector<6x16xf32>
    %cst_42 = arith.constant 0.000000e+00 : f32
    %51 = vector.broadcast %cst_42 : f32 to vector<1x4x4x128xf32>
    %c0_43 = arith.constant 0 : index
    %c0_44 = arith.constant 0 : index
    %c0_45 = arith.constant 0 : index
    %c0_46 = arith.constant 0 : index
    %52 = vector.load %arg16[%c0_43, %c0_44, %c0_45, %c0_46] : memref<1x4x4x128xf32, #tpu.memory_space<vmem>>, vector<1x4x4x128xf32>
    tpu.vector_store %arg16[%c0_43, %c0_44, %c0_45, %c0_46], %51 {strides = array<i32>} : memref<1x4x4x128xf32, #tpu.memory_space<vmem>>, vector<1x4x4x128xf32>,
    %c0_47 = arith.constant 0 : index
    %c0_48 = arith.constant 0 : index
    %c0_49 = arith.constant 0 : index
    %53 = vector.load %arg2[%c0_47, %c0_48, %c0_49] : memref<1x1x128xf32, #tpu.memory_space<vmem>>, vector<1x1x128xf32>
    %54 = vector.shape_cast %53 : vector<1x1x128xf32> to vector<1x128xf32>
    %c0_50 = arith.constant 0 : index
    %c0_51 = arith.constant 0 : index
    %c0_52 = arith.constant 0 : index
    %55 = vector.load %arg15[%c0_50, %c0_51, %c0_52] : memref<1x5x128xf32, #tpu.memory_space<vmem>>, vector<1x1x128xf32>
    %56 = vector.shape_cast %55 : vector<1x1x128xf32> to vector<1x128xf32>
    %57 = vector.shape_cast %54 : vector<1x128xf32> to vector<1x1x128xf32>
    tpu.vector_store %arg15[%c0_50, %c0_51, %c0_52], %57 {strides = array<i32>} : memref<1x5x128xf32, #tpu.memory_space<vmem>>, vector<1x1x128xf32>,
    %c0_53 = arith.constant 0 : index
    %c0_54 = arith.constant 0 : index
    %c0_55 = arith.constant 0 : index
    %58 = vector.load %arg2[%c0_53, %c0_54, %c0_55] : memref<1x1x128xf32, #tpu.memory_space<vmem>>, vector<1x1x128xf32>
    %59 = vector.shape_cast %58 : vector<1x1x128xf32> to vector<1x128xf32>
    %c0_56 = arith.constant 0 : index
    %c0_57 = arith.constant 0 : index
    %60 = vector.load %arg3[%c0_56, %c0_57] : memref<4x128xf32, #tpu.memory_space<vmem>>, vector<1x128xf32>
    %61 = arith.addf %59, %60 : vector<1x128xf32>
    %c0_58 = arith.constant 0 : index
    %c0_59 = arith.constant 0 : index
    %c0_60 = arith.constant 0 : index
    %62 = vector.load %arg5[%c0_58, %c0_59, %c0_60] : memref<1x128x128xf32, #tpu.memory_space<vmem>>, vector<1x128x128xf32>
    %63 = vector.shape_cast %62 : vector<1x128x128xf32> to vector<128x128xf32>
    %cst_61 = arith.constant dense<0.000000e+00> : vector<1x128xf32>
    %64 = tpu.matmul %61, %63, %cst_61 {dimension_numbers = #tpu.dot_dimension_numbers<[1], [0], [0], [1], [0, 0, 1, 1], [], []>} : vector<1x128xf32>, vector<128x128xf32>, vector<1x128xf32> -> vector<1x128xf32>
    %65 = arith.addf %64, %61 : vector<1x128xf32>
    %c0_62 = arith.constant 0 : index
    %c0_63 = arith.constant 0 : index
    %c0_64 = arith.constant 0 : index
    %66 = vector.load %arg6[%c0_62, %c0_63, %c0_64] : memref<1x7x128xf32, #tpu.memory_space<vmem>>, vector<1x1x128xf32>
    %67 = vector.shape_cast %66 : vector<1x1x128xf32> to vector<1x128xf32>
    %c0_65 = arith.constant 0 : index
    %c1_66 = arith.constant 1 : index
    %c0_67 = arith.constant 0 : index
    %68 = vector.load %arg6[%c0_65, %c1_66, %c0_67] : memref<1x7x128xf32, #tpu.memory_space<vmem>>, vector<1x1x128xf32>
    %69 = vector.shape_cast %68 : vector<1x1x128xf32> to vector<1x128xf32>
    %cst_68 = arith.constant dense<0.000000e+00> : vector<1xf32>
    %70 = vector.multi_reduction <add>, %65, %cst_68 [1] : vector<1x128xf32> to vector<1xf32>
    %71 = vector.shape_cast %70 : vector<1xf32> to vector<1x1xf32>
    %cst_69 = arith.constant 0.0263157897 : f32
    %72 = vector.broadcast %cst_69 : f32 to vector<1x1xf32>
    %73 = arith.mulf %71, %72 : vector<1x1xf32>
    %74 = vector.broadcast %73 : vector<1x1xf32> to vector<1x128xf32>
    %75 = arith.subf %65, %74 : vector<1x128xf32>
    %76 = arith.mulf %75, %4 : vector<1x128xf32>
    %77 = arith.mulf %76, %76 : vector<1x128xf32>
    %cst_70 = arith.constant dense<0.000000e+00> : vector<1xf32>
    %78 = vector.multi_reduction <add>, %77, %cst_70 [1] : vector<1x128xf32> to vector<1xf32>
    %79 = vector.shape_cast %78 : vector<1xf32> to vector<1x1xf32>
    %cst_71 = arith.constant 0.0263157897 : f32
    %80 = vector.broadcast %cst_71 : f32 to vector<1x1xf32>
    %81 = arith.mulf %79, %80 : vector<1x1xf32>
    %cst_72 = arith.constant 9.99999974E-6 : f32
    %82 = vector.broadcast %cst_72 : f32 to vector<1x1xf32>
    %83 = arith.addf %81, %82 : vector<1x1xf32>
    %84 = math.rsqrt %83 : vector<1x1xf32>
    %85 = vector.broadcast %84 : vector<1x1xf32> to vector<1x128xf32>
    %86 = arith.mulf %76, %85 : vector<1x128xf32>
    %87 = arith.mulf %86, %67 : vector<1x128xf32>
    %88 = arith.addf %87, %69 : vector<1x128xf32>
    %cst_73 = arith.constant 0.000000e+00 : f32
    %89 = vector.broadcast %cst_73 : f32 to vector<1x128xf32>
    %c0_74 = arith.constant 0 : index
    %c0_75 = arith.constant 0 : index
    %c0_76 = arith.constant 0 : index
    %c0_77 = arith.constant 0 : index
    %90 = vector.load %arg7[%c0_74, %c0_75, %c0_76, %c0_77] : memref<1x4x128x16xf32, #tpu.memory_space<vmem>>, vector<1x1x128x16xf32>
    %91 = vector.shape_cast %90 : vector<1x1x128x16xf32> to vector<128x16xf32>
    %cst_78 = arith.constant dense<0.000000e+00> : vector<1x16xf32>
    %92 = tpu.matmul %88, %91, %cst_78 {dimension_numbers = #tpu.dot_dimension_numbers<[1], [0], [0], [1], [0, 0, 1, 1], [], []>} : vector<1x128xf32>, vector<128x16xf32>, vector<1x16xf32> -> vector<1x16xf32>
    %cst_79 = arith.constant dense<0.000000e+00> : vector<1x6xf32>
    %93 = tpu.matmul %92, %29, %cst_79 {dimension_numbers = #tpu.dot_dimension_numbers<[1], [1], [0], [0], [0, 0, 1, 0], [], []>} : vector<1x16xf32>, vector<6x16xf32>, vector<1x6xf32> -> vector<1x6xf32>
    %cst_80 = arith.constant 2.500000e-01 : f32
    %94 = vector.broadcast %cst_80 : f32 to vector<1x6xf32>
    %95 = arith.mulf %93, %94 : vector<1x6xf32>
    %96 = arith.addf %95, %24 : vector<1x6xf32>
    %cst_81 = arith.constant dense<0xFF800000> : vector<1xf32>
    %97 = vector.multi_reduction <maximumf>, %96, %cst_81 [1] : vector<1x6xf32> to vector<1xf32>
    %98 = vector.shape_cast %97 : vector<1xf32> to vector<1x1xf32>
    %99 = vector.broadcast %98 : vector<1x1xf32> to vector<1x6xf32>
    %100 = arith.subf %96, %99 : vector<1x6xf32>
    %101 = math.exp %100 : vector<1x6xf32>
    %cst_82 = arith.constant dense<0.000000e+00> : vector<1xf32>
    %102 = vector.multi_reduction <add>, %101, %cst_82 [1] : vector<1x6xf32> to vector<1xf32>
    %103 = vector.shape_cast %102 : vector<1xf32> to vector<1x1xf32>
    %104 = vector.broadcast %103 : vector<1x1xf32> to vector<1x6xf32>
    %105 = arith.divf %101, %104 : vector<1x6xf32>
    %cst_83 = arith.constant dense<0.000000e+00> : vector<1x16xf32>
    %106 = tpu.matmul %105, %41, %cst_83 {dimension_numbers = #tpu.dot_dimension_numbers<[1], [0], [0], [1], [0, 0, 1, 1], [], []>} : vector<1x6xf32>, vector<6x16xf32>, vector<1x16xf32> -> vector<1x16xf32>
    %c0_84 = arith.constant 0 : index
    %c0_85 = arith.constant 0 : index
    %c0_86 = arith.constant 0 : index
    %c0_87 = arith.constant 0 : index
    %107 = vector.load %arg10[%c0_84, %c0_85, %c0_86, %c0_87] : memref<1x4x16x128xf32, #tpu.memory_space<vmem>>, vector<1x1x16x128xf32>
    %108 = vector.shape_cast %107 : vector<1x1x16x128xf32> to vector<16x128xf32>
    %cst_88 = arith.constant dense<0.000000e+00> : vector<1x128xf32>
    %109 = tpu.matmul %106, %108, %cst_88 {dimension_numbers = #tpu.dot_dimension_numbers<[1], [0], [0], [1], [0, 0, 1, 1], [], []>} : vector<1x16xf32>, vector<16x128xf32>, vector<1x128xf32> -> vector<1x128xf32>
    %110 = arith.addf %89, %109 : vector<1x128xf32>
    %c0_89 = arith.constant 0 : index
    %c0_90 = arith.constant 0 : index
    %c0_91 = arith.constant 0 : index
    %c0_92 = arith.constant 0 : index
    %111 = vector.load %arg16[%c0_89, %c0_90, %c0_91, %c0_92] : memref<1x4x4x128xf32, #tpu.memory_space<vmem>>, vector<1x1x1x6xf32>
    %112 = vector.shape_cast %111 : vector<1x1x1x6xf32> to vector<1x6xf32>
    %113 = vector.shape_cast %105 : vector<1x6xf32> to vector<1x1x1x6xf32>
    tpu.vector_store %arg16[%c0_89, %c0_90, %c0_91, %c0_92], %113 {strides = array<i32>} : memref<1x4x4x128xf32, #tpu.memory_space<vmem>>, vector<1x1x1x6xf32>,
    %c0_93 = arith.constant 0 : index
    %c1_94 = arith.constant 1 : index
    %c0_95 = arith.constant 0 : index
    %c0_96 = arith.constant 0 : index
    %114 = vector.load %arg7[%c0_93, %c1_94, %c0_95, %c0_96] : memref<1x4x128x16xf32, #tpu.memory_space<vmem>>, vector<1x1x128x16xf32>
    %115 = vector.shape_cast %114 : vector<1x1x128x16xf32> to vector<128x16xf32>
    %cst_97 = arith.constant dense<0.000000e+00> : vector<1x16xf32>
    %116 = tpu.matmul %88, %115, %cst_97 {dimension_numbers = #tpu.dot_dimension_numbers<[1], [0], [0], [1], [0, 0, 1, 1], [], []>} : vector<1x128xf32>, vector<128x16xf32>, vector<1x16xf32> -> vector<1x16xf32>
    %cst_98 = arith.constant dense<0.000000e+00> : vector<1x6xf32>
    %117 = tpu.matmul %116, %32, %cst_98 {dimension_numbers = #tpu.dot_dimension_numbers<[1], [1], [0], [0], [0, 0, 1, 0], [], []>} : vector<1x16xf32>, vector<6x16xf32>, vector<1x6xf32> -> vector<1x6xf32>
    %cst_99 = arith.constant 2.500000e-01 : f32
    %118 = vector.broadcast %cst_99 : f32 to vector<1x6xf32>
    %119 = arith.mulf %117, %118 : vector<1x6xf32>
    %120 = arith.addf %119, %24 : vector<1x6xf32>
    %cst_100 = arith.constant dense<0xFF800000> : vector<1xf32>
    %121 = vector.multi_reduction <maximumf>, %120, %cst_100 [1] : vector<1x6xf32> to vector<1xf32>
    %122 = vector.shape_cast %121 : vector<1xf32> to vector<1x1xf32>
    %123 = vector.broadcast %122 : vector<1x1xf32> to vector<1x6xf32>
    %124 = arith.subf %120, %123 : vector<1x6xf32>
    %125 = math.exp %124 : vector<1x6xf32>
    %cst_101 = arith.constant dense<0.000000e+00> : vector<1xf32>
    %126 = vector.multi_reduction <add>, %125, %cst_101 [1] : vector<1x6xf32> to vector<1xf32>
    %127 = vector.shape_cast %126 : vector<1xf32> to vector<1x1xf32>
    %128 = vector.broadcast %127 : vector<1x1xf32> to vector<1x6xf32>
    %129 = arith.divf %125, %128 : vector<1x6xf32>
    %cst_102 = arith.constant dense<0.000000e+00> : vector<1x16xf32>
    %130 = tpu.matmul %129, %44, %cst_102 {dimension_numbers = #tpu.dot_dimension_numbers<[1], [0], [0], [1], [0, 0, 1, 1], [], []>} : vector<1x6xf32>, vector<6x16xf32>, vector<1x16xf32> -> vector<1x16xf32>
    %c0_103 = arith.constant 0 : index
    %c1_104 = arith.constant 1 : index
    %c0_105 = arith.constant 0 : index
    %c0_106 = arith.constant 0 : index
    %131 = vector.load %arg10[%c0_103, %c1_104, %c0_105, %c0_106] : memref<1x4x16x128xf32, #tpu.memory_space<vmem>>, vector<1x1x16x128xf32>
    %132 = vector.shape_cast %131 : vector<1x1x16x128xf32> to vector<16x128xf32>
    %cst_107 = arith.constant dense<0.000000e+00> : vector<1x128xf32>
    %133 = tpu.matmul %130, %132, %cst_107 {dimension_numbers = #tpu.dot_dimension_numbers<[1], [0], [0], [1], [0, 0, 1, 1], [], []>} : vector<1x16xf32>, vector<16x128xf32>, vector<1x128xf32> -> vector<1x128xf32>
    %134 = arith.addf %110, %133 : vector<1x128xf32>
    %c0_108 = arith.constant 0 : index
    %c1_109 = arith.constant 1 : index
    %c0_110 = arith.constant 0 : index
    %c0_111 = arith.constant 0 : index
    %135 = vector.load %arg16[%c0_108, %c1_109, %c0_110, %c0_111] : memref<1x4x4x128xf32, #tpu.memory_space<vmem>>, vector<1x1x1x6xf32>
    %136 = vector.shape_cast %135 : vector<1x1x1x6xf32> to vector<1x6xf32>
    %137 = vector.shape_cast %129 : vector<1x6xf32> to vector<1x1x1x6xf32>
    tpu.vector_store %arg16[%c0_108, %c1_109, %c0_110, %c0_111], %137 {strides = array<i32>} : memref<1x4x4x128xf32, #tpu.memory_space<vmem>>, vector<1x1x1x6xf32>,
    %c0_112 = arith.constant 0 : index
    %c2_113 = arith.constant 2 : index
    %c0_114 = arith.constant 0 : index
    %c0_115 = arith.constant 0 : index
    %138 = vector.load %arg7[%c0_112, %c2_113, %c0_114, %c0_115] : memref<1x4x128x16xf32, #tpu.memory_space<vmem>>, vector<1x1x128x16xf32>
    %139 = vector.shape_cast %138 : vector<1x1x128x16xf32> to vector<128x16xf32>
    %cst_116 = arith.constant dense<0.000000e+00> : vector<1x16xf32>
    %140 = tpu.matmul %88, %139, %cst_116 {dimension_numbers = #tpu.dot_dimension_numbers<[1], [0], [0], [1], [0, 0, 1, 1], [], []>} : vector<1x128xf32>, vector<128x16xf32>, vector<1x16xf32> -> vector<1x16xf32>
    %cst_117 = arith.constant dense<0.000000e+00> : vector<1x6xf32>
    %141 = tpu.matmul %140, %35, %cst_117 {dimension_numbers = #tpu.dot_dimension_numbers<[1], [1], [0], [0], [0, 0, 1, 0], [], []>} : vector<1x16xf32>, vector<6x16xf32>, vector<1x6xf32> -> vector<1x6xf32>
    %cst_118 = arith.constant 2.500000e-01 : f32
    %142 = vector.broadcast %cst_118 : f32 to vector<1x6xf32>
    %143 = arith.mulf %141, %142 : vector<1x6xf32>
    %144 = arith.addf %143, %24 : vector<1x6xf32>
    %cst_119 = arith.constant dense<0xFF800000> : vector<1xf32>
    %145 = vector.multi_reduction <maximumf>, %144, %cst_119 [1] : vector<1x6xf32> to vector<1xf32>
    %146 = vector.shape_cast %145 : vector<1xf32> to vector<1x1xf32>
    %147 = vector.broadcast %146 : vector<1x1xf32> to vector<1x6xf32>
    %148 = arith.subf %144, %147 : vector<1x6xf32>
    %149 = math.exp %148 : vector<1x6xf32>
    %cst_120 = arith.constant dense<0.000000e+00> : vector<1xf32>
    %150 = vector.multi_reduction <add>, %149, %cst_120 [1] : vector<1x6xf32> to vector<1xf32>
    %151 = vector.shape_cast %150 : vector<1xf32> to vector<1x1xf32>
    %152 = vector.broadcast %151 : vector<1x1xf32> to vector<1x6xf32>
    %153 = arith.divf %149, %152 : vector<1x6xf32>
    %cst_121 = arith.constant dense<0.000000e+00> : vector<1x16xf32>
    %154 = tpu.matmul %153, %47, %cst_121 {dimension_numbers = #tpu.dot_dimension_numbers<[1], [0], [0], [1], [0, 0, 1, 1], [], []>} : vector<1x6xf32>, vector<6x16xf32>, vector<1x16xf32> -> vector<1x16xf32>
    %c0_122 = arith.constant 0 : index
    %c2_123 = arith.constant 2 : index
    %c0_124 = arith.constant 0 : index
    %c0_125 = arith.constant 0 : index
    %155 = vector.load %arg10[%c0_122, %c2_123, %c0_124, %c0_125] : memref<1x4x16x128xf32, #tpu.memory_space<vmem>>, vector<1x1x16x128xf32>
    %156 = vector.shape_cast %155 : vector<1x1x16x128xf32> to vector<16x128xf32>
    %cst_126 = arith.constant dense<0.000000e+00> : vector<1x128xf32>
    %157 = tpu.matmul %154, %156, %cst_126 {dimension_numbers = #tpu.dot_dimension_numbers<[1], [0], [0], [1], [0, 0, 1, 1], [], []>} : vector<1x16xf32>, vector<16x128xf32>, vector<1x128xf32> -> vector<1x128xf32>
    %158 = arith.addf %134, %157 : vector<1x128xf32>
    %c0_127 = arith.constant 0 : index
    %c2_128 = arith.constant 2 : index
    %c0_129 = arith.constant 0 : index
    %c0_130 = arith.constant 0 : index
    %159 = vector.load %arg16[%c0_127, %c2_128, %c0_129, %c0_130] : memref<1x4x4x128xf32, #tpu.memory_space<vmem>>, vector<1x1x1x6xf32>
    %160 = vector.shape_cast %159 : vector<1x1x1x6xf32> to vector<1x6xf32>
    %161 = vector.shape_cast %153 : vector<1x6xf32> to vector<1x1x1x6xf32>
    tpu.vector_store %arg16[%c0_127, %c2_128, %c0_129, %c0_130], %161 {strides = array<i32>} : memref<1x4x4x128xf32, #tpu.memory_space<vmem>>, vector<1x1x1x6xf32>,
    %c0_131 = arith.constant 0 : index
    %c3_132 = arith.constant 3 : index
    %c0_133 = arith.constant 0 : index
    %c0_134 = arith.constant 0 : index
    %162 = vector.load %arg7[%c0_131, %c3_132, %c0_133, %c0_134] : memref<1x4x128x16xf32, #tpu.memory_space<vmem>>, vector<1x1x128x16xf32>
    %163 = vector.shape_cast %162 : vector<1x1x128x16xf32> to vector<128x16xf32>
    %cst_135 = arith.constant dense<0.000000e+00> : vector<1x16xf32>
    %164 = tpu.matmul %88, %163, %cst_135 {dimension_numbers = #tpu.dot_dimension_numbers<[1], [0], [0], [1], [0, 0, 1, 1], [], []>} : vector<1x128xf32>, vector<128x16xf32>, vector<1x16xf32> -> vector<1x16xf32>
    %cst_136 = arith.constant dense<0.000000e+00> : vector<1x6xf32>
    %165 = tpu.matmul %164, %38, %cst_136 {dimension_numbers = #tpu.dot_dimension_numbers<[1], [1], [0], [0], [0, 0, 1, 0], [], []>} : vector<1x16xf32>, vector<6x16xf32>, vector<1x6xf32> -> vector<1x6xf32>
    %cst_137 = arith.constant 2.500000e-01 : f32
    %166 = vector.broadcast %cst_137 : f32 to vector<1x6xf32>
    %167 = arith.mulf %165, %166 : vector<1x6xf32>
    %168 = arith.addf %167, %24 : vector<1x6xf32>
    %cst_138 = arith.constant dense<0xFF800000> : vector<1xf32>
    %169 = vector.multi_reduction <maximumf>, %168, %cst_138 [1] : vector<1x6xf32> to vector<1xf32>
    %170 = vector.shape_cast %169 : vector<1xf32> to vector<1x1xf32>
    %171 = vector.broadcast %170 : vector<1x1xf32> to vector<1x6xf32>
    %172 = arith.subf %168, %171 : vector<1x6xf32>
    %173 = math.exp %172 : vector<1x6xf32>
    %cst_139 = arith.constant dense<0.000000e+00> : vector<1xf32>
    %174 = vector.multi_reduction <add>, %173, %cst_139 [1] : vector<1x6xf32> to vector<1xf32>
    %175 = vector.shape_cast %174 : vector<1xf32> to vector<1x1xf32>
    %176 = vector.broadcast %175 : vector<1x1xf32> to vector<1x6xf32>
    %177 = arith.divf %173, %176 : vector<1x6xf32>
    %cst_140 = arith.constant dense<0.000000e+00> : vector<1x16xf32>
    %178 = tpu.matmul %177, %50, %cst_140 {dimension_numbers = #tpu.dot_dimension_numbers<[1], [0], [0], [1], [0, 0, 1, 1], [], []>} : vector<1x6xf32>, vector<6x16xf32>, vector<1x16xf32> -> vector<1x16xf32>
    %c0_141 = arith.constant 0 : index
    %c3_142 = arith.constant 3 : index
    %c0_143 = arith.constant 0 : index
    %c0_144 = arith.constant 0 : index
    %179 = vector.load %arg10[%c0_141, %c3_142, %c0_143, %c0_144] : memref<1x4x16x128xf32, #tpu.memory_space<vmem>>, vector<1x1x16x128xf32>
    %180 = vector.shape_cast %179 : vector<1x1x16x128xf32> to vector<16x128xf32>
    %cst_145 = arith.constant dense<0.000000e+00> : vector<1x128xf32>
    %181 = tpu.matmul %178, %180, %cst_145 {dimension_numbers = #tpu.dot_dimension_numbers<[1], [0], [0], [1], [0, 0, 1, 1], [], []>} : vector<1x16xf32>, vector<16x128xf32>, vector<1x128xf32> -> vector<1x128xf32>
    %182 = arith.addf %158, %181 : vector<1x128xf32>
    %c0_146 = arith.constant 0 : index
    %c3_147 = arith.constant 3 : index
    %c0_148 = arith.constant 0 : index
    %c0_149 = arith.constant 0 : index
    %183 = vector.load %arg16[%c0_146, %c3_147, %c0_148, %c0_149] : memref<1x4x4x128xf32, #tpu.memory_space<vmem>>, vector<1x1x1x6xf32>
    %184 = vector.shape_cast %183 : vector<1x1x1x6xf32> to vector<1x6xf32>
    %185 = vector.shape_cast %177 : vector<1x6xf32> to vector<1x1x1x6xf32>
    tpu.vector_store %arg16[%c0_146, %c3_147, %c0_148, %c0_149], %185 {strides = array<i32>} : memref<1x4x4x128xf32, #tpu.memory_space<vmem>>, vector<1x1x1x6xf32>,
    %186 = arith.addf %182, %88 : vector<1x128xf32>
    %c0_150 = arith.constant 0 : index
    %c2_151 = arith.constant 2 : index
    %c0_152 = arith.constant 0 : index
    %187 = vector.load %arg6[%c0_150, %c2_151, %c0_152] : memref<1x7x128xf32, #tpu.memory_space<vmem>>, vector<1x1x128xf32>
    %188 = vector.shape_cast %187 : vector<1x1x128xf32> to vector<1x128xf32>
    %c0_153 = arith.constant 0 : index
    %c3_154 = arith.constant 3 : index
    %c0_155 = arith.constant 0 : index
    %189 = vector.load %arg6[%c0_153, %c3_154, %c0_155] : memref<1x7x128xf32, #tpu.memory_space<vmem>>, vector<1x1x128xf32>
    %190 = vector.shape_cast %189 : vector<1x1x128xf32> to vector<1x128xf32>
    %cst_156 = arith.constant dense<0.000000e+00> : vector<1xf32>
    %191 = vector.multi_reduction <add>, %186, %cst_156 [1] : vector<1x128xf32> to vector<1xf32>
    %192 = vector.shape_cast %191 : vector<1xf32> to vector<1x1xf32>
    %cst_157 = arith.constant 0.0263157897 : f32
    %193 = vector.broadcast %cst_157 : f32 to vector<1x1xf32>
    %194 = arith.mulf %192, %193 : vector<1x1xf32>
    %195 = vector.broadcast %194 : vector<1x1xf32> to vector<1x128xf32>
    %196 = arith.subf %186, %195 : vector<1x128xf32>
    %197 = arith.mulf %196, %4 : vector<1x128xf32>
    %198 = arith.mulf %197, %197 : vector<1x128xf32>
    %cst_158 = arith.constant dense<0.000000e+00> : vector<1xf32>
    %199 = vector.multi_reduction <add>, %198, %cst_158 [1] : vector<1x128xf32> to vector<1xf32>
    %200 = vector.shape_cast %199 : vector<1xf32> to vector<1x1xf32>
    %cst_159 = arith.constant 0.0263157897 : f32
    %201 = vector.broadcast %cst_159 : f32 to vector<1x1xf32>
    %202 = arith.mulf %200, %201 : vector<1x1xf32>
    %cst_160 = arith.constant 9.99999974E-6 : f32
    %203 = vector.broadcast %cst_160 : f32 to vector<1x1xf32>
    %204 = arith.addf %202, %203 : vector<1x1xf32>
    %205 = math.rsqrt %204 : vector<1x1xf32>
    %206 = vector.broadcast %205 : vector<1x1xf32> to vector<1x128xf32>
    %207 = arith.mulf %197, %206 : vector<1x128xf32>
    %208 = arith.mulf %207, %188 : vector<1x128xf32>
    %209 = arith.addf %208, %190 : vector<1x128xf32>
    %c0_161 = arith.constant 0 : index
    %c0_162 = arith.constant 0 : index
    %c0_163 = arith.constant 0 : index
    %210 = vector.load %arg11[%c0_161, %c0_162, %c0_163] : memref<1x128x128xf32, #tpu.memory_space<vmem>>, vector<1x128x128xf32>
    %211 = vector.shape_cast %210 : vector<1x128x128xf32> to vector<128x128xf32>
    %cst_164 = arith.constant dense<0.000000e+00> : vector<1x128xf32>
    %212 = tpu.matmul %209, %211, %cst_164 {dimension_numbers = #tpu.dot_dimension_numbers<[1], [0], [0], [1], [0, 0, 1, 1], [], []>} : vector<1x128xf32>, vector<128x128xf32>, vector<1x128xf32> -> vector<1x128xf32>
    %c0_165 = arith.constant 0 : index
    %c0_166 = arith.constant 0 : index
    %c0_167 = arith.constant 0 : index
    %213 = vector.load %arg12[%c0_165, %c0_166, %c0_167] : memref<1x1x128xf32, #tpu.memory_space<vmem>>, vector<1x1x128xf32>
    %214 = vector.shape_cast %213 : vector<1x1x128xf32> to vector<1x128xf32>
    %215 = arith.addf %212, %214 : vector<1x128xf32>
    %cst_168 = arith.constant 0.000000e+00 : f32
    %216 = vector.broadcast %cst_168 : f32 to vector<1x128xf32>
    %217 = arith.maximumf %215, %216 : vector<1x128xf32>
    %c0_169 = arith.constant 0 : index
    %c0_170 = arith.constant 0 : index
    %c0_171 = arith.constant 0 : index
    %218 = vector.load %arg13[%c0_169, %c0_170, %c0_171] : memref<1x128x128xf32, #tpu.memory_space<vmem>>, vector<1x128x128xf32>
    %219 = vector.shape_cast %218 : vector<1x128x128xf32> to vector<128x128xf32>
    %cst_172 = arith.constant dense<0.000000e+00> : vector<1x128xf32>
    %220 = tpu.matmul %217, %219, %cst_172 {dimension_numbers = #tpu.dot_dimension_numbers<[1], [0], [0], [1], [0, 0, 1, 1], [], []>} : vector<1x128xf32>, vector<128x128xf32>, vector<1x128xf32> -> vector<1x128xf32>
    %c0_173 = arith.constant 0 : index
    %c6 = arith.constant 6 : index
    %c0_174 = arith.constant 0 : index
    %221 = vector.load %arg6[%c0_173, %c6, %c0_174] : memref<1x7x128xf32, #tpu.memory_space<vmem>>, vector<1x1x128xf32>
    %222 = vector.shape_cast %221 : vector<1x1x128xf32> to vector<1x128xf32>
    %223 = arith.addf %220, %222 : vector<1x128xf32>
    %224 = arith.addf %223, %209 : vector<1x128xf32>
    %c0_175 = arith.constant 0 : index
    %c4 = arith.constant 4 : index
    %c0_176 = arith.constant 0 : index
    %225 = vector.load %arg6[%c0_175, %c4, %c0_176] : memref<1x7x128xf32, #tpu.memory_space<vmem>>, vector<1x1x128xf32>
    %226 = vector.shape_cast %225 : vector<1x1x128xf32> to vector<1x128xf32>
    %c0_177 = arith.constant 0 : index
    %c5 = arith.constant 5 : index
    %c0_178 = arith.constant 0 : index
    %227 = vector.load %arg6[%c0_177, %c5, %c0_178] : memref<1x7x128xf32, #tpu.memory_space<vmem>>, vector<1x1x128xf32>
    %228 = vector.shape_cast %227 : vector<1x1x128xf32> to vector<1x128xf32>
    %cst_179 = arith.constant dense<0.000000e+00> : vector<1xf32>
    %229 = vector.multi_reduction <add>, %224, %cst_179 [1] : vector<1x128xf32> to vector<1xf32>
    %230 = vector.shape_cast %229 : vector<1xf32> to vector<1x1xf32>
    %cst_180 = arith.constant 0.0263157897 : f32
    %231 = vector.broadcast %cst_180 : f32 to vector<1x1xf32>
    %232 = arith.mulf %230, %231 : vector<1x1xf32>
    %233 = vector.broadcast %232 : vector<1x1xf32> to vector<1x128xf32>
    %234 = arith.subf %224, %233 : vector<1x128xf32>
    %235 = arith.mulf %234, %4 : vector<1x128xf32>
    %236 = arith.mulf %235, %235 : vector<1x128xf32>
    %cst_181 = arith.constant dense<0.000000e+00> : vector<1xf32>
    %237 = vector.multi_reduction <add>, %236, %cst_181 [1] : vector<1x128xf32> to vector<1xf32>
    %238 = vector.shape_cast %237 : vector<1xf32> to vector<1x1xf32>
    %cst_182 = arith.constant 0.0263157897 : f32
    %239 = vector.broadcast %cst_182 : f32 to vector<1x1xf32>
    %240 = arith.mulf %238, %239 : vector<1x1xf32>
    %cst_183 = arith.constant 9.99999974E-6 : f32
    %241 = vector.broadcast %cst_183 : f32 to vector<1x1xf32>
    %242 = arith.addf %240, %241 : vector<1x1xf32>
    %243 = math.rsqrt %242 : vector<1x1xf32>
    %244 = vector.broadcast %243 : vector<1x1xf32> to vector<1x128xf32>
    %245 = arith.mulf %235, %244 : vector<1x128xf32>
    %246 = arith.mulf %245, %226 : vector<1x128xf32>
    %247 = arith.addf %246, %228 : vector<1x128xf32>
    %c0_184 = arith.constant 0 : index
    %c0_185 = arith.constant 0 : index
    %248 = vector.load %arg14[%c0_184, %c0_185] : memref<128x128xf32, #tpu.memory_space<vmem>>, vector<128x128xf32>
    %cst_186 = arith.constant dense<0.000000e+00> : vector<1x128xf32>
    %249 = tpu.matmul %247, %248, %cst_186 {dimension_numbers = #tpu.dot_dimension_numbers<[1], [0], [0], [1], [0, 0, 1, 1], [], []>} : vector<1x128xf32>, vector<128x128xf32>, vector<1x128xf32> -> vector<1x128xf32>
    %250 = arith.addf %249, %59 : vector<1x128xf32>
    %cst_187 = arith.constant -1.000000e+30 : f32
    %251 = vector.broadcast %cst_187 : f32 to vector<1x128xf32>
    %252 = arith.select %6, %250, %251 : vector<1x128xi1>, vector<1x128xf32>
    %cst_188 = arith.constant dense<0xFF800000> : vector<1xf32>
    %253 = vector.multi_reduction <maximumf>, %252, %cst_188 [1] : vector<1x128xf32> to vector<1xf32>
    %254 = vector.shape_cast %253 : vector<1xf32> to vector<1x1xf32>
    %255 = vector.broadcast %254 : vector<1x1xf32> to vector<1x128xf32>
    %256 = arith.subf %252, %255 : vector<1x128xf32>
    %257 = math.exp %256 : vector<1x128xf32>
    %cst_189 = arith.constant 0.000000e+00 : f32
    %258 = vector.broadcast %cst_189 : f32 to vector<1x128xf32>
    %259 = arith.select %6, %257, %258 : vector<1x128xi1>, vector<1x128xf32>
    %cst_190 = arith.constant dense<0.000000e+00> : vector<1xf32>
    %260 = vector.multi_reduction <add>, %259, %cst_190 [1] : vector<1x128xf32> to vector<1xf32>
    %261 = vector.shape_cast %260 : vector<1xf32> to vector<1x1xf32>
    %262 = vector.broadcast %261 : vector<1x1xf32> to vector<1x128xf32>
    %263 = arith.divf %259, %262 : vector<1x128xf32>
    %cst_191 = arith.constant 0.000000e+00 : f32
    %264 = vector.broadcast %cst_191 : f32 to vector<1x128xf32>
    %265 = arith.select %6, %263, %264 : vector<1x128xi1>, vector<1x128xf32>
    %cst_192 = arith.constant -1.000000e+30 : f32
    %266 = vector.broadcast %cst_192 : f32 to vector<1x128xf32>
    %267 = arith.select %11, %250, %266 : vector<1x128xi1>, vector<1x128xf32>
    %cst_193 = arith.constant dense<0xFF800000> : vector<1xf32>
    %268 = vector.multi_reduction <maximumf>, %267, %cst_193 [1] : vector<1x128xf32> to vector<1xf32>
    %269 = vector.shape_cast %268 : vector<1xf32> to vector<1x1xf32>
    %270 = vector.broadcast %269 : vector<1x1xf32> to vector<1x128xf32>
    %271 = arith.subf %267, %270 : vector<1x128xf32>
    %272 = math.exp %271 : vector<1x128xf32>
    %cst_194 = arith.constant 0.000000e+00 : f32
    %273 = vector.broadcast %cst_194 : f32 to vector<1x128xf32>
    %274 = arith.select %11, %272, %273 : vector<1x128xi1>, vector<1x128xf32>
    %cst_195 = arith.constant dense<0.000000e+00> : vector<1xf32>
    %275 = vector.multi_reduction <add>, %274, %cst_195 [1] : vector<1x128xf32> to vector<1xf32>
    %276 = vector.shape_cast %275 : vector<1xf32> to vector<1x1xf32>
    %277 = vector.broadcast %276 : vector<1x1xf32> to vector<1x128xf32>
    %278 = arith.divf %274, %277 : vector<1x128xf32>
    %cst_196 = arith.constant 0.000000e+00 : f32
    %279 = vector.broadcast %cst_196 : f32 to vector<1x128xf32>
    %280 = arith.select %11, %278, %279 : vector<1x128xi1>, vector<1x128xf32>
    %281 = arith.addf %265, %280 : vector<1x128xf32>
    %cst_197 = arith.constant 0.000000e+00 : f32
    %282 = vector.broadcast %cst_197 : f32 to vector<1x128xf32>
    %283 = arith.subf %282, %250 : vector<1x128xf32>
    %284 = math.exp %283 : vector<1x128xf32>
    %cst_198 = arith.constant 1.000000e+00 : f32
    %285 = vector.broadcast %cst_198 : f32 to vector<1x128xf32>
    %286 = arith.addf %285, %284 : vector<1x128xf32>
    %cst_199 = arith.constant 1.000000e+00 : f32
    %287 = vector.broadcast %cst_199 : f32 to vector<1x128xf32>
    %288 = arith.divf %287, %286 : vector<1x128xf32>
    %cst_200 = arith.constant 0.000000e+00 : f32
    %289 = vector.broadcast %cst_200 : f32 to vector<1x128xf32>
    %290 = arith.select %16, %288, %289 : vector<1x128xi1>, vector<1x128xf32>
    %291 = arith.addf %281, %290 : vector<1x128xf32>
    %c0_201 = arith.constant 0 : index
    %c1_202 = arith.constant 1 : index
    %c0_203 = arith.constant 0 : index
    %292 = vector.load %arg15[%c0_201, %c1_202, %c0_203] : memref<1x5x128xf32, #tpu.memory_space<vmem>>, vector<1x1x128xf32>
    %293 = vector.shape_cast %292 : vector<1x1x128xf32> to vector<1x128xf32>
    %294 = vector.shape_cast %291 : vector<1x128xf32> to vector<1x1x128xf32>
    tpu.vector_store %arg15[%c0_201, %c1_202, %c0_203], %294 {strides = array<i32>} : memref<1x5x128xf32, #tpu.memory_space<vmem>>, vector<1x1x128xf32>,
    %c1_204 = arith.constant 1 : index
    %c0_205 = arith.constant 0 : index
    %295 = vector.load %arg3[%c1_204, %c0_205] : memref<4x128xf32, #tpu.memory_space<vmem>>, vector<1x128xf32>
    %296 = arith.addf %291, %295 : vector<1x128xf32>
    %c0_206 = arith.constant 0 : index
    %c0_207 = arith.constant 0 : index
    %c0_208 = arith.constant 0 : index
    %297 = vector.load %arg5[%c0_206, %c0_207, %c0_208] : memref<1x128x128xf32, #tpu.memory_space<vmem>>, vector<1x128x128xf32>
    %298 = vector.shape_cast %297 : vector<1x128x128xf32> to vector<128x128xf32>
    %cst_209 = arith.constant dense<0.000000e+00> : vector<1x128xf32>
    %299 = tpu.matmul %296, %298, %cst_209 {dimension_numbers = #tpu.dot_dimension_numbers<[1], [0], [0], [1], [0, 0, 1, 1], [], []>} : vector<1x128xf32>, vector<128x128xf32>, vector<1x128xf32> -> vector<1x128xf32>
    %300 = arith.addf %299, %296 : vector<1x128xf32>
    %c0_210 = arith.constant 0 : index
    %c0_211 = arith.constant 0 : index
    %c0_212 = arith.constant 0 : index
    %301 = vector.load %arg6[%c0_210, %c0_211, %c0_212] : memref<1x7x128xf32, #tpu.memory_space<vmem>>, vector<1x1x128xf32>
    %302 = vector.shape_cast %301 : vector<1x1x128xf32> to vector<1x128xf32>
    %c0_213 = arith.constant 0 : index
    %c1_214 = arith.constant 1 : index
    %c0_215 = arith.constant 0 : index
    %303 = vector.load %arg6[%c0_213, %c1_214, %c0_215] : memref<1x7x128xf32, #tpu.memory_space<vmem>>, vector<1x1x128xf32>
    %304 = vector.shape_cast %303 : vector<1x1x128xf32> to vector<1x128xf32>
    %cst_216 = arith.constant dense<0.000000e+00> : vector<1xf32>
    %305 = vector.multi_reduction <add>, %300, %cst_216 [1] : vector<1x128xf32> to vector<1xf32>
    %306 = vector.shape_cast %305 : vector<1xf32> to vector<1x1xf32>
    %cst_217 = arith.constant 0.0263157897 : f32
    %307 = vector.broadcast %cst_217 : f32 to vector<1x1xf32>
    %308 = arith.mulf %306, %307 : vector<1x1xf32>
    %309 = vector.broadcast %308 : vector<1x1xf32> to vector<1x128xf32>
    %310 = arith.subf %300, %309 : vector<1x128xf32>
    %311 = arith.mulf %310, %4 : vector<1x128xf32>
    %312 = arith.mulf %311, %311 : vector<1x128xf32>
    %cst_218 = arith.constant dense<0.000000e+00> : vector<1xf32>
    %313 = vector.multi_reduction <add>, %312, %cst_218 [1] : vector<1x128xf32> to vector<1xf32>
    %314 = vector.shape_cast %313 : vector<1xf32> to vector<1x1xf32>
    %cst_219 = arith.constant 0.0263157897 : f32
    %315 = vector.broadcast %cst_219 : f32 to vector<1x1xf32>
    %316 = arith.mulf %314, %315 : vector<1x1xf32>
    %cst_220 = arith.constant 9.99999974E-6 : f32
    %317 = vector.broadcast %cst_220 : f32 to vector<1x1xf32>
    %318 = arith.addf %316, %317 : vector<1x1xf32>
    %319 = math.rsqrt %318 : vector<1x1xf32>
    %320 = vector.broadcast %319 : vector<1x1xf32> to vector<1x128xf32>
    %321 = arith.mulf %311, %320 : vector<1x128xf32>
    %322 = arith.mulf %321, %302 : vector<1x128xf32>
    %323 = arith.addf %322, %304 : vector<1x128xf32>
    %cst_221 = arith.constant 0.000000e+00 : f32
    %324 = vector.broadcast %cst_221 : f32 to vector<1x128xf32>
    %c0_222 = arith.constant 0 : index
    %c0_223 = arith.constant 0 : index
    %c0_224 = arith.constant 0 : index
    %c0_225 = arith.constant 0 : index
    %325 = vector.load %arg7[%c0_222, %c0_223, %c0_224, %c0_225] : memref<1x4x128x16xf32, #tpu.memory_space<vmem>>, vector<1x1x128x16xf32>
    %326 = vector.shape_cast %325 : vector<1x1x128x16xf32> to vector<128x16xf32>
    %cst_226 = arith.constant dense<0.000000e+00> : vector<1x16xf32>
    %327 = tpu.matmul %323, %326, %cst_226 {dimension_numbers = #tpu.dot_dimension_numbers<[1], [0], [0], [1], [0, 0, 1, 1], [], []>} : vector<1x128xf32>, vector<128x16xf32>, vector<1x16xf32> -> vector<1x16xf32>
    %cst_227 = arith.constant dense<0.000000e+00> : vector<1x6xf32>
    %328 = tpu.matmul %327, %29, %cst_227 {dimension_numbers = #tpu.dot_dimension_numbers<[1], [1], [0], [0], [0, 0, 1, 0], [], []>} : vector<1x16xf32>, vector<6x16xf32>, vector<1x6xf32> -> vector<1x6xf32>
    %cst_228 = arith.constant 2.500000e-01 : f32
    %329 = vector.broadcast %cst_228 : f32 to vector<1x6xf32>
    %330 = arith.mulf %328, %329 : vector<1x6xf32>
    %331 = arith.addf %330, %24 : vector<1x6xf32>
    %cst_229 = arith.constant dense<0xFF800000> : vector<1xf32>
    %332 = vector.multi_reduction <maximumf>, %331, %cst_229 [1] : vector<1x6xf32> to vector<1xf32>
    %333 = vector.shape_cast %332 : vector<1xf32> to vector<1x1xf32>
    %334 = vector.broadcast %333 : vector<1x1xf32> to vector<1x6xf32>
    %335 = arith.subf %331, %334 : vector<1x6xf32>
    %336 = math.exp %335 : vector<1x6xf32>
    %cst_230 = arith.constant dense<0.000000e+00> : vector<1xf32>
    %337 = vector.multi_reduction <add>, %336, %cst_230 [1] : vector<1x6xf32> to vector<1xf32>
    %338 = vector.shape_cast %337 : vector<1xf32> to vector<1x1xf32>
    %339 = vector.broadcast %338 : vector<1x1xf32> to vector<1x6xf32>
    %340 = arith.divf %336, %339 : vector<1x6xf32>
    %cst_231 = arith.constant dense<0.000000e+00> : vector<1x16xf32>
    %341 = tpu.matmul %340, %41, %cst_231 {dimension_numbers = #tpu.dot_dimension_numbers<[1], [0], [0], [1], [0, 0, 1, 1], [], []>} : vector<1x6xf32>, vector<6x16xf32>, vector<1x16xf32> -> vector<1x16xf32>
    %c0_232 = arith.constant 0 : index
    %c0_233 = arith.constant 0 : index
    %c0_234 = arith.constant 0 : index
    %c0_235 = arith.constant 0 : index
    %342 = vector.load %arg10[%c0_232, %c0_233, %c0_234, %c0_235] : memref<1x4x16x128xf32, #tpu.memory_space<vmem>>, vector<1x1x16x128xf32>
    %343 = vector.shape_cast %342 : vector<1x1x16x128xf32> to vector<16x128xf32>
    %cst_236 = arith.constant dense<0.000000e+00> : vector<1x128xf32>
    %344 = tpu.matmul %341, %343, %cst_236 {dimension_numbers = #tpu.dot_dimension_numbers<[1], [0], [0], [1], [0, 0, 1, 1], [], []>} : vector<1x16xf32>, vector<16x128xf32>, vector<1x128xf32> -> vector<1x128xf32>
    %345 = arith.addf %324, %344 : vector<1x128xf32>
    %c0_237 = arith.constant 0 : index
    %c0_238 = arith.constant 0 : index
    %c1_239 = arith.constant 1 : index
    %c0_240 = arith.constant 0 : index
    %346 = vector.load %arg16[%c0_237, %c0_238, %c1_239, %c0_240] : memref<1x4x4x128xf32, #tpu.memory_space<vmem>>, vector<1x1x1x6xf32>
    %347 = vector.shape_cast %346 : vector<1x1x1x6xf32> to vector<1x6xf32>
    %348 = vector.shape_cast %340 : vector<1x6xf32> to vector<1x1x1x6xf32>
    tpu.vector_store %arg16[%c0_237, %c0_238, %c1_239, %c0_240], %348 {strides = array<i32>} : memref<1x4x4x128xf32, #tpu.memory_space<vmem>>, vector<1x1x1x6xf32>,
    %c0_241 = arith.constant 0 : index
    %c1_242 = arith.constant 1 : index
    %c0_243 = arith.constant 0 : index
    %c0_244 = arith.constant 0 : index
    %349 = vector.load %arg7[%c0_241, %c1_242, %c0_243, %c0_244] : memref<1x4x128x16xf32, #tpu.memory_space<vmem>>, vector<1x1x128x16xf32>
    %350 = vector.shape_cast %349 : vector<1x1x128x16xf32> to vector<128x16xf32>
    %cst_245 = arith.constant dense<0.000000e+00> : vector<1x16xf32>
    %351 = tpu.matmul %323, %350, %cst_245 {dimension_numbers = #tpu.dot_dimension_numbers<[1], [0], [0], [1], [0, 0, 1, 1], [], []>} : vector<1x128xf32>, vector<128x16xf32>, vector<1x16xf32> -> vector<1x16xf32>
    %cst_246 = arith.constant dense<0.000000e+00> : vector<1x6xf32>
    %352 = tpu.matmul %351, %32, %cst_246 {dimension_numbers = #tpu.dot_dimension_numbers<[1], [1], [0], [0], [0, 0, 1, 0], [], []>} : vector<1x16xf32>, vector<6x16xf32>, vector<1x6xf32> -> vector<1x6xf32>
    %cst_247 = arith.constant 2.500000e-01 : f32
    %353 = vector.broadcast %cst_247 : f32 to vector<1x6xf32>
    %354 = arith.mulf %352, %353 : vector<1x6xf32>
    %355 = arith.addf %354, %24 : vector<1x6xf32>
    %cst_248 = arith.constant dense<0xFF800000> : vector<1xf32>
    %356 = vector.multi_reduction <maximumf>, %355, %cst_248 [1] : vector<1x6xf32> to vector<1xf32>
    %357 = vector.shape_cast %356 : vector<1xf32> to vector<1x1xf32>
    %358 = vector.broadcast %357 : vector<1x1xf32> to vector<1x6xf32>
    %359 = arith.subf %355, %358 : vector<1x6xf32>
    %360 = math.exp %359 : vector<1x6xf32>
    %cst_249 = arith.constant dense<0.000000e+00> : vector<1xf32>
    %361 = vector.multi_reduction <add>, %360, %cst_249 [1] : vector<1x6xf32> to vector<1xf32>
    %362 = vector.shape_cast %361 : vector<1xf32> to vector<1x1xf32>
    %363 = vector.broadcast %362 : vector<1x1xf32> to vector<1x6xf32>
    %364 = arith.divf %360, %363 : vector<1x6xf32>
    %cst_250 = arith.constant dense<0.000000e+00> : vector<1x16xf32>
    %365 = tpu.matmul %364, %44, %cst_250 {dimension_numbers = #tpu.dot_dimension_numbers<[1], [0], [0], [1], [0, 0, 1, 1], [], []>} : vector<1x6xf32>, vector<6x16xf32>, vector<1x16xf32> -> vector<1x16xf32>
    %c0_251 = arith.constant 0 : index
    %c1_252 = arith.constant 1 : index
    %c0_253 = arith.constant 0 : index
    %c0_254 = arith.constant 0 : index
    %366 = vector.load %arg10[%c0_251, %c1_252, %c0_253, %c0_254] : memref<1x4x16x128xf32, #tpu.memory_space<vmem>>, vector<1x1x16x128xf32>
    %367 = vector.shape_cast %366 : vector<1x1x16x128xf32> to vector<16x128xf32>
    %cst_255 = arith.constant dense<0.000000e+00> : vector<1x128xf32>
    %368 = tpu.matmul %365, %367, %cst_255 {dimension_numbers = #tpu.dot_dimension_numbers<[1], [0], [0], [1], [0, 0, 1, 1], [], []>} : vector<1x16xf32>, vector<16x128xf32>, vector<1x128xf32> -> vector<1x128xf32>
    %369 = arith.addf %345, %368 : vector<1x128xf32>
    %c0_256 = arith.constant 0 : index
    %c1_257 = arith.constant 1 : index
    %c1_258 = arith.constant 1 : index
    %c0_259 = arith.constant 0 : index
    %370 = vector.load %arg16[%c0_256, %c1_257, %c1_258, %c0_259] : memref<1x4x4x128xf32, #tpu.memory_space<vmem>>, vector<1x1x1x6xf32>
    %371 = vector.shape_cast %370 : vector<1x1x1x6xf32> to vector<1x6xf32>
    %372 = vector.shape_cast %364 : vector<1x6xf32> to vector<1x1x1x6xf32>
    tpu.vector_store %arg16[%c0_256, %c1_257, %c1_258, %c0_259], %372 {strides = array<i32>} : memref<1x4x4x128xf32, #tpu.memory_space<vmem>>, vector<1x1x1x6xf32>,
    %c0_260 = arith.constant 0 : index
    %c2_261 = arith.constant 2 : index
    %c0_262 = arith.constant 0 : index
    %c0_263 = arith.constant 0 : index
    %373 = vector.load %arg7[%c0_260, %c2_261, %c0_262, %c0_263] : memref<1x4x128x16xf32, #tpu.memory_space<vmem>>, vector<1x1x128x16xf32>
    %374 = vector.shape_cast %373 : vector<1x1x128x16xf32> to vector<128x16xf32>
    %cst_264 = arith.constant dense<0.000000e+00> : vector<1x16xf32>
    %375 = tpu.matmul %323, %374, %cst_264 {dimension_numbers = #tpu.dot_dimension_numbers<[1], [0], [0], [1], [0, 0, 1, 1], [], []>} : vector<1x128xf32>, vector<128x16xf32>, vector<1x16xf32> -> vector<1x16xf32>
    %cst_265 = arith.constant dense<0.000000e+00> : vector<1x6xf32>
    %376 = tpu.matmul %375, %35, %cst_265 {dimension_numbers = #tpu.dot_dimension_numbers<[1], [1], [0], [0], [0, 0, 1, 0], [], []>} : vector<1x16xf32>, vector<6x16xf32>, vector<1x6xf32> -> vector<1x6xf32>
    %cst_266 = arith.constant 2.500000e-01 : f32
    %377 = vector.broadcast %cst_266 : f32 to vector<1x6xf32>
    %378 = arith.mulf %376, %377 : vector<1x6xf32>
    %379 = arith.addf %378, %24 : vector<1x6xf32>
    %cst_267 = arith.constant dense<0xFF800000> : vector<1xf32>
    %380 = vector.multi_reduction <maximumf>, %379, %cst_267 [1] : vector<1x6xf32> to vector<1xf32>
    %381 = vector.shape_cast %380 : vector<1xf32> to vector<1x1xf32>
    %382 = vector.broadcast %381 : vector<1x1xf32> to vector<1x6xf32>
    %383 = arith.subf %379, %382 : vector<1x6xf32>
    %384 = math.exp %383 : vector<1x6xf32>
    %cst_268 = arith.constant dense<0.000000e+00> : vector<1xf32>
    %385 = vector.multi_reduction <add>, %384, %cst_268 [1] : vector<1x6xf32> to vector<1xf32>
    %386 = vector.shape_cast %385 : vector<1xf32> to vector<1x1xf32>
    %387 = vector.broadcast %386 : vector<1x1xf32> to vector<1x6xf32>
    %388 = arith.divf %384, %387 : vector<1x6xf32>
    %cst_269 = arith.constant dense<0.000000e+00> : vector<1x16xf32>
    %389 = tpu.matmul %388, %47, %cst_269 {dimension_numbers = #tpu.dot_dimension_numbers<[1], [0], [0], [1], [0, 0, 1, 1], [], []>} : vector<1x6xf32>, vector<6x16xf32>, vector<1x16xf32> -> vector<1x16xf32>
    %c0_270 = arith.constant 0 : index
    %c2_271 = arith.constant 2 : index
    %c0_272 = arith.constant 0 : index
    %c0_273 = arith.constant 0 : index
    %390 = vector.load %arg10[%c0_270, %c2_271, %c0_272, %c0_273] : memref<1x4x16x128xf32, #tpu.memory_space<vmem>>, vector<1x1x16x128xf32>
    %391 = vector.shape_cast %390 : vector<1x1x16x128xf32> to vector<16x128xf32>
    %cst_274 = arith.constant dense<0.000000e+00> : vector<1x128xf32>
    %392 = tpu.matmul %389, %391, %cst_274 {dimension_numbers = #tpu.dot_dimension_numbers<[1], [0], [0], [1], [0, 0, 1, 1], [], []>} : vector<1x16xf32>, vector<16x128xf32>, vector<1x128xf32> -> vector<1x128xf32>
    %393 = arith.addf %369, %392 : vector<1x128xf32>
    %c0_275 = arith.constant 0 : index
    %c2_276 = arith.constant 2 : index
    %c1_277 = arith.constant 1 : index
    %c0_278 = arith.constant 0 : index
    %394 = vector.load %arg16[%c0_275, %c2_276, %c1_277, %c0_278] : memref<1x4x4x128xf32, #tpu.memory_space<vmem>>, vector<1x1x1x6xf32>
    %395 = vector.shape_cast %394 : vector<1x1x1x6xf32> to vector<1x6xf32>
    %396 = vector.shape_cast %388 : vector<1x6xf32> to vector<1x1x1x6xf32>
    tpu.vector_store %arg16[%c0_275, %c2_276, %c1_277, %c0_278], %396 {strides = array<i32>} : memref<1x4x4x128xf32, #tpu.memory_space<vmem>>, vector<1x1x1x6xf32>,
    %c0_279 = arith.constant 0 : index
    %c3_280 = arith.constant 3 : index
    %c0_281 = arith.constant 0 : index
    %c0_282 = arith.constant 0 : index
    %397 = vector.load %arg7[%c0_279, %c3_280, %c0_281, %c0_282] : memref<1x4x128x16xf32, #tpu.memory_space<vmem>>, vector<1x1x128x16xf32>
    %398 = vector.shape_cast %397 : vector<1x1x128x16xf32> to vector<128x16xf32>
    %cst_283 = arith.constant dense<0.000000e+00> : vector<1x16xf32>
    %399 = tpu.matmul %323, %398, %cst_283 {dimension_numbers = #tpu.dot_dimension_numbers<[1], [0], [0], [1], [0, 0, 1, 1], [], []>} : vector<1x128xf32>, vector<128x16xf32>, vector<1x16xf32> -> vector<1x16xf32>
    %cst_284 = arith.constant dense<0.000000e+00> : vector<1x6xf32>
    %400 = tpu.matmul %399, %38, %cst_284 {dimension_numbers = #tpu.dot_dimension_numbers<[1], [1], [0], [0], [0, 0, 1, 0], [], []>} : vector<1x16xf32>, vector<6x16xf32>, vector<1x6xf32> -> vector<1x6xf32>
    %cst_285 = arith.constant 2.500000e-01 : f32
    %401 = vector.broadcast %cst_285 : f32 to vector<1x6xf32>
    %402 = arith.mulf %400, %401 : vector<1x6xf32>
    %403 = arith.addf %402, %24 : vector<1x6xf32>
    %cst_286 = arith.constant dense<0xFF800000> : vector<1xf32>
    %404 = vector.multi_reduction <maximumf>, %403, %cst_286 [1] : vector<1x6xf32> to vector<1xf32>
    %405 = vector.shape_cast %404 : vector<1xf32> to vector<1x1xf32>
    %406 = vector.broadcast %405 : vector<1x1xf32> to vector<1x6xf32>
    %407 = arith.subf %403, %406 : vector<1x6xf32>
    %408 = math.exp %407 : vector<1x6xf32>
    %cst_287 = arith.constant dense<0.000000e+00> : vector<1xf32>
    %409 = vector.multi_reduction <add>, %408, %cst_287 [1] : vector<1x6xf32> to vector<1xf32>
    %410 = vector.shape_cast %409 : vector<1xf32> to vector<1x1xf32>
    %411 = vector.broadcast %410 : vector<1x1xf32> to vector<1x6xf32>
    %412 = arith.divf %408, %411 : vector<1x6xf32>
    %cst_288 = arith.constant dense<0.000000e+00> : vector<1x16xf32>
    %413 = tpu.matmul %412, %50, %cst_288 {dimension_numbers = #tpu.dot_dimension_numbers<[1], [0], [0], [1], [0, 0, 1, 1], [], []>} : vector<1x6xf32>, vector<6x16xf32>, vector<1x16xf32> -> vector<1x16xf32>
    %c0_289 = arith.constant 0 : index
    %c3_290 = arith.constant 3 : index
    %c0_291 = arith.constant 0 : index
    %c0_292 = arith.constant 0 : index
    %414 = vector.load %arg10[%c0_289, %c3_290, %c0_291, %c0_292] : memref<1x4x16x128xf32, #tpu.memory_space<vmem>>, vector<1x1x16x128xf32>
    %415 = vector.shape_cast %414 : vector<1x1x16x128xf32> to vector<16x128xf32>
    %cst_293 = arith.constant dense<0.000000e+00> : vector<1x128xf32>
    %416 = tpu.matmul %413, %415, %cst_293 {dimension_numbers = #tpu.dot_dimension_numbers<[1], [0], [0], [1], [0, 0, 1, 1], [], []>} : vector<1x16xf32>, vector<16x128xf32>, vector<1x128xf32> -> vector<1x128xf32>
    %417 = arith.addf %393, %416 : vector<1x128xf32>
    %c0_294 = arith.constant 0 : index
    %c3_295 = arith.constant 3 : index
    %c1_296 = arith.constant 1 : index
    %c0_297 = arith.constant 0 : index
    %418 = vector.load %arg16[%c0_294, %c3_295, %c1_296, %c0_297] : memref<1x4x4x128xf32, #tpu.memory_space<vmem>>, vector<1x1x1x6xf32>
    %419 = vector.shape_cast %418 : vector<1x1x1x6xf32> to vector<1x6xf32>
    %420 = vector.shape_cast %412 : vector<1x6xf32> to vector<1x1x1x6xf32>
    tpu.vector_store %arg16[%c0_294, %c3_295, %c1_296, %c0_297], %420 {strides = array<i32>} : memref<1x4x4x128xf32, #tpu.memory_space<vmem>>, vector<1x1x1x6xf32>,
    %421 = arith.addf %417, %323 : vector<1x128xf32>
    %c0_298 = arith.constant 0 : index
    %c2_299 = arith.constant 2 : index
    %c0_300 = arith.constant 0 : index
    %422 = vector.load %arg6[%c0_298, %c2_299, %c0_300] : memref<1x7x128xf32, #tpu.memory_space<vmem>>, vector<1x1x128xf32>
    %423 = vector.shape_cast %422 : vector<1x1x128xf32> to vector<1x128xf32>
    %c0_301 = arith.constant 0 : index
    %c3_302 = arith.constant 3 : index
    %c0_303 = arith.constant 0 : index
    %424 = vector.load %arg6[%c0_301, %c3_302, %c0_303] : memref<1x7x128xf32, #tpu.memory_space<vmem>>, vector<1x1x128xf32>
    %425 = vector.shape_cast %424 : vector<1x1x128xf32> to vector<1x128xf32>
    %cst_304 = arith.constant dense<0.000000e+00> : vector<1xf32>
    %426 = vector.multi_reduction <add>, %421, %cst_304 [1] : vector<1x128xf32> to vector<1xf32>
    %427 = vector.shape_cast %426 : vector<1xf32> to vector<1x1xf32>
    %cst_305 = arith.constant 0.0263157897 : f32
    %428 = vector.broadcast %cst_305 : f32 to vector<1x1xf32>
    %429 = arith.mulf %427, %428 : vector<1x1xf32>
    %430 = vector.broadcast %429 : vector<1x1xf32> to vector<1x128xf32>
    %431 = arith.subf %421, %430 : vector<1x128xf32>
    %432 = arith.mulf %431, %4 : vector<1x128xf32>
    %433 = arith.mulf %432, %432 : vector<1x128xf32>
    %cst_306 = arith.constant dense<0.000000e+00> : vector<1xf32>
    %434 = vector.multi_reduction <add>, %433, %cst_306 [1] : vector<1x128xf32> to vector<1xf32>
    %435 = vector.shape_cast %434 : vector<1xf32> to vector<1x1xf32>
    %cst_307 = arith.constant 0.0263157897 : f32
    %436 = vector.broadcast %cst_307 : f32 to vector<1x1xf32>
    %437 = arith.mulf %435, %436 : vector<1x1xf32>
    %cst_308 = arith.constant 9.99999974E-6 : f32
    %438 = vector.broadcast %cst_308 : f32 to vector<1x1xf32>
    %439 = arith.addf %437, %438 : vector<1x1xf32>
    %440 = math.rsqrt %439 : vector<1x1xf32>
    %441 = vector.broadcast %440 : vector<1x1xf32> to vector<1x128xf32>
    %442 = arith.mulf %432, %441 : vector<1x128xf32>
    %443 = arith.mulf %442, %423 : vector<1x128xf32>
    %444 = arith.addf %443, %425 : vector<1x128xf32>
    %c0_309 = arith.constant 0 : index
    %c0_310 = arith.constant 0 : index
    %c0_311 = arith.constant 0 : index
    %445 = vector.load %arg11[%c0_309, %c0_310, %c0_311] : memref<1x128x128xf32, #tpu.memory_space<vmem>>, vector<1x128x128xf32>
    %446 = vector.shape_cast %445 : vector<1x128x128xf32> to vector<128x128xf32>
    %cst_312 = arith.constant dense<0.000000e+00> : vector<1x128xf32>
    %447 = tpu.matmul %444, %446, %cst_312 {dimension_numbers = #tpu.dot_dimension_numbers<[1], [0], [0], [1], [0, 0, 1, 1], [], []>} : vector<1x128xf32>, vector<128x128xf32>, vector<1x128xf32> -> vector<1x128xf32>
    %c0_313 = arith.constant 0 : index
    %c0_314 = arith.constant 0 : index
    %c0_315 = arith.constant 0 : index
    %448 = vector.load %arg12[%c0_313, %c0_314, %c0_315] : memref<1x1x128xf32, #tpu.memory_space<vmem>>, vector<1x1x128xf32>
    %449 = vector.shape_cast %448 : vector<1x1x128xf32> to vector<1x128xf32>
    %450 = arith.addf %447, %449 : vector<1x128xf32>
    %cst_316 = arith.constant 0.000000e+00 : f32
    %451 = vector.broadcast %cst_316 : f32 to vector<1x128xf32>
    %452 = arith.maximumf %450, %451 : vector<1x128xf32>
    %c0_317 = arith.constant 0 : index
    %c0_318 = arith.constant 0 : index
    %c0_319 = arith.constant 0 : index
    %453 = vector.load %arg13[%c0_317, %c0_318, %c0_319] : memref<1x128x128xf32, #tpu.memory_space<vmem>>, vector<1x128x128xf32>
    %454 = vector.shape_cast %453 : vector<1x128x128xf32> to vector<128x128xf32>
    %cst_320 = arith.constant dense<0.000000e+00> : vector<1x128xf32>
    %455 = tpu.matmul %452, %454, %cst_320 {dimension_numbers = #tpu.dot_dimension_numbers<[1], [0], [0], [1], [0, 0, 1, 1], [], []>} : vector<1x128xf32>, vector<128x128xf32>, vector<1x128xf32> -> vector<1x128xf32>
    %c0_321 = arith.constant 0 : index
    %c6_322 = arith.constant 6 : index
    %c0_323 = arith.constant 0 : index
    %456 = vector.load %arg6[%c0_321, %c6_322, %c0_323] : memref<1x7x128xf32, #tpu.memory_space<vmem>>, vector<1x1x128xf32>
    %457 = vector.shape_cast %456 : vector<1x1x128xf32> to vector<1x128xf32>
    %458 = arith.addf %455, %457 : vector<1x128xf32>
    %459 = arith.addf %458, %444 : vector<1x128xf32>
    %c0_324 = arith.constant 0 : index
    %c4_325 = arith.constant 4 : index
    %c0_326 = arith.constant 0 : index
    %460 = vector.load %arg6[%c0_324, %c4_325, %c0_326] : memref<1x7x128xf32, #tpu.memory_space<vmem>>, vector<1x1x128xf32>
    %461 = vector.shape_cast %460 : vector<1x1x128xf32> to vector<1x128xf32>
    %c0_327 = arith.constant 0 : index
    %c5_328 = arith.constant 5 : index
    %c0_329 = arith.constant 0 : index
    %462 = vector.load %arg6[%c0_327, %c5_328, %c0_329] : memref<1x7x128xf32, #tpu.memory_space<vmem>>, vector<1x1x128xf32>
    %463 = vector.shape_cast %462 : vector<1x1x128xf32> to vector<1x128xf32>
    %cst_330 = arith.constant dense<0.000000e+00> : vector<1xf32>
    %464 = vector.multi_reduction <add>, %459, %cst_330 [1] : vector<1x128xf32> to vector<1xf32>
    %465 = vector.shape_cast %464 : vector<1xf32> to vector<1x1xf32>
    %cst_331 = arith.constant 0.0263157897 : f32
    %466 = vector.broadcast %cst_331 : f32 to vector<1x1xf32>
    %467 = arith.mulf %465, %466 : vector<1x1xf32>
    %468 = vector.broadcast %467 : vector<1x1xf32> to vector<1x128xf32>
    %469 = arith.subf %459, %468 : vector<1x128xf32>
    %470 = arith.mulf %469, %4 : vector<1x128xf32>
    %471 = arith.mulf %470, %470 : vector<1x128xf32>
    %cst_332 = arith.constant dense<0.000000e+00> : vector<1xf32>
    %472 = vector.multi_reduction <add>, %471, %cst_332 [1] : vector<1x128xf32> to vector<1xf32>
    %473 = vector.shape_cast %472 : vector<1xf32> to vector<1x1xf32>
    %cst_333 = arith.constant 0.0263157897 : f32
    %474 = vector.broadcast %cst_333 : f32 to vector<1x1xf32>
    %475 = arith.mulf %473, %474 : vector<1x1xf32>
    %cst_334 = arith.constant 9.99999974E-6 : f32
    %476 = vector.broadcast %cst_334 : f32 to vector<1x1xf32>
    %477 = arith.addf %475, %476 : vector<1x1xf32>
    %478 = math.rsqrt %477 : vector<1x1xf32>
    %479 = vector.broadcast %478 : vector<1x1xf32> to vector<1x128xf32>
    %480 = arith.mulf %470, %479 : vector<1x128xf32>
    %481 = arith.mulf %480, %461 : vector<1x128xf32>
    %482 = arith.addf %481, %463 : vector<1x128xf32>
    %c0_335 = arith.constant 0 : index
    %c0_336 = arith.constant 0 : index
    %483 = vector.load %arg14[%c0_335, %c0_336] : memref<128x128xf32, #tpu.memory_space<vmem>>, vector<128x128xf32>
    %cst_337 = arith.constant dense<0.000000e+00> : vector<1x128xf32>
    %484 = tpu.matmul %482, %483, %cst_337 {dimension_numbers = #tpu.dot_dimension_numbers<[1], [0], [0], [1], [0, 0, 1, 1], [], []>} : vector<1x128xf32>, vector<128x128xf32>, vector<1x128xf32> -> vector<1x128xf32>
    %485 = arith.addf %484, %291 : vector<1x128xf32>
    %cst_338 = arith.constant -1.000000e+30 : f32
    %486 = vector.broadcast %cst_338 : f32 to vector<1x128xf32>
    %487 = arith.select %6, %485, %486 : vector<1x128xi1>, vector<1x128xf32>
    %cst_339 = arith.constant dense<0xFF800000> : vector<1xf32>
    %488 = vector.multi_reduction <maximumf>, %487, %cst_339 [1] : vector<1x128xf32> to vector<1xf32>
    %489 = vector.shape_cast %488 : vector<1xf32> to vector<1x1xf32>
    %490 = vector.broadcast %489 : vector<1x1xf32> to vector<1x128xf32>
    %491 = arith.subf %487, %490 : vector<1x128xf32>
    %492 = math.exp %491 : vector<1x128xf32>
    %cst_340 = arith.constant 0.000000e+00 : f32
    %493 = vector.broadcast %cst_340 : f32 to vector<1x128xf32>
    %494 = arith.select %6, %492, %493 : vector<1x128xi1>, vector<1x128xf32>
    %cst_341 = arith.constant dense<0.000000e+00> : vector<1xf32>
    %495 = vector.multi_reduction <add>, %494, %cst_341 [1] : vector<1x128xf32> to vector<1xf32>
    %496 = vector.shape_cast %495 : vector<1xf32> to vector<1x1xf32>
    %497 = vector.broadcast %496 : vector<1x1xf32> to vector<1x128xf32>
    %498 = arith.divf %494, %497 : vector<1x128xf32>
    %cst_342 = arith.constant 0.000000e+00 : f32
    %499 = vector.broadcast %cst_342 : f32 to vector<1x128xf32>
    %500 = arith.select %6, %498, %499 : vector<1x128xi1>, vector<1x128xf32>
    %cst_343 = arith.constant -1.000000e+30 : f32
    %501 = vector.broadcast %cst_343 : f32 to vector<1x128xf32>
    %502 = arith.select %11, %485, %501 : vector<1x128xi1>, vector<1x128xf32>
    %cst_344 = arith.constant dense<0xFF800000> : vector<1xf32>
    %503 = vector.multi_reduction <maximumf>, %502, %cst_344 [1] : vector<1x128xf32> to vector<1xf32>
    %504 = vector.shape_cast %503 : vector<1xf32> to vector<1x1xf32>
    %505 = vector.broadcast %504 : vector<1x1xf32> to vector<1x128xf32>
    %506 = arith.subf %502, %505 : vector<1x128xf32>
    %507 = math.exp %506 : vector<1x128xf32>
    %cst_345 = arith.constant 0.000000e+00 : f32
    %508 = vector.broadcast %cst_345 : f32 to vector<1x128xf32>
    %509 = arith.select %11, %507, %508 : vector<1x128xi1>, vector<1x128xf32>
    %cst_346 = arith.constant dense<0.000000e+00> : vector<1xf32>
    %510 = vector.multi_reduction <add>, %509, %cst_346 [1] : vector<1x128xf32> to vector<1xf32>
    %511 = vector.shape_cast %510 : vector<1xf32> to vector<1x1xf32>
    %512 = vector.broadcast %511 : vector<1x1xf32> to vector<1x128xf32>
    %513 = arith.divf %509, %512 : vector<1x128xf32>
    %cst_347 = arith.constant 0.000000e+00 : f32
    %514 = vector.broadcast %cst_347 : f32 to vector<1x128xf32>
    %515 = arith.select %11, %513, %514 : vector<1x128xi1>, vector<1x128xf32>
    %516 = arith.addf %500, %515 : vector<1x128xf32>
    %cst_348 = arith.constant 0.000000e+00 : f32
    %517 = vector.broadcast %cst_348 : f32 to vector<1x128xf32>
    %518 = arith.subf %517, %485 : vector<1x128xf32>
    %519 = math.exp %518 : vector<1x128xf32>
    %cst_349 = arith.constant 1.000000e+00 : f32
    %520 = vector.broadcast %cst_349 : f32 to vector<1x128xf32>
    %521 = arith.addf %520, %519 : vector<1x128xf32>
    %cst_350 = arith.constant 1.000000e+00 : f32
    %522 = vector.broadcast %cst_350 : f32 to vector<1x128xf32>
    %523 = arith.divf %522, %521 : vector<1x128xf32>
    %cst_351 = arith.constant 0.000000e+00 : f32
    %524 = vector.broadcast %cst_351 : f32 to vector<1x128xf32>
    %525 = arith.select %16, %523, %524 : vector<1x128xi1>, vector<1x128xf32>
    %526 = arith.addf %516, %525 : vector<1x128xf32>
    %c0_352 = arith.constant 0 : index
    %c2_353 = arith.constant 2 : index
    %c0_354 = arith.constant 0 : index
    %527 = vector.load %arg15[%c0_352, %c2_353, %c0_354] : memref<1x5x128xf32, #tpu.memory_space<vmem>>, vector<1x1x128xf32>
    %528 = vector.shape_cast %527 : vector<1x1x128xf32> to vector<1x128xf32>
    %529 = vector.shape_cast %526 : vector<1x128xf32> to vector<1x1x128xf32>
    tpu.vector_store %arg15[%c0_352, %c2_353, %c0_354], %529 {strides = array<i32>} : memref<1x5x128xf32, #tpu.memory_space<vmem>>, vector<1x1x128xf32>,
    %c2_355 = arith.constant 2 : index
    %c0_356 = arith.constant 0 : index
    %530 = vector.load %arg3[%c2_355, %c0_356] : memref<4x128xf32, #tpu.memory_space<vmem>>, vector<1x128xf32>
    %531 = arith.addf %526, %530 : vector<1x128xf32>
    %c0_357 = arith.constant 0 : index
    %c0_358 = arith.constant 0 : index
    %c0_359 = arith.constant 0 : index
    %532 = vector.load %arg5[%c0_357, %c0_358, %c0_359] : memref<1x128x128xf32, #tpu.memory_space<vmem>>, vector<1x128x128xf32>
    %533 = vector.shape_cast %532 : vector<1x128x128xf32> to vector<128x128xf32>
    %cst_360 = arith.constant dense<0.000000e+00> : vector<1x128xf32>
    %534 = tpu.matmul %531, %533, %cst_360 {dimension_numbers = #tpu.dot_dimension_numbers<[1], [0], [0], [1], [0, 0, 1, 1], [], []>} : vector<1x128xf32>, vector<128x128xf32>, vector<1x128xf32> -> vector<1x128xf32>
    %535 = arith.addf %534, %531 : vector<1x128xf32>
    %c0_361 = arith.constant 0 : index
    %c0_362 = arith.constant 0 : index
    %c0_363 = arith.constant 0 : index
    %536 = vector.load %arg6[%c0_361, %c0_362, %c0_363] : memref<1x7x128xf32, #tpu.memory_space<vmem>>, vector<1x1x128xf32>
    %537 = vector.shape_cast %536 : vector<1x1x128xf32> to vector<1x128xf32>
    %c0_364 = arith.constant 0 : index
    %c1_365 = arith.constant 1 : index
    %c0_366 = arith.constant 0 : index
    %538 = vector.load %arg6[%c0_364, %c1_365, %c0_366] : memref<1x7x128xf32, #tpu.memory_space<vmem>>, vector<1x1x128xf32>
    %539 = vector.shape_cast %538 : vector<1x1x128xf32> to vector<1x128xf32>
    %cst_367 = arith.constant dense<0.000000e+00> : vector<1xf32>
    %540 = vector.multi_reduction <add>, %535, %cst_367 [1] : vector<1x128xf32> to vector<1xf32>
    %541 = vector.shape_cast %540 : vector<1xf32> to vector<1x1xf32>
    %cst_368 = arith.constant 0.0263157897 : f32
    %542 = vector.broadcast %cst_368 : f32 to vector<1x1xf32>
    %543 = arith.mulf %541, %542 : vector<1x1xf32>
    %544 = vector.broadcast %543 : vector<1x1xf32> to vector<1x128xf32>
    %545 = arith.subf %535, %544 : vector<1x128xf32>
    %546 = arith.mulf %545, %4 : vector<1x128xf32>
    %547 = arith.mulf %546, %546 : vector<1x128xf32>
    %cst_369 = arith.constant dense<0.000000e+00> : vector<1xf32>
    %548 = vector.multi_reduction <add>, %547, %cst_369 [1] : vector<1x128xf32> to vector<1xf32>
    %549 = vector.shape_cast %548 : vector<1xf32> to vector<1x1xf32>
    %cst_370 = arith.constant 0.0263157897 : f32
    %550 = vector.broadcast %cst_370 : f32 to vector<1x1xf32>
    %551 = arith.mulf %549, %550 : vector<1x1xf32>
    %cst_371 = arith.constant 9.99999974E-6 : f32
    %552 = vector.broadcast %cst_371 : f32 to vector<1x1xf32>
    %553 = arith.addf %551, %552 : vector<1x1xf32>
    %554 = math.rsqrt %553 : vector<1x1xf32>
    %555 = vector.broadcast %554 : vector<1x1xf32> to vector<1x128xf32>
    %556 = arith.mulf %546, %555 : vector<1x128xf32>
    %557 = arith.mulf %556, %537 : vector<1x128xf32>
    %558 = arith.addf %557, %539 : vector<1x128xf32>
    %cst_372 = arith.constant 0.000000e+00 : f32
    %559 = vector.broadcast %cst_372 : f32 to vector<1x128xf32>
    %c0_373 = arith.constant 0 : index
    %c0_374 = arith.constant 0 : index
    %c0_375 = arith.constant 0 : index
    %c0_376 = arith.constant 0 : index
    %560 = vector.load %arg7[%c0_373, %c0_374, %c0_375, %c0_376] : memref<1x4x128x16xf32, #tpu.memory_space<vmem>>, vector<1x1x128x16xf32>
    %561 = vector.shape_cast %560 : vector<1x1x128x16xf32> to vector<128x16xf32>
    %cst_377 = arith.constant dense<0.000000e+00> : vector<1x16xf32>
    %562 = tpu.matmul %558, %561, %cst_377 {dimension_numbers = #tpu.dot_dimension_numbers<[1], [0], [0], [1], [0, 0, 1, 1], [], []>} : vector<1x128xf32>, vector<128x16xf32>, vector<1x16xf32> -> vector<1x16xf32>
    %cst_378 = arith.constant dense<0.000000e+00> : vector<1x6xf32>
    %563 = tpu.matmul %562, %29, %cst_378 {dimension_numbers = #tpu.dot_dimension_numbers<[1], [1], [0], [0], [0, 0, 1, 0], [], []>} : vector<1x16xf32>, vector<6x16xf32>, vector<1x6xf32> -> vector<1x6xf32>
    %cst_379 = arith.constant 2.500000e-01 : f32
    %564 = vector.broadcast %cst_379 : f32 to vector<1x6xf32>
    %565 = arith.mulf %563, %564 : vector<1x6xf32>
    %566 = arith.addf %565, %24 : vector<1x6xf32>
    %cst_380 = arith.constant dense<0xFF800000> : vector<1xf32>
    %567 = vector.multi_reduction <maximumf>, %566, %cst_380 [1] : vector<1x6xf32> to vector<1xf32>
    %568 = vector.shape_cast %567 : vector<1xf32> to vector<1x1xf32>
    %569 = vector.broadcast %568 : vector<1x1xf32> to vector<1x6xf32>
    %570 = arith.subf %566, %569 : vector<1x6xf32>
    %571 = math.exp %570 : vector<1x6xf32>
    %cst_381 = arith.constant dense<0.000000e+00> : vector<1xf32>
    %572 = vector.multi_reduction <add>, %571, %cst_381 [1] : vector<1x6xf32> to vector<1xf32>
    %573 = vector.shape_cast %572 : vector<1xf32> to vector<1x1xf32>
    %574 = vector.broadcast %573 : vector<1x1xf32> to vector<1x6xf32>
    %575 = arith.divf %571, %574 : vector<1x6xf32>
    %cst_382 = arith.constant dense<0.000000e+00> : vector<1x16xf32>
    %576 = tpu.matmul %575, %41, %cst_382 {dimension_numbers = #tpu.dot_dimension_numbers<[1], [0], [0], [1], [0, 0, 1, 1], [], []>} : vector<1x6xf32>, vector<6x16xf32>, vector<1x16xf32> -> vector<1x16xf32>
    %c0_383 = arith.constant 0 : index
    %c0_384 = arith.constant 0 : index
    %c0_385 = arith.constant 0 : index
    %c0_386 = arith.constant 0 : index
    %577 = vector.load %arg10[%c0_383, %c0_384, %c0_385, %c0_386] : memref<1x4x16x128xf32, #tpu.memory_space<vmem>>, vector<1x1x16x128xf32>
    %578 = vector.shape_cast %577 : vector<1x1x16x128xf32> to vector<16x128xf32>
    %cst_387 = arith.constant dense<0.000000e+00> : vector<1x128xf32>
    %579 = tpu.matmul %576, %578, %cst_387 {dimension_numbers = #tpu.dot_dimension_numbers<[1], [0], [0], [1], [0, 0, 1, 1], [], []>} : vector<1x16xf32>, vector<16x128xf32>, vector<1x128xf32> -> vector<1x128xf32>
    %580 = arith.addf %559, %579 : vector<1x128xf32>
    %c0_388 = arith.constant 0 : index
    %c0_389 = arith.constant 0 : index
    %c2_390 = arith.constant 2 : index
    %c0_391 = arith.constant 0 : index
    %581 = vector.load %arg16[%c0_388, %c0_389, %c2_390, %c0_391] : memref<1x4x4x128xf32, #tpu.memory_space<vmem>>, vector<1x1x1x6xf32>
    %582 = vector.shape_cast %581 : vector<1x1x1x6xf32> to vector<1x6xf32>
    %583 = vector.shape_cast %575 : vector<1x6xf32> to vector<1x1x1x6xf32>
    tpu.vector_store %arg16[%c0_388, %c0_389, %c2_390, %c0_391], %583 {strides = array<i32>} : memref<1x4x4x128xf32, #tpu.memory_space<vmem>>, vector<1x1x1x6xf32>,
    %c0_392 = arith.constant 0 : index
    %c1_393 = arith.constant 1 : index
    %c0_394 = arith.constant 0 : index
    %c0_395 = arith.constant 0 : index
    %584 = vector.load %arg7[%c0_392, %c1_393, %c0_394, %c0_395] : memref<1x4x128x16xf32, #tpu.memory_space<vmem>>, vector<1x1x128x16xf32>
    %585 = vector.shape_cast %584 : vector<1x1x128x16xf32> to vector<128x16xf32>
    %cst_396 = arith.constant dense<0.000000e+00> : vector<1x16xf32>
    %586 = tpu.matmul %558, %585, %cst_396 {dimension_numbers = #tpu.dot_dimension_numbers<[1], [0], [0], [1], [0, 0, 1, 1], [], []>} : vector<1x128xf32>, vector<128x16xf32>, vector<1x16xf32> -> vector<1x16xf32>
    %cst_397 = arith.constant dense<0.000000e+00> : vector<1x6xf32>
    %587 = tpu.matmul %586, %32, %cst_397 {dimension_numbers = #tpu.dot_dimension_numbers<[1], [1], [0], [0], [0, 0, 1, 0], [], []>} : vector<1x16xf32>, vector<6x16xf32>, vector<1x6xf32> -> vector<1x6xf32>
    %cst_398 = arith.constant 2.500000e-01 : f32
    %588 = vector.broadcast %cst_398 : f32 to vector<1x6xf32>
    %589 = arith.mulf %587, %588 : vector<1x6xf32>
    %590 = arith.addf %589, %24 : vector<1x6xf32>
    %cst_399 = arith.constant dense<0xFF800000> : vector<1xf32>
    %591 = vector.multi_reduction <maximumf>, %590, %cst_399 [1] : vector<1x6xf32> to vector<1xf32>
    %592 = vector.shape_cast %591 : vector<1xf32> to vector<1x1xf32>
    %593 = vector.broadcast %592 : vector<1x1xf32> to vector<1x6xf32>
    %594 = arith.subf %590, %593 : vector<1x6xf32>
    %595 = math.exp %594 : vector<1x6xf32>
    %cst_400 = arith.constant dense<0.000000e+00> : vector<1xf32>
    %596 = vector.multi_reduction <add>, %595, %cst_400 [1] : vector<1x6xf32> to vector<1xf32>
    %597 = vector.shape_cast %596 : vector<1xf32> to vector<1x1xf32>
    %598 = vector.broadcast %597 : vector<1x1xf32> to vector<1x6xf32>
    %599 = arith.divf %595, %598 : vector<1x6xf32>
    %cst_401 = arith.constant dense<0.000000e+00> : vector<1x16xf32>
    %600 = tpu.matmul %599, %44, %cst_401 {dimension_numbers = #tpu.dot_dimension_numbers<[1], [0], [0], [1], [0, 0, 1, 1], [], []>} : vector<1x6xf32>, vector<6x16xf32>, vector<1x16xf32> -> vector<1x16xf32>
    %c0_402 = arith.constant 0 : index
    %c1_403 = arith.constant 1 : index
    %c0_404 = arith.constant 0 : index
    %c0_405 = arith.constant 0 : index
    %601 = vector.load %arg10[%c0_402, %c1_403, %c0_404, %c0_405] : memref<1x4x16x128xf32, #tpu.memory_space<vmem>>, vector<1x1x16x128xf32>
    %602 = vector.shape_cast %601 : vector<1x1x16x128xf32> to vector<16x128xf32>
    %cst_406 = arith.constant dense<0.000000e+00> : vector<1x128xf32>
    %603 = tpu.matmul %600, %602, %cst_406 {dimension_numbers = #tpu.dot_dimension_numbers<[1], [0], [0], [1], [0, 0, 1, 1], [], []>} : vector<1x16xf32>, vector<16x128xf32>, vector<1x128xf32> -> vector<1x128xf32>
    %604 = arith.addf %580, %603 : vector<1x128xf32>
    %c0_407 = arith.constant 0 : index
    %c1_408 = arith.constant 1 : index
    %c2_409 = arith.constant 2 : index
    %c0_410 = arith.constant 0 : index
    %605 = vector.load %arg16[%c0_407, %c1_408, %c2_409, %c0_410] : memref<1x4x4x128xf32, #tpu.memory_space<vmem>>, vector<1x1x1x6xf32>
    %606 = vector.shape_cast %605 : vector<1x1x1x6xf32> to vector<1x6xf32>
    %607 = vector.shape_cast %599 : vector<1x6xf32> to vector<1x1x1x6xf32>
    tpu.vector_store %arg16[%c0_407, %c1_408, %c2_409, %c0_410], %607 {strides = array<i32>} : memref<1x4x4x128xf32, #tpu.memory_space<vmem>>, vector<1x1x1x6xf32>,
    %c0_411 = arith.constant 0 : index
    %c2_412 = arith.constant 2 : index
    %c0_413 = arith.constant 0 : index
    %c0_414 = arith.constant 0 : index
    %608 = vector.load %arg7[%c0_411, %c2_412, %c0_413, %c0_414] : memref<1x4x128x16xf32, #tpu.memory_space<vmem>>, vector<1x1x128x16xf32>
    %609 = vector.shape_cast %608 : vector<1x1x128x16xf32> to vector<128x16xf32>
    %cst_415 = arith.constant dense<0.000000e+00> : vector<1x16xf32>
    %610 = tpu.matmul %558, %609, %cst_415 {dimension_numbers = #tpu.dot_dimension_numbers<[1], [0], [0], [1], [0, 0, 1, 1], [], []>} : vector<1x128xf32>, vector<128x16xf32>, vector<1x16xf32> -> vector<1x16xf32>
    %cst_416 = arith.constant dense<0.000000e+00> : vector<1x6xf32>
    %611 = tpu.matmul %610, %35, %cst_416 {dimension_numbers = #tpu.dot_dimension_numbers<[1], [1], [0], [0], [0, 0, 1, 0], [], []>} : vector<1x16xf32>, vector<6x16xf32>, vector<1x6xf32> -> vector<1x6xf32>
    %cst_417 = arith.constant 2.500000e-01 : f32
    %612 = vector.broadcast %cst_417 : f32 to vector<1x6xf32>
    %613 = arith.mulf %611, %612 : vector<1x6xf32>
    %614 = arith.addf %613, %24 : vector<1x6xf32>
    %cst_418 = arith.constant dense<0xFF800000> : vector<1xf32>
    %615 = vector.multi_reduction <maximumf>, %614, %cst_418 [1] : vector<1x6xf32> to vector<1xf32>
    %616 = vector.shape_cast %615 : vector<1xf32> to vector<1x1xf32>
    %617 = vector.broadcast %616 : vector<1x1xf32> to vector<1x6xf32>
    %618 = arith.subf %614, %617 : vector<1x6xf32>
    %619 = math.exp %618 : vector<1x6xf32>
    %cst_419 = arith.constant dense<0.000000e+00> : vector<1xf32>
    %620 = vector.multi_reduction <add>, %619, %cst_419 [1] : vector<1x6xf32> to vector<1xf32>
    %621 = vector.shape_cast %620 : vector<1xf32> to vector<1x1xf32>
    %622 = vector.broadcast %621 : vector<1x1xf32> to vector<1x6xf32>
    %623 = arith.divf %619, %622 : vector<1x6xf32>
    %cst_420 = arith.constant dense<0.000000e+00> : vector<1x16xf32>
    %624 = tpu.matmul %623, %47, %cst_420 {dimension_numbers = #tpu.dot_dimension_numbers<[1], [0], [0], [1], [0, 0, 1, 1], [], []>} : vector<1x6xf32>, vector<6x16xf32>, vector<1x16xf32> -> vector<1x16xf32>
    %c0_421 = arith.constant 0 : index
    %c2_422 = arith.constant 2 : index
    %c0_423 = arith.constant 0 : index
    %c0_424 = arith.constant 0 : index
    %625 = vector.load %arg10[%c0_421, %c2_422, %c0_423, %c0_424] : memref<1x4x16x128xf32, #tpu.memory_space<vmem>>, vector<1x1x16x128xf32>
    %626 = vector.shape_cast %625 : vector<1x1x16x128xf32> to vector<16x128xf32>
    %cst_425 = arith.constant dense<0.000000e+00> : vector<1x128xf32>
    %627 = tpu.matmul %624, %626, %cst_425 {dimension_numbers = #tpu.dot_dimension_numbers<[1], [0], [0], [1], [0, 0, 1, 1], [], []>} : vector<1x16xf32>, vector<16x128xf32>, vector<1x128xf32> -> vector<1x128xf32>
    %628 = arith.addf %604, %627 : vector<1x128xf32>
    %c0_426 = arith.constant 0 : index
    %c2_427 = arith.constant 2 : index
    %c2_428 = arith.constant 2 : index
    %c0_429 = arith.constant 0 : index
    %629 = vector.load %arg16[%c0_426, %c2_427, %c2_428, %c0_429] : memref<1x4x4x128xf32, #tpu.memory_space<vmem>>, vector<1x1x1x6xf32>
    %630 = vector.shape_cast %629 : vector<1x1x1x6xf32> to vector<1x6xf32>
    %631 = vector.shape_cast %623 : vector<1x6xf32> to vector<1x1x1x6xf32>
    tpu.vector_store %arg16[%c0_426, %c2_427, %c2_428, %c0_429], %631 {strides = array<i32>} : memref<1x4x4x128xf32, #tpu.memory_space<vmem>>, vector<1x1x1x6xf32>,
    %c0_430 = arith.constant 0 : index
    %c3_431 = arith.constant 3 : index
    %c0_432 = arith.constant 0 : index
    %c0_433 = arith.constant 0 : index
    %632 = vector.load %arg7[%c0_430, %c3_431, %c0_432, %c0_433] : memref<1x4x128x16xf32, #tpu.memory_space<vmem>>, vector<1x1x128x16xf32>
    %633 = vector.shape_cast %632 : vector<1x1x128x16xf32> to vector<128x16xf32>
    %cst_434 = arith.constant dense<0.000000e+00> : vector<1x16xf32>
    %634 = tpu.matmul %558, %633, %cst_434 {dimension_numbers = #tpu.dot_dimension_numbers<[1], [0], [0], [1], [0, 0, 1, 1], [], []>} : vector<1x128xf32>, vector<128x16xf32>, vector<1x16xf32> -> vector<1x16xf32>
    %cst_435 = arith.constant dense<0.000000e+00> : vector<1x6xf32>
    %635 = tpu.matmul %634, %38, %cst_435 {dimension_numbers = #tpu.dot_dimension_numbers<[1], [1], [0], [0], [0, 0, 1, 0], [], []>} : vector<1x16xf32>, vector<6x16xf32>, vector<1x6xf32> -> vector<1x6xf32>
    %cst_436 = arith.constant 2.500000e-01 : f32
    %636 = vector.broadcast %cst_436 : f32 to vector<1x6xf32>
    %637 = arith.mulf %635, %636 : vector<1x6xf32>
    %638 = arith.addf %637, %24 : vector<1x6xf32>
    %cst_437 = arith.constant dense<0xFF800000> : vector<1xf32>
    %639 = vector.multi_reduction <maximumf>, %638, %cst_437 [1] : vector<1x6xf32> to vector<1xf32>
    %640 = vector.shape_cast %639 : vector<1xf32> to vector<1x1xf32>
    %641 = vector.broadcast %640 : vector<1x1xf32> to vector<1x6xf32>
    %642 = arith.subf %638, %641 : vector<1x6xf32>
    %643 = math.exp %642 : vector<1x6xf32>
    %cst_438 = arith.constant dense<0.000000e+00> : vector<1xf32>
    %644 = vector.multi_reduction <add>, %643, %cst_438 [1] : vector<1x6xf32> to vector<1xf32>
    %645 = vector.shape_cast %644 : vector<1xf32> to vector<1x1xf32>
    %646 = vector.broadcast %645 : vector<1x1xf32> to vector<1x6xf32>
    %647 = arith.divf %643, %646 : vector<1x6xf32>
    %cst_439 = arith.constant dense<0.000000e+00> : vector<1x16xf32>
    %648 = tpu.matmul %647, %50, %cst_439 {dimension_numbers = #tpu.dot_dimension_numbers<[1], [0], [0], [1], [0, 0, 1, 1], [], []>} : vector<1x6xf32>, vector<6x16xf32>, vector<1x16xf32> -> vector<1x16xf32>
    %c0_440 = arith.constant 0 : index
    %c3_441 = arith.constant 3 : index
    %c0_442 = arith.constant 0 : index
    %c0_443 = arith.constant 0 : index
    %649 = vector.load %arg10[%c0_440, %c3_441, %c0_442, %c0_443] : memref<1x4x16x128xf32, #tpu.memory_space<vmem>>, vector<1x1x16x128xf32>
    %650 = vector.shape_cast %649 : vector<1x1x16x128xf32> to vector<16x128xf32>
    %cst_444 = arith.constant dense<0.000000e+00> : vector<1x128xf32>
    %651 = tpu.matmul %648, %650, %cst_444 {dimension_numbers = #tpu.dot_dimension_numbers<[1], [0], [0], [1], [0, 0, 1, 1], [], []>} : vector<1x16xf32>, vector<16x128xf32>, vector<1x128xf32> -> vector<1x128xf32>
    %652 = arith.addf %628, %651 : vector<1x128xf32>
    %c0_445 = arith.constant 0 : index
    %c3_446 = arith.constant 3 : index
    %c2_447 = arith.constant 2 : index
    %c0_448 = arith.constant 0 : index
    %653 = vector.load %arg16[%c0_445, %c3_446, %c2_447, %c0_448] : memref<1x4x4x128xf32, #tpu.memory_space<vmem>>, vector<1x1x1x6xf32>
    %654 = vector.shape_cast %653 : vector<1x1x1x6xf32> to vector<1x6xf32>
    %655 = vector.shape_cast %647 : vector<1x6xf32> to vector<1x1x1x6xf32>
    tpu.vector_store %arg16[%c0_445, %c3_446, %c2_447, %c0_448], %655 {strides = array<i32>} : memref<1x4x4x128xf32, #tpu.memory_space<vmem>>, vector<1x1x1x6xf32>,
    %656 = arith.addf %652, %558 : vector<1x128xf32>
    %c0_449 = arith.constant 0 : index
    %c2_450 = arith.constant 2 : index
    %c0_451 = arith.constant 0 : index
    %657 = vector.load %arg6[%c0_449, %c2_450, %c0_451] : memref<1x7x128xf32, #tpu.memory_space<vmem>>, vector<1x1x128xf32>
    %658 = vector.shape_cast %657 : vector<1x1x128xf32> to vector<1x128xf32>
    %c0_452 = arith.constant 0 : index
    %c3_453 = arith.constant 3 : index
    %c0_454 = arith.constant 0 : index
    %659 = vector.load %arg6[%c0_452, %c3_453, %c0_454] : memref<1x7x128xf32, #tpu.memory_space<vmem>>, vector<1x1x128xf32>
    %660 = vector.shape_cast %659 : vector<1x1x128xf32> to vector<1x128xf32>
    %cst_455 = arith.constant dense<0.000000e+00> : vector<1xf32>
    %661 = vector.multi_reduction <add>, %656, %cst_455 [1] : vector<1x128xf32> to vector<1xf32>
    %662 = vector.shape_cast %661 : vector<1xf32> to vector<1x1xf32>
    %cst_456 = arith.constant 0.0263157897 : f32
    %663 = vector.broadcast %cst_456 : f32 to vector<1x1xf32>
    %664 = arith.mulf %662, %663 : vector<1x1xf32>
    %665 = vector.broadcast %664 : vector<1x1xf32> to vector<1x128xf32>
    %666 = arith.subf %656, %665 : vector<1x128xf32>
    %667 = arith.mulf %666, %4 : vector<1x128xf32>
    %668 = arith.mulf %667, %667 : vector<1x128xf32>
    %cst_457 = arith.constant dense<0.000000e+00> : vector<1xf32>
    %669 = vector.multi_reduction <add>, %668, %cst_457 [1] : vector<1x128xf32> to vector<1xf32>
    %670 = vector.shape_cast %669 : vector<1xf32> to vector<1x1xf32>
    %cst_458 = arith.constant 0.0263157897 : f32
    %671 = vector.broadcast %cst_458 : f32 to vector<1x1xf32>
    %672 = arith.mulf %670, %671 : vector<1x1xf32>
    %cst_459 = arith.constant 9.99999974E-6 : f32
    %673 = vector.broadcast %cst_459 : f32 to vector<1x1xf32>
    %674 = arith.addf %672, %673 : vector<1x1xf32>
    %675 = math.rsqrt %674 : vector<1x1xf32>
    %676 = vector.broadcast %675 : vector<1x1xf32> to vector<1x128xf32>
    %677 = arith.mulf %667, %676 : vector<1x128xf32>
    %678 = arith.mulf %677, %658 : vector<1x128xf32>
    %679 = arith.addf %678, %660 : vector<1x128xf32>
    %c0_460 = arith.constant 0 : index
    %c0_461 = arith.constant 0 : index
    %c0_462 = arith.constant 0 : index
    %680 = vector.load %arg11[%c0_460, %c0_461, %c0_462] : memref<1x128x128xf32, #tpu.memory_space<vmem>>, vector<1x128x128xf32>
    %681 = vector.shape_cast %680 : vector<1x128x128xf32> to vector<128x128xf32>
    %cst_463 = arith.constant dense<0.000000e+00> : vector<1x128xf32>
    %682 = tpu.matmul %679, %681, %cst_463 {dimension_numbers = #tpu.dot_dimension_numbers<[1], [0], [0], [1], [0, 0, 1, 1], [], []>} : vector<1x128xf32>, vector<128x128xf32>, vector<1x128xf32> -> vector<1x128xf32>
    %c0_464 = arith.constant 0 : index
    %c0_465 = arith.constant 0 : index
    %c0_466 = arith.constant 0 : index
    %683 = vector.load %arg12[%c0_464, %c0_465, %c0_466] : memref<1x1x128xf32, #tpu.memory_space<vmem>>, vector<1x1x128xf32>
    %684 = vector.shape_cast %683 : vector<1x1x128xf32> to vector<1x128xf32>
    %685 = arith.addf %682, %684 : vector<1x128xf32>
    %cst_467 = arith.constant 0.000000e+00 : f32
    %686 = vector.broadcast %cst_467 : f32 to vector<1x128xf32>
    %687 = arith.maximumf %685, %686 : vector<1x128xf32>
    %c0_468 = arith.constant 0 : index
    %c0_469 = arith.constant 0 : index
    %c0_470 = arith.constant 0 : index
    %688 = vector.load %arg13[%c0_468, %c0_469, %c0_470] : memref<1x128x128xf32, #tpu.memory_space<vmem>>, vector<1x128x128xf32>
    %689 = vector.shape_cast %688 : vector<1x128x128xf32> to vector<128x128xf32>
    %cst_471 = arith.constant dense<0.000000e+00> : vector<1x128xf32>
    %690 = tpu.matmul %687, %689, %cst_471 {dimension_numbers = #tpu.dot_dimension_numbers<[1], [0], [0], [1], [0, 0, 1, 1], [], []>} : vector<1x128xf32>, vector<128x128xf32>, vector<1x128xf32> -> vector<1x128xf32>
    %c0_472 = arith.constant 0 : index
    %c6_473 = arith.constant 6 : index
    %c0_474 = arith.constant 0 : index
    %691 = vector.load %arg6[%c0_472, %c6_473, %c0_474] : memref<1x7x128xf32, #tpu.memory_space<vmem>>, vector<1x1x128xf32>
    %692 = vector.shape_cast %691 : vector<1x1x128xf32> to vector<1x128xf32>
    %693 = arith.addf %690, %692 : vector<1x128xf32>
    %694 = arith.addf %693, %679 : vector<1x128xf32>
    %c0_475 = arith.constant 0 : index
    %c4_476 = arith.constant 4 : index
    %c0_477 = arith.constant 0 : index
    %695 = vector.load %arg6[%c0_475, %c4_476, %c0_477] : memref<1x7x128xf32, #tpu.memory_space<vmem>>, vector<1x1x128xf32>
    %696 = vector.shape_cast %695 : vector<1x1x128xf32> to vector<1x128xf32>
    %c0_478 = arith.constant 0 : index
    %c5_479 = arith.constant 5 : index
    %c0_480 = arith.constant 0 : index
    %697 = vector.load %arg6[%c0_478, %c5_479, %c0_480] : memref<1x7x128xf32, #tpu.memory_space<vmem>>, vector<1x1x128xf32>
    %698 = vector.shape_cast %697 : vector<1x1x128xf32> to vector<1x128xf32>
    %cst_481 = arith.constant dense<0.000000e+00> : vector<1xf32>
    %699 = vector.multi_reduction <add>, %694, %cst_481 [1] : vector<1x128xf32> to vector<1xf32>
    %700 = vector.shape_cast %699 : vector<1xf32> to vector<1x1xf32>
    %cst_482 = arith.constant 0.0263157897 : f32
    %701 = vector.broadcast %cst_482 : f32 to vector<1x1xf32>
    %702 = arith.mulf %700, %701 : vector<1x1xf32>
    %703 = vector.broadcast %702 : vector<1x1xf32> to vector<1x128xf32>
    %704 = arith.subf %694, %703 : vector<1x128xf32>
    %705 = arith.mulf %704, %4 : vector<1x128xf32>
    %706 = arith.mulf %705, %705 : vector<1x128xf32>
    %cst_483 = arith.constant dense<0.000000e+00> : vector<1xf32>
    %707 = vector.multi_reduction <add>, %706, %cst_483 [1] : vector<1x128xf32> to vector<1xf32>
    %708 = vector.shape_cast %707 : vector<1xf32> to vector<1x1xf32>
    %cst_484 = arith.constant 0.0263157897 : f32
    %709 = vector.broadcast %cst_484 : f32 to vector<1x1xf32>
    %710 = arith.mulf %708, %709 : vector<1x1xf32>
    %cst_485 = arith.constant 9.99999974E-6 : f32
    %711 = vector.broadcast %cst_485 : f32 to vector<1x1xf32>
    %712 = arith.addf %710, %711 : vector<1x1xf32>
    %713 = math.rsqrt %712 : vector<1x1xf32>
    %714 = vector.broadcast %713 : vector<1x1xf32> to vector<1x128xf32>
    %715 = arith.mulf %705, %714 : vector<1x128xf32>
    %716 = arith.mulf %715, %696 : vector<1x128xf32>
    %717 = arith.addf %716, %698 : vector<1x128xf32>
    %c0_486 = arith.constant 0 : index
    %c0_487 = arith.constant 0 : index
    %718 = vector.load %arg14[%c0_486, %c0_487] : memref<128x128xf32, #tpu.memory_space<vmem>>, vector<128x128xf32>
    %cst_488 = arith.constant dense<0.000000e+00> : vector<1x128xf32>
    %719 = tpu.matmul %717, %718, %cst_488 {dimension_numbers = #tpu.dot_dimension_numbers<[1], [0], [0], [1], [0, 0, 1, 1], [], []>} : vector<1x128xf32>, vector<128x128xf32>, vector<1x128xf32> -> vector<1x128xf32>
    %720 = arith.addf %719, %526 : vector<1x128xf32>
    %cst_489 = arith.constant -1.000000e+30 : f32
    %721 = vector.broadcast %cst_489 : f32 to vector<1x128xf32>
    %722 = arith.select %6, %720, %721 : vector<1x128xi1>, vector<1x128xf32>
    %cst_490 = arith.constant dense<0xFF800000> : vector<1xf32>
    %723 = vector.multi_reduction <maximumf>, %722, %cst_490 [1] : vector<1x128xf32> to vector<1xf32>
    %724 = vector.shape_cast %723 : vector<1xf32> to vector<1x1xf32>
    %725 = vector.broadcast %724 : vector<1x1xf32> to vector<1x128xf32>
    %726 = arith.subf %722, %725 : vector<1x128xf32>
    %727 = math.exp %726 : vector<1x128xf32>
    %cst_491 = arith.constant 0.000000e+00 : f32
    %728 = vector.broadcast %cst_491 : f32 to vector<1x128xf32>
    %729 = arith.select %6, %727, %728 : vector<1x128xi1>, vector<1x128xf32>
    %cst_492 = arith.constant dense<0.000000e+00> : vector<1xf32>
    %730 = vector.multi_reduction <add>, %729, %cst_492 [1] : vector<1x128xf32> to vector<1xf32>
    %731 = vector.shape_cast %730 : vector<1xf32> to vector<1x1xf32>
    %732 = vector.broadcast %731 : vector<1x1xf32> to vector<1x128xf32>
    %733 = arith.divf %729, %732 : vector<1x128xf32>
    %cst_493 = arith.constant 0.000000e+00 : f32
    %734 = vector.broadcast %cst_493 : f32 to vector<1x128xf32>
    %735 = arith.select %6, %733, %734 : vector<1x128xi1>, vector<1x128xf32>
    %cst_494 = arith.constant -1.000000e+30 : f32
    %736 = vector.broadcast %cst_494 : f32 to vector<1x128xf32>
    %737 = arith.select %11, %720, %736 : vector<1x128xi1>, vector<1x128xf32>
    %cst_495 = arith.constant dense<0xFF800000> : vector<1xf32>
    %738 = vector.multi_reduction <maximumf>, %737, %cst_495 [1] : vector<1x128xf32> to vector<1xf32>
    %739 = vector.shape_cast %738 : vector<1xf32> to vector<1x1xf32>
    %740 = vector.broadcast %739 : vector<1x1xf32> to vector<1x128xf32>
    %741 = arith.subf %737, %740 : vector<1x128xf32>
    %742 = math.exp %741 : vector<1x128xf32>
    %cst_496 = arith.constant 0.000000e+00 : f32
    %743 = vector.broadcast %cst_496 : f32 to vector<1x128xf32>
    %744 = arith.select %11, %742, %743 : vector<1x128xi1>, vector<1x128xf32>
    %cst_497 = arith.constant dense<0.000000e+00> : vector<1xf32>
    %745 = vector.multi_reduction <add>, %744, %cst_497 [1] : vector<1x128xf32> to vector<1xf32>
    %746 = vector.shape_cast %745 : vector<1xf32> to vector<1x1xf32>
    %747 = vector.broadcast %746 : vector<1x1xf32> to vector<1x128xf32>
    %748 = arith.divf %744, %747 : vector<1x128xf32>
    %cst_498 = arith.constant 0.000000e+00 : f32
    %749 = vector.broadcast %cst_498 : f32 to vector<1x128xf32>
    %750 = arith.select %11, %748, %749 : vector<1x128xi1>, vector<1x128xf32>
    %751 = arith.addf %735, %750 : vector<1x128xf32>
    %cst_499 = arith.constant 0.000000e+00 : f32
    %752 = vector.broadcast %cst_499 : f32 to vector<1x128xf32>
    %753 = arith.subf %752, %720 : vector<1x128xf32>
    %754 = math.exp %753 : vector<1x128xf32>
    %cst_500 = arith.constant 1.000000e+00 : f32
    %755 = vector.broadcast %cst_500 : f32 to vector<1x128xf32>
    %756 = arith.addf %755, %754 : vector<1x128xf32>
    %cst_501 = arith.constant 1.000000e+00 : f32
    %757 = vector.broadcast %cst_501 : f32 to vector<1x128xf32>
    %758 = arith.divf %757, %756 : vector<1x128xf32>
    %cst_502 = arith.constant 0.000000e+00 : f32
    %759 = vector.broadcast %cst_502 : f32 to vector<1x128xf32>
    %760 = arith.select %16, %758, %759 : vector<1x128xi1>, vector<1x128xf32>
    %761 = arith.addf %751, %760 : vector<1x128xf32>
    %c0_503 = arith.constant 0 : index
    %c3_504 = arith.constant 3 : index
    %c0_505 = arith.constant 0 : index
    %762 = vector.load %arg15[%c0_503, %c3_504, %c0_505] : memref<1x5x128xf32, #tpu.memory_space<vmem>>, vector<1x1x128xf32>
    %763 = vector.shape_cast %762 : vector<1x1x128xf32> to vector<1x128xf32>
    %764 = vector.shape_cast %761 : vector<1x128xf32> to vector<1x1x128xf32>
    tpu.vector_store %arg15[%c0_503, %c3_504, %c0_505], %764 {strides = array<i32>} : memref<1x5x128xf32, #tpu.memory_space<vmem>>, vector<1x1x128xf32>,
    %c3_506 = arith.constant 3 : index
    %c0_507 = arith.constant 0 : index
    %765 = vector.load %arg3[%c3_506, %c0_507] : memref<4x128xf32, #tpu.memory_space<vmem>>, vector<1x128xf32>
    %766 = arith.addf %761, %765 : vector<1x128xf32>
    %c0_508 = arith.constant 0 : index
    %c0_509 = arith.constant 0 : index
    %c0_510 = arith.constant 0 : index
    %767 = vector.load %arg5[%c0_508, %c0_509, %c0_510] : memref<1x128x128xf32, #tpu.memory_space<vmem>>, vector<1x128x128xf32>
    %768 = vector.shape_cast %767 : vector<1x128x128xf32> to vector<128x128xf32>
    %cst_511 = arith.constant dense<0.000000e+00> : vector<1x128xf32>
    %769 = tpu.matmul %766, %768, %cst_511 {dimension_numbers = #tpu.dot_dimension_numbers<[1], [0], [0], [1], [0, 0, 1, 1], [], []>} : vector<1x128xf32>, vector<128x128xf32>, vector<1x128xf32> -> vector<1x128xf32>
    %770 = arith.addf %769, %766 : vector<1x128xf32>
    %c0_512 = arith.constant 0 : index
    %c0_513 = arith.constant 0 : index
    %c0_514 = arith.constant 0 : index
    %771 = vector.load %arg6[%c0_512, %c0_513, %c0_514] : memref<1x7x128xf32, #tpu.memory_space<vmem>>, vector<1x1x128xf32>
    %772 = vector.shape_cast %771 : vector<1x1x128xf32> to vector<1x128xf32>
    %c0_515 = arith.constant 0 : index
    %c1_516 = arith.constant 1 : index
    %c0_517 = arith.constant 0 : index
    %773 = vector.load %arg6[%c0_515, %c1_516, %c0_517] : memref<1x7x128xf32, #tpu.memory_space<vmem>>, vector<1x1x128xf32>
    %774 = vector.shape_cast %773 : vector<1x1x128xf32> to vector<1x128xf32>
    %cst_518 = arith.constant dense<0.000000e+00> : vector<1xf32>
    %775 = vector.multi_reduction <add>, %770, %cst_518 [1] : vector<1x128xf32> to vector<1xf32>
    %776 = vector.shape_cast %775 : vector<1xf32> to vector<1x1xf32>
    %cst_519 = arith.constant 0.0263157897 : f32
    %777 = vector.broadcast %cst_519 : f32 to vector<1x1xf32>
    %778 = arith.mulf %776, %777 : vector<1x1xf32>
    %779 = vector.broadcast %778 : vector<1x1xf32> to vector<1x128xf32>
    %780 = arith.subf %770, %779 : vector<1x128xf32>
    %781 = arith.mulf %780, %4 : vector<1x128xf32>
    %782 = arith.mulf %781, %781 : vector<1x128xf32>
    %cst_520 = arith.constant dense<0.000000e+00> : vector<1xf32>
    %783 = vector.multi_reduction <add>, %782, %cst_520 [1] : vector<1x128xf32> to vector<1xf32>
    %784 = vector.shape_cast %783 : vector<1xf32> to vector<1x1xf32>
    %cst_521 = arith.constant 0.0263157897 : f32
    %785 = vector.broadcast %cst_521 : f32 to vector<1x1xf32>
    %786 = arith.mulf %784, %785 : vector<1x1xf32>
    %cst_522 = arith.constant 9.99999974E-6 : f32
    %787 = vector.broadcast %cst_522 : f32 to vector<1x1xf32>
    %788 = arith.addf %786, %787 : vector<1x1xf32>
    %789 = math.rsqrt %788 : vector<1x1xf32>
    %790 = vector.broadcast %789 : vector<1x1xf32> to vector<1x128xf32>
    %791 = arith.mulf %781, %790 : vector<1x128xf32>
    %792 = arith.mulf %791, %772 : vector<1x128xf32>
    %793 = arith.addf %792, %774 : vector<1x128xf32>
    %cst_523 = arith.constant 0.000000e+00 : f32
    %794 = vector.broadcast %cst_523 : f32 to vector<1x128xf32>
    %c0_524 = arith.constant 0 : index
    %c0_525 = arith.constant 0 : index
    %c0_526 = arith.constant 0 : index
    %c0_527 = arith.constant 0 : index
    %795 = vector.load %arg7[%c0_524, %c0_525, %c0_526, %c0_527] : memref<1x4x128x16xf32, #tpu.memory_space<vmem>>, vector<1x1x128x16xf32>
    %796 = vector.shape_cast %795 : vector<1x1x128x16xf32> to vector<128x16xf32>
    %cst_528 = arith.constant dense<0.000000e+00> : vector<1x16xf32>
    %797 = tpu.matmul %793, %796, %cst_528 {dimension_numbers = #tpu.dot_dimension_numbers<[1], [0], [0], [1], [0, 0, 1, 1], [], []>} : vector<1x128xf32>, vector<128x16xf32>, vector<1x16xf32> -> vector<1x16xf32>
    %cst_529 = arith.constant dense<0.000000e+00> : vector<1x6xf32>
    %798 = tpu.matmul %797, %29, %cst_529 {dimension_numbers = #tpu.dot_dimension_numbers<[1], [1], [0], [0], [0, 0, 1, 0], [], []>} : vector<1x16xf32>, vector<6x16xf32>, vector<1x6xf32> -> vector<1x6xf32>
    %cst_530 = arith.constant 2.500000e-01 : f32
    %799 = vector.broadcast %cst_530 : f32 to vector<1x6xf32>
    %800 = arith.mulf %798, %799 : vector<1x6xf32>
    %801 = arith.addf %800, %24 : vector<1x6xf32>
    %cst_531 = arith.constant dense<0xFF800000> : vector<1xf32>
    %802 = vector.multi_reduction <maximumf>, %801, %cst_531 [1] : vector<1x6xf32> to vector<1xf32>
    %803 = vector.shape_cast %802 : vector<1xf32> to vector<1x1xf32>
    %804 = vector.broadcast %803 : vector<1x1xf32> to vector<1x6xf32>
    %805 = arith.subf %801, %804 : vector<1x6xf32>
    %806 = math.exp %805 : vector<1x6xf32>
    %cst_532 = arith.constant dense<0.000000e+00> : vector<1xf32>
    %807 = vector.multi_reduction <add>, %806, %cst_532 [1] : vector<1x6xf32> to vector<1xf32>
    %808 = vector.shape_cast %807 : vector<1xf32> to vector<1x1xf32>
    %809 = vector.broadcast %808 : vector<1x1xf32> to vector<1x6xf32>
    %810 = arith.divf %806, %809 : vector<1x6xf32>
    %cst_533 = arith.constant dense<0.000000e+00> : vector<1x16xf32>
    %811 = tpu.matmul %810, %41, %cst_533 {dimension_numbers = #tpu.dot_dimension_numbers<[1], [0], [0], [1], [0, 0, 1, 1], [], []>} : vector<1x6xf32>, vector<6x16xf32>, vector<1x16xf32> -> vector<1x16xf32>
    %c0_534 = arith.constant 0 : index
    %c0_535 = arith.constant 0 : index
    %c0_536 = arith.constant 0 : index
    %c0_537 = arith.constant 0 : index
    %812 = vector.load %arg10[%c0_534, %c0_535, %c0_536, %c0_537] : memref<1x4x16x128xf32, #tpu.memory_space<vmem>>, vector<1x1x16x128xf32>
    %813 = vector.shape_cast %812 : vector<1x1x16x128xf32> to vector<16x128xf32>
    %cst_538 = arith.constant dense<0.000000e+00> : vector<1x128xf32>
    %814 = tpu.matmul %811, %813, %cst_538 {dimension_numbers = #tpu.dot_dimension_numbers<[1], [0], [0], [1], [0, 0, 1, 1], [], []>} : vector<1x16xf32>, vector<16x128xf32>, vector<1x128xf32> -> vector<1x128xf32>
    %815 = arith.addf %794, %814 : vector<1x128xf32>
    %c0_539 = arith.constant 0 : index
    %c0_540 = arith.constant 0 : index
    %c3_541 = arith.constant 3 : index
    %c0_542 = arith.constant 0 : index
    %816 = vector.load %arg16[%c0_539, %c0_540, %c3_541, %c0_542] : memref<1x4x4x128xf32, #tpu.memory_space<vmem>>, vector<1x1x1x6xf32>
    %817 = vector.shape_cast %816 : vector<1x1x1x6xf32> to vector<1x6xf32>
    %818 = vector.shape_cast %810 : vector<1x6xf32> to vector<1x1x1x6xf32>
    tpu.vector_store %arg16[%c0_539, %c0_540, %c3_541, %c0_542], %818 {strides = array<i32>} : memref<1x4x4x128xf32, #tpu.memory_space<vmem>>, vector<1x1x1x6xf32>,
    %c0_543 = arith.constant 0 : index
    %c1_544 = arith.constant 1 : index
    %c0_545 = arith.constant 0 : index
    %c0_546 = arith.constant 0 : index
    %819 = vector.load %arg7[%c0_543, %c1_544, %c0_545, %c0_546] : memref<1x4x128x16xf32, #tpu.memory_space<vmem>>, vector<1x1x128x16xf32>
    %820 = vector.shape_cast %819 : vector<1x1x128x16xf32> to vector<128x16xf32>
    %cst_547 = arith.constant dense<0.000000e+00> : vector<1x16xf32>
    %821 = tpu.matmul %793, %820, %cst_547 {dimension_numbers = #tpu.dot_dimension_numbers<[1], [0], [0], [1], [0, 0, 1, 1], [], []>} : vector<1x128xf32>, vector<128x16xf32>, vector<1x16xf32> -> vector<1x16xf32>
    %cst_548 = arith.constant dense<0.000000e+00> : vector<1x6xf32>
    %822 = tpu.matmul %821, %32, %cst_548 {dimension_numbers = #tpu.dot_dimension_numbers<[1], [1], [0], [0], [0, 0, 1, 0], [], []>} : vector<1x16xf32>, vector<6x16xf32>, vector<1x6xf32> -> vector<1x6xf32>
    %cst_549 = arith.constant 2.500000e-01 : f32
    %823 = vector.broadcast %cst_549 : f32 to vector<1x6xf32>
    %824 = arith.mulf %822, %823 : vector<1x6xf32>
    %825 = arith.addf %824, %24 : vector<1x6xf32>
    %cst_550 = arith.constant dense<0xFF800000> : vector<1xf32>
    %826 = vector.multi_reduction <maximumf>, %825, %cst_550 [1] : vector<1x6xf32> to vector<1xf32>
    %827 = vector.shape_cast %826 : vector<1xf32> to vector<1x1xf32>
    %828 = vector.broadcast %827 : vector<1x1xf32> to vector<1x6xf32>
    %829 = arith.subf %825, %828 : vector<1x6xf32>
    %830 = math.exp %829 : vector<1x6xf32>
    %cst_551 = arith.constant dense<0.000000e+00> : vector<1xf32>
    %831 = vector.multi_reduction <add>, %830, %cst_551 [1] : vector<1x6xf32> to vector<1xf32>
    %832 = vector.shape_cast %831 : vector<1xf32> to vector<1x1xf32>
    %833 = vector.broadcast %832 : vector<1x1xf32> to vector<1x6xf32>
    %834 = arith.divf %830, %833 : vector<1x6xf32>
    %cst_552 = arith.constant dense<0.000000e+00> : vector<1x16xf32>
    %835 = tpu.matmul %834, %44, %cst_552 {dimension_numbers = #tpu.dot_dimension_numbers<[1], [0], [0], [1], [0, 0, 1, 1], [], []>} : vector<1x6xf32>, vector<6x16xf32>, vector<1x16xf32> -> vector<1x16xf32>
    %c0_553 = arith.constant 0 : index
    %c1_554 = arith.constant 1 : index
    %c0_555 = arith.constant 0 : index
    %c0_556 = arith.constant 0 : index
    %836 = vector.load %arg10[%c0_553, %c1_554, %c0_555, %c0_556] : memref<1x4x16x128xf32, #tpu.memory_space<vmem>>, vector<1x1x16x128xf32>
    %837 = vector.shape_cast %836 : vector<1x1x16x128xf32> to vector<16x128xf32>
    %cst_557 = arith.constant dense<0.000000e+00> : vector<1x128xf32>
    %838 = tpu.matmul %835, %837, %cst_557 {dimension_numbers = #tpu.dot_dimension_numbers<[1], [0], [0], [1], [0, 0, 1, 1], [], []>} : vector<1x16xf32>, vector<16x128xf32>, vector<1x128xf32> -> vector<1x128xf32>
    %839 = arith.addf %815, %838 : vector<1x128xf32>
    %c0_558 = arith.constant 0 : index
    %c1_559 = arith.constant 1 : index
    %c3_560 = arith.constant 3 : index
    %c0_561 = arith.constant 0 : index
    %840 = vector.load %arg16[%c0_558, %c1_559, %c3_560, %c0_561] : memref<1x4x4x128xf32, #tpu.memory_space<vmem>>, vector<1x1x1x6xf32>
    %841 = vector.shape_cast %840 : vector<1x1x1x6xf32> to vector<1x6xf32>
    %842 = vector.shape_cast %834 : vector<1x6xf32> to vector<1x1x1x6xf32>
    tpu.vector_store %arg16[%c0_558, %c1_559, %c3_560, %c0_561], %842 {strides = array<i32>} : memref<1x4x4x128xf32, #tpu.memory_space<vmem>>, vector<1x1x1x6xf32>,
    %c0_562 = arith.constant 0 : index
    %c2_563 = arith.constant 2 : index
    %c0_564 = arith.constant 0 : index
    %c0_565 = arith.constant 0 : index
    %843 = vector.load %arg7[%c0_562, %c2_563, %c0_564, %c0_565] : memref<1x4x128x16xf32, #tpu.memory_space<vmem>>, vector<1x1x128x16xf32>
    %844 = vector.shape_cast %843 : vector<1x1x128x16xf32> to vector<128x16xf32>
    %cst_566 = arith.constant dense<0.000000e+00> : vector<1x16xf32>
    %845 = tpu.matmul %793, %844, %cst_566 {dimension_numbers = #tpu.dot_dimension_numbers<[1], [0], [0], [1], [0, 0, 1, 1], [], []>} : vector<1x128xf32>, vector<128x16xf32>, vector<1x16xf32> -> vector<1x16xf32>
    %cst_567 = arith.constant dense<0.000000e+00> : vector<1x6xf32>
    %846 = tpu.matmul %845, %35, %cst_567 {dimension_numbers = #tpu.dot_dimension_numbers<[1], [1], [0], [0], [0, 0, 1, 0], [], []>} : vector<1x16xf32>, vector<6x16xf32>, vector<1x6xf32> -> vector<1x6xf32>
    %cst_568 = arith.constant 2.500000e-01 : f32
    %847 = vector.broadcast %cst_568 : f32 to vector<1x6xf32>
    %848 = arith.mulf %846, %847 : vector<1x6xf32>
    %849 = arith.addf %848, %24 : vector<1x6xf32>
    %cst_569 = arith.constant dense<0xFF800000> : vector<1xf32>
    %850 = vector.multi_reduction <maximumf>, %849, %cst_569 [1] : vector<1x6xf32> to vector<1xf32>
    %851 = vector.shape_cast %850 : vector<1xf32> to vector<1x1xf32>
    %852 = vector.broadcast %851 : vector<1x1xf32> to vector<1x6xf32>
    %853 = arith.subf %849, %852 : vector<1x6xf32>
    %854 = math.exp %853 : vector<1x6xf32>
    %cst_570 = arith.constant dense<0.000000e+00> : vector<1xf32>
    %855 = vector.multi_reduction <add>, %854, %cst_570 [1] : vector<1x6xf32> to vector<1xf32>
    %856 = vector.shape_cast %855 : vector<1xf32> to vector<1x1xf32>
    %857 = vector.broadcast %856 : vector<1x1xf32> to vector<1x6xf32>
    %858 = arith.divf %854, %857 : vector<1x6xf32>
    %cst_571 = arith.constant dense<0.000000e+00> : vector<1x16xf32>
    %859 = tpu.matmul %858, %47, %cst_571 {dimension_numbers = #tpu.dot_dimension_numbers<[1], [0], [0], [1], [0, 0, 1, 1], [], []>} : vector<1x6xf32>, vector<6x16xf32>, vector<1x16xf32> -> vector<1x16xf32>
    %c0_572 = arith.constant 0 : index
    %c2_573 = arith.constant 2 : index
    %c0_574 = arith.constant 0 : index
    %c0_575 = arith.constant 0 : index
    %860 = vector.load %arg10[%c0_572, %c2_573, %c0_574, %c0_575] : memref<1x4x16x128xf32, #tpu.memory_space<vmem>>, vector<1x1x16x128xf32>
    %861 = vector.shape_cast %860 : vector<1x1x16x128xf32> to vector<16x128xf32>
    %cst_576 = arith.constant dense<0.000000e+00> : vector<1x128xf32>
    %862 = tpu.matmul %859, %861, %cst_576 {dimension_numbers = #tpu.dot_dimension_numbers<[1], [0], [0], [1], [0, 0, 1, 1], [], []>} : vector<1x16xf32>, vector<16x128xf32>, vector<1x128xf32> -> vector<1x128xf32>
    %863 = arith.addf %839, %862 : vector<1x128xf32>
    %c0_577 = arith.constant 0 : index
    %c2_578 = arith.constant 2 : index
    %c3_579 = arith.constant 3 : index
    %c0_580 = arith.constant 0 : index
    %864 = vector.load %arg16[%c0_577, %c2_578, %c3_579, %c0_580] : memref<1x4x4x128xf32, #tpu.memory_space<vmem>>, vector<1x1x1x6xf32>
    %865 = vector.shape_cast %864 : vector<1x1x1x6xf32> to vector<1x6xf32>
    %866 = vector.shape_cast %858 : vector<1x6xf32> to vector<1x1x1x6xf32>
    tpu.vector_store %arg16[%c0_577, %c2_578, %c3_579, %c0_580], %866 {strides = array<i32>} : memref<1x4x4x128xf32, #tpu.memory_space<vmem>>, vector<1x1x1x6xf32>,
    %c0_581 = arith.constant 0 : index
    %c3_582 = arith.constant 3 : index
    %c0_583 = arith.constant 0 : index
    %c0_584 = arith.constant 0 : index
    %867 = vector.load %arg7[%c0_581, %c3_582, %c0_583, %c0_584] : memref<1x4x128x16xf32, #tpu.memory_space<vmem>>, vector<1x1x128x16xf32>
    %868 = vector.shape_cast %867 : vector<1x1x128x16xf32> to vector<128x16xf32>
    %cst_585 = arith.constant dense<0.000000e+00> : vector<1x16xf32>
    %869 = tpu.matmul %793, %868, %cst_585 {dimension_numbers = #tpu.dot_dimension_numbers<[1], [0], [0], [1], [0, 0, 1, 1], [], []>} : vector<1x128xf32>, vector<128x16xf32>, vector<1x16xf32> -> vector<1x16xf32>
    %cst_586 = arith.constant dense<0.000000e+00> : vector<1x6xf32>
    %870 = tpu.matmul %869, %38, %cst_586 {dimension_numbers = #tpu.dot_dimension_numbers<[1], [1], [0], [0], [0, 0, 1, 0], [], []>} : vector<1x16xf32>, vector<6x16xf32>, vector<1x6xf32> -> vector<1x6xf32>
    %cst_587 = arith.constant 2.500000e-01 : f32
    %871 = vector.broadcast %cst_587 : f32 to vector<1x6xf32>
    %872 = arith.mulf %870, %871 : vector<1x6xf32>
    %873 = arith.addf %872, %24 : vector<1x6xf32>
    %cst_588 = arith.constant dense<0xFF800000> : vector<1xf32>
    %874 = vector.multi_reduction <maximumf>, %873, %cst_588 [1] : vector<1x6xf32> to vector<1xf32>
    %875 = vector.shape_cast %874 : vector<1xf32> to vector<1x1xf32>
    %876 = vector.broadcast %875 : vector<1x1xf32> to vector<1x6xf32>
    %877 = arith.subf %873, %876 : vector<1x6xf32>
    %878 = math.exp %877 : vector<1x6xf32>
    %cst_589 = arith.constant dense<0.000000e+00> : vector<1xf32>
    %879 = vector.multi_reduction <add>, %878, %cst_589 [1] : vector<1x6xf32> to vector<1xf32>
    %880 = vector.shape_cast %879 : vector<1xf32> to vector<1x1xf32>
    %881 = vector.broadcast %880 : vector<1x1xf32> to vector<1x6xf32>
    %882 = arith.divf %878, %881 : vector<1x6xf32>
    %cst_590 = arith.constant dense<0.000000e+00> : vector<1x16xf32>
    %883 = tpu.matmul %882, %50, %cst_590 {dimension_numbers = #tpu.dot_dimension_numbers<[1], [0], [0], [1], [0, 0, 1, 1], [], []>} : vector<1x6xf32>, vector<6x16xf32>, vector<1x16xf32> -> vector<1x16xf32>
    %c0_591 = arith.constant 0 : index
    %c3_592 = arith.constant 3 : index
    %c0_593 = arith.constant 0 : index
    %c0_594 = arith.constant 0 : index
    %884 = vector.load %arg10[%c0_591, %c3_592, %c0_593, %c0_594] : memref<1x4x16x128xf32, #tpu.memory_space<vmem>>, vector<1x1x16x128xf32>
    %885 = vector.shape_cast %884 : vector<1x1x16x128xf32> to vector<16x128xf32>
    %cst_595 = arith.constant dense<0.000000e+00> : vector<1x128xf32>
    %886 = tpu.matmul %883, %885, %cst_595 {dimension_numbers = #tpu.dot_dimension_numbers<[1], [0], [0], [1], [0, 0, 1, 1], [], []>} : vector<1x16xf32>, vector<16x128xf32>, vector<1x128xf32> -> vector<1x128xf32>
    %887 = arith.addf %863, %886 : vector<1x128xf32>
    %c0_596 = arith.constant 0 : index
    %c3_597 = arith.constant 3 : index
    %c3_598 = arith.constant 3 : index
    %c0_599 = arith.constant 0 : index
    %888 = vector.load %arg16[%c0_596, %c3_597, %c3_598, %c0_599] : memref<1x4x4x128xf32, #tpu.memory_space<vmem>>, vector<1x1x1x6xf32>
    %889 = vector.shape_cast %888 : vector<1x1x1x6xf32> to vector<1x6xf32>
    %890 = vector.shape_cast %882 : vector<1x6xf32> to vector<1x1x1x6xf32>
    tpu.vector_store %arg16[%c0_596, %c3_597, %c3_598, %c0_599], %890 {strides = array<i32>} : memref<1x4x4x128xf32, #tpu.memory_space<vmem>>, vector<1x1x1x6xf32>,
    %891 = arith.addf %887, %793 : vector<1x128xf32>
    %c0_600 = arith.constant 0 : index
    %c2_601 = arith.constant 2 : index
    %c0_602 = arith.constant 0 : index
    %892 = vector.load %arg6[%c0_600, %c2_601, %c0_602] : memref<1x7x128xf32, #tpu.memory_space<vmem>>, vector<1x1x128xf32>
    %893 = vector.shape_cast %892 : vector<1x1x128xf32> to vector<1x128xf32>
    %c0_603 = arith.constant 0 : index
    %c3_604 = arith.constant 3 : index
    %c0_605 = arith.constant 0 : index
    %894 = vector.load %arg6[%c0_603, %c3_604, %c0_605] : memref<1x7x128xf32, #tpu.memory_space<vmem>>, vector<1x1x128xf32>
    %895 = vector.shape_cast %894 : vector<1x1x128xf32> to vector<1x128xf32>
    %cst_606 = arith.constant dense<0.000000e+00> : vector<1xf32>
    %896 = vector.multi_reduction <add>, %891, %cst_606 [1] : vector<1x128xf32> to vector<1xf32>
    %897 = vector.shape_cast %896 : vector<1xf32> to vector<1x1xf32>
    %cst_607 = arith.constant 0.0263157897 : f32
    %898 = vector.broadcast %cst_607 : f32 to vector<1x1xf32>
    %899 = arith.mulf %897, %898 : vector<1x1xf32>
    %900 = vector.broadcast %899 : vector<1x1xf32> to vector<1x128xf32>
    %901 = arith.subf %891, %900 : vector<1x128xf32>
    %902 = arith.mulf %901, %4 : vector<1x128xf32>
    %903 = arith.mulf %902, %902 : vector<1x128xf32>
    %cst_608 = arith.constant dense<0.000000e+00> : vector<1xf32>
    %904 = vector.multi_reduction <add>, %903, %cst_608 [1] : vector<1x128xf32> to vector<1xf32>
    %905 = vector.shape_cast %904 : vector<1xf32> to vector<1x1xf32>
    %cst_609 = arith.constant 0.0263157897 : f32
    %906 = vector.broadcast %cst_609 : f32 to vector<1x1xf32>
    %907 = arith.mulf %905, %906 : vector<1x1xf32>
    %cst_610 = arith.constant 9.99999974E-6 : f32
    %908 = vector.broadcast %cst_610 : f32 to vector<1x1xf32>
    %909 = arith.addf %907, %908 : vector<1x1xf32>
    %910 = math.rsqrt %909 : vector<1x1xf32>
    %911 = vector.broadcast %910 : vector<1x1xf32> to vector<1x128xf32>
    %912 = arith.mulf %902, %911 : vector<1x128xf32>
    %913 = arith.mulf %912, %893 : vector<1x128xf32>
    %914 = arith.addf %913, %895 : vector<1x128xf32>
    %c0_611 = arith.constant 0 : index
    %c0_612 = arith.constant 0 : index
    %c0_613 = arith.constant 0 : index
    %915 = vector.load %arg11[%c0_611, %c0_612, %c0_613] : memref<1x128x128xf32, #tpu.memory_space<vmem>>, vector<1x128x128xf32>
    %916 = vector.shape_cast %915 : vector<1x128x128xf32> to vector<128x128xf32>
    %cst_614 = arith.constant dense<0.000000e+00> : vector<1x128xf32>
    %917 = tpu.matmul %914, %916, %cst_614 {dimension_numbers = #tpu.dot_dimension_numbers<[1], [0], [0], [1], [0, 0, 1, 1], [], []>} : vector<1x128xf32>, vector<128x128xf32>, vector<1x128xf32> -> vector<1x128xf32>
    %c0_615 = arith.constant 0 : index
    %c0_616 = arith.constant 0 : index
    %c0_617 = arith.constant 0 : index
    %918 = vector.load %arg12[%c0_615, %c0_616, %c0_617] : memref<1x1x128xf32, #tpu.memory_space<vmem>>, vector<1x1x128xf32>
    %919 = vector.shape_cast %918 : vector<1x1x128xf32> to vector<1x128xf32>
    %920 = arith.addf %917, %919 : vector<1x128xf32>
    %cst_618 = arith.constant 0.000000e+00 : f32
    %921 = vector.broadcast %cst_618 : f32 to vector<1x128xf32>
    %922 = arith.maximumf %920, %921 : vector<1x128xf32>
    %c0_619 = arith.constant 0 : index
    %c0_620 = arith.constant 0 : index
    %c0_621 = arith.constant 0 : index
    %923 = vector.load %arg13[%c0_619, %c0_620, %c0_621] : memref<1x128x128xf32, #tpu.memory_space<vmem>>, vector<1x128x128xf32>
    %924 = vector.shape_cast %923 : vector<1x128x128xf32> to vector<128x128xf32>
    %cst_622 = arith.constant dense<0.000000e+00> : vector<1x128xf32>
    %925 = tpu.matmul %922, %924, %cst_622 {dimension_numbers = #tpu.dot_dimension_numbers<[1], [0], [0], [1], [0, 0, 1, 1], [], []>} : vector<1x128xf32>, vector<128x128xf32>, vector<1x128xf32> -> vector<1x128xf32>
    %c0_623 = arith.constant 0 : index
    %c6_624 = arith.constant 6 : index
    %c0_625 = arith.constant 0 : index
    %926 = vector.load %arg6[%c0_623, %c6_624, %c0_625] : memref<1x7x128xf32, #tpu.memory_space<vmem>>, vector<1x1x128xf32>
    %927 = vector.shape_cast %926 : vector<1x1x128xf32> to vector<1x128xf32>
    %928 = arith.addf %925, %927 : vector<1x128xf32>
    %929 = arith.addf %928, %914 : vector<1x128xf32>
    %c0_626 = arith.constant 0 : index
    %c4_627 = arith.constant 4 : index
    %c0_628 = arith.constant 0 : index
    %930 = vector.load %arg6[%c0_626, %c4_627, %c0_628] : memref<1x7x128xf32, #tpu.memory_space<vmem>>, vector<1x1x128xf32>
    %931 = vector.shape_cast %930 : vector<1x1x128xf32> to vector<1x128xf32>
    %c0_629 = arith.constant 0 : index
    %c5_630 = arith.constant 5 : index
    %c0_631 = arith.constant 0 : index
    %932 = vector.load %arg6[%c0_629, %c5_630, %c0_631] : memref<1x7x128xf32, #tpu.memory_space<vmem>>, vector<1x1x128xf32>
    %933 = vector.shape_cast %932 : vector<1x1x128xf32> to vector<1x128xf32>
    %cst_632 = arith.constant dense<0.000000e+00> : vector<1xf32>
    %934 = vector.multi_reduction <add>, %929, %cst_632 [1] : vector<1x128xf32> to vector<1xf32>
    %935 = vector.shape_cast %934 : vector<1xf32> to vector<1x1xf32>
    %cst_633 = arith.constant 0.0263157897 : f32
    %936 = vector.broadcast %cst_633 : f32 to vector<1x1xf32>
    %937 = arith.mulf %935, %936 : vector<1x1xf32>
    %938 = vector.broadcast %937 : vector<1x1xf32> to vector<1x128xf32>
    %939 = arith.subf %929, %938 : vector<1x128xf32>
    %940 = arith.mulf %939, %4 : vector<1x128xf32>
    %941 = arith.mulf %940, %940 : vector<1x128xf32>
    %cst_634 = arith.constant dense<0.000000e+00> : vector<1xf32>
    %942 = vector.multi_reduction <add>, %941, %cst_634 [1] : vector<1x128xf32> to vector<1xf32>
    %943 = vector.shape_cast %942 : vector<1xf32> to vector<1x1xf32>
    %cst_635 = arith.constant 0.0263157897 : f32
    %944 = vector.broadcast %cst_635 : f32 to vector<1x1xf32>
    %945 = arith.mulf %943, %944 : vector<1x1xf32>
    %cst_636 = arith.constant 9.99999974E-6 : f32
    %946 = vector.broadcast %cst_636 : f32 to vector<1x1xf32>
    %947 = arith.addf %945, %946 : vector<1x1xf32>
    %948 = math.rsqrt %947 : vector<1x1xf32>
    %949 = vector.broadcast %948 : vector<1x1xf32> to vector<1x128xf32>
    %950 = arith.mulf %940, %949 : vector<1x128xf32>
    %951 = arith.mulf %950, %931 : vector<1x128xf32>
    %952 = arith.addf %951, %933 : vector<1x128xf32>
    %c0_637 = arith.constant 0 : index
    %c0_638 = arith.constant 0 : index
    %953 = vector.load %arg14[%c0_637, %c0_638] : memref<128x128xf32, #tpu.memory_space<vmem>>, vector<128x128xf32>
    %cst_639 = arith.constant dense<0.000000e+00> : vector<1x128xf32>
    %954 = tpu.matmul %952, %953, %cst_639 {dimension_numbers = #tpu.dot_dimension_numbers<[1], [0], [0], [1], [0, 0, 1, 1], [], []>} : vector<1x128xf32>, vector<128x128xf32>, vector<1x128xf32> -> vector<1x128xf32>
    %955 = arith.addf %954, %761 : vector<1x128xf32>
    %cst_640 = arith.constant -1.000000e+30 : f32
    %956 = vector.broadcast %cst_640 : f32 to vector<1x128xf32>
    %957 = arith.select %6, %955, %956 : vector<1x128xi1>, vector<1x128xf32>
    %cst_641 = arith.constant dense<0xFF800000> : vector<1xf32>
    %958 = vector.multi_reduction <maximumf>, %957, %cst_641 [1] : vector<1x128xf32> to vector<1xf32>
    %959 = vector.shape_cast %958 : vector<1xf32> to vector<1x1xf32>
    %960 = vector.broadcast %959 : vector<1x1xf32> to vector<1x128xf32>
    %961 = arith.subf %957, %960 : vector<1x128xf32>
    %962 = math.exp %961 : vector<1x128xf32>
    %cst_642 = arith.constant 0.000000e+00 : f32
    %963 = vector.broadcast %cst_642 : f32 to vector<1x128xf32>
    %964 = arith.select %6, %962, %963 : vector<1x128xi1>, vector<1x128xf32>
    %cst_643 = arith.constant dense<0.000000e+00> : vector<1xf32>
    %965 = vector.multi_reduction <add>, %964, %cst_643 [1] : vector<1x128xf32> to vector<1xf32>
    %966 = vector.shape_cast %965 : vector<1xf32> to vector<1x1xf32>
    %967 = vector.broadcast %966 : vector<1x1xf32> to vector<1x128xf32>
    %968 = arith.divf %964, %967 : vector<1x128xf32>
    %cst_644 = arith.constant 0.000000e+00 : f32
    %969 = vector.broadcast %cst_644 : f32 to vector<1x128xf32>
    %970 = arith.select %6, %968, %969 : vector<1x128xi1>, vector<1x128xf32>
    %cst_645 = arith.constant -1.000000e+30 : f32
    %971 = vector.broadcast %cst_645 : f32 to vector<1x128xf32>
    %972 = arith.select %11, %955, %971 : vector<1x128xi1>, vector<1x128xf32>
    %cst_646 = arith.constant dense<0xFF800000> : vector<1xf32>
    %973 = vector.multi_reduction <maximumf>, %972, %cst_646 [1] : vector<1x128xf32> to vector<1xf32>
    %974 = vector.shape_cast %973 : vector<1xf32> to vector<1x1xf32>
    %975 = vector.broadcast %974 : vector<1x1xf32> to vector<1x128xf32>
    %976 = arith.subf %972, %975 : vector<1x128xf32>
    %977 = math.exp %976 : vector<1x128xf32>
    %cst_647 = arith.constant 0.000000e+00 : f32
    %978 = vector.broadcast %cst_647 : f32 to vector<1x128xf32>
    %979 = arith.select %11, %977, %978 : vector<1x128xi1>, vector<1x128xf32>
    %cst_648 = arith.constant dense<0.000000e+00> : vector<1xf32>
    %980 = vector.multi_reduction <add>, %979, %cst_648 [1] : vector<1x128xf32> to vector<1xf32>
    %981 = vector.shape_cast %980 : vector<1xf32> to vector<1x1xf32>
    %982 = vector.broadcast %981 : vector<1x1xf32> to vector<1x128xf32>
    %983 = arith.divf %979, %982 : vector<1x128xf32>
    %cst_649 = arith.constant 0.000000e+00 : f32
    %984 = vector.broadcast %cst_649 : f32 to vector<1x128xf32>
    %985 = arith.select %11, %983, %984 : vector<1x128xi1>, vector<1x128xf32>
    %986 = arith.addf %970, %985 : vector<1x128xf32>
    %cst_650 = arith.constant 0.000000e+00 : f32
    %987 = vector.broadcast %cst_650 : f32 to vector<1x128xf32>
    %988 = arith.subf %987, %955 : vector<1x128xf32>
    %989 = math.exp %988 : vector<1x128xf32>
    %cst_651 = arith.constant 1.000000e+00 : f32
    %990 = vector.broadcast %cst_651 : f32 to vector<1x128xf32>
    %991 = arith.addf %990, %989 : vector<1x128xf32>
    %cst_652 = arith.constant 1.000000e+00 : f32
    %992 = vector.broadcast %cst_652 : f32 to vector<1x128xf32>
    %993 = arith.divf %992, %991 : vector<1x128xf32>
    %cst_653 = arith.constant 0.000000e+00 : f32
    %994 = vector.broadcast %cst_653 : f32 to vector<1x128xf32>
    %995 = arith.select %16, %993, %994 : vector<1x128xi1>, vector<1x128xf32>
    %996 = arith.addf %986, %995 : vector<1x128xf32>
    %c0_654 = arith.constant 0 : index
    %c4_655 = arith.constant 4 : index
    %c0_656 = arith.constant 0 : index
    %997 = vector.load %arg15[%c0_654, %c4_655, %c0_656] : memref<1x5x128xf32, #tpu.memory_space<vmem>>, vector<1x1x128xf32>
    %998 = vector.shape_cast %997 : vector<1x1x128xf32> to vector<1x128xf32>
    %999 = vector.shape_cast %996 : vector<1x128xf32> to vector<1x1x128xf32>
    tpu.vector_store %arg15[%c0_654, %c4_655, %c0_656], %999 {strides = array<i32>} : memref<1x5x128xf32, #tpu.memory_space<vmem>>, vector<1x1x128xf32>,
    return
  }
  func.func @transform_0(%arg0: i32, %arg1: memref<2xi32, #tpu.memory_space<smem>>) -> (i32, i32, i32) {
    %c0_i32 = arith.constant 0 : i32
    %c0_i32_0 = arith.constant 0 : i32
    %c0_i32_1 = arith.constant 0 : i32
    return %arg0, %c0_i32, %c0_i32_0 : i32, i32, i32
  }
  func.func @transform_1(%arg0: i32, %arg1: memref<2xi32, #tpu.memory_space<smem>>) -> (i32, i32) {
    %c0_i32 = arith.constant 0 : i32
    %c0_i32_0 = arith.constant 0 : i32
    %c0_i32_1 = arith.constant 0 : i32
    return %c0_i32, %c0_i32_0 : i32, i32
  }
  func.func @transform_2(%arg0: i32, %arg1: memref<2xi32, #tpu.memory_space<smem>>) -> (i32, i32, i32) {
    %c0_i32 = arith.constant 0 : i32
    %c0_i32_0 = arith.constant 0 : i32
    %c0_i32_1 = arith.constant 0 : i32
    return %arg0, %c0_i32, %c0_i32_0 : i32, i32, i32
  }
  func.func @transform_3(%arg0: i32, %arg1: memref<2xi32, #tpu.memory_space<smem>>) -> (i32, i32, i32) {
    %c0_i32 = arith.constant 0 : i32
    %c0_i32_0 = arith.constant 0 : i32
    %c0_i32_1 = arith.constant 0 : i32
    %c0_i32_2 = arith.constant 0 : i32
    return %c0_i32, %c0_i32_0, %c0_i32_1 : i32, i32, i32
  }
  func.func @transform_4(%arg0: i32, %arg1: memref<2xi32, #tpu.memory_space<smem>>) -> (i32, i32, i32) {
    %c0_i32 = arith.constant 0 : i32
    %c0_i32_0 = arith.constant 0 : i32
    %c0_i32_1 = arith.constant 0 : i32
    %c0_i32_2 = arith.constant 0 : i32
    return %c0_i32, %c0_i32_0, %c0_i32_1 : i32, i32, i32
  }
  func.func @transform_5(%arg0: i32, %arg1: memref<2xi32, #tpu.memory_space<smem>>) -> (i32, i32, i32, i32) {
    %c0_i32 = arith.constant 0 : i32
    %c0_i32_0 = arith.constant 0 : i32
    %c0_i32_1 = arith.constant 0 : i32
    %c0_i32_2 = arith.constant 0 : i32
    %c0_i32_3 = arith.constant 0 : i32
    return %c0_i32, %c0_i32_0, %c0_i32_1, %c0_i32_2 : i32, i32, i32, i32
  }
  func.func @transform_6(%arg0: i32, %arg1: memref<2xi32, #tpu.memory_space<smem>>) -> (i32, i32, i32, i32) {
    %c0_i32 = arith.constant 0 : i32
    %c0_i32_0 = arith.constant 0 : i32
    %c0_i32_1 = arith.constant 0 : i32
    %c0_i32_2 = arith.constant 0 : i32
    %c0_i32_3 = arith.constant 0 : i32
    return %c0_i32, %c0_i32_0, %c0_i32_1, %c0_i32_2 : i32, i32, i32, i32
  }
  func.func @transform_7(%arg0: i32, %arg1: memref<2xi32, #tpu.memory_space<smem>>) -> (i32, i32, i32, i32) {
    %c0_i32 = arith.constant 0 : i32
    %c0_i32_0 = arith.constant 0 : i32
    %c0_i32_1 = arith.constant 0 : i32
    %c0_i32_2 = arith.constant 0 : i32
    %c0_i32_3 = arith.constant 0 : i32
    return %c0_i32, %c0_i32_0, %c0_i32_1, %c0_i32_2 : i32, i32, i32, i32
  }
  func.func @transform_8(%arg0: i32, %arg1: memref<2xi32, #tpu.memory_space<smem>>) -> (i32, i32, i32, i32) {
    %c0_i32 = arith.constant 0 : i32
    %c0_i32_0 = arith.constant 0 : i32
    %c0_i32_1 = arith.constant 0 : i32
    %c0_i32_2 = arith.constant 0 : i32
    %c0_i32_3 = arith.constant 0 : i32
    return %c0_i32, %c0_i32_0, %c0_i32_1, %c0_i32_2 : i32, i32, i32, i32
  }
  func.func @transform_9(%arg0: i32, %arg1: memref<2xi32, #tpu.memory_space<smem>>) -> (i32, i32, i32) {
    %c0_i32 = arith.constant 0 : i32
    %c0_i32_0 = arith.constant 0 : i32
    %c0_i32_1 = arith.constant 0 : i32
    %c0_i32_2 = arith.constant 0 : i32
    return %c0_i32, %c0_i32_0, %c0_i32_1 : i32, i32, i32
  }
  func.func @transform_10(%arg0: i32, %arg1: memref<2xi32, #tpu.memory_space<smem>>) -> (i32, i32, i32) {
    %c0_i32 = arith.constant 0 : i32
    %c0_i32_0 = arith.constant 0 : i32
    %c0_i32_1 = arith.constant 0 : i32
    %c0_i32_2 = arith.constant 0 : i32
    return %c0_i32, %c0_i32_0, %c0_i32_1 : i32, i32, i32
  }
  func.func @transform_11(%arg0: i32, %arg1: memref<2xi32, #tpu.memory_space<smem>>) -> (i32, i32, i32) {
    %c0_i32 = arith.constant 0 : i32
    %c0_i32_0 = arith.constant 0 : i32
    %c0_i32_1 = arith.constant 0 : i32
    %c0_i32_2 = arith.constant 0 : i32
    return %c0_i32, %c0_i32_0, %c0_i32_1 : i32, i32, i32
  }
  func.func @transform_12(%arg0: i32, %arg1: memref<2xi32, #tpu.memory_space<smem>>) -> (i32, i32) {
    %c0_i32 = arith.constant 0 : i32
    %c0_i32_0 = arith.constant 0 : i32
    %c0_i32_1 = arith.constant 0 : i32
    return %c0_i32, %c0_i32_0 : i32, i32
  }
  func.func @transform_13(%arg0: i32, %arg1: memref<2xi32, #tpu.memory_space<smem>>) -> (i32, i32, i32) {
    %c0_i32 = arith.constant 0 : i32
    %c0_i32_0 = arith.constant 0 : i32
    %c0_i32_1 = arith.constant 0 : i32
    return %arg0, %c0_i32, %c0_i32_0 : i32, i32, i32
  }
  func.func @transform_14(%arg0: i32, %arg1: memref<2xi32, #tpu.memory_space<smem>>) -> (i32, i32, i32, i32) {
    %c0_i32 = arith.constant 0 : i32
    %c0_i32_0 = arith.constant 0 : i32
    %c0_i32_1 = arith.constant 0 : i32
    %c0_i32_2 = arith.constant 0 : i32
    return %arg0, %c0_i32, %c0_i32_0, %c0_i32_1 : i32, i32, i32, i32
  }
}

</mosaic_0001>

<bundles_post_ra>
// kernel: transformer_forward.2
= control target key start
LH: loop header
LB: loop body
LE: loop exit
PB: predicated region body
PF: predicated region fallthrough
CT: control target
= control target key end

     0   :  { %s5135_s0 = inlined_call_operand.vmem [shape: s32[2], index: 0, kind: input, shape index: {}]   ;;  %s5136_s1 = inlined_call_operand.vmem [shape: f32[2,6,128], index: 1, kind: input, shape index: {}]   ;;  %s5137_s2 = inlined_call_operand.vmem [shape: f32[1,4,128,16], index: 2, kind: input, shape index: {}]   ;;  %s5138_s3 = inlined_call_operand.vmem [shape: f32[1,4,128,16], index: 3, kind: input, shape index: {}]   ;;  %s5139_s4 = inlined_call_operand.vmem [shape: f32[1,4,128,16], index: 4, kind: input, shape index: {}]   ;;  %s5140_s5 = inlined_call_operand.vmem [shape: f32[1,4,16,128], index: 5, kind: input, shape index: {}]   ;;  %s5141_s6 = inlined_call_operand.vmem [shape: f32[1,5,128], index: 6, kind: input, shape index: {}]   ;;  %s5142_s7 = inlined_call_operand.vmem [shape: f32[1,128,128], index: 7, kind: input, shape index: {}]   ;;  %s5143_s8 = inlined_call_operand.vmem [shape: f32[1,1,128], index: 8, kind: input, shape index: {}]   ;;  %s5144_s9 = inlined_call_operand.vmem [shape: f32[1,128,128], index: 9, kind: input, shape index: {}]   ;;  %s5145_s10 = inlined_call_operand.vmem [shape: f32[2,6,128], index: 10, kind: output, shape index: {}]  }
   0x1   :  { %s15_s15 = sshll.u32 %s5135_s0, 4  ;;  %s16_s15 = int_to_ptr.vmem [resolvable:$true] %s15_s15 }
   0x2   :  { %s4046_s16 = scalar_lea.vmem %s16_s15, 16  ;;  %p4051_p1 = scmp.lt.s32.totalorder %s16_s15, %s16_s15 }
   0x3   :  { %p4047_p0 = scmp.ne.s32.totalorder %s16_s15, %s4046_s16  ;;  %p4052_p2 = scmp.lt.s32.totalorder %s4046_s16, %s4046_s16 }
   0x5   :  { %p4053_p3 = por %p4052_p2, %p4051_p1 }
   0x7   :  { %p4054_p4 = pnand %p4053_p3, %p4047_p0 }
   0x9   :  { %4057 = shalt.err (!%p4054_p4)  }
   0xa   :  { %s4068_s17 = smov [#allocation3]  }
   0xb   :  { %18 = dma.vmem_to_smem %s16_s15, 16, %s4068_s17, [#allocation2] }
   0xc   :  { %4062 = dma.done.wait [#allocation2], 16 }
   0xd   :  { %4063 = vsyncadd [#allocation2], 4294967280 }
   0xe   :  { %20 = sfence }
   0xf   :  { %s4131_s18 = smov 0  }
  0x10 LB: > { %s4137_s0 = sadd.s32 4294967295, %s4066_s18   ;;  %p2657_p5 = scmp.ge.s32.totalorder %s4066_s18, 1  ;;  %s4066_s18 = sphi %s4131_s18, %s26_s18  }
  0x11   : > { %p293_p6 = scmp.lt.s32.totalorder %s4066_s18, 3 }
  0x13   : > { %p294_p7 = pnand %p2657_p5, %p293_p6 }
  0x14   : > { %v434_v0 = vld [vmem:[%s5138_s3] sm:$0xff] (!%p294_p7)  ;;  %v435_v1 = vld [vmem:[%s5138_s3 + $0x8] sm:$0xff] (!%p294_p7)  ;;  %v4069_v3 = vmov (!%p294_p7), 0.0|0.0   ;;  %v436_v6 = vld [vmem:[%s5138_s3 + $0x10] sm:$0xff] (!%p294_p7)  ;;  %vm4070_vm0 = vmmov (!%p294_p7), 0   ;;  %v4071_v11 = vmov (!%p294_p7), 0.0  }
  0x15   : > { %297 = sbr.rel (%p294_p7) target bundleno = 5038 (0x13ae), region = 56  ;;  %v348_v2 = vld [vmem:[%s5137_s2] sm:$0xff] (!%p294_p7)  ;;  %3688 = vmatprep.subr.bf16.mxu1 (!%p294_p7), %v4069_v3  ;;  %v3689_v4 = vpack.c.bf16 (!%p294_p7), %v435_v1, %v434_v0  ;;  %3664 = vmatprep.subr.bf16.mxu0 (!%p294_p7), %v4069_v3  ;;  %v349_v5 = vld [vmem:[%s5137_s2 + $0x8] sm:$0xff] (!%p294_p7)  ;;  %v437_v7 = vld [vmem:[%s5138_s3 + $0x18] sm:$0xff] (!%p294_p7)  ;;  %p327_p8 = scmp.lt.s32.totalorder (!%p294_p7), %s4137_s0, 1  ;;  %vm606_vm1 = vcmask (!%p294_p7), 130048  }
  0x16   : > { %v3665_v8 = vpack.c.bf16 (!%p294_p7), %v349_v5, %v348_v2  ;;  %v350_v9 = vld [vmem:[%s5137_s2 + $0x10] sm:$0xff] (!%p294_p7)  ;;  %v351_v10 = vld [vmem:[%s5137_s2 + $0x18] sm:$0xff] (!%p294_p7)  ;;  %3173 = vmatprep.mubr.msk.f32.mxu1 (!%p294_p7), %vm4070_vm0, %v4071_v11  ;;  %3138 = vmatprep.mubr.msk.f32.mxu0 (!%p294_p7), %vm4070_vm0, %v4071_v11  ;;  %v3692_v12 = vpack.c.bf16 (!%p294_p7), %v437_v7, %v436_v6  ;;  %v438_v14 = vld [vmem:[%s5138_s3 + $0x20] sm:$0xff] (!%p294_p7)  ;;  %s343_s11 = sld [smem:[#allocation3 + %s4137_s0]] (!%p294_p7)  ;;  %vm685_vm3 = vcmask (!%p294_p7), 46080   ;;  %vm701_vm4 = vcmask (!%p294_p7), 1045504  }
  0x17   : > { %3690 = vmatpush3.bf16.msra.mxu1 (!%p294_p7), %v3689_v4  ;;  %v3668_v13 = vpack.c.bf16 (!%p294_p7), %v351_v10, %v350_v9  ;;  %v439_v15 = vld [vmem:[%s5138_s3 + $0x28] sm:$0xff] (!%p294_p7)  ;;  %v352_v16 = vld [vmem:[%s5137_s2 + $0x20] sm:$0xff] (!%p294_p7)  ;;  %v440_v20 = vld [vmem:[%s5138_s3 + $0x30] sm:$0xff] (!%p294_p7)  ;;  %vm697_vm5 = vcmask (!%p294_p7), 48128  }
  0x18   : > { %3666 = vmatpush3.bf16.msra.mxu0 (!%p294_p7), %v3665_v8  ;;  %3691 = vmatprep.subr.bf16.mxu1 (!%p294_p7), %v4069_v3  ;;  %v353_v17 = vld [vmem:[%s5137_s2 + $0x28] sm:$0xff] (!%p294_p7)  ;;  %v3695_v18 = vpack.c.bf16 (!%p294_p7), %v439_v15, %v438_v14  ;;  %v441_v21 = vld [vmem:[%s5138_s3 + $0x38] sm:$0xff] (!%p294_p7)  ;;  %v354_v22 = vld [vmem:[%s5137_s2 + $0x30] sm:$0xff] (!%p294_p7) }
  0x19   : > { %3667 = vmatprep.subr.bf16.mxu0 (!%p294_p7), %v4069_v3  ;;  %v3671_v19 = vpack.c.bf16 (!%p294_p7), %v353_v17, %v352_v16  ;;  %v355_v23 = vld [vmem:[%s5137_s2 + $0x38] sm:$0xff] (!%p294_p7)  ;;  %v3698_v24 = vpack.c.bf16 (!%p294_p7), %v441_v21, %v440_v20  ;;  %v442_v26 = vld [vmem:[%s5138_s3 + $0x40] sm:$0xff] (!%p294_p7)  ;;  %v443_v27 = vld [vmem:[%s5138_s3 + $0x48] sm:$0xff] (!%p294_p7)  ;;  %v335_v17 = vlaneseq (!%p294_p7)  ;;  %v4072_v21 = vmov (!%p294_p7), -1e+09  }
  0x1a   : > { %v3674_v25 = vpack.c.bf16 (!%p294_p7), %v355_v23, %v354_v22  ;;  %v356_v28 = vld [vmem:[%s5137_s2 + $0x40] sm:$0xff] (!%p294_p7)  ;;  %v357_v29 = vld [vmem:[%s5137_s2 + $0x48] sm:$0xff] (!%p294_p7)  ;;  %v3701_v30 = vpack.c.bf16 (!%p294_p7), %v443_v27, %v442_v26  ;;  %v444_v32 = vld [vmem:[%s5138_s3 + $0x50] sm:$0xff] (!%p294_p7) }
  0x1b   : > { %3693 = vmatpush3.bf16.msra.mxu1 (!%p294_p7), %v3692_v12  ;;  %v3677_v31 = vpack.c.bf16 (!%p294_p7), %v357_v29, %v356_v28  ;;  %v445_v33 = vld [vmem:[%s5138_s3 + $0x58] sm:$0xff] (!%p294_p7)  ;;  %v358_v34 = vld [vmem:[%s5137_s2 + $0x50] sm:$0xff] (!%p294_p7)  ;;  %v446_v38 = vld [vmem:[%s5138_s3 + $0x60] sm:$0xff] (!%p294_p7) }
  0x1c   : > { %3669 = vmatpush3.bf16.msra.mxu0 %v3668_v13  ;;  %3694 = vmatprep.subr.bf16.mxu1 %v4069_v3  ;;  %v359_v35 = vld [vmem:[%s5137_s2 + $0x58] sm:$0xff]  ;;  %v3704_v36 = vpack.c.bf16 %v445_v33, %v444_v32  ;;  %v447_v39 = vld [vmem:[%s5138_s3 + $0x68] sm:$0xff]  ;;  %v360_v40 = vld [vmem:[%s5137_s2 + $0x60] sm:$0xff]  ;;  %s4243_s17 = scalar_select %p327_p8, %s4137_s0, 1 }
  0x1d   : > { %3670 = vmatprep.subr.bf16.mxu0 %v4069_v3  ;;  %v3680_v37 = vpack.c.bf16 %v359_v35, %v358_v34  ;;  %v361_v41 = vld [vmem:[%s5137_s2 + $0x68] sm:$0xff]  ;;  %v3707_v42 = vpack.c.bf16 %v447_v39, %v446_v38  ;;  %v448_v44 = vld [vmem:[%s5138_s3 + $0x70] sm:$0xff]  ;;  %v449_v45 = vld [vmem:[%s5138_s3 + $0x78] sm:$0xff] }
  0x1e   : > { %v3683_v43 = vpack.c.bf16 %v361_v41, %v360_v40  ;;  %v362_v46 = vld [vmem:[%s5137_s2 + $0x70] sm:$0xff]  ;;  %v363_v47 = vld [vmem:[%s5137_s2 + $0x78] sm:$0xff]  ;;  %s2658_s27 = sshll.u32 %s4243_s17, 3  ;;  %v3710_v48 = vpack.c.bf16 %v449_v45, %v448_v44  ;;  %v520_v55 = vld [vmem:[%s5139_s4] sm:$0xff] }
  0x1f   : > { %3696 = vmatpush3.bf16.msra.mxu1 %v3695_v18  ;;  %v3686_v49 = vpack.c.bf16 %v363_v47, %v362_v46  ;;  %s4266_s30 = scalar_lea.vmem %s5136_s1, %s2658_s27  ;;  %v521_v56 = vld [vmem:[%s5139_s4 + $0x8] sm:$0xff]  ;;  %v522_v57 = vld [vmem:[%s5139_s4 + $0x10] sm:$0xff]  ;;  %v523_v59 = vld [vmem:[%s5139_s4 + $0x18] sm:$0xff]  ;;  %v4345_v18 = vand.u32 127, %v335_v17  ;;  %s334_s12 = scalar_lea.vmem %s5145_s10, %s2658_s27 }
  0x20   : > { %3672 = vmatpush3.bf16.msra.mxu0 %v3671_v19  ;;  %3697 = vmatprep.subr.bf16.mxu1 %v4069_v3  ;;  %v4270_v50 = vld [vmem:[%s4266_s30] sm:$0x3f]  ;;  %v3713_v58 = vpack.c.bf16 %v521_v56, %v520_v55  ;;  %v3716_v60 = vpack.c.bf16 %v523_v59, %v522_v57  ;;  %v525_v62 = vld [vmem:[%s5139_s4 + $0x28] sm:$0xff]  ;;  %v526_v0 = vld [vmem:[%s5139_s4 + $0x30] sm:$0xff]  ;;  %v344_v19 = vstv %s343_s11 }
  0x21   : > { %3673 = vmatprep.subr.bf16.mxu0 %v4069_v3  ;;  %v524_v61 = vld [vmem:[%s5139_s4 + $0x20] sm:$0xff]  ;;  %v527_v1 = vld [vmem:[%s5139_s4 + $0x38] sm:$0xff]  ;;  %v529_v5 = vld [vmem:[%s5139_s4 + $0x48] sm:$0xff]  ;;  %vm345_vm2 = vcmp.lt.s32.totalorder %v4345_v18, %v344_v19  ;;  %vm337_vm6 = vcmp.lt.s32.totalorder %v4345_v18, 102  ;;  %vm340_vm7 = vcmp.lt.s32.totalorder %v4345_v18, 51 }
  0x22   : > { %v3719_v63 = vpack.c.bf16 %v525_v62, %v524_v61  ;;  %v3722_v2 = vpack.c.bf16 %v527_v1, %v526_v0  ;;  %v528_v4 = vld [vmem:[%s5139_s4 + $0x40] sm:$0xff]  ;;  %v530_v7 = vld [vmem:[%s5139_s4 + $0x50] sm:$0xff]  ;;  %v531_v8 = vld [vmem:[%s5139_s4 + $0x58] sm:$0xff]  ;;  %v4348_v22 = vsel %vm345_vm2, 0.0, %v4072_v21 }
  0x23   : > { %3699 = vmatpush3.bf16.msra.mxu1 %v3698_v24  ;;  %v3725_v6 = vpack.c.bf16 %v529_v5, %v528_v4  ;;  %v3728_v9 = vpack.c.bf16 %v531_v8, %v530_v7  ;;  %v532_v10 = vld [vmem:[%s5139_s4 + $0x60] sm:$0xff]  ;;  %v533_v12 = vld [vmem:[%s5139_s4 + $0x68] sm:$0xff]  ;;  %v534_v14 = vld [vmem:[%s5139_s4 + $0x70] sm:$0xff] }
  0x24   : > { %3675 = vmatpush3.bf16.msra.mxu0 %v3674_v25  ;;  %3700 = vmatprep.subr.bf16.mxu1 %v4069_v3  ;;  %v3731_v13 = vpack.c.bf16 %v533_v12, %v532_v10  ;;  %v535_v15 = vld [vmem:[%s5139_s4 + $0x78] sm:$0xff]  ;;  %v2682_v32 = vld [vmem:[%s5138_s3 + $0x80] sm:$0xff]  ;;  %v2683_v33 = vld [vmem:[%s5138_s3 + $0x88] sm:$0xff] }
  0x25   : > { %3676 = vmatprep.subr.bf16.mxu0 %v4069_v3  ;;  %v3734_v16 = vpack.c.bf16 %v535_v15, %v534_v14  ;;  %v3761_v34 = vpack.c.bf16 %v2683_v33, %v2682_v32  ;;  %v2685_v38 = vld [vmem:[%s5138_s3 + $0x98] sm:$0xff]  ;;  %v2686_v40 = vld [vmem:[%s5138_s3 + $0xa0] sm:$0xff]  ;;  %v2687_v41 = vld [vmem:[%s5138_s3 + $0xa8] sm:$0xff] }
  0x26   : > { %v2689_v44 = vld [vmem:[%s5138_s3 + $0xb8] sm:$0xff]  ;;  %v2690_v46 = vld [vmem:[%s5138_s3 + $0xc0] sm:$0xff]  ;;  %v2691_v47 = vld [vmem:[%s5138_s3 + $0xc8] sm:$0xff] }
  0x27   : > { %3702 = vmatpush3.bf16.msra.mxu1 %v3701_v30  ;;  %v2696_v56 = vld [vmem:[%s5138_s3 + $0xf0] sm:$0xff]  ;;  %v2697_v57 = vld [vmem:[%s5138_s3 + $0xf8] sm:$0xff]  ;;  %v2667_v61 = vld [vmem:[%s5137_s2 + $0x88] sm:$0xff] }
  0x28   : > { %3678 = vmatpush3.bf16.msra.mxu0 %v3677_v31  ;;  %3703 = vmatprep.subr.bf16.mxu1 %v4069_v3  ;;  %v2668_v1 = vld [vmem:[%s5137_s2 + $0x90] sm:$0xff]  ;;  %v2670_v5 = vld [vmem:[%s5137_s2 + $0xa0] sm:$0xff]  ;;  %v2703_v33 = vld [vmem:[%s5139_s4 + $0xa8] sm:$0xff] }
  0x29   : > { %3679 = vmatprep.subr.bf16.mxu0 %v4069_v3  ;;  %v2672_v8 = vld [vmem:[%s5137_s2 + $0xb0] sm:$0xff]  ;;  %v2674_v12 = vld [vmem:[%s5137_s2 + $0xc0] sm:$0xff] }
  0x2a   : > { %v2676_v15 = vld [vmem:[%s5137_s2 + $0xd0] sm:$0xff]  ;;  %v2678_v19 = vld [vmem:[%s5137_s2 + $0xe0] sm:$0xff] }
  0x2b   : > { %3705 = vmatpush3.bf16.msra.mxu1 %v3704_v36  ;;  %v2702_v32 = vld [vmem:[%s5139_s4 + $0xa0] sm:$0xff] }
  0x2c   : > { %3681 = vmatpush3.bf16.msra.mxu0 %v3680_v37  ;;  %3706 = vmatprep.subr.bf16.mxu1 %v4069_v3  ;;  %v2684_v37 = vld [vmem:[%s5138_s3 + $0x90] sm:$0xff] }
  0x2d   : > { %3682 = vmatprep.subr.bf16.mxu0 %v4069_v3  ;;  %v3764_v39 = vpack.c.bf16 %v2685_v38, %v2684_v37  ;;  %v2706_v38 = vld [vmem:[%s5139_s4 + $0xc0] sm:$0xff] }
  0x2f   : > { %3708 = vmatpush3.bf16.msra.mxu1 %v3707_v42  ;;  %v3767_v42 = vpack.c.bf16 %v2687_v41, %v2686_v40  ;;  %v2708_v41 = vld [vmem:[%s5139_s4 + $0xd0] sm:$0xff] }
  0x30   : > { %3684 = vmatpush3.bf16.msra.mxu0 %v3683_v43  ;;  %3709 = vmatprep.subr.bf16.mxu1 %v4069_v3  ;;  %v2688_v43 = vld [vmem:[%s5138_s3 + $0xb0] sm:$0xff] }
  0x31   : > { %3685 = vmatprep.subr.bf16.mxu0 %v4069_v3  ;;  %v3770_v45 = vpack.c.bf16 %v2689_v44, %v2688_v43  ;;  %v2710_v44 = vld [vmem:[%s5139_s4 + $0xe0] sm:$0xff] }
  0x33   : > { %3711 = vmatpush3.bf16.msra.mxu1 %v3710_v48  ;;  %v3773_v48 = vpack.c.bf16 %v2691_v47, %v2690_v46  ;;  %v2712_v47 = vld [vmem:[%s5139_s4 + $0xf0] sm:$0xff] }
  0x34   : > { %3687 = vmatpush3.bf16.msra.mxu0 %v3686_v49  ;;  %3211 = vmatprep.subr.mxu1 %v4071_v11  ;;  %v2692_v49 = vld [vmem:[%s5138_s3 + $0xd0] sm:$0xff] }
  0x35   : > { %3712 = vmatprep.subr.bf16.mxu0 %v4069_v3 }
  0x36   : > { %3174 = vmatmul.mubr.f32.vlgmr.msra.gmra.mrb[0].mxu1 %v4270_v50 }
  0x37   : > { %3139 = vmatmul.mubr.f32.vlgmr.msra.gmra.mrb[0].mxu0 %v4270_v50  ;;  %3213 = vmatprep.mubr.msk.f32.mxu1 %vm4070_vm0, %v4071_v11 }
  0x38   : > { %3208 = vmatprep.mubr.msk.f32.mxu0 %vm4070_vm0, %v4071_v11  ;;  %3714 = vmatpush3.bf16.msra.mxu0 %v3713_v58  ;;  %v3782_v58 = vpack.c.bf16 %v2697_v57, %v2696_v56 }
  0x39   : > { %3715 = vmatprep.subr.bf16.mxu0 %v4069_v3 }
  0x3c   : > { %3717 = vmatpush3.bf16.msra.mxu0 %v3716_v60  ;;  %v2666_v60 = vld [vmem:[%s5137_s2 + $0x80] sm:$0xff] }
  0x3d   : > { %3718 = vmatprep.subr.bf16.mxu0 %v4069_v3 }
  0x40   : > { %3720 = vmatpush3.bf16.msra.mxu0 %v3719_v63  ;;  %v3737_v63 = vpack.c.bf16 %v2667_v61, %v2666_v60 }
  0x41   : > { %3721 = vmatprep.subr.bf16.mxu0 %v4069_v3 }
  0x44   : > { %3723 = vmatpush3.bf16.msra.mxu0 %v3722_v2  ;;  %v2669_v2 = vld [vmem:[%s5137_s2 + $0x98] sm:$0xff] }
  0x45   : > { %3724 = vmatprep.subr.bf16.mxu0 %v4069_v3  ;;  %v3740_v4 = vpack.c.bf16 %v2669_v2, %v2668_v1 }
  0x48   : > { %3726 = vmatpush3.bf16.msra.mxu0 %v3725_v6  ;;  %v2671_v6 = vld [vmem:[%s5137_s2 + $0xa8] sm:$0xff] }
  0x49   : > { %3727 = vmatprep.subr.bf16.mxu0 %v4069_v3  ;;  %v3743_v7 = vpack.c.bf16 %v2671_v6, %v2670_v5 }
  0x4c   : > { %3729 = vmatpush3.bf16.msra.mxu0 %v3728_v9  ;;  %v2673_v9 = vld [vmem:[%s5137_s2 + $0xb8] sm:$0xff] }
  0x4d   : > { %3730 = vmatprep.subr.bf16.mxu0 %v4069_v3  ;;  %v3746_v10 = vpack.c.bf16 %v2673_v9, %v2672_v8 }
  0x50   : > { %3732 = vmatpush3.bf16.msra.mxu0 %v3731_v13  ;;  %v2675_v13 = vld [vmem:[%s5137_s2 + $0xc8] sm:$0xff] }
  0x51   : > { %3733 = vmatprep.subr.bf16.mxu0 %v4069_v3  ;;  %v3749_v14 = vpack.c.bf16 %v2675_v13, %v2674_v12  ;;  %v2738_v12 = vld [vmem:[%s5138_s3 + $0x100] sm:$0xff]  ;;  %v2739_v13 = vld [vmem:[%s5138_s3 + $0x108] sm:$0xff] }
  0x54   : > { %3735 = vmatpush3.bf16.msra.mxu0 %v3734_v16  ;;  %v2677_v16 = vld [vmem:[%s5137_s2 + $0xd8] sm:$0xff] }
  0x55   : > { %3760 = vmatprep.subr.bf16.mxu0 %v4069_v3  ;;  %v3752_v17 = vpack.c.bf16 %v2677_v16, %v2676_v15  ;;  %v2718_v16 = vld [vmem:[%s5140_s5 + $0x10] sm:$0xff] }
  0x57   : > { %3209 = vmatmul.mubr.f32.vlgmr.msra.gmra.mrb[2].mxu0 %v4270_v50 }
  0x58   : > { %3288 = vmatprep.mubr.msk.f32.mxu0 %vm4070_vm0, %v4071_v11  ;;  %3762 = vmatpush3.bf16.msra.mxu0 %v3761_v34  ;;  %v3791_v34 = vpack.c.bf16 %v2703_v33, %v2702_v32  ;;  %v2746_v32 = vld [vmem:[%s5138_s3 + $0x140] sm:$0xff]  ;;  %v2747_v33 = vld [vmem:[%s5138_s3 + $0x148] sm:$0xff] }
  0x59   : > { %3763 = vmatprep.subr.bf16.mxu0 %v4069_v3 }
  0x5c   : > { %3765 = vmatpush3.bf16.msra.mxu0 %v3764_v39  ;;  %v2707_v39 = vld [vmem:[%s5139_s4 + $0xc8] sm:$0xff] }
  0x5d   : > { %3766 = vmatprep.subr.bf16.mxu0 %v4069_v3  ;;  %v3797_v40 = vpack.c.bf16 %v2707_v39, %v2706_v38  ;;  %v2750_v38 = vld [vmem:[%s5138_s3 + $0x160] sm:$0xff]  ;;  %v2751_v39 = vld [vmem:[%s5138_s3 + $0x168] sm:$0xff] }
  0x60   : > { %3768 = vmatpush3.bf16.msra.mxu0 %v3767_v42  ;;  %v2709_v42 = vld [vmem:[%s5139_s4 + $0xd8] sm:$0xff] }
  0x61   : > { %3769 = vmatprep.subr.bf16.mxu0 %v4069_v3  ;;  %v3800_v43 = vpack.c.bf16 %v2709_v42, %v2708_v41  ;;  %v2752_v41 = vld [vmem:[%s5138_s3 + $0x170] sm:$0xff]  ;;  %v2753_v42 = vld [vmem:[%s5138_s3 + $0x178] sm:$0xff] }
  0x64   : > { %3771 = vmatpush3.bf16.msra.mxu0 %v3770_v45  ;;  %v2711_v45 = vld [vmem:[%s5139_s4 + $0xe8] sm:$0xff] }
  0x65   : > { %3772 = vmatprep.subr.bf16.mxu0 %v4069_v3  ;;  %v3803_v46 = vpack.c.bf16 %v2711_v45, %v2710_v44  ;;  %v2722_v44 = vld [vmem:[%s5137_s2 + $0x100] sm:$0xff]  ;;  %v2723_v45 = vld [vmem:[%s5137_s2 + $0x108] sm:$0xff] }
  0x68   : > { %3774 = vmatpush3.bf16.msra.mxu0 %v3773_v48  ;;  %v2713_v48 = vld [vmem:[%s5139_s4 + $0xf8] sm:$0xff] }
  0x69   : > { %3775 = vmatprep.subr.bf16.mxu0 %v4069_v3 }
 0x109   : > { %v516_v51 = vpop.f32.mrb[0].mxu1 }
 0x10a   : > { %v3175_v52 = vpop.f32.mrb[1].mxu1  ;;  %3212 = vmatpush3.xpose.msk.msra.mxu1 %vm606_vm1, %v516_v51  ;;  %v430_v53 = vpop.f32.mrb[0].mxu0  ;;  %v2693_v51 = vld [vmem:[%s5138_s3 + $0xd8] sm:$0xff] }
 0x10b   : > { %v3140_v54 = vpop.f32.mrb[1].mxu0  ;;  %3216 = vmatprep.subr.mxu1 %v4071_v11  ;;  %v3776_v52 = vpack.c.bf16 %v2693_v51, %v2692_v49  ;;  %v3806_v49 = vpack.c.bf16 %v2713_v48, %v2712_v47  ;;  %v775_v51 = vld [vmem:[%s5140_s5] sm:$0xff]  ;;  %v2724_v47 = vld [vmem:[%s5137_s2 + $0x110] sm:$0xff]  ;;  %v2725_v48 = vld [vmem:[%s5137_s2 + $0x118] sm:$0xff] }
 0x10c   : > { %v2695_v54 = vld [vmem:[%s5138_s3 + $0xe8] sm:$0xff] }
 0x10d   : > { %3214 = vmatmul.mubr.msk.f32.vlgmr.msra.gmra.mrb[2].mxu1 %vm606_vm1, %v430_v53  ;;  %3777 = vmatpush3.bf16.msra.mxu0 %v3776_v52  ;;  %v2694_v53 = vld [vmem:[%s5138_s3 + $0xe0] sm:$0xff]  ;;  %v776_v52 = vld [vmem:[%s5140_s5 + $0x8] sm:$0xff] }
 0x10e   : > { %3218 = vmatprep.mubr.msk.f32.mxu1 %vm4070_vm0, %v4071_v11  ;;  %3778 = vmatprep.subr.bf16.mxu0 %v4069_v3  ;;  %v3779_v55 = vpack.c.bf16 %v2695_v54, %v2694_v53  ;;  %v3812_v53 = vpack.c.bf16 %v776_v52, %v775_v51  ;;  %v3818_v52 = vpack.c.bf16 %v2725_v48, %v2724_v47 }
 0x111   : > { %3780 = vmatpush3.bf16.msra.mxu0 %v3779_v55 }
 0x112   : > { %3781 = vmatprep.subr.bf16.mxu0 %v4069_v3 }
 0x115   : > { %3783 = vmatpush3.bf16.msra.mxu0 %v3782_v58 }
 0x116   : > { %3326 = vmatprep.subr.mxu0 %v4071_v11 }
 0x118   : > { %3289 = vmatmul.mubr.f32.vlgmr.msra.gmra.mrb[4].mxu0 %v4270_v50 }
 0x119   : > { %3328 = vmatprep.mubr.msk.f32.mxu0 %vm4070_vm0, %v4071_v11 }
 0x12a   : > { %v602_v35 = vpop.f32.mrb[2].mxu0 }
 0x12b   : > { %v3210_v36 = vpop.f32.mrb[3].mxu0  ;;  %3217 = vmatpush3.msk.msra.mxu1 %vm701_vm4, %v602_v35  ;;  %v2704_v35 = vld [vmem:[%s5139_s4 + $0xb0] sm:$0xff] }
 0x12c   : > { %3736 = vmatprep.subr.bf16.mxu1 %v4069_v3  ;;  %v2705_v36 = vld [vmem:[%s5139_s4 + $0xb8] sm:$0xff] }
 0x12d   : > { %v3794_v37 = vpack.c.bf16 %v2705_v36, %v2704_v35  ;;  %v2748_v35 = vld [vmem:[%s5138_s3 + $0x150] sm:$0xff]  ;;  %v2749_v36 = vld [vmem:[%s5138_s3 + $0x158] sm:$0xff] }
 0x1e0   : > { %v679_v20 = vpop.f32.mrb[2].mxu1 }
 0x1e1   : > { %v683_v23 = vmul.f32 0.25, %v679_v20  ;;  %v3215_v24 = vpop.f32.mrb[3].mxu1  ;;  %v2679_v20 = vld [vmem:[%s5137_s2 + $0xe8] sm:$0xff] }
 0x1e2   : > { %v3755_v21 = vpack.c.bf16 %v2679_v20, %v2678_v19  ;;  %v2681_v24 = vld [vmem:[%s5137_s2 + $0xf8] sm:$0xff] }
 0x1e3   : > { %v684_v25 = vadd.f32 %v683_v23, %v4348_v22  ;;  %v2680_v23 = vld [vmem:[%s5137_s2 + $0xf0] sm:$0xff] }
 0x1e5   : > { %v686_v26 = vsel %vm685_vm3, %v684_v25, -inf }
 0x1e6   : > { %687 = vmax.xlane.f32.xlu0 %v686_v26  ;;  %v2698_v26 = vld [vmem:[%s5139_s4 + $0x80] sm:$0xff] }
 0x1eb   : > { %v947_v54 = vpop.f32.mrb[4].mxu0 }
 0x1ec   : > { %v3290_v55 = vpop.f32.mrb[5].mxu0  ;;  %3327 = vmatpush3.xpose.msk.msra.mxu0 %vm606_vm1, %v947_v54  ;;  %v2727_v54 = vld [vmem:[%s5137_s2 + $0x128] sm:$0xff] }
 0x1ed   : > { %3331 = vmatprep.subr.mxu0 %v4071_v11 }
 0x273   : > { %v688_v27 = vpop.xlane.xlu0 %687 }
 0x274   : > { %v689_v28 = vsub.f32 %v684_v25, %v688_v27  ;;  %v3758_v25 = vpack.c.bf16 %v2681_v24, %v2680_v23  ;;  %v2699_v27 = vld [vmem:[%s5139_s4 + $0x88] sm:$0xff]  ;;  %v2740_v23 = vld [vmem:[%s5138_s3 + $0x110] sm:$0xff]  ;;  %v2741_v24 = vld [vmem:[%s5138_s3 + $0x118] sm:$0xff] }
 0x276   : > { %v690_v29 = vmul.f32 1.442695, %v689_v28  ;;  %v3785_v28 = vpack.c.bf16 %v2699_v27, %v2698_v26  ;;  %v2742_v26 = vld [vmem:[%s5138_s3 + $0x120] sm:$0xff]  ;;  %v2743_v27 = vld [vmem:[%s5138_s3 + $0x128] sm:$0xff] }
 0x278   : > { %4025 = vpow2.f32 %v690_v29  ;;  %v2700_v29 = vld [vmem:[%s5139_s4 + $0x90] sm:$0xff] }
 0x282   : > { %v4026_v30 = vpop.eup %4025 }
 0x283   : > { %v692_v31 = vsel %vm685_vm3, %v4026_v30, 0.0 }
 0x284   : > { %693 = vadd.xlane.f32.xlu0 %v692_v31 }
 0x311   : > { %v694_v59 = vpop.xlane.xlu0 %693 }
 0x312   : > { %4027 = vrcp.f32 %v694_v59 }
 0x31c   : > { %v4028_v62 = vpop.eup %4027 }
 0x31d   : > { %v696_v0 = vmul.f32 %v4028_v62, %v4026_v30  ;;  %v2701_v30 = vld [vmem:[%s5139_s4 + $0x98] sm:$0xff] }
 0x31e   : > { %v3788_v31 = vpack.c.bf16 %v2701_v30, %v2700_v29  ;;  %v2744_v29 = vld [vmem:[%s5138_s3 + $0x130] sm:$0xff]  ;;  %v2745_v30 = vld [vmem:[%s5138_s3 + $0x138] sm:$0xff] }
 0x31f   : > { %3219 = vmatmul.mubr.msk.f32.vlgmr.msra.gmra.mrb[4].mxu1 %vm697_vm5, %v696_v0 }
 0x320   : > { %3738 = vmatpush3.bf16.msra.mxu1 %v3737_v63  ;;  %3253 = vmatprep.mubr.msk.f32.mxu1 %vm4070_vm0, %v4071_v11 }
 0x321   : > { %3739 = vmatprep.subr.bf16.mxu1 %v4069_v3 }
 0x324   : > { %3741 = vmatpush3.bf16.msra.mxu1 %v3740_v4 }
 0x325   : > { %3742 = vmatprep.subr.bf16.mxu1 %v4069_v3 }
 0x328   : > { %3744 = vmatpush3.bf16.msra.mxu1 %v3743_v7 }
 0x329   : > { %3745 = vmatprep.subr.bf16.mxu1 %v4069_v3 }
 0x32c   : > { %3747 = vmatpush3.bf16.msra.mxu1 %v3746_v10 }
 0x32d   : > { %3748 = vmatprep.subr.bf16.mxu1 %v4069_v3 }
 0x330   : > { %3750 = vmatpush3.bf16.msra.mxu1 %v3749_v14  ;;  %v3839_v14 = vpack.c.bf16 %v2739_v13, %v2738_v12 }
 0x331   : > { %3751 = vmatprep.subr.bf16.mxu1 %v4069_v3 }
 0x334   : > { %3753 = vmatpush3.bf16.msra.mxu1 %v3752_v17  ;;  %v2719_v17 = vld [vmem:[%s5140_s5 + $0x18] sm:$0xff] }
 0x335   : > { %3754 = vmatprep.subr.bf16.mxu1 %v4069_v3  ;;  %v3809_v20 = vpack.c.bf16 %v2719_v17, %v2718_v16  ;;  %v2754_v17 = vld [vmem:[%s5139_s4 + $0x100] sm:$0xff] }
 0x338   : > { %3756 = vmatpush3.bf16.msra.mxu1 %v3755_v21 }
 0x339   : > { %3757 = vmatprep.subr.bf16.mxu1 %v4069_v3 }
 0x33c   : > { %3759 = vmatpush3.bf16.msra.mxu1 %v3758_v25  ;;  %v3842_v25 = vpack.c.bf16 %v2741_v24, %v2740_v23  ;;  %v2758_v24 = vld [vmem:[%s5139_s4 + $0x120] sm:$0xff] }
 0x33d   : > { %3784 = vmatprep.subr.bf16.mxu1 %v4069_v3 }
 0x33f   : > { %3254 = vmatmul.mubr.f32.vlgmr.msra.gmra.mrb[6].mxu1 %v4270_v50 }
 0x340   : > { %3786 = vmatpush3.bf16.msra.mxu1 %v3785_v28  ;;  %3323 = vmatprep.mubr.msk.f32.mxu1 %vm4070_vm0, %v4071_v11  ;;  %v3845_v28 = vpack.c.bf16 %v2743_v27, %v2742_v26  ;;  %v2760_v27 = vld [vmem:[%s5139_s4 + $0x130] sm:$0xff] }
 0x341   : > { %3787 = vmatprep.subr.bf16.mxu1 %v4069_v3 }
 0x344   : > { %3789 = vmatpush3.bf16.msra.mxu1 %v3788_v31  ;;  %v3848_v31 = vpack.c.bf16 %v2745_v30, %v2744_v29  ;;  %v2762_v30 = vld [vmem:[%s5139_s4 + $0x140] sm:$0xff] }
 0x345   : > { %3790 = vmatprep.subr.bf16.mxu1 %v4069_v3 }
 0x348   : > { %3792 = vmatpush3.bf16.msra.mxu1 %v3791_v34  ;;  %v3851_v34 = vpack.c.bf16 %v2747_v33, %v2746_v32  ;;  %v2764_v33 = vld [vmem:[%s5139_s4 + $0x150] sm:$0xff] }
 0x349   : > { %3793 = vmatprep.subr.bf16.mxu1 %v4069_v3 }
 0x34c   : > { %3795 = vmatpush3.bf16.msra.mxu1 %v3794_v37  ;;  %v3854_v37 = vpack.c.bf16 %v2749_v36, %v2748_v35  ;;  %v2766_v36 = vld [vmem:[%s5139_s4 + $0x160] sm:$0xff] }
 0x34d   : > { %3796 = vmatprep.subr.bf16.mxu1 %v4069_v3 }
 0x350   : > { %3798 = vmatpush3.bf16.msra.mxu1 %v3797_v40  ;;  %v3857_v40 = vpack.c.bf16 %v2751_v39, %v2750_v38  ;;  %v2768_v39 = vld [vmem:[%s5139_s4 + $0x170] sm:$0xff] }
 0x351   : > { %3799 = vmatprep.subr.bf16.mxu1 %v4069_v3 }
 0x354   : > { %3801 = vmatpush3.bf16.msra.mxu1 %v3800_v43  ;;  %v3860_v43 = vpack.c.bf16 %v2753_v42, %v2752_v41 }
 0x355   : > { %3802 = vmatprep.subr.bf16.mxu1 %v4069_v3 }
 0x358   : > { %3804 = vmatpush3.bf16.msra.mxu1 %v3803_v46  ;;  %v3815_v46 = vpack.c.bf16 %v2723_v45, %v2722_v44 }
 0x359   : > { %3805 = vmatprep.subr.bf16.mxu1 %v4069_v3 }
 0x35c   : > { %3807 = vmatpush3.bf16.msra.mxu1 %v3806_v49 }
 0x35d   : > { %3811 = vmatprep.subr.bf16.mxu1 %v4069_v3 }
 0x35f   : > { %3324 = vmatmul.mubr.f32.vlgmr.msra.gmra.mrb[8].mxu1 %v4270_v50 }
 0x360   : > { %3813 = vmatpush3.bf16.msra.mxu1 %v3812_v53  ;;  %3347 = vmatprep.mubr.msk.f32.mxu1 %vm4070_vm0, %v4071_v11  ;;  %v2726_v53 = vld [vmem:[%s5137_s2 + $0x120] sm:$0xff] }
 0x361   : > { %3838 = vmatprep.subr.bf16.mxu1 %v4069_v3  ;;  %v3821_v55 = vpack.c.bf16 %v2727_v54, %v2726_v53 }
 0x3f2   : > { %v771_v56 = vpop.f32.mrb[4].mxu1 }
 0x3f3   : > { %v3220_v57 = vpop.f32.mrb[5].mxu1  ;;  %3348 = vmatmul.mubr.msk.f32.vlgmr.msra.gmra.mrb[10].mxu1 %vm606_vm1, %v771_v56  ;;  %v2728_v56 = vld [vmem:[%s5137_s2 + $0x130] sm:$0xff] }
 0x3f4   : > { %3417 = vmatprep.mubr.msk.f32.mxu1 %vm4070_vm0, %v4071_v11  ;;  %3840 = vmatpush3.bf16.msra.mxu1 %v3839_v14  ;;  %v2729_v57 = vld [vmem:[%s5137_s2 + $0x138] sm:$0xff] }
 0x3f5   : > { %3841 = vmatprep.subr.bf16.mxu1 %v4069_v3 }
 0x3f8   : > { %3843 = vmatpush3.bf16.msra.mxu1 %v3842_v25  ;;  %v2759_v25 = vld [vmem:[%s5139_s4 + $0x128] sm:$0xff] }
 0x3f9   : > { %3844 = vmatprep.subr.bf16.mxu1 %v4069_v3  ;;  %v3869_v26 = vpack.c.bf16 %v2759_v25, %v2758_v24  ;;  %v2808_v24 = vld [vmem:[%s5138_s3 + $0x1f8] sm:$0xff] }
 0x3fc   : > { %3846 = vmatpush3.bf16.msra.mxu1 %v3845_v28  ;;  %v2761_v28 = vld [vmem:[%s5139_s4 + $0x138] sm:$0xff] }
 0x3fd   : > { %3847 = vmatprep.subr.bf16.mxu1 %v4069_v3  ;;  %v3872_v29 = vpack.c.bf16 %v2761_v28, %v2760_v27  ;;  %v2778_v27 = vld [vmem:[%s5137_s2 + $0x188] sm:$0xff] }
 0x400   : > { %3849 = vmatpush3.bf16.msra.mxu1 %v3848_v31  ;;  %v2763_v31 = vld [vmem:[%s5139_s4 + $0x148] sm:$0xff] }
 0x401   : > { %3850 = vmatprep.subr.bf16.mxu1 %v4069_v3  ;;  %v3875_v32 = vpack.c.bf16 %v2763_v31, %v2762_v30 }
 0x404   : > { %3852 = vmatpush3.bf16.msra.mxu1 %v3851_v34  ;;  %v2765_v34 = vld [vmem:[%s5139_s4 + $0x158] sm:$0xff] }
 0x405   : > { %3853 = vmatprep.subr.bf16.mxu1 %v4069_v3  ;;  %v3878_v35 = vpack.c.bf16 %v2765_v34, %v2764_v33  ;;  %v2781_v33 = vld [vmem:[%s5137_s2 + $0x1a0] sm:$0xff]  ;;  %v2782_v34 = vld [vmem:[%s5137_s2 + $0x1a8] sm:$0xff] }
 0x408   : > { %3855 = vmatpush3.bf16.msra.mxu1 %v3854_v37  ;;  %v2767_v37 = vld [vmem:[%s5139_s4 + $0x168] sm:$0xff] }
 0x409   : > { %3856 = vmatprep.subr.bf16.mxu1 %v4069_v3  ;;  %v3881_v38 = vpack.c.bf16 %v2767_v37, %v2766_v36  ;;  %v2783_v36 = vld [vmem:[%s5137_s2 + $0x1b0] sm:$0xff]  ;;  %v2784_v37 = vld [vmem:[%s5137_s2 + $0x1b8] sm:$0xff] }
 0x40c   : > { %3858 = vmatpush3.bf16.msra.mxu1 %v3857_v40  ;;  %v2769_v40 = vld [vmem:[%s5139_s4 + $0x178] sm:$0xff] }
 0x40d   : > { %3859 = vmatprep.subr.bf16.mxu1 %v4069_v3  ;;  %v3884_v41 = vpack.c.bf16 %v2769_v40, %v2768_v39  ;;  %v2785_v39 = vld [vmem:[%s5137_s2 + $0x1c0] sm:$0xff]  ;;  %v2786_v40 = vld [vmem:[%s5137_s2 + $0x1c8] sm:$0xff] }
 0x410   : > { %3861 = vmatpush3.bf16.msra.mxu1 %v3860_v43 }
 0x411   : > { %3455 = vmatprep.subr.mxu1 %v4071_v11 }
 0x412   : > { %v860_v58 = vpop.f32.mrb[6].mxu1 }
 0x413   : > { %v3255_v59 = vpop.f32.mrb[7].mxu1  ;;  %3329 = vmatmul.mubr.msk.f32.vlgmr.msra.gmra.mrb[6].mxu0 %vm606_vm1, %v860_v58  ;;  %3418 = vmatmul.mubr.f32.vlgmr.msra.gmra.mrb[12].mxu1 %v4270_v50  ;;  %v3824_v58 = vpack.c.bf16 %v2729_v57, %v2728_v56  ;;  %v2794_v56 = vld [vmem:[%s5138_s3 + $0x188] sm:$0xff] }
 0x414   : > { %3333 = vmatprep.mubr.msk.f32.mxu0 %vm4070_vm0, %v4071_v11  ;;  %3457 = vmatprep.mubr.msk.f32.mxu1 %vm4070_vm0, %v4071_v11  ;;  %v2730_v59 = vld [vmem:[%s5137_s2 + $0x140] sm:$0xff] }
 0x432   : > { %v1034_v60 = vpop.f32.mrb[8].mxu1 }
 0x433   : > { %v3325_v61 = vpop.f32.mrb[9].mxu1  ;;  %3332 = vmatpush3.msk.msra.mxu0 %vm701_vm4, %v1034_v60  ;;  %v2731_v60 = vld [vmem:[%s5137_s2 + $0x148] sm:$0xff] }
 0x434   : > { %3808 = vmatprep.subr.bf16.mxu0 %v4069_v3  ;;  %v3827_v61 = vpack.c.bf16 %v2731_v60, %v2730_v59  ;;  %v2774_v59 = vld [vmem:[%s5140_s5 + $0x20] sm:$0xff]  ;;  %v2775_v60 = vld [vmem:[%s5140_s5 + $0x28] sm:$0xff] }
 0x4c6   : > { %v4552_v62 = vpop.f32.mrb[10].mxu1 }
 0x4c7   : > { %v3349_v63 = vpop.f32.mrb[11].mxu1 }
 0x4c8   : > { %v2732_v63 = vld [vmem:[%s5137_s2 + $0x150] sm:$0xff] }
 0x4e6   : > { %v1110_v0 = vpop.f32.mrb[6].mxu0 }
 0x4e7   : > { %v1114_v1 = vmul.f32 0.25, %v1110_v0  ;;  %v3330_v2 = vpop.f32.mrb[7].mxu0  ;;  %v2733_v0 = vld [vmem:[%s5137_s2 + $0x158] sm:$0xff] }
 0x4e8   : > { %v2734_v2 = vld [vmem:[%s5137_s2 + $0x160] sm:$0xff] }
 0x4e9   : > { %v1115_v4 = vadd.f32 %v1114_v1, %v4348_v22  ;;  %v3830_v1 = vpack.c.bf16 %v2733_v0, %v2732_v63  ;;  %v3887_v63 = vpack.c.bf16 %v2775_v60, %v2774_v59  ;;  %v2809_v60 = vld [vmem:[%s5139_s4 + $0x180] sm:$0xff] }
 0x4eb   : > { %v1116_v5 = vsel %vm685_vm3, %v1115_v4, -inf }
 0x4ec   : > { %1117 = vmax.xlane.f32.xlu1 %v1116_v5 }
 0x579   : > { %v1118_v6 = vpop.xlane.xlu1 %1117 }
 0x57a   : > { %v1119_v7 = vsub.f32 %v1115_v4, %v1118_v6  ;;  %v2735_v4 = vld [vmem:[%s5137_s2 + $0x168] sm:$0xff]  ;;  %v2736_v6 = vld [vmem:[%s5137_s2 + $0x170] sm:$0xff] }
 0x57b   : > { %v3833_v5 = vpack.c.bf16 %v2735_v4, %v2734_v2  ;;  %v2796_v2 = vld [vmem:[%s5138_s3 + $0x198] sm:$0xff] }
 0x57c   : > { %v1120_v8 = vmul.f32 1.442695, %v1119_v7  ;;  %v2737_v7 = vld [vmem:[%s5137_s2 + $0x178] sm:$0xff] }
 0x57e   : > { %4029 = vpow2.f32 %v1120_v8  ;;  %v3836_v8 = vpack.c.bf16 %v2737_v7, %v2736_v6  ;;  %v2798_v6 = vld [vmem:[%s5138_s3 + $0x1a8] sm:$0xff] }
 0x588   : > { %v4030_v9 = vpop.eup %4029 }
 0x589   : > { %v1122_v10 = vsel %vm685_vm3, %v4030_v9, 0.0 }
 0x58a   : > { %1123 = vadd.xlane.f32.xlu1 %v1122_v10 }
 0x617   : > { %v1124_v15 = vpop.xlane.xlu1 %1123 }
 0x618   : > { %4031 = vrcp.f32 %v1124_v15 }
 0x622   : > { %v4032_v19 = vpop.eup %4031 }
 0x623   : > { %v1126_v21 = vmul.f32 %v4032_v19, %v4030_v9  ;;  %v1522_v9 = vpop.f32.mrb[12].mxu1  ;;  %v2755_v19 = vld [vmem:[%s5139_s4 + $0x108] sm:$0xff] }
 0x624   : > { %v3419_v10 = vpop.f32.mrb[13].mxu1  ;;  %3456 = vmatpush3.xpose.msk.msra.mxu1 %vm606_vm1, %v1522_v9  ;;  %v2800_v9 = vld [vmem:[%s5138_s3 + $0x1b8] sm:$0xff] }
 0x625   : > { %3334 = vmatmul.mubr.msk.f32.vlgmr.msra.gmra.mrb[8].mxu0 %vm697_vm5, %v1126_v21  ;;  %3460 = vmatprep.subr.mxu1 %v4071_v11  ;;  %v2757_v21 = vld [vmem:[%s5139_s4 + $0x118] sm:$0xff] }
 0x626   : > { %3810 = vmatpush3.bf16.msra.mxu0 %v3809_v20  ;;  %3340 = vmatprep.mubr.msk.f32.mxu0 %vm4070_vm0, %v4071_v11  ;;  %v3863_v20 = vpack.c.bf16 %v2755_v19, %v2754_v17  ;;  %v2804_v17 = vld [vmem:[%s5138_s3 + $0x1d8] sm:$0xff] }
 0x627   : > { %3814 = vmatprep.subr.bf16.mxu0 %v4069_v3 }
 0x6f8   : > { %v1199_v49 = vpop.f32.mrb[8].mxu0 }
 0x6f9   : > { %v3335_v51 = vpop.f32.mrb[9].mxu0  ;;  %3341 = vmatmul.mubr.msk.f32.vlgmr.msra.gmra.mrb[10].mxu0 %vm606_vm1, %v1199_v49 }
 0x6fa   : > { %3816 = vmatpush3.bf16.msra.mxu0 %v3815_v46  ;;  %3382 = vmatprep.mubr.msk.f32.mxu0 %vm4070_vm0, %v4071_v11 }
 0x6fb   : > { %3817 = vmatprep.subr.bf16.mxu0 %v4069_v3 }
 0x6fe   : > { %3819 = vmatpush3.bf16.msra.mxu0 %v3818_v52 }
 0x6ff   : > { %3820 = vmatprep.subr.bf16.mxu0 %v4069_v3 }
 0x702   : > { %3822 = vmatpush3.bf16.msra.mxu0 %v3821_v55  ;;  %v2793_v55 = vld [vmem:[%s5138_s3 + $0x180] sm:$0xff] }
 0x703   : > { %3823 = vmatprep.subr.bf16.mxu0 %v4069_v3  ;;  %v3914_v57 = vpack.c.bf16 %v2794_v56, %v2793_v55 }
 0x706   : > { %3825 = vmatpush3.bf16.msra.mxu0 %v3824_v58 }
 0x707   : > { %3826 = vmatprep.subr.bf16.mxu0 %v4069_v3 }
 0x70a   : > { %3828 = vmatpush3.bf16.msra.mxu0 %v3827_v61 }
 0x70b   : > { %3829 = vmatprep.subr.bf16.mxu0 %v4069_v3 }
 0x70e   : > { %3831 = vmatpush3.bf16.msra.mxu0 %v3830_v1  ;;  %v2795_v1 = vld [vmem:[%s5138_s3 + $0x190] sm:$0xff] }
 0x70f   : > { %3832 = vmatprep.subr.bf16.mxu0 %v4069_v3  ;;  %v3917_v4 = vpack.c.bf16 %v2796_v2, %v2795_v1  ;;  %v2813_v2 = vld [vmem:[%s5139_s4 + $0x1a0] sm:$0xff] }
 0x712   : > { %3834 = vmatpush3.bf16.msra.mxu0 %v3833_v5  ;;  %v2797_v5 = vld [vmem:[%s5138_s3 + $0x1a0] sm:$0xff] }
 0x713   : > { %3835 = vmatprep.subr.bf16.mxu0 %v4069_v3  ;;  %v3920_v7 = vpack.c.bf16 %v2798_v6, %v2797_v5  ;;  %v2815_v6 = vld [vmem:[%s5139_s4 + $0x1b0] sm:$0xff] }
 0x716   : > { %3837 = vmatpush3.bf16.msra.mxu0 %v3836_v8  ;;  %v2799_v8 = vld [vmem:[%s5138_s3 + $0x1b0] sm:$0xff] }
 0x717   : > { %3862 = vmatprep.subr.bf16.mxu0 %v4069_v3  ;;  %v3923_v10 = vpack.c.bf16 %v2800_v9, %v2799_v8  ;;  %v2817_v9 = vld [vmem:[%s5139_s4 + $0x1c0] sm:$0xff] }
 0x719   : > { %3383 = vmatmul.mubr.f32.vlgmr.msra.gmra.mrb[12].mxu0 %v4270_v50 }
 0x71a   : > { %3452 = vmatprep.mubr.msk.f32.mxu0 %vm4070_vm0, %v4071_v11  ;;  %3864 = vmatpush3.bf16.msra.mxu0 %v3863_v20  ;;  %v2806_v20 = vld [vmem:[%s5138_s3 + $0x1e8] sm:$0xff] }
 0x71b   : > { %3865 = vmatprep.subr.bf16.mxu0 %v4069_v3 }
 0x7cc   : > { %v1275_v12 = vpop.f32.mrb[10].mxu0 }
 0x7cd   : > { %v4691_v13 = vadd.f32 %v4552_v62, %v1275_v12  ;;  %v3342_v14 = vpop.f32.mrb[11].mxu0  ;;  %v2756_v62 = vld [vmem:[%s5139_s4 + $0x110] sm:$0xff]  ;;  %v2801_v12 = vld [vmem:[%s5138_s3 + $0x1c0] sm:$0xff] }
 0x7ce   : > { %v3866_v23 = vpack.c.bf16 %v2757_v21, %v2756_v62  ;;  %v2802_v14 = vld [vmem:[%s5138_s3 + $0x1c8] sm:$0xff]  ;;  %v2805_v62 = vld [vmem:[%s5138_s3 + $0x1e0] sm:$0xff] }
 0x7cf   : > { %v3932_v21 = vpack.c.bf16 %v2806_v20, %v2805_v62  ;;  %v2823_v20 = vld [vmem:[%s5139_s4 + $0x1f0] sm:$0xff] }
 0x7d0   : > { %3867 = vmatpush3.bf16.msra.mxu0 %v3866_v23  ;;  %v2807_v23 = vld [vmem:[%s5138_s3 + $0x1f0] sm:$0xff] }
 0x7d1   : > { %3868 = vmatprep.subr.bf16.mxu0 %v4069_v3  ;;  %v3935_v25 = vpack.c.bf16 %v2808_v24, %v2807_v23 }
 0x7d4   : > { %3870 = vmatpush3.bf16.msra.mxu0 %v3869_v26  ;;  %v2777_v26 = vld [vmem:[%s5137_s2 + $0x180] sm:$0xff] }
 0x7d5   : > { %3871 = vmatprep.subr.bf16.mxu0 %v4069_v3  ;;  %v3890_v28 = vpack.c.bf16 %v2778_v27, %v2777_v26 }
 0x7d8   : > { %3873 = vmatpush3.bf16.msra.mxu0 %v3872_v29  ;;  %v2779_v29 = vld [vmem:[%s5137_s2 + $0x190] sm:$0xff] }
 0x7d9   : > { %3874 = vmatprep.subr.bf16.mxu0 %v4069_v3 }
 0x7dc   : > { %3876 = vmatpush3.bf16.msra.mxu0 %v3875_v32 }
 0x7dd   : > { %3877 = vmatprep.subr.bf16.mxu0 %v4069_v3 }
 0x7e0   : > { %3879 = vmatpush3.bf16.msra.mxu0 %v3878_v35  ;;  %v3896_v35 = vpack.c.bf16 %v2782_v34, %v2781_v33 }
 0x7e1   : > { %3880 = vmatprep.subr.bf16.mxu0 %v4069_v3 }
 0x7e4   : > { %3882 = vmatpush3.bf16.msra.mxu0 %v3881_v38  ;;  %v3899_v38 = vpack.c.bf16 %v2784_v37, %v2783_v36  ;;  %v2830_v36 = vld [vmem:[%s5140_s5 + $0x38] sm:$0xff] }
 0x7e5   : > { %3883 = vmatprep.subr.bf16.mxu0 %v4069_v3 }
 0x7e8   : > { %3885 = vmatpush3.bf16.msra.mxu0 %v3884_v41  ;;  %v3902_v41 = vpack.c.bf16 %v2786_v40, %v2785_v39 }
 0x7e9   : > { %3913 = vmatprep.subr.bf16.mxu0 %v4069_v3 }
 0x7eb   : > { %3453 = vmatmul.mubr.f32.vlgmr.msra.gmra.mrb[14].mxu0 %v4270_v50 }
 0x7ec   : > { %v1435_v15 = vpop.f32.mrb[12].mxu0  ;;  %3539 = vmatprep.mubr.msk.f32.mxu0 %vm4070_vm0, %v4071_v11  ;;  %3915 = vmatpush3.bf16.msra.mxu0 %v3914_v57 }
 0x7ed   : > { %v3384_v16 = vpop.f32.mrb[13].mxu0  ;;  %3458 = vmatmul.mubr.msk.f32.vlgmr.msra.gmra.mrb[14].mxu1 %vm606_vm1, %v1435_v15  ;;  %3916 = vmatprep.subr.bf16.mxu0 %v4069_v3  ;;  %v3926_v15 = vpack.c.bf16 %v2802_v14, %v2801_v12  ;;  %v2819_v14 = vld [vmem:[%s5139_s4 + $0x1d0] sm:$0xff] }
 0x7ee   : > { %3462 = vmatprep.mubr.msk.f32.mxu1 %vm4070_vm0, %v4071_v11  ;;  %v2803_v16 = vld [vmem:[%s5138_s3 + $0x1d0] sm:$0xff] }
 0x7ef   : > { %v3929_v19 = vpack.c.bf16 %v2804_v17, %v2803_v16  ;;  %v2821_v17 = vld [vmem:[%s5139_s4 + $0x1e0] sm:$0xff] }
 0x7f0   : > { %3918 = vmatpush3.bf16.msra.mxu0 %v3917_v4  ;;  %v2814_v4 = vld [vmem:[%s5139_s4 + $0x1a8] sm:$0xff] }
 0x7f1   : > { %3919 = vmatprep.subr.bf16.mxu0 %v4069_v3  ;;  %v3944_v5 = vpack.c.bf16 %v2814_v4, %v2813_v2  ;;  %v2392_v2 = vld [vmem:[%s5142_s7 + $0x38] sm:$0xff] }
 0x7f4   : > { %3921 = vmatpush3.bf16.msra.mxu0 %v3920_v7  ;;  %v2816_v7 = vld [vmem:[%s5139_s4 + $0x1b8] sm:$0xff] }
 0x7f5   : > { %3922 = vmatprep.subr.bf16.mxu0 %v4069_v3  ;;  %v3947_v8 = vpack.c.bf16 %v2816_v7, %v2815_v6  ;;  %v2394_v6 = vld [vmem:[%s5142_s7 + $0x48] sm:$0xff] }
 0x7f8   : > { %3924 = vmatpush3.bf16.msra.mxu0 %v3923_v10  ;;  %v2818_v10 = vld [vmem:[%s5139_s4 + $0x1c8] sm:$0xff] }
 0x7f9   : > { %3925 = vmatprep.subr.bf16.mxu0 %v4069_v3  ;;  %v3950_v12 = vpack.c.bf16 %v2818_v10, %v2817_v9  ;;  %v2396_v9 = vld [vmem:[%s5142_s7 + $0x58] sm:$0xff] }
 0x7fc   : > { %3927 = vmatpush3.bf16.msra.mxu0 %v3926_v15  ;;  %v2820_v15 = vld [vmem:[%s5139_s4 + $0x1d8] sm:$0xff] }
 0x7fd   : > { %3928 = vmatprep.subr.bf16.mxu0 %v4069_v3  ;;  %v3953_v16 = vpack.c.bf16 %v2820_v15, %v2819_v14  ;;  %v2398_v14 = vld [vmem:[%s5142_s7 + $0x68] sm:$0xff] }
 0x800   : > { %3930 = vmatpush3.bf16.msra.mxu0 %v3929_v19  ;;  %v2822_v19 = vld [vmem:[%s5139_s4 + $0x1e8] sm:$0xff] }
 0x801   : > { %3931 = vmatprep.subr.bf16.mxu0 %v4069_v3  ;;  %v3956_v62 = vpack.c.bf16 %v2822_v19, %v2821_v17  ;;  %v2400_v17 = vld [vmem:[%s5142_s7 + $0x78] sm:$0xff] }
 0x804   : > { %3933 = vmatpush3.bf16.msra.mxu0 %v3932_v21  ;;  %v2824_v21 = vld [vmem:[%s5139_s4 + $0x1f8] sm:$0xff] }
 0x805   : > { %3934 = vmatprep.subr.bf16.mxu0 %v4069_v3  ;;  %v3959_v23 = vpack.c.bf16 %v2824_v21, %v2823_v20  ;;  %v2480_v20 = vld [vmem:[%s5144_s9 + $0x8] sm:$0xff]  ;;  %v2481_v21 = vld [vmem:[%s5144_s9 + $0x10] sm:$0xff] }
 0x808   : > { %3936 = vmatpush3.bf16.msra.mxu0 %v3935_v25 }
 0x809   : > { %3577 = vmatprep.subr.mxu0 %v4071_v11 }
 0x80b   : > { %3540 = vmatmul.mubr.f32.vlgmr.msra.gmra.mrb[16].mxu0 %v4270_v50  ;;  %v2780_v50 = vld [vmem:[%s5137_s2 + $0x198] sm:$0xff] }
 0x80c   : > { %3579 = vmatprep.mubr.msk.f32.mxu0 %vm4070_vm0, %v4071_v11  ;;  %v3893_v32 = vpack.c.bf16 %v2780_v50, %v2779_v29 }
 0x8be   : > { %v1609_v53 = vpop.f32.mrb[14].mxu0 }
 0x8bf   : > { %v3454_v54 = vpop.f32.mrb[15].mxu0  ;;  %3461 = vmatpush3.msk.msra.mxu1 %vm701_vm4, %v1609_v53 }
 0x8c0   : > { %v1685_v42 = vpop.f32.mrb[14].mxu1  ;;  %3886 = vmatprep.subr.bf16.mxu1 %v4069_v3 }
 0x8c1   : > { %v1689_v43 = vmul.f32 0.25, %v1685_v42  ;;  %v3459_v44 = vpop.f32.mrb[15].mxu1  ;;  %v2787_v42 = vld [vmem:[%s5137_s2 + $0x1d0] sm:$0xff] }
 0x8c3   : > { %v1690_v45 = vadd.f32 %v1689_v43, %v4348_v22  ;;  %v2788_v43 = vld [vmem:[%s5137_s2 + $0x1d8] sm:$0xff] }
 0x8c4   : > { %v3905_v44 = vpack.c.bf16 %v2788_v43, %v2787_v42 }
 0x8c5   : > { %v1691_v46 = vsel %vm685_vm3, %v1690_v45, -inf }
 0x8c6   : > { %1692 = vmax.xlane.f32.xlu0 %v1691_v46  ;;  %v2790_v46 = vld [vmem:[%s5137_s2 + $0x1e8] sm:$0xff] }
 0x8de   : > { %v2025_v53 = vpop.f32.mrb[16].mxu0 }
 0x8df   : > { %v3541_v54 = vpop.f32.mrb[17].mxu0  ;;  %3578 = vmatpush3.xpose.msk.msra.mxu0 %vm606_vm1, %v2025_v53  ;;  %v2388_v53 = vld [vmem:[%s5142_s7 + $0x18] sm:$0xff] }
 0x8e0   : > { %3582 = vmatprep.subr.mxu0 %v4071_v11 }
 0x953   : > { %v1693_v47 = vpop.xlane.xlu0 %1692 }
 0x954   : > { %v1694_v48 = vsub.f32 %v1690_v45, %v1693_v47  ;;  %v2789_v45 = vld [vmem:[%s5137_s2 + $0x1e0] sm:$0xff] }
 0x955   : > { %v3908_v47 = vpack.c.bf16 %v2790_v46, %v2789_v45 }
 0x956   : > { %v1695_v49 = vmul.f32 1.442695, %v1694_v48  ;;  %v2791_v48 = vld [vmem:[%s5137_s2 + $0x1f0] sm:$0xff] }
 0x958   : > { %4033 = vpow2.f32 %v1695_v49  ;;  %v2792_v49 = vld [vmem:[%s5137_s2 + $0x1f8] sm:$0xff] }
 0x962   : > { %v4034_v51 = vpop.eup %4033 }
 0x963   : > { %v1697_v52 = vsel %vm685_vm3, %v4034_v51, 0.0 }
 0x964   : > { %1698 = vadd.xlane.f32.xlu1 %v1697_v52  ;;  %v4889_v52 = vld [vmem:[%s4266_s30] sm:$0x3f] }
 0x9f1   : > { %v1699_v58 = vpop.xlane.xlu1 %1698 }
 0x9f2   : > { %4035 = vrcp.f32 %v1699_v58 }
 0x9fc   : > { %v4036_v61 = vpop.eup %4035 }
 0x9fd   : > { %v1701_v0 = vmul.f32 %v4036_v61, %v4034_v51  ;;  %v3911_v51 = vpack.c.bf16 %v2792_v49, %v2791_v48  ;;  %v2810_v61 = vld [vmem:[%s5139_s4 + $0x188] sm:$0xff]  ;;  %v2387_v49 = vld [vmem:[%s5142_s7 + $0x10] sm:$0xff] }
 0x9fe   : > { %v2386_v48 = vld [vmem:[%s5142_s7 + $0x8] sm:$0xff]  ;;  %v3968_v54 = vpack.c.bf16 %v2388_v53, %v2387_v49 }
 0x9ff   : > { %3463 = vmatmul.mubr.msk.f32.vlgmr.msra.gmra.mrb[16].mxu1 %vm697_vm5, %v1701_v0  ;;  %v2812_v0 = vld [vmem:[%s5139_s4 + $0x198] sm:$0xff] }
 0xa00   : > { %3888 = vmatpush3.bf16.msra.mxu1 %v3887_v63  ;;  %3469 = vmatprep.mubr.msk.f32.mxu1 %vm4070_vm0, %v4071_v11  ;;  %v3938_v63 = vpack.c.bf16 %v2810_v61, %v2809_v60  ;;  %v5005_v60 = vsel %vm337_vm6, 1.0, %v4071_v11 }
 0xa01   : > { %3889 = vmatprep.subr.bf16.mxu1 %v4069_v3 }
 0xad2   : > { %v1774_v30 = vpop.f32.mrb[16].mxu1 }
 0xad3   : > { %v3464_v31 = vpop.f32.mrb[17].mxu1  ;;  %3470 = vmatmul.mubr.msk.f32.vlgmr.msra.gmra.mrb[18].mxu1 %vm606_vm1, %v1774_v30 }
 0xad4   : > { %3891 = vmatpush3.bf16.msra.mxu1 %v3890_v28  ;;  %3504 = vmatprep.mubr.msk.f32.mxu1 %vm4070_vm0, %v4071_v11 }
 0xad5   : > { %3892 = vmatprep.subr.bf16.mxu1 %v4069_v3 }
 0xad8   : > { %3894 = vmatpush3.bf16.msra.mxu1 %v3893_v32 }
 0xad9   : > { %3895 = vmatprep.subr.bf16.mxu1 %v4069_v3 }
 0xadc   : > { %3897 = vmatpush3.bf16.msra.mxu1 %v3896_v35 }
 0xadd   : > { %3898 = vmatprep.subr.bf16.mxu1 %v4069_v3 }
 0xae0   : > { %3900 = vmatpush3.bf16.msra.mxu1 %v3899_v38 }
 0xae1   : > { %3901 = vmatprep.subr.bf16.mxu1 %v4069_v3 }
 0xae4   : > { %3903 = vmatpush3.bf16.msra.mxu1 %v3902_v41 }
 0xae5   : > { %3904 = vmatprep.subr.bf16.mxu1 %v4069_v3 }
 0xae8   : > { %3906 = vmatpush3.bf16.msra.mxu1 %v3905_v44 }
 0xae9   : > { %3907 = vmatprep.subr.bf16.mxu1 %v4069_v3 }
 0xaec   : > { %3909 = vmatpush3.bf16.msra.mxu1 %v3908_v47  ;;  %v2385_v47 = vld [vmem:[%s5142_s7] sm:$0xff] }
 0xaed   : > { %3910 = vmatprep.subr.bf16.mxu1 %v4069_v3 }
 0xaf0   : > { %3912 = vmatpush3.bf16.msra.mxu1 %v3911_v51  ;;  %v3965_v51 = vpack.c.bf16 %v2386_v48, %v2385_v47  ;;  %v2494_v48 = vld [vmem:[%s5144_s9 + $0x78] sm:$0xff] }
 0xaf1   : > { %3937 = vmatprep.subr.bf16.mxu1 %v4069_v3 }
 0xaf3   : > { %3505 = vmatmul.mubr.f32.vlgmr.msra.gmra.mrb[20].mxu1 %v4889_v52 }
 0xaf4   : > { %3574 = vmatprep.mubr.msk.f32.mxu1 %vm4070_vm0, %v4071_v11  ;;  %3939 = vmatpush3.bf16.msra.mxu1 %v3938_v63 }
 0xaf5   : > { %3940 = vmatprep.subr.bf16.mxu1 %v4069_v3 }
 0xba6   : > { %v1850_v55 = vpop.f32.mrb[18].mxu1 }
 0xba7   : > { %v4897_v56 = vadd.f32 %v1850_v55, %v4691_v13  ;;  %v3471_v57 = vpop.f32.mrb[19].mxu1  ;;  %v2811_v13 = vld [vmem:[%s5139_s4 + $0x190] sm:$0xff]  ;;  %v2389_v55 = vld [vmem:[%s5142_s7 + $0x20] sm:$0xff] }
 0xba8   : > { %v3941_v1 = vpack.c.bf16 %v2812_v0, %v2811_v13 }
 0xbaa   : > { %3942 = vmatpush3.bf16.msra.mxu1 %v3941_v1  ;;  %v2391_v1 = vld [vmem:[%s5142_s7 + $0x30] sm:$0xff] }
 0xbab   : > { %3943 = vmatprep.subr.bf16.mxu1 %v4069_v3  ;;  %v3974_v4 = vpack.c.bf16 %v2392_v2, %v2391_v1 }
 0xbae   : > { %3945 = vmatpush3.bf16.msra.mxu1 %v3944_v5  ;;  %v2393_v5 = vld [vmem:[%s5142_s7 + $0x40] sm:$0xff] }
 0xbaf   : > { %3946 = vmatprep.subr.bf16.mxu1 %v4069_v3  ;;  %v3977_v7 = vpack.c.bf16 %v2394_v6, %v2393_v5 }
 0xbb2   : > { %3948 = vmatpush3.bf16.msra.mxu1 %v3947_v8  ;;  %v2395_v8 = vld [vmem:[%s5142_s7 + $0x50] sm:$0xff] }
 0xbb3   : > { %3949 = vmatprep.subr.bf16.mxu1 %v4069_v3  ;;  %v3980_v10 = vpack.c.bf16 %v2396_v9, %v2395_v8 }
 0xbb6   : > { %3951 = vmatpush3.bf16.msra.mxu1 %v3950_v12  ;;  %v2397_v12 = vld [vmem:[%s5142_s7 + $0x60] sm:$0xff] }
 0xbb7   : > { %3952 = vmatprep.subr.bf16.mxu1 %v4069_v3  ;;  %v3983_v15 = vpack.c.bf16 %v2398_v14, %v2397_v12  ;;  %v2661_v12 = vsel %vm340_vm7, 1.0, %v4071_v11  ;;  %v2836_v14 = vld [vmem:[%s5141_s6 + $0x2] ss:$0 sm:$0xff] }
 0xbba   : > { %3954 = vmatpush3.bf16.msra.mxu1 %v3953_v16  ;;  %v2399_v16 = vld [vmem:[%s5142_s7 + $0x70] sm:$0xff] }
 0xbbb   : > { %3955 = vmatprep.subr.bf16.mxu1 %v4069_v3  ;;  %v3986_v19 = vpack.c.bf16 %v2400_v17, %v2399_v16  ;;  %v2597_v16 = vmul.f32 %v4889_v52, %v2661_v12 }
 0xbbe   : > { %3957 = vmatpush3.bf16.msra.mxu1 %v3956_v62  ;;  %v2479_v62 = vld [vmem:[%s5144_s9] sm:$0xff] }
 0xbbf   : > { %3958 = vmatprep.subr.bf16.mxu1 %v4069_v3 }
 0xbc2   : > { %3960 = vmatpush3.bf16.msra.mxu1 %v3959_v23  ;;  %v3989_v23 = vpack.c.bf16 %v2480_v20, %v2479_v62 }
 0xbc3   : > { %3988 = vmatprep.subr.bf16.mxu1 %v4069_v3 }
 0xbc5   : > { %3575 = vmatmul.mubr.f32.vlgmr.msra.gmra.mrb[22].mxu1 %v4889_v52 }
 0xbc6   : > { %v1938_v58 = vpop.f32.mrb[20].mxu1  ;;  %3661 = vmatprep.mubr.msk.f32.mxu1 %vm4070_vm0, %v4071_v11  ;;  %3990 = vmatpush3.bf16.msra.mxu1 %v3989_v23 }
 0xbc7   : > { %v3506_v59 = vpop.f32.mrb[21].mxu1  ;;  %3580 = vmatmul.mubr.msk.f32.vlgmr.msra.gmra.mrb[18].mxu0 %vm606_vm1, %v1938_v58  ;;  %3991 = vmatprep.subr.bf16.mxu1 %v4069_v3 }
 0xbc8   : > { %3584 = vmatprep.mubr.msk.f32.mxu0 %vm4070_vm0, %v4071_v11 }
 0xc98   : > { %v2112_v33 = vpop.f32.mrb[22].mxu1 }
 0xc99   : > { %v3576_v34 = vpop.f32.mrb[23].mxu1  ;;  %3583 = vmatpush3.msk.msra.mxu0 %vm701_vm4, %v2112_v33 }
 0xc9a   : > { %v2188_v24 = vpop.f32.mrb[18].mxu0  ;;  %3961 = vmatprep.subr.bf16.mxu0 %v4069_v3  ;;  %v2489_v34 = vld [vmem:[%s5144_s9 + $0x50] sm:$0xff] }
 0xc9b   : > { %v2192_v25 = vmul.f32 0.25, %v2188_v24  ;;  %v3581_v26 = vpop.f32.mrb[19].mxu0  ;;  %v2482_v24 = vld [vmem:[%s5144_s9 + $0x18] sm:$0xff] }
 0xc9c   : > { %v2483_v26 = vld [vmem:[%s5144_s9 + $0x20] sm:$0xff] }
 0xc9d   : > { %v2193_v27 = vadd.f32 %v2192_v25, %v4348_v22  ;;  %v2829_v22 = vld [vmem:[%s5140_s5 + $0x30] sm:$0xff]  ;;  %v3992_v25 = vpack.c.bf16 %v2482_v24, %v2481_v21 }
 0xc9e   : > { %v3962_v38 = vpack.c.bf16 %v2830_v36, %v2829_v22  ;;  %v2491_v36 = vld [vmem:[%s5144_s9 + $0x60] sm:$0xff] }
 0xc9f   : > { %v2194_v28 = vsel %vm685_vm3, %v2193_v27, -inf  ;;  %3993 = vmatpush3.bf16.msra.mxu1 %v3992_v25 }
 0xca0   : > { %2195 = vmax.xlane.f32.xlu0 %v2194_v28  ;;  %3994 = vmatprep.subr.bf16.mxu1 %v4069_v3 }
 0xd2d   : > { %v2196_v29 = vpop.xlane.xlu0 %2195 }
 0xd2e   : > { %v2197_v50 = vsub.f32 %v2193_v27, %v2196_v29  ;;  %v2484_v27 = vld [vmem:[%s5144_s9 + $0x28] sm:$0xff]  ;;  %v2485_v29 = vld [vmem:[%s5144_s9 + $0x30] sm:$0xff] }
 0xd2f   : > { %v3995_v28 = vpack.c.bf16 %v2484_v27, %v2483_v26 }
 0xd30   : > { %v2198_v30 = vmul.f32 1.442695, %v2197_v50  ;;  %v2486_v50 = vld [vmem:[%s5144_s9 + $0x38] sm:$0xff] }
 0xd31   : > { %3996 = vmatpush3.bf16.msra.mxu1 %v3995_v28 }
 0xd32   : > { %4037 = vpow2.f32 %v2198_v30  ;;  %v3998_v30 = vpack.c.bf16 %v2486_v50, %v2485_v29  ;;  %3997 = vmatprep.subr.bf16.mxu1 %v4069_v3 }
 0xd35   : > { %3999 = vmatpush3.bf16.msra.mxu1 %v3998_v30 }
 0xd36   : > { %4000 = vmatprep.subr.bf16.mxu1 %v4069_v3 }
 0xd3c   : > { %v4038_v31 = vpop.eup %4037 }
 0xd3d   : > { %v2200_v32 = vsel %vm685_vm3, %v4038_v31, 0.0 }
 0xd3e   : > { %2201 = vadd.xlane.f32.xlu1 %v2200_v32  ;;  %v2488_v32 = vld [vmem:[%s5144_s9 + $0x48] sm:$0xff] }
 0xdcb   : > { %v2202_v35 = vpop.xlane.xlu1 %2201 }
 0xdcc   : > { %4039 = vrcp.f32 %v2202_v35  ;;  %v2490_v35 = vld [vmem:[%s5144_s9 + $0x58] sm:$0xff] }
 0xdcd   : > { %v4004_v22 = vpack.c.bf16 %v2490_v35, %v2489_v34 }
 0xdd6   : > { %v4040_v37 = vpop.eup %4039 }
 0xdd7   : > { %v2204_v39 = vmul.f32 %v4040_v37, %v4038_v31  ;;  %v2487_v31 = vld [vmem:[%s5144_s9 + $0x40] sm:$0xff]  ;;  %v2492_v37 = vld [vmem:[%s5144_s9 + $0x68] sm:$0xff] }
 0xdd8   : > { %v4001_v33 = vpack.c.bf16 %v2488_v32, %v2487_v31 }
 0xdd9   : > { %3585 = vmatmul.mubr.msk.f32.vlgmr.msra.gmra.mrb[20].mxu0 %vm697_vm5, %v2204_v39 }
 0xdda   : > { %3963 = vmatpush3.bf16.msra.mxu0 %v3962_v38  ;;  %3591 = vmatprep.mubr.msk.f32.mxu0 %vm4070_vm0, %v4071_v11  ;;  %v4007_v38 = vpack.c.bf16 %v2492_v37, %v2491_v36 }
 0xddb   : > { %3964 = vmatprep.subr.bf16.mxu0 %v4069_v3  ;;  %4002 = vmatpush3.bf16.msra.mxu1 %v4001_v33 }
 0xddc   : > { %4003 = vmatprep.subr.bf16.mxu1 %v4069_v3 }
 0xddf   : > { %4005 = vmatpush3.bf16.msra.mxu1 %v4004_v22 }
 0xde0   : > { %4006 = vmatprep.subr.bf16.mxu1 %v4069_v3 }
 0xde3   : > { %4008 = vmatpush3.bf16.msra.mxu1 %v4007_v38 }
 0xde4   : > { %4009 = vmatprep.subr.bf16.mxu1 %v4069_v3 }
 0xeac   : > { %v2277_v40 = vpop.f32.mrb[20].mxu0 }
 0xead   : > { %v3586_v41 = vpop.f32.mrb[21].mxu0  ;;  %3592 = vmatmul.mubr.msk.f32.vlgmr.msra.gmra.mrb[22].mxu0 %vm606_vm1, %v2277_v40 }
 0xeae   : > { %3626 = vmatprep.mubr.msk.f32.mxu0 %vm4070_vm0, %v4071_v11  ;;  %3966 = vmatpush3.bf16.msra.mxu0 %v3965_v51  ;;  %v2834_v51 = vld [vmem:[%s5143_s8] ss:$0 sm:$0xff] }
 0xeaf   : > { %3967 = vmatprep.subr.bf16.mxu0 %v4069_v3 }
 0xeb2   : > { %3969 = vmatpush3.bf16.msra.mxu0 %v3968_v54 }
 0xeb3   : > { %3970 = vmatprep.subr.bf16.mxu0 %v4069_v3 }
 0xf80   : > { %v2353_v42 = vpop.f32.mrb[22].mxu0 }
 0xf81   : > { %v2357_v43 = vadd.f32 %v2353_v42, %v4897_v56  ;;  %v3593_v44 = vpop.f32.mrb[23].mxu0  ;;  %v2390_v56 = vld [vmem:[%s5142_s7 + $0x28] sm:$0xff] }
 0xf82   : > { %v3971_v57 = vpack.c.bf16 %v2390_v56, %v2389_v55 }
 0xf83   : > { %v2358_v45 = vadd.f32 %v4889_v52, %v2357_v43  ;;  %v2832_v43 = vld [vmem:[%s5141_s6] ss:$0 sm:$0xff] }
 0xf84   : > { %3972 = vmatpush3.bf16.msra.mxu0 %v3971_v57  ;;  %v2835_v57 = vld [vmem:[%s5141_s6 + $0x4] ss:$0 sm:$0xff] }
 0xf85   : > { %v2361_v46 = vsel %vm701_vm4, %v2358_v45, 0.0  ;;  %3973 = vmatprep.subr.bf16.mxu0 %v4069_v3 }
 0xf86   : > { %2362 = vadd.xlane.f32.xlu0 %v2361_v46 }
 0xf88   : > { %3975 = vmatpush3.bf16.msra.mxu0 %v3974_v4 }
 0xf89   : > { %3976 = vmatprep.subr.bf16.mxu0 %v4069_v3 }
 0xf8c   : > { %3978 = vmatpush3.bf16.msra.mxu0 %v3977_v7 }
 0xf8d   : > { %3979 = vmatprep.subr.bf16.mxu0 %v4069_v3 }
 0xf90   : > { %3981 = vmatpush3.bf16.msra.mxu0 %v3980_v10 }
 0xf91   : > { %3982 = vmatprep.subr.bf16.mxu0 %v4069_v3 }
 0xf94   : > { %3984 = vmatpush3.bf16.msra.mxu0 %v3983_v15 }
 0xf95   : > { %3985 = vmatprep.subr.bf16.mxu0 %v4069_v3  ;;  %v2493_v3 = vld [vmem:[%s5144_s9 + $0x70] sm:$0xff] }
 0xf96   : > { %v4010_v49 = vpack.c.bf16 %v2494_v48, %v2493_v3 }
 0xf98   : > { %3987 = vmatpush3.bf16.msra.mxu0 %v3986_v19  ;;  %4011 = vmatpush3.bf16.msra.mxu1 %v4010_v49 }
0x1013   : > { %v2363_v58 = vpop.xlane.xlu0 %2362 }
0x1014   : > { %v2364_v59 = vmul.f32 0.009803922, %v2363_v58 }
0x1016   : > { %v2365_v61 = vsub.f32 %v2358_v45, %v2364_v59  ;;  %v2833_v45 = vld [vmem:[%s5141_s6 + $0x1] ss:$0 sm:$0xff] }
0x1018   : > { %v5008_v13 = vmul.f32 %v5005_v60, %v2365_v61 }
0x101a   : > { %v2367_v63 = vmul.f32 %v5008_v13, %v5008_v13 }
0x101c   : > { %v2368_v0 = vsel %vm701_vm4, %v2367_v63, 0.0 }
0x101d   : > { %2369 = vadd.xlane.f32.xlu1 %v2368_v0 }
0x10aa   : > { %v2370_v39 = vpop.xlane.xlu1 %2369 }
0x10ab   : > { %v2371_v40 = vmul.f32 0.009803922, %v2370_v39 }
0x10ad   : > { %v2372_v41 = vadd.f32 1e-05, %v2371_v40 }
0x10af   : > { %4041 = vrsqrt.f32 %v2372_v41 }
0x10b9   : > { %v4042_v42 = vpop.eup %4041 }
0x10ba   : > { %v2374_v44 = vmul.f32 %v4042_v42, %v5008_v13 }
0x10bc   : > { %v2379_v46 = vmul.f32 %v2832_v43, %v2374_v44 }
0x10be   : > { %v2384_v47 = vadd.f32 %v2833_v45, %v2379_v46 }
0x10c0   : > { %3627 = vmatmul.mubr.f32.vlgmr.msra.gmra.mrb[24].mxu0 %v2384_v47 }
0x1193   : > { %v2474_v53 = vpop.f32.mrb[24].mxu0 }
0x1194   : > { %v2475_v54 = vadd.f32 %v2834_v51, %v2474_v53  ;;  %v3628_v55 = vpop.f32.mrb[25].mxu0 }
0x1196   : > { %v2478_v56 = vmax.f32 %v2475_v54, 0.0 }
0x1198   : > { %3662 = vmatmul.mubr.f32.vlgmr.msra.gmra.mrb[24].mxu1 %v2478_v56 }
0x126b   : > { %v2566_v58 = vpop.f32.mrb[24].mxu1 }
0x126c   : > { %v2567_v59 = vadd.f32 %v2835_v57, %v2566_v58  ;;  %v3663_v61 = vpop.f32.mrb[25].mxu1 }
0x126e   : > { %v2570_v13 = vadd.f32 %v2567_v59, %v2384_v47 }
0x1270   : > { %v2573_v63 = vsel %vm701_vm4, %v2570_v13, 0.0 }
0x1271   : > { %2574 = vadd.xlane.f32.xlu0 %v2573_v63 }
0x12fe   : > { %v2575_v0 = vpop.xlane.xlu0 %2574 }
0x12ff   : > { %v2576_v1 = vmul.f32 0.009803922, %v2575_v0 }
0x1301   : > { %v2577_v2 = vsub.f32 %v2570_v13, %v2576_v1 }
0x1303   : > { %v2578_v4 = vmul.f32 %v5005_v60, %v2577_v2  ;;  %v2837_v60 = vld [vmem:[%s5141_s6 + $0x3] ss:$0 sm:$0xff] }
0x1305   : > { %v2579_v5 = vmul.f32 %v2578_v4, %v2578_v4 }
0x1307   : > { %v2580_v6 = vsel %vm701_vm4, %v2579_v5, 0.0 }
0x1308   : > { %2581 = vadd.xlane.f32.xlu1 %v2580_v6 }
0x1395   : > { %v2582_v7 = vpop.xlane.xlu1 %2581 }
0x1396   : > { %v2583_v8 = vmul.f32 0.009803922, %v2582_v7 }
0x1398   : > { %v2584_v9 = vadd.f32 1e-05, %v2583_v8 }
0x139a   : > { %4043 = vrsqrt.f32 %v2584_v9 }
0x13a4   : > { %v4044_v10 = vpop.eup %4043 }
0x13a5   : > { %v2586_v15 = vmul.f32 %v4044_v10, %v2578_v4 }
0x13a7   : > { %v2591_v17 = vmul.f32 %v2836_v14, %v2586_v15 }
0x13a9   : > { %v2596_v19 = vadd.f32 %v2837_v60, %v2591_v17 }
0x13ab   : > { %v2598_v18 = vadd.f32 %v2597_v16, %v2596_v19 }
0x13ad   : > { %2599 = vst [vmem:[%s334_s12] sm:$0x3f] %v2598_v18 }
0x13ae PF: > { %s26_s18 = sadd.s32 1, %s4066_s18  }
0x13af   : > { %p23_p9 = scmp.ge.s32.totalorder %s26_s18, 4  }
0x13b1   :  { %25 = sbr.rel (!%p23_p9) target bundleno = 16 (0x10), region = 98 }

// kernel: transformer_forward.3
= control target key start
LH: loop header
LB: loop body
LE: loop exit
PB: predicated region body
PF: predicated region fallthrough
CT: control target
= control target key end

     0   :  { %s15780_s0 = inlined_call_operand.vmem [shape: s32[2], index: 0, kind: input, shape index: {}]   ;;  %s15781_s1 = inlined_call_operand.vmem [shape: f32[2,1,128], index: 1, kind: input, shape index: {}]   ;;  %s15782_s2 = inlined_call_operand.vmem [shape: f32[4,128], index: 2, kind: input, shape index: {}]   ;;  %s15783_s3 = inlined_call_operand.vmem [shape: f32[2,6,128], index: 3, kind: input, shape index: {}]   ;;  %s15784_s4 = inlined_call_operand.vmem [shape: f32[1,128,128], index: 4, kind: input, shape index: {}]   ;;  %s15785_s5 = inlined_call_operand.vmem [shape: f32[1,7,128], index: 5, kind: input, shape index: {}]   ;;  %s15786_s6 = inlined_call_operand.vmem [shape: f32[1,4,128,16], index: 6, kind: input, shape index: {}]   ;;  %s15787_s7 = inlined_call_operand.vmem [shape: f32[1,4,128,16], index: 7, kind: input, shape index: {}]   ;;  %s15788_s8 = inlined_call_operand.vmem [shape: f32[1,4,128,16], index: 8, kind: input, shape index: {}]   ;;  %s15789_s9 = inlined_call_operand.vmem [shape: f32[1,4,16,128], index: 9, kind: input, shape index: {}]   ;;  %s15790_s10 = inlined_call_operand.vmem [shape: f32[1,128,128], index: 10, kind: input, shape index: {}]   ;;  %s15791_s11 = inlined_call_operand.vmem [shape: f32[1,1,128], index: 11, kind: input, shape index: {}]   ;;  %s15792_s12 = inlined_call_operand.vmem [shape: f32[1,128,128], index: 12, kind: input, shape index: {}]   ;;  %s15793_s13 = inlined_call_operand.vmem [shape: f32[128,128], index: 13, kind: input, shape index: {}]   ;;  %s15794_s14 = inlined_call_operand.vmem [shape: f32[2,5,128], index: 14, kind: output, shape index: {0}]   ;;  %s15795_s15 = inlined_call_operand.hbm [shape: f32[2,4,4,128], index: 15, kind: output, shape index: {1}]  }
   0x1   :  { %15802 = sst [smem:[#allocation13_spill]] %s15783_s3  ;;  %s21_s20 = sshll.u32 %s15780_s0, 4  ;;  %s22_s20 = int_to_ptr.vmem [resolvable:$true] %s21_s20 }
   0x2   :  { %s12356_s21 = scalar_lea.vmem %s22_s20, 16  ;;  %p12361_p1 = scmp.lt.s32.totalorder %s22_s20, %s22_s20 }
   0x3   :  { %p12357_p0 = scmp.ne.s32.totalorder %s22_s20, %s12356_s21  ;;  %p12362_p2 = scmp.lt.s32.totalorder %s12356_s21, %s12356_s21 }
   0x5   :  { %p12363_p3 = por %p12362_p2, %p12361_p1 }
   0x7   :  { %p12364_p4 = pnand %p12363_p3, %p12357_p0 }
   0x9   :  { %12367 = shalt.err (!%p12364_p4)  }
   0xa   :  { %s12434_s22 = smov [#allocation3]  }
   0xb   :  { %24 = dma.vmem_to_smem %s22_s20, 16, %s12434_s22, [#allocation2] }
   0xc   :  { %12412 = dma.done.wait [#allocation2], 16 }
   0xd   :  { %12413 = vsyncadd [#allocation2], 4294967280 }
   0xe   :  { %26 = sfence }
   0xf   :  { %27 = vsyncpa [#allocation5], 0 }
  0x10   :  { %29 = vsyncpa [#allocation5 + $0x1], 0  ;;  %s12525_s23 = smov 0   ;;  %s12527_s24 = smov 0  }
  0x11   :  { %s12529_s0 = smov 0   ;;  %s12531_s25 = smov 0  }
  0x12 LB: > { %15803 = sst [smem:[#allocation8_spill]] %s12420_s23  ;;  %s12546_s26 = sadd.s32 4294967295, %s12432_s25   ;;  %s12432_s25 = sphi %s12531_s25, %s15818_s25   ;;  %s12428_s0 = sphi %s12529_s0, %s15820_s0   ;;  %s12424_s24 = sphi %s12527_s24, %s15822_s24   ;;  %s12420_s23 = sphi %s12525_s23, %s15821_s23  }
  0x13   : > { %15804 = sst [smem:[#allocation9_spill]] %s12428_s0  ;;  %s8283_s27 = sadd.s32 4294967294, %s12432_s25  }
  0x14   : > { %s12550_s28 = sadd.s32 1, %s12432_s25   ;;  %s351_s29 = sadd.s32 1, %s12428_s0 }
  0x15   : > { %15805 = sst [smem:[#allocation10_spill]] %s12550_s28  ;;  %s348_s30 = ssub.s32 %s12432_s25, %s12550_s28 }
  0x16   : > { %p361_p5 = scmp.ne.s32.totalorder %s12428_s0, %s12424_s24  ;;  %p349_p6 = scmp.eq.s32.totalorder %s348_s30, 0 }
  0x17   : > { %p362_p7 = scmp.eq.s32.totalorder %s12546_s26, 1  ;;  %p367_p8 = scmp.ne.s32.totalorder %s12424_s24, %s12420_s23 }
  0x18   : > { %p368_p9 = scmp.eq.s32.totalorder %s8283_s27, 1  ;;  %p8286_p12 = scmp.ge.s32.totalorder %s12432_s25, 1 }
  0x19   : > { %s12561_s16 = scalar_select %p349_p6, %s12428_s0, %s351_s29  }
  0x1a   : > { %p12563_p10 = por %p362_p7, %p361_p5  ;;  %p12567_p11 = por %p368_p9, %p367_p8 }
  0x1b   : > { %15806 = sst [smem:[#allocation11_spill]] %s12561_s16  ;;  %p432_p13 = scmp.lt.s32.totalorder %s12432_s25, 3 }
  0x1c   : > { %s15808_s18 = scalar_select %p12567_p11, 1, 0 }
  0x1d   : > { %p433_p0 = pnand %p8286_p12, %p432_p13 }
  0x1e   : > { %15809 = sst [smem:[#allocation12_spill]] %s15808_s18  ;;  %v512_v0 = vld [vmem:[%s15787_s7] sm:$0xff] (!%p433_p0)  ;;  %v513_v1 = vld [vmem:[%s15787_s7 + $0x8] sm:$0xff] (!%p433_p0)  ;;  %v514_v2 = vld [vmem:[%s15787_s7 + $0x10] sm:$0xff] (!%p433_p0)  ;;  %v12435_v3 = vmov (!%p433_p0), 0.0|0.0   ;;  %vm12436_vm0 = vmmov (!%p433_p0), 0  }
  0x1f   : > { %436 = sbr.rel (%p433_p0) target bundleno = 23668 (0x5c74), region = 72  ;;  %11165 = vmatprep.subr.bf16.mxu0 (!%p433_p0), %v12435_v3  ;;  %v11166_v4 = vpack.c.bf16 (!%p433_p0), %v513_v1, %v512_v0  ;;  %v515_v5 = vld [vmem:[%s15787_s7 + $0x18] sm:$0xff] (!%p433_p0)  ;;  %v12437_v6 = vmov (!%p433_p0), 0.0   ;;  %11189 = vmatprep.subr.bf16.mxu1 (!%p433_p0), %v12435_v3  ;;  %v516_v8 = vld [vmem:[%s15787_s7 + $0x20] sm:$0xff] (!%p433_p0)  ;;  %v517_v9 = vld [vmem:[%s15787_s7 + $0x28] sm:$0xff] (!%p433_p0)  ;;  %p484_p1 = scmp.lt.s32.totalorder (!%p433_p0), %s12546_s26, 1 }
  0x20   : > { %9525 = vmatprep.mubr.msk.f32.mxu0 (!%p433_p0), %vm12436_vm0, %v12437_v6  ;;  %9560 = vmatprep.mubr.msk.f32.mxu1 (!%p433_p0), %vm12436_vm0, %v12437_v6  ;;  %v11169_v7 = vpack.c.bf16 (!%p433_p0), %v515_v5, %v514_v2  ;;  %v11172_v10 = vpack.c.bf16 (!%p433_p0), %v517_v9, %v516_v8  ;;  %v518_v11 = vld [vmem:[%s15787_s7 + $0x30] sm:$0xff] (!%p433_p0)  ;;  %v519_v12 = vld [vmem:[%s15787_s7 + $0x38] sm:$0xff] (!%p433_p0)  ;;  %v520_v14 = vld [vmem:[%s15787_s7 + $0x40] sm:$0xff] (!%p433_p0)  ;;  %s15810_s3 = sld [smem:[#allocation13_spill]] (!%p433_p0)  ;;  %vm1303_vm1 = vcmask (!%p433_p0), 1040384   ;;  %vm1406_vm3 = vcmask (!%p433_p0), 130048  }
  0x21   : > { %11167 = vmatpush3.bf16.msra.mxu0 (!%p433_p0), %v11166_v4  ;;  %v11175_v13 = vpack.c.bf16 (!%p433_p0), %v519_v12, %v518_v11  ;;  %v521_v15 = vld [vmem:[%s15787_s7 + $0x48] sm:$0xff] (!%p433_p0)  ;;  %v522_v17 = vld [vmem:[%s15787_s7 + $0x50] sm:$0xff] (!%p433_p0)  ;;  %v523_v18 = vld [vmem:[%s15787_s7 + $0x58] sm:$0xff] (!%p433_p0)  ;;  %vm1501_vm4 = vcmask (!%p433_p0), 1045504   ;;  %vm1485_vm6 = vcmask (!%p433_p0), 40960   ;;  %s15801_s21 = sand.u32 (!%p433_p0), 1, %s12424_s24  }
  0x22   : > { %11168 = vmatprep.subr.bf16.mxu0 (!%p433_p0), %v12435_v3  ;;  %v11178_v16 = vpack.c.bf16 (!%p433_p0), %v521_v15, %v520_v14  ;;  %v11181_v19 = vpack.c.bf16 (!%p433_p0), %v523_v18, %v522_v17  ;;  %v524_v20 = vld [vmem:[%s15787_s7 + $0x60] sm:$0xff] (!%p433_p0)  ;;  %v525_v21 = vld [vmem:[%s15787_s7 + $0x68] sm:$0xff] (!%p433_p0)  ;;  %v526_v23 = vld [vmem:[%s15787_s7 + $0x70] sm:$0xff] (!%p433_p0)  ;;  %vm1497_vm7 = vcmask (!%p433_p0), 48128   ;;  %s8700_s19 = sshll.u32 (!%p433_p0), %s12546_s26, 8 }
  0x23   : > { %v11184_v22 = vpack.c.bf16 (!%p433_p0), %v525_v21, %v524_v20  ;;  %v527_v24 = vld [vmem:[%s15787_s7 + $0x78] sm:$0xff] (!%p433_p0)  ;;  %v8307_v26 = vld [vmem:[%s15787_s7 + $0x100] sm:$0xff] (!%p433_p0)  ;;  %v8308_v27 = vld [vmem:[%s15787_s7 + $0x108] sm:$0xff] (!%p433_p0)  ;;  %s15726_s18 = scalar_lea.hbm (!%p433_p0), %s15795_s15, %s8700_s19 }
  0x24   : > { %v11187_v25 = vpack.c.bf16 (!%p433_p0), %v527_v24, %v526_v23  ;;  %v11214_v29 = vpack.c.bf16 (!%p433_p0), %v8308_v27, %v8307_v26  ;;  %v8309_v31 = vld [vmem:[%s15787_s7 + $0x110] sm:$0xff] (!%p433_p0)  ;;  %v8310_v32 = vld [vmem:[%s15787_s7 + $0x118] sm:$0xff] (!%p433_p0)  ;;  %v8311_v34 = vld [vmem:[%s15787_s7 + $0x120] sm:$0xff] (!%p433_p0) }
  0x25   : > { %11170 = vmatpush3.bf16.msra.mxu0 (!%p433_p0), %v11169_v7  ;;  %v11217_v33 = vpack.c.bf16 (!%p433_p0), %v8310_v32, %v8309_v31  ;;  %v8312_v35 = vld [vmem:[%s15787_s7 + $0x128] sm:$0xff] (!%p433_p0)  ;;  %v8313_v37 = vld [vmem:[%s15787_s7 + $0x130] sm:$0xff] (!%p433_p0)  ;;  %v8314_v38 = vld [vmem:[%s15787_s7 + $0x138] sm:$0xff] (!%p433_p0) }
  0x26   : > { %11171 = vmatprep.subr.bf16.mxu0 %v12435_v3  ;;  %s485_s0 = scalar_select %p484_p1, %s12546_s26, 1  ;;  %v11220_v36 = vpack.c.bf16 %v8312_v35, %v8311_v34  ;;  %v11223_v39 = vpack.c.bf16 %v8314_v38, %v8313_v37  ;;  %v8315_v40 = vld [vmem:[%s15787_s7 + $0x140] sm:$0xff]  ;;  %v8316_v41 = vld [vmem:[%s15787_s7 + $0x148] sm:$0xff]  ;;  %v8317_v43 = vld [vmem:[%s15787_s7 + $0x150] sm:$0xff] }
  0x27   : > { %v11226_v42 = vpack.c.bf16 %v8316_v41, %v8315_v40  ;;  %v8318_v44 = vld [vmem:[%s15787_s7 + $0x158] sm:$0xff]  ;;  %v8319_v46 = vld [vmem:[%s15787_s7 + $0x160] sm:$0xff]  ;;  %v8320_v47 = vld [vmem:[%s15787_s7 + $0x168] sm:$0xff] }
  0x28   : > { %s8288_s28 = sshll.u32 %s485_s0, 3  ;;  %s12648_s30 = scalar_lea.vmem %s15781_s1, %s485_s0  ;;  %v11229_v45 = vpack.c.bf16 %v8318_v44, %v8317_v43  ;;  %v11232_v48 = vpack.c.bf16 %v8320_v47, %v8319_v46  ;;  %v8321_v49 = vld [vmem:[%s15787_s7 + $0x170] sm:$0xff]  ;;  %v8322_v50 = vld [vmem:[%s15787_s7 + $0x178] sm:$0xff]  ;;  %v859_v52 = vld [vmem:[%s15788_s8] sm:$0xff] }
  0x29   : > { %11173 = vmatpush3.bf16.msra.mxu0 %v11172_v10  ;;  %s490_s16 = scalar_lea.vmem %s15810_s3, %s8288_s28  ;;  %s12655_s3 = scalar_lea.vmem %s15794_s14, %s8288_s28  ;;  %v1210_v30 = vld [vmem:[%s12648_s30] sm:$0x1]  ;;  %v11235_v51 = vpack.c.bf16 %v8322_v50, %v8321_v49  ;;  %v860_v53 = vld [vmem:[%s15788_s8 + $0x8] sm:$0xff]  ;;  %v861_v55 = vld [vmem:[%s15788_s8 + $0x10] sm:$0xff] }
  0x2a   : > { %11174 = vmatprep.subr.bf16.mxu0 %v12435_v3  ;;  %v12650_v28 = vld [vmem:[%s490_s16] sm:$0x3f]  ;;  %1211 = vst [vmem:[%s12655_s3] sm:$0x1] %v1210_v30  ;;  %v11262_v54 = vpack.c.bf16 %v860_v53, %v859_v52  ;;  %v862_v56 = vld [vmem:[%s15788_s8 + $0x18] sm:$0xff]  ;;  %v864_v59 = vld [vmem:[%s15788_s8 + $0x28] sm:$0xff]  ;;  %s507_s0 = sld [smem:[#allocation3 + %s12546_s26]] }
  0x2b   : > { %v11265_v57 = vpack.c.bf16 %v862_v56, %v861_v55  ;;  %v863_v58 = vld [vmem:[%s15788_s8 + $0x20] sm:$0xff]  ;;  %v865_v61 = vld [vmem:[%s15788_s8 + $0x30] sm:$0xff]  ;;  %v866_v62 = vld [vmem:[%s15788_s8 + $0x38] sm:$0xff]  ;;  %s8287_s28 = sshll.u32 %s15801_s21, 4  ;;  %s12439_s26 = smov [#allocation4]  }
  0x2c   : > { %v11268_v60 = vpack.c.bf16 %v864_v59, %v863_v58  ;;  %v11271_v63 = vpack.c.bf16 %v866_v62, %v865_v61  ;;  %v867_v0 = vld [vmem:[%s15788_s8 + $0x40] sm:$0xff]  ;;  %v868_v1 = vld [vmem:[%s15788_s8 + $0x48] sm:$0xff]  ;;  %v869_v4 = vld [vmem:[%s15788_s8 + $0x50] sm:$0xff]  ;;  %s13372_s16 = scalar_lea.vmem [#allocation4], %s8287_s28 }
  0x2d   : > { %11176 = vmatpush3.bf16.msra.mxu0 %v11175_v13  ;;  %v11274_v2 = vpack.c.bf16 %v868_v1, %v867_v0  ;;  %v870_v5 = vld [vmem:[%s15788_s8 + $0x58] sm:$0xff]  ;;  %v871_v8 = vld [vmem:[%s15788_s8 + $0x60] sm:$0xff]  ;;  %v872_v9 = vld [vmem:[%s15788_s8 + $0x68] sm:$0xff]  ;;  %1206 = vst [vmem:[%s13372_s16] sm:$0xf] %v12437_v6 }
  0x2e   : > { %11177 = vmatprep.subr.bf16.mxu0 %v12435_v3  ;;  %v11277_v7 = vpack.c.bf16 %v870_v5, %v869_v4  ;;  %v11280_v10 = vpack.c.bf16 %v872_v9, %v871_v8  ;;  %v873_v11 = vld [vmem:[%s15788_s8 + $0x70] sm:$0xff]  ;;  %v874_v12 = vld [vmem:[%s15788_s8 + $0x78] sm:$0xff]  ;;  %v8355_v14 = vld [vmem:[%s15788_s8 + $0x100] sm:$0xff]  ;;  %1207 = vst [vmem:[%s13372_s16 + $0x4] sm:$0xf] %v12437_v6 }
  0x2f   : > { %v11283_v13 = vpack.c.bf16 %v874_v12, %v873_v11  ;;  %v8356_v15 = vld [vmem:[%s15788_s8 + $0x108] sm:$0xff]  ;;  %v8357_v17 = vld [vmem:[%s15788_s8 + $0x110] sm:$0xff]  ;;  %v8358_v18 = vld [vmem:[%s15788_s8 + $0x118] sm:$0xff]  ;;  %1208 = vst [vmem:[%s13372_s16 + $0x8] sm:$0xf] %v12437_v6 }
  0x30   : > { %v8359_v20 = vld [vmem:[%s15788_s8 + $0x120] sm:$0xff]  ;;  %v8360_v21 = vld [vmem:[%s15788_s8 + $0x128] sm:$0xff]  ;;  %v8361_v23 = vld [vmem:[%s15788_s8 + $0x130] sm:$0xff]  ;;  %1209 = vst [vmem:[%s13372_s16 + $0xc] sm:$0xf] %v12437_v6 }
  0x31   : > { %11179 = vmatpush3.bf16.msra.mxu0 %v11178_v16  ;;  %v11310_v16 = vpack.c.bf16 %v8356_v15, %v8355_v14  ;;  %v8362_v24 = vld [vmem:[%s15788_s8 + $0x138] sm:$0xff]  ;;  %v8363_v26 = vld [vmem:[%s15788_s8 + $0x140] sm:$0xff]  ;;  %v8364_v27 = vld [vmem:[%s15788_s8 + $0x148] sm:$0xff] }
  0x32   : > { %11180 = vmatprep.subr.bf16.mxu0 %v12435_v3  ;;  %v8365_v30 = vld [vmem:[%s15788_s8 + $0x150] sm:$0xff]  ;;  %v8366_v31 = vld [vmem:[%s15788_s8 + $0x158] sm:$0xff]  ;;  %v8368_v34 = vld [vmem:[%s15788_s8 + $0x168] sm:$0xff] }
  0x33   : > { %v11325_v32 = vpack.c.bf16 %v8366_v31, %v8365_v30  ;;  %v8370_v37 = vld [vmem:[%s15788_s8 + $0x178] sm:$0xff]  ;;  %v1216_v40 = vld [vmem:[%s15784_s4 + $0x8] sm:$0xff]  ;;  %v1213_v0 = vld [vmem:[%s15782_s2] sm:$0x1] }
  0x34   : > { %v1218_v43 = vld [vmem:[%s15784_s4 + $0x18] sm:$0xff]  ;;  %v1220_v46 = vld [vmem:[%s15784_s4 + $0x28] sm:$0xff] }
  0x35   : > { %11182 = vmatpush3.bf16.msra.mxu0 %v11181_v19  ;;  %v11313_v19 = vpack.c.bf16 %v8358_v18, %v8357_v17  ;;  %v1222_v49 = vld [vmem:[%s15784_s4 + $0x38] sm:$0xff]  ;;  %v1224_v52 = vld [vmem:[%s15784_s4 + $0x48] sm:$0xff] }
  0x36   : > { %11183 = vmatprep.subr.bf16.mxu0 %v12435_v3  ;;  %v1226_v55 = vld [vmem:[%s15784_s4 + $0x58] sm:$0xff]  ;;  %v1228_v58 = vld [vmem:[%s15784_s4 + $0x68] sm:$0xff] }
  0x37   : > { %v1230_v61 = vld [vmem:[%s15784_s4 + $0x78] sm:$0xff]  ;;  %v8292_v17 = vld [vmem:[%s15787_s7 + $0x88] sm:$0xff] }
  0x38   : > { %v8300_v30 = vld [vmem:[%s15787_s7 + $0xc8] sm:$0xff] }
  0x39   : > { %11185 = vmatpush3.bf16.msra.mxu0 %v11184_v22  ;;  %v11316_v22 = vpack.c.bf16 %v8360_v21, %v8359_v20  ;;  %v8294_v20 = vld [vmem:[%s15787_s7 + $0x98] sm:$0xff] }
  0x3a   : > { %11186 = vmatprep.subr.bf16.mxu0 %v12435_v3 }
  0x3d   : > { %11188 = vmatpush3.bf16.msra.mxu0 %v11187_v25  ;;  %v11319_v25 = vpack.c.bf16 %v8362_v24, %v8361_v23  ;;  %v8296_v23 = vld [vmem:[%s15787_s7 + $0xa8] sm:$0xff] }
  0x3e   : > { %11213 = vmatprep.subr.bf16.mxu0 %v12435_v3 }
  0x40   : > { %9526 = vmatmul.mubr.f32.vlgmr.msra.gmra.mrb[0].mxu0 %v12650_v28 }
  0x41   : > { %11215 = vmatpush3.bf16.msra.mxu0 %v11214_v29  ;;  %9595 = vmatprep.mubr.msk.f32.mxu0 %vm12436_vm0, %v12437_v6  ;;  %v11322_v29 = vpack.c.bf16 %v8364_v27, %v8363_v26  ;;  %v8298_v26 = vld [vmem:[%s15787_s7 + $0xb8] sm:$0xff] }
  0x42   : > { %11216 = vmatprep.subr.bf16.mxu0 %v12435_v3 }
  0x45   : > { %11218 = vmatpush3.bf16.msra.mxu0 %v11217_v33  ;;  %v8367_v33 = vld [vmem:[%s15788_s8 + $0x160] sm:$0xff] }
  0x46   : > { %11219 = vmatprep.subr.bf16.mxu0 %v12435_v3  ;;  %v11328_v35 = vpack.c.bf16 %v8368_v34, %v8367_v33  ;;  %v8302_v33 = vld [vmem:[%s15787_s7 + $0xd8] sm:$0xff] }
  0x49   : > { %11221 = vmatpush3.bf16.msra.mxu0 %v11220_v36  ;;  %v8369_v36 = vld [vmem:[%s15788_s8 + $0x170] sm:$0xff] }
  0x4a   : > { %11222 = vmatprep.subr.bf16.mxu0 %v12435_v3  ;;  %v11331_v38 = vpack.c.bf16 %v8370_v37, %v8369_v36  ;;  %v8304_v36 = vld [vmem:[%s15787_s7 + $0xe8] sm:$0xff] }
  0x4d   : > { %11224 = vmatpush3.bf16.msra.mxu0 %v11223_v39  ;;  %v1215_v39 = vld [vmem:[%s15784_s4] sm:$0xff] }
  0x4e   : > { %11225 = vmatprep.subr.bf16.mxu0 %v12435_v3  ;;  %v11358_v41 = vpack.c.bf16 %v1216_v40, %v1215_v39  ;;  %v8306_v39 = vld [vmem:[%s15787_s7 + $0xf8] sm:$0xff]  ;;  %v8391_v40 = vld [vmem:[%s15786_s6 + $0x80] sm:$0xff] }
  0x51   : > { %11227 = vmatpush3.bf16.msra.mxu0 %v11226_v42  ;;  %v1217_v42 = vld [vmem:[%s15784_s4 + $0x10] sm:$0xff] }
  0x52   : > { %11228 = vmatprep.subr.bf16.mxu0 %v12435_v3  ;;  %v11361_v44 = vpack.c.bf16 %v1218_v43, %v1217_v42 }
  0x55   : > { %11230 = vmatpush3.bf16.msra.mxu0 %v11229_v45  ;;  %v1219_v45 = vld [vmem:[%s15784_s4 + $0x20] sm:$0xff] }
  0x56   : > { %11231 = vmatprep.subr.bf16.mxu0 %v12435_v3  ;;  %v11364_v47 = vpack.c.bf16 %v1220_v46, %v1219_v45  ;;  %v8323_v45 = vld [vmem:[%s15787_s7 + $0x180] sm:$0xff]  ;;  %v8324_v46 = vld [vmem:[%s15787_s7 + $0x188] sm:$0xff] }
  0x59   : > { %11233 = vmatpush3.bf16.msra.mxu0 %v11232_v48  ;;  %v1221_v48 = vld [vmem:[%s15784_s4 + $0x30] sm:$0xff] }
  0x5a   : > { %11234 = vmatprep.subr.bf16.mxu0 %v12435_v3  ;;  %v11367_v50 = vpack.c.bf16 %v1222_v49, %v1221_v48  ;;  %v8395_v49 = vld [vmem:[%s15786_s6 + $0xa0] sm:$0xff] }
  0x5d   : > { %11236 = vmatpush3.bf16.msra.mxu0 %v11235_v51  ;;  %v1223_v51 = vld [vmem:[%s15784_s4 + $0x40] sm:$0xff] }
  0x5e   : > { %11261 = vmatprep.subr.bf16.mxu0 %v12435_v3  ;;  %v11370_v53 = vpack.c.bf16 %v1224_v52, %v1223_v51  ;;  %v11238_v51 = vpack.c.bf16 %v8324_v46, %v8323_v45  ;;  %v8325_v52 = vld [vmem:[%s15787_s7 + $0x190] sm:$0xff]  ;;  %v8374_v46 = vld [vmem:[%s15788_s8 + $0x198] sm:$0xff] }
  0x5f   : > { %v8373_v45 = vld [vmem:[%s15788_s8 + $0x190] sm:$0xff] }
  0x60   : > { %9596 = vmatmul.mubr.f32.vlgmr.msra.gmra.mrb[2].mxu0 %v12650_v28 }
  0x61   : > { %11263 = vmatpush3.bf16.msra.mxu0 %v11262_v54  ;;  %9665 = vmatprep.mubr.msk.f32.mxu0 %vm12436_vm0, %v12437_v6  ;;  %v1225_v54 = vld [vmem:[%s15784_s4 + $0x50] sm:$0xff] }
  0x62   : > { %11264 = vmatprep.subr.bf16.mxu0 %v12435_v3  ;;  %v11373_v56 = vpack.c.bf16 %v1226_v55, %v1225_v54 }
  0x65   : > { %11266 = vmatpush3.bf16.msra.mxu0 %v11265_v57  ;;  %v1227_v57 = vld [vmem:[%s15784_s4 + $0x60] sm:$0xff] }
  0x66   : > { %11267 = vmatprep.subr.bf16.mxu0 %v12435_v3  ;;  %v11376_v59 = vpack.c.bf16 %v1228_v58, %v1227_v57  ;;  %v8328_v57 = vld [vmem:[%s15787_s7 + $0x1a8] sm:$0xff] }
  0x69   : > { %11269 = vmatpush3.bf16.msra.mxu0 %v11268_v60  ;;  %v1229_v60 = vld [vmem:[%s15784_s4 + $0x70] sm:$0xff] }
  0x6a   : > { %11270 = vmatprep.subr.bf16.mxu0 %v12435_v3  ;;  %v11379_v62 = vpack.c.bf16 %v1230_v61, %v1229_v60  ;;  %v8330_v60 = vld [vmem:[%s15787_s7 + $0x1b8] sm:$0xff] }
  0x6d   : > { %11272 = vmatpush3.bf16.msra.mxu0 %v11271_v63  ;;  %v1212_v63 = vld [vmem:[%s12648_s30] sm:$0x1] }
  0x6e   : > { %11273 = vmatprep.subr.bf16.mxu0 %v12435_v3  ;;  %v1214_v1 = vadd.f32 %v1213_v0, %v1212_v63  ;;  %v8332_v63 = vld [vmem:[%s15787_s7 + $0x1c8] sm:$0xff] }
  0x71   : > { %11275 = vmatpush3.bf16.msra.mxu0 %v11274_v2 }
  0x72   : > { %11276 = vmatprep.subr.bf16.mxu0 %v12435_v3 }
  0x75   : > { %11278 = vmatpush3.bf16.msra.mxu0 %v11277_v7 }
  0x76   : > { %11279 = vmatprep.subr.bf16.mxu0 %v12435_v3 }
  0x79   : > { %11281 = vmatpush3.bf16.msra.mxu0 %v11280_v10 }
  0x7a   : > { %11282 = vmatprep.subr.bf16.mxu0 %v12435_v3 }
  0x7d   : > { %11284 = vmatpush3.bf16.msra.mxu0 %v11283_v13 }
  0x7e   : > { %11309 = vmatprep.subr.bf16.mxu0 %v12435_v3 }
  0x80   : > { %9666 = vmatmul.mubr.f32.vlgmr.msra.gmra.mrb[4].mxu0 %v12650_v28 }
  0x81   : > { %11311 = vmatpush3.bf16.msra.mxu0 %v11310_v16  ;;  %9735 = vmatprep.mubr.msk.f32.mxu0 %vm12436_vm0, %v12437_v6  ;;  %v8291_v16 = vld [vmem:[%s15787_s7 + $0x80] sm:$0xff] }
  0x82   : > { %11312 = vmatprep.subr.bf16.mxu0 %v12435_v3  ;;  %v11190_v18 = vpack.c.bf16 %v8292_v17, %v8291_v16  ;;  %v8339_v17 = vld [vmem:[%s15788_s8 + $0x80] sm:$0xff] }
  0x84   : > { %11191 = vmatpush3.bf16.msra.mxu1 %v11190_v18  ;;  %v8340_v18 = vld [vmem:[%s15788_s8 + $0x88] sm:$0xff] }
  0x85   : > { %11314 = vmatpush3.bf16.msra.mxu0 %v11313_v19  ;;  %11192 = vmatprep.subr.bf16.mxu1 %v12435_v3  ;;  %v8293_v19 = vld [vmem:[%s15787_s7 + $0x90] sm:$0xff] }
  0x86   : > { %11315 = vmatprep.subr.bf16.mxu0 %v12435_v3  ;;  %v11193_v21 = vpack.c.bf16 %v8294_v20, %v8293_v19  ;;  %v11286_v19 = vpack.c.bf16 %v8340_v18, %v8339_v17  ;;  %v8341_v20 = vld [vmem:[%s15788_s8 + $0x90] sm:$0xff] }
  0x88   : > { %11194 = vmatpush3.bf16.msra.mxu1 %v11193_v21  ;;  %v8342_v21 = vld [vmem:[%s15788_s8 + $0x98] sm:$0xff] }
  0x89   : > { %11317 = vmatpush3.bf16.msra.mxu0 %v11316_v22  ;;  %v8295_v22 = vld [vmem:[%s15787_s7 + $0xa0] sm:$0xff]  ;;  %11195 = vmatprep.subr.bf16.mxu1 %v12435_v3 }
  0x8a   : > { %11318 = vmatprep.subr.bf16.mxu0 %v12435_v3  ;;  %v11196_v24 = vpack.c.bf16 %v8296_v23, %v8295_v22  ;;  %v11289_v22 = vpack.c.bf16 %v8342_v21, %v8341_v20  ;;  %v8343_v23 = vld [vmem:[%s15788_s8 + $0xa0] sm:$0xff]  ;;  %v1323_v20 = vld [vmem:[%s15786_s6 + $0x18] sm:$0xff] }
  0x8c   : > { %11197 = vmatpush3.bf16.msra.mxu1 %v11196_v24  ;;  %v8344_v24 = vld [vmem:[%s15788_s8 + $0xa8] sm:$0xff] }
  0x8d   : > { %11320 = vmatpush3.bf16.msra.mxu0 %v11319_v25  ;;  %v8297_v25 = vld [vmem:[%s15787_s7 + $0xb0] sm:$0xff]  ;;  %11198 = vmatprep.subr.bf16.mxu1 %v12435_v3 }
  0x8e   : > { %11321 = vmatprep.subr.bf16.mxu0 %v12435_v3  ;;  %v11199_v27 = vpack.c.bf16 %v8298_v26, %v8297_v25  ;;  %v11292_v25 = vpack.c.bf16 %v8344_v24, %v8343_v23  ;;  %v8345_v26 = vld [vmem:[%s15788_s8 + $0xb0] sm:$0xff]  ;;  %v1324_v23 = vld [vmem:[%s15786_s6 + $0x20] sm:$0xff]  ;;  %v1325_v24 = vld [vmem:[%s15786_s6 + $0x28] sm:$0xff] }
  0x90   : > { %11200 = vmatpush3.bf16.msra.mxu1 %v11199_v27  ;;  %v8346_v27 = vld [vmem:[%s15788_s8 + $0xb8] sm:$0xff] }
  0x91   : > { %11323 = vmatpush3.bf16.msra.mxu0 %v11322_v29  ;;  %v8299_v29 = vld [vmem:[%s15787_s7 + $0xc0] sm:$0xff]  ;;  %11201 = vmatprep.subr.bf16.mxu1 %v12435_v3 }
  0x92   : > { %11324 = vmatprep.subr.bf16.mxu0 %v12435_v3  ;;  %v11202_v31 = vpack.c.bf16 %v8300_v30, %v8299_v29  ;;  %v11295_v29 = vpack.c.bf16 %v8346_v27, %v8345_v26  ;;  %v8347_v30 = vld [vmem:[%s15788_s8 + $0xc0] sm:$0xff]  ;;  %v1327_v26 = vld [vmem:[%s15786_s6 + $0x38] sm:$0xff] }
  0x94   : > { %11203 = vmatpush3.bf16.msra.mxu1 %v11202_v31  ;;  %v8348_v31 = vld [vmem:[%s15788_s8 + $0xc8] sm:$0xff] }
  0x95   : > { %11326 = vmatpush3.bf16.msra.mxu0 %v11325_v32  ;;  %v8301_v32 = vld [vmem:[%s15787_s7 + $0xd0] sm:$0xff]  ;;  %11204 = vmatprep.subr.bf16.mxu1 %v12435_v3 }
  0x96   : > { %11327 = vmatprep.subr.bf16.mxu0 %v12435_v3  ;;  %v11205_v34 = vpack.c.bf16 %v8302_v33, %v8301_v32  ;;  %v11298_v32 = vpack.c.bf16 %v8348_v31, %v8347_v30  ;;  %v8349_v33 = vld [vmem:[%s15788_s8 + $0xd0] sm:$0xff]  ;;  %v1329_v30 = vld [vmem:[%s15786_s6 + $0x48] sm:$0xff] }
  0x98   : > { %11206 = vmatpush3.bf16.msra.mxu1 %v11205_v34  ;;  %v8350_v34 = vld [vmem:[%s15788_s8 + $0xd8] sm:$0xff] }
  0x99   : > { %11329 = vmatpush3.bf16.msra.mxu0 %v11328_v35  ;;  %v8303_v35 = vld [vmem:[%s15787_s7 + $0xe0] sm:$0xff]  ;;  %11207 = vmatprep.subr.bf16.mxu1 %v12435_v3 }
  0x9a   : > { %11330 = vmatprep.subr.bf16.mxu0 %v12435_v3  ;;  %v11208_v37 = vpack.c.bf16 %v8304_v36, %v8303_v35  ;;  %v11301_v35 = vpack.c.bf16 %v8350_v34, %v8349_v33  ;;  %v8351_v36 = vld [vmem:[%s15788_s8 + $0xe0] sm:$0xff]  ;;  %v8398_v33 = vld [vmem:[%s15786_s6 + $0xb8] sm:$0xff] }
  0x9c   : > { %11209 = vmatpush3.bf16.msra.mxu1 %v11208_v37  ;;  %v8352_v37 = vld [vmem:[%s15788_s8 + $0xe8] sm:$0xff] }
  0x9d   : > { %11332 = vmatpush3.bf16.msra.mxu0 %v11331_v38  ;;  %v8305_v38 = vld [vmem:[%s15787_s7 + $0xf0] sm:$0xff]  ;;  %11210 = vmatprep.subr.bf16.mxu1 %v12435_v3 }
  0x9e   : > { %11357 = vmatprep.subr.bf16.mxu0 %v12435_v3  ;;  %v11211_v42 = vpack.c.bf16 %v8306_v39, %v8305_v38  ;;  %v11304_v38 = vpack.c.bf16 %v8352_v37, %v8351_v36  ;;  %v8353_v39 = vld [vmem:[%s15788_s8 + $0xf0] sm:$0xff]  ;;  %v1331_v36 = vld [vmem:[%s15786_s6 + $0x58] sm:$0xff] }
  0xa0   : > { %9736 = vmatmul.mubr.f32.vlgmr.msra.gmra.mrb[6].mxu0 %v12650_v28  ;;  %11212 = vmatpush3.bf16.msra.mxu1 %v11211_v42  ;;  %v8371_v42 = vld [vmem:[%s15788_s8 + $0x180] sm:$0xff] }
  0xa1   : > { %11359 = vmatpush3.bf16.msra.mxu0 %v11358_v41  ;;  %9805 = vmatprep.mubr.msk.f32.mxu0 %vm12436_vm0, %v12437_v6  ;;  %v8392_v41 = vld [vmem:[%s15786_s6 + $0x88] sm:$0xff] }
  0xa2   : > { %11360 = vmatprep.subr.bf16.mxu0 %v12435_v3  ;;  %v11406_v43 = vpack.c.bf16 %v8392_v41, %v8391_v40  ;;  %11237 = vmatprep.subr.bf16.mxu1 %v12435_v3  ;;  %v8354_v40 = vld [vmem:[%s15788_s8 + $0xf8] sm:$0xff] }
  0xa3   : > { %9561 = vmatmul.mubr.f32.vlgmr.msra.gmra.mrb[0].mxu1 %v12650_v28  ;;  %v11307_v41 = vpack.c.bf16 %v8354_v40, %v8353_v39  ;;  %v8400_v39 = vld [vmem:[%s15786_s6 + $0xc8] sm:$0xff] }
  0xa4   : > { %11239 = vmatpush3.bf16.msra.mxu1 %v11238_v51  ;;  %9630 = vmatprep.mubr.msk.f32.mxu1 %vm12436_vm0, %v12437_v6  ;;  %v8377_v51 = vld [vmem:[%s15788_s8 + $0x1b0] sm:$0xff] }
  0xa5   : > { %11362 = vmatpush3.bf16.msra.mxu0 %v11361_v44  ;;  %v8393_v44 = vld [vmem:[%s15786_s6 + $0x90] sm:$0xff]  ;;  %11240 = vmatprep.subr.bf16.mxu1 %v12435_v3 }
  0xa6   : > { %11363 = vmatprep.subr.bf16.mxu0 %v12435_v3 }
  0xa9   : > { %11365 = vmatpush3.bf16.msra.mxu0 %v11364_v47  ;;  %v8394_v47 = vld [vmem:[%s15786_s6 + $0x98] sm:$0xff] }
  0xaa   : > { %11366 = vmatprep.subr.bf16.mxu0 %v12435_v3  ;;  %v11409_v48 = vpack.c.bf16 %v8394_v47, %v8393_v44  ;;  %v11337_v47 = vpack.c.bf16 %v8374_v46, %v8373_v45  ;;  %v8402_v45 = vld [vmem:[%s15786_s6 + $0xd8] sm:$0xff] }
  0xad   : > { %11368 = vmatpush3.bf16.msra.mxu0 %v11367_v50  ;;  %v8396_v50 = vld [vmem:[%s15786_s6 + $0xa8] sm:$0xff] }
  0xae   : > { %11369 = vmatprep.subr.bf16.mxu0 %v12435_v3  ;;  %v11412_v54 = vpack.c.bf16 %v8396_v50, %v8395_v49  ;;  %v8376_v49 = vld [vmem:[%s15788_s8 + $0x1a8] sm:$0xff] }
  0xb1   : > { %11371 = vmatpush3.bf16.msra.mxu0 %v11370_v53  ;;  %v8326_v53 = vld [vmem:[%s15787_s7 + $0x198] sm:$0xff] }
  0xb2   : > { %11372 = vmatprep.subr.bf16.mxu0 %v12435_v3  ;;  %v11241_v55 = vpack.c.bf16 %v8326_v53, %v8325_v52  ;;  %v8378_v52 = vld [vmem:[%s15788_s8 + $0x1b8] sm:$0xff] }
  0xb3   : > { %v11343_v53 = vpack.c.bf16 %v8378_v52, %v8377_v51  ;;  %v8404_v51 = vld [vmem:[%s15786_s6 + $0xe8] sm:$0xff] }
  0xb4   : > { %11242 = vmatpush3.bf16.msra.mxu1 %v11241_v55  ;;  %v8380_v55 = vld [vmem:[%s15788_s8 + $0x1c8] sm:$0xff] }
  0xb5   : > { %11374 = vmatpush3.bf16.msra.mxu0 %v11373_v56  ;;  %v8327_v56 = vld [vmem:[%s15787_s7 + $0x1a0] sm:$0xff]  ;;  %11243 = vmatprep.subr.bf16.mxu1 %v12435_v3 }
  0xb6   : > { %11375 = vmatprep.subr.bf16.mxu0 %v12435_v3  ;;  %v11244_v58 = vpack.c.bf16 %v8328_v57, %v8327_v56  ;;  %v8381_v57 = vld [vmem:[%s15788_s8 + $0x1d0] sm:$0xff] }
  0xb8   : > { %11245 = vmatpush3.bf16.msra.mxu1 %v11244_v58  ;;  %v8382_v58 = vld [vmem:[%s15788_s8 + $0x1d8] sm:$0xff] }
  0xb9   : > { %11377 = vmatpush3.bf16.msra.mxu0 %v11376_v59  ;;  %v8329_v59 = vld [vmem:[%s15787_s7 + $0x1b0] sm:$0xff]  ;;  %11246 = vmatprep.subr.bf16.mxu1 %v12435_v3 }
  0xba   : > { %11378 = vmatprep.subr.bf16.mxu0 %v12435_v3  ;;  %v11247_v61 = vpack.c.bf16 %v8330_v60, %v8329_v59  ;;  %v495_v59 = vlaneseq  ;;  %v11349_v60 = vpack.c.bf16 %v8382_v58, %v8381_v57 }
  0xbc   : > { %11248 = vmatpush3.bf16.msra.mxu1 %v11247_v61  ;;  %v8383_v61 = vld [vmem:[%s15788_s8 + $0x1e0] sm:$0xff] }
  0xbd   : > { %11380 = vmatpush3.bf16.msra.mxu0 %v11379_v62  ;;  %v8331_v62 = vld [vmem:[%s15787_s7 + $0x1c0] sm:$0xff]  ;;  %11249 = vmatprep.subr.bf16.mxu1 %v12435_v3 }
  0xbe   : > { %11405 = vmatprep.subr.bf16.mxu0 %v12435_v3  ;;  %v11250_v0 = vpack.c.bf16 %v8332_v63, %v8331_v62  ;;  %v8384_v62 = vld [vmem:[%s15788_s8 + $0x1e8] sm:$0xff]  ;;  %v13153_v63 = vand.u32 127, %v495_v59 }
  0xc0   : > { %9806 = vmatmul.mubr.f32.vlgmr.msra.gmra.mrb[8].mxu0 %v1214_v1  ;;  %11251 = vmatpush3.bf16.msra.mxu1 %v11250_v0  ;;  %v11352_v0 = vpack.c.bf16 %v8384_v62, %v8383_v61  ;;  %vm497_vm2 = vcmp.lt.s32.totalorder %v13153_v63, 38  ;;  %vm501_vm8 = vcmp.ge.s32.totalorder %v13153_v63, 9  ;;  %vm502_vm9 = vcmp.lt.s32.totalorder %v13153_v63, 18 }
  0xc1   : > { %9885 = vmatprep.mubr.msk.f32.mxu0 %vm12436_vm0, %v12437_v6  ;;  %11407 = vmatpush3.bf16.msra.mxu0 %v11406_v43  ;;  %v8372_v43 = vld [vmem:[%s15788_s8 + $0x188] sm:$0xff]  ;;  %vm13744_vm10 = vmand %vm501_vm8, %vm502_vm9  ;;  %vm500_vm11 = vcmp.lt.s32.totalorder %v13153_v63, 9  ;;  %vm504_vm12 = vcmp.ge.s32.totalorder %v13153_v63, 18  ;;  %vm505_vm13 = vcmp.lt.s32.totalorder %v13153_v63, 19 }
  0xc2   : > { %11408 = vmatprep.subr.bf16.mxu0 %v12435_v3  ;;  %11252 = vmatprep.subr.bf16.mxu1 %v12435_v3  ;;  %v11334_v44 = vpack.c.bf16 %v8372_v43, %v8371_v42  ;;  %v1333_v42 = vld [vmem:[%s15786_s6 + $0x68] sm:$0xff]  ;;  %vm13827_vm14 = vmand %vm504_vm12, %vm505_vm13 }
  0xc5   : > { %11410 = vmatpush3.bf16.msra.mxu0 %v11409_v48  ;;  %v8375_v48 = vld [vmem:[%s15788_s8 + $0x1a0] sm:$0xff] }
  0xc6   : > { %11411 = vmatprep.subr.bf16.mxu0 %v12435_v3  ;;  %v11340_v50 = vpack.c.bf16 %v8376_v49, %v8375_v48  ;;  %v1335_v48 = vld [vmem:[%s15786_s6 + $0x78] sm:$0xff] }
  0xc9   : > { %11413 = vmatpush3.bf16.msra.mxu0 %v11412_v54  ;;  %v8379_v54 = vld [vmem:[%s15788_s8 + $0x1c0] sm:$0xff] }
  0xca   : > { %11414 = vmatprep.subr.bf16.mxu0 %v12435_v3  ;;  %v11346_v56 = vpack.c.bf16 %v8380_v55, %v8379_v54  ;;  %v8406_v54 = vld [vmem:[%s15786_s6 + $0xf8] sm:$0xff] }
 0x113   : > { %v12896_v2 = vpop.f32.mrb[0].mxu0 }
 0x114   : > { %v9527_v4 = vpop.f32.mrb[1].mxu0 }
 0x115   : > { %v8334_v4 = vld [vmem:[%s15787_s7 + $0x1d8] sm:$0xff] }
 0x133   : > { %v12898_v5 = vpop.f32.mrb[2].mxu0 }
 0x134   : > { %v9597_v7 = vpop.f32.mrb[3].mxu0 }
 0x153   : > { %v12900_v8 = vpop.f32.mrb[4].mxu0 }
 0x154   : > { %v9667_v9 = vpop.f32.mrb[5].mxu0 }
 0x155   : > { %v8335_v9 = vld [vmem:[%s15787_s7 + $0x1e0] sm:$0xff] }
 0x173   : > { %v12902_v10 = vpop.f32.mrb[6].mxu0 }
 0x174   : > { %v9737_v11 = vpop.f32.mrb[7].mxu0 }
 0x175   : > { %v8336_v11 = vld [vmem:[%s15787_s7 + $0x1e8] sm:$0xff] }
 0x193   : > { %v1297_v12 = vpop.f32.mrb[8].mxu0 }
 0x194   : > { %v12904_v13 = vadd.f32 %v1297_v12, %v1214_v1  ;;  %v9807_v14 = vpop.f32.mrb[9].mxu0  ;;  %v8333_v1 = vld [vmem:[%s15787_s7 + $0x1d0] sm:$0xff]  ;;  %v11256_v12 = vpack.c.bf16 %v8336_v11, %v8335_v9 }
 0x195   : > { %v11253_v7 = vpack.c.bf16 %v8334_v4, %v8333_v1  ;;  %v8337_v14 = vld [vmem:[%s15787_s7 + $0x1f0] sm:$0xff]  ;;  %v8386_v4 = vld [vmem:[%s15788_s8 + $0x1f8] sm:$0xff] }
 0x196   : > { %v1304_v15 = vsel %vm1303_vm1, %v12904_v13, 0.0  ;;  %v8385_v1 = vld [vmem:[%s15788_s8 + $0x1f0] sm:$0xff] }
 0x197   : > { %1305 = vadd.xlane.f32.xlu0 %v1304_v15  ;;  %11254 = vmatpush3.bf16.msra.mxu1 %v11253_v7  ;;  %v8338_v15 = vld [vmem:[%s15787_s7 + $0x1f8] sm:$0xff]  ;;  %v11355_v9 = vpack.c.bf16 %v8386_v4, %v8385_v1  ;;  %v1301_v1 = vld [vmem:[%s15785_s5] sm:$0x1] }
 0x198   : > { %11255 = vmatprep.subr.bf16.mxu1 %v12435_v3  ;;  %v11259_v16 = vpack.c.bf16 %v8338_v15, %v8337_v14  ;;  %v1321_v14 = vld [vmem:[%s15786_s6 + $0x8] sm:$0xff]  ;;  %v13171_v15 = vsel %vm497_vm2, 1.0, %v12437_v6 }
 0x19b   : > { %11257 = vmatpush3.bf16.msra.mxu1 %v11256_v12  ;;  %v1320_v12 = vld [vmem:[%s15786_s6] sm:$0xff] }
 0x19c   : > { %11258 = vmatprep.subr.bf16.mxu1 %v12435_v3  ;;  %v11382_v17 = vpack.c.bf16 %v1321_v14, %v1320_v12 }
 0x19f   : > { %11260 = vmatpush3.bf16.msra.mxu1 %v11259_v16 }
 0x1a0   : > { %11285 = vmatprep.subr.bf16.mxu1 %v12435_v3 }
 0x1a2   : > { %9631 = vmatmul.mubr.f32.vlgmr.msra.gmra.mrb[2].mxu1 %v12650_v28 }
 0x1a3   : > { %11287 = vmatpush3.bf16.msra.mxu1 %v11286_v19  ;;  %9700 = vmatprep.mubr.msk.f32.mxu1 %vm12436_vm0, %v12437_v6  ;;  %v1322_v19 = vld [vmem:[%s15786_s6 + $0x10] sm:$0xff] }
 0x1a4   : > { %11288 = vmatprep.subr.bf16.mxu1 %v12435_v3 }
 0x1a7   : > { %11290 = vmatpush3.bf16.msra.mxu1 %v11289_v22 }
 0x1a8   : > { %11291 = vmatprep.subr.bf16.mxu1 %v12435_v3 }
 0x1ab   : > { %11293 = vmatpush3.bf16.msra.mxu1 %v11292_v25  ;;  %v1326_v25 = vld [vmem:[%s15786_s6 + $0x30] sm:$0xff] }
 0x1ac   : > { %11294 = vmatprep.subr.bf16.mxu1 %v12435_v3  ;;  %v11391_v27 = vpack.c.bf16 %v1327_v26, %v1326_v25  ;;  %v8449_v25 = vld [vmem:[%s15786_s6 + $0x1c8] sm:$0xff] }
 0x1af   : > { %11296 = vmatpush3.bf16.msra.mxu1 %v11295_v29  ;;  %v1328_v29 = vld [vmem:[%s15786_s6 + $0x40] sm:$0xff] }
 0x1b0   : > { %11297 = vmatprep.subr.bf16.mxu1 %v12435_v3  ;;  %v11394_v31 = vpack.c.bf16 %v1329_v30, %v1328_v29  ;;  %v8450_v29 = vld [vmem:[%s15786_s6 + $0x1d0] sm:$0xff]  ;;  %v8451_v30 = vld [vmem:[%s15786_s6 + $0x1d8] sm:$0xff] }
 0x1b3   : > { %11299 = vmatpush3.bf16.msra.mxu1 %v11298_v32  ;;  %v8397_v32 = vld [vmem:[%s15786_s6 + $0xb0] sm:$0xff] }
 0x1b4   : > { %11300 = vmatprep.subr.bf16.mxu1 %v12435_v3  ;;  %v11415_v34 = vpack.c.bf16 %v8398_v33, %v8397_v32  ;;  %v11478_v32 = vpack.c.bf16 %v8451_v30, %v8450_v29  ;;  %v8452_v33 = vld [vmem:[%s15786_s6 + $0x1e0] sm:$0xff]  ;;  %v1576_v30 = vld [vmem:[%s15789_s9 + $0x8] sm:$0xff] }
 0x1b5   : > { %v1575_v29 = vld [vmem:[%s15789_s9] sm:$0xff] }
 0x1b6   : > { %11416 = vmatpush3.bf16.msra.mxu0 %v11415_v34  ;;  %v8453_v34 = vld [vmem:[%s15786_s6 + $0x1e8] sm:$0xff] }
 0x1b7   : > { %11302 = vmatpush3.bf16.msra.mxu1 %v11301_v35  ;;  %v1330_v35 = vld [vmem:[%s15786_s6 + $0x50] sm:$0xff]  ;;  %11417 = vmatprep.subr.bf16.mxu0 %v12435_v3 }
 0x1b8   : > { %11303 = vmatprep.subr.bf16.mxu1 %v12435_v3  ;;  %v11397_v37 = vpack.c.bf16 %v1331_v36, %v1330_v35  ;;  %v11481_v35 = vpack.c.bf16 %v8453_v34, %v8452_v33  ;;  %v8454_v36 = vld [vmem:[%s15786_s6 + $0x1f0] sm:$0xff]  ;;  %v8417_v33 = vld [vmem:[%s15786_s6 + $0x108] sm:$0xff] }
 0x1bb   : > { %11305 = vmatpush3.bf16.msra.mxu1 %v11304_v38  ;;  %v8399_v38 = vld [vmem:[%s15786_s6 + $0xc0] sm:$0xff] }
 0x1bc   : > { %11306 = vmatprep.subr.bf16.mxu1 %v12435_v3  ;;  %v11418_v40 = vpack.c.bf16 %v8400_v39, %v8399_v38 }
 0x1be   : > { %11419 = vmatpush3.bf16.msra.mxu0 %v11418_v40 }
 0x1bf   : > { %11308 = vmatpush3.bf16.msra.mxu1 %v11307_v41  ;;  %v1332_v41 = vld [vmem:[%s15786_s6 + $0x60] sm:$0xff]  ;;  %11420 = vmatprep.subr.bf16.mxu0 %v12435_v3 }
 0x1c0   : > { %11333 = vmatprep.subr.bf16.mxu1 %v12435_v3  ;;  %v11400_v43 = vpack.c.bf16 %v1333_v42, %v1332_v41 }
 0x1c2   : > { %9701 = vmatmul.mubr.f32.vlgmr.msra.gmra.mrb[4].mxu1 %v12650_v28 }
 0x1c3   : > { %11335 = vmatpush3.bf16.msra.mxu1 %v11334_v44  ;;  %9770 = vmatprep.mubr.msk.f32.mxu1 %vm12436_vm0, %v12437_v6  ;;  %v8401_v44 = vld [vmem:[%s15786_s6 + $0xd0] sm:$0xff] }
 0x1c4   : > { %11336 = vmatprep.subr.bf16.mxu1 %v12435_v3  ;;  %v11421_v46 = vpack.c.bf16 %v8402_v45, %v8401_v44 }
 0x1c6   : > { %11422 = vmatpush3.bf16.msra.mxu0 %v11421_v46 }
 0x1c7   : > { %11338 = vmatpush3.bf16.msra.mxu1 %v11337_v47  ;;  %v1334_v47 = vld [vmem:[%s15786_s6 + $0x70] sm:$0xff]  ;;  %11423 = vmatprep.subr.bf16.mxu0 %v12435_v3 }
 0x1c8   : > { %11339 = vmatprep.subr.bf16.mxu1 %v12435_v3  ;;  %v11403_v49 = vpack.c.bf16 %v1335_v48, %v1334_v47  ;;  %v508_v47 = vstv %s507_s0  ;;  %s15815_s0 = sand.u32 1, %s12424_s24  }
 0x1c9   : > { %vm509_vm5 = vcmp.lt.s32.totalorder %v13153_v63, %v508_v47  ;;  %s15732_s28 = scalar_lea.sflag [#allocation5], %s15815_s0 }
 0x1cb   : > { %11341 = vmatpush3.bf16.msra.mxu1 %v11340_v50  ;;  %v8403_v50 = vld [vmem:[%s15786_s6 + $0xe0] sm:$0xff] }
 0x1cc   : > { %11342 = vmatprep.subr.bf16.mxu1 %v12435_v3  ;;  %v11424_v52 = vpack.c.bf16 %v8404_v51, %v8403_v50 }
 0x1ce   : > { %11425 = vmatpush3.bf16.msra.mxu0 %v11424_v52 }
 0x1cf   : > { %11344 = vmatpush3.bf16.msra.mxu1 %v11343_v53  ;;  %11426 = vmatprep.subr.bf16.mxu0 %v12435_v3  ;;  %v8405_v53 = vld [vmem:[%s15786_s6 + $0xf0] sm:$0xff] }
 0x1d0   : > { %11345 = vmatprep.subr.bf16.mxu1 %v12435_v3  ;;  %v11427_v55 = vpack.c.bf16 %v8406_v54, %v8405_v53 }
 0x1d2   : > { %11428 = vmatpush3.bf16.msra.mxu0 %v11427_v55 }
 0x1d3   : > { %11347 = vmatpush3.bf16.msra.mxu1 %v11346_v56  ;;  %11462 = vmatprep.subr.bf16.mxu0 %v12435_v3  ;;  %v13269_v56 = vpop.f32.mrb[0].mxu1 }
 0x1d4   : > { %11348 = vmatprep.subr.bf16.mxu1 %v12435_v3  ;;  %v9562_v57 = vpop.f32.mrb[1].mxu1 }
 0x1d7   : > { %11350 = vmatpush3.bf16.msra.mxu1 %v11349_v60 }
 0x1d8   : > { %11351 = vmatprep.subr.bf16.mxu1 %v12435_v3 }
 0x1db   : > { %11353 = vmatpush3.bf16.msra.mxu1 %v11352_v0 }
 0x1dc   : > { %11354 = vmatprep.subr.bf16.mxu1 %v12435_v3 }
 0x1df   : > { %11356 = vmatpush3.bf16.msra.mxu1 %v11355_v9  ;;  %v8441_v9 = vld [vmem:[%s15786_s6 + $0x188] sm:$0xff] }
 0x1e0   : > { %11381 = vmatprep.subr.bf16.mxu1 %v12435_v3 }
 0x1e2   : > { %9771 = vmatmul.mubr.f32.vlgmr.msra.gmra.mrb[6].mxu1 %v12650_v28  ;;  %v11388_v28 = vpack.c.bf16 %v1325_v24, %v1324_v23  ;;  %v8447_v23 = vld [vmem:[%s15786_s6 + $0x1b8] sm:$0xff] }
 0x1e3   : > { %11383 = vmatpush3.bf16.msra.mxu1 %v11382_v17  ;;  %9840 = vmatprep.mubr.msk.f32.mxu1 %vm12436_vm0, %v12437_v6  ;;  %v8442_v17 = vld [vmem:[%s15786_s6 + $0x190] sm:$0xff] }
 0x1e4   : > { %11384 = vmatprep.subr.bf16.mxu1 %v12435_v3 }
 0x224   : > { %v1306_v7 = vpop.xlane.xlu0 %1305 }
 0x225   : > { %v1307_v11 = vmul.f32 0.02631579, %v1306_v7  ;;  %v8440_v7 = vld [vmem:[%s15786_s6 + $0x180] sm:$0xff] }
 0x226   : > { %v11463_v14 = vpack.c.bf16 %v8441_v9, %v8440_v7 }
 0x227   : > { %v1308_v16 = vsub.f32 %v12904_v13, %v1307_v11  ;;  %v11385_v13 = vpack.c.bf16 %v1323_v20, %v1322_v19  ;;  %v1302_v11 = vld [vmem:[%s15785_s5 + $0x1] sm:$0x1] }
 0x228   : > { %v8444_v20 = vld [vmem:[%s15786_s6 + $0x1a0] sm:$0xff] }
 0x229   : > { %v13175_v18 = vmul.f32 %v13171_v15, %v1308_v16  ;;  %11386 = vmatpush3.bf16.msra.mxu1 %v11385_v13 }
 0x22a   : > { %11387 = vmatprep.subr.bf16.mxu1 %v12435_v3 }
 0x22b   : > { %v1310_v21 = vmul.f32 %v13175_v18, %v13175_v18 }
 0x22d   : > { %v1311_v22 = vsel %vm1303_vm1, %v1310_v21, 0.0  ;;  %11389 = vmatpush3.bf16.msra.mxu1 %v11388_v28  ;;  %v8445_v21 = vld [vmem:[%s15786_s6 + $0x1a8] sm:$0xff]  ;;  %v8448_v28 = vld [vmem:[%s15786_s6 + $0x1c0] sm:$0xff] }
 0x22e   : > { %1312 = vadd.xlane.f32.xlu0 %v1311_v22  ;;  %11390 = vmatprep.subr.bf16.mxu1 %v12435_v3  ;;  %v11469_v13 = vpack.c.bf16 %v8445_v21, %v8444_v20  ;;  %v8446_v22 = vld [vmem:[%s15786_s6 + $0x1b0] sm:$0xff]  ;;  %v11475_v26 = vpack.c.bf16 %v8449_v25, %v8448_v28 }
 0x22f   : > { %v11472_v24 = vpack.c.bf16 %v8447_v23, %v8446_v22  ;;  %v8411_v23 = vld [vmem:[%s15789_s9 + $0x10] sm:$0xff] }
 0x231   : > { %11392 = vmatpush3.bf16.msra.mxu1 %v11391_v27 }
 0x232   : > { %11393 = vmatprep.subr.bf16.mxu1 %v12435_v3 }
 0x235   : > { %11395 = vmatpush3.bf16.msra.mxu1 %v11394_v31 }
 0x236   : > { %11396 = vmatprep.subr.bf16.mxu1 %v12435_v3 }
 0x239   : > { %11398 = vmatpush3.bf16.msra.mxu1 %v11397_v37  ;;  %v8455_v37 = vld [vmem:[%s15786_s6 + $0x1f8] sm:$0xff] }
 0x23a   : > { %11399 = vmatprep.subr.bf16.mxu1 %v12435_v3  ;;  %v11484_v38 = vpack.c.bf16 %v8455_v37, %v8454_v36  ;;  %v8418_v37 = vld [vmem:[%s15786_s6 + $0x110] sm:$0xff] }
 0x23d   : > { %11401 = vmatpush3.bf16.msra.mxu1 %v11400_v43 }
 0x23e   : > { %11402 = vmatprep.subr.bf16.mxu1 %v12435_v3 }
 0x241   : > { %11404 = vmatpush3.bf16.msra.mxu1 %v11403_v49  ;;  %v12438_v49 = vmov -1e+09  }
 0x242   : > { %9843 = vmatprep.subr.mxu1 %v12437_v6  ;;  %v13364_v50 = vsel %vm509_vm5, 0.0, %v12438_v49  ;;  %v8425_v49 = vld [vmem:[%s15786_s6 + $0x148] sm:$0xff] }
 0x275   : > { %v13271_v61 = vpop.f32.mrb[2].mxu1 }
 0x276   : > { %v9632_v62 = vpop.f32.mrb[3].mxu1 }
 0x295   : > { %v13324_v27 = vpop.f32.mrb[4].mxu1 }
 0x296   : > { %v9702_v31 = vpop.f32.mrb[5].mxu1 }
 0x297   : > { %v11433_v31 = vpack.c.bf16 %v1576_v30, %v1575_v29 }
 0x2b5   : > { %v13352_v39 = vpop.f32.mrb[6].mxu1 }
 0x2b6   : > { %v9772_v40 = vpop.f32.mrb[7].mxu1 }
 0x2bb   : > { %v1313_v58 = vpop.xlane.xlu0 %1312 }
 0x2bc   : > { %v1314_v59 = vmul.f32 0.02631579, %v1313_v58 }
 0x2be   : > { %v1315_v60 = vadd.f32 1e-05, %v1314_v59 }
 0x2c0   : > { %12219 = vrsqrt.f32 %v1315_v60 }
 0x2ca   : > { %v12220_v0 = vpop.eup %12219 }
 0x2cb   : > { %v1317_v4 = vmul.f32 %v12220_v0, %v13175_v18  ;;  %v8443_v18 = vld [vmem:[%s15786_s6 + $0x198] sm:$0xff] }
 0x2cc   : > { %v11466_v19 = vpack.c.bf16 %v8443_v18, %v8442_v17 }
 0x2cd   : > { %v1318_v12 = vmul.f32 %v1317_v4, %v1301_v1 }
 0x2cf   : > { %v13286_v16 = vadd.f32 %v1318_v12, %v1302_v11 }
 0x2d1   : > { %9841 = vmatmul.mubr.f32.vlgmr.msra.gmra.mrb[8].mxu1 %v13286_v16  ;;  %9886 = vmatmul.mubr.f32.vlgmr.msra.gmra.mrb[10].mxu0 %v13286_v16 }
 0x2d2   : > { %9844 = vmatpush3.xpose.msk.msra.mxu1 %vm1406_vm3, %v12896_v2  ;;  %11464 = vmatpush3.bf16.msra.mxu0 %v11463_v14 }
 0x2d3   : > { %11465 = vmatprep.subr.bf16.mxu0 %v12435_v3  ;;  %9996 = vmatprep.mubr.msk.f32.mxu0 %vm12436_vm0, %v12437_v6 }
 0x2d4   : > { %9845 = vmatprep.mubr.msk.f32.mxu1 %vm12436_vm0, %v12437_v6  ;;  %9848 = vmatprep.subr.mxu1 %v12437_v6 }
 0x2d6   : > { %11467 = vmatpush3.bf16.msra.mxu0 %v11466_v19 }
 0x2d7   : > { %11468 = vmatprep.subr.bf16.mxu0 %v12435_v3 }
 0x2da   : > { %11470 = vmatpush3.bf16.msra.mxu0 %v11469_v13 }
 0x2db   : > { %11471 = vmatprep.subr.bf16.mxu0 %v12435_v3 }
 0x2de   : > { %11473 = vmatpush3.bf16.msra.mxu0 %v11472_v24  ;;  %v8412_v24 = vld [vmem:[%s15789_s9 + $0x18] sm:$0xff] }
 0x2df   : > { %11474 = vmatprep.subr.bf16.mxu0 %v12435_v3  ;;  %v11430_v25 = vpack.c.bf16 %v8412_v24, %v8411_v23 }
 0x2e2   : > { %11476 = vmatpush3.bf16.msra.mxu0 %v11475_v26 }
 0x2e3   : > { %11477 = vmatprep.subr.bf16.mxu0 %v12435_v3 }
 0x2e6   : > { %11479 = vmatpush3.bf16.msra.mxu0 %v11478_v32  ;;  %v8416_v32 = vld [vmem:[%s15786_s6 + $0x100] sm:$0xff] }
 0x2e7   : > { %11480 = vmatprep.subr.bf16.mxu0 %v12435_v3  ;;  %v11436_v36 = vpack.c.bf16 %v8417_v33, %v8416_v32 }
 0x2ea   : > { %11482 = vmatpush3.bf16.msra.mxu0 %v11481_v35 }
 0x2eb   : > { %11483 = vmatprep.subr.bf16.mxu0 %v12435_v3 }
 0x2ee   : > { %11485 = vmatpush3.bf16.msra.mxu0 %v11484_v38  ;;  %v8419_v38 = vld [vmem:[%s15786_s6 + $0x118] sm:$0xff] }
 0x2ef   : > { %11513 = vmatprep.subr.bf16.mxu0 %v12435_v3  ;;  %v11439_v40 = vpack.c.bf16 %v8419_v38, %v8418_v37 }
 0x2f1   : > { %9997 = vmatmul.mubr.f32.vlgmr.msra.gmra.mrb[12].mxu0 %v13286_v16 }
 0x2f2   : > { %10083 = vmatprep.mubr.msk.f32.mxu0 %vm12436_vm0, %v12437_v6 }
 0x3a4   : > { %v1402_v41 = vpop.f32.mrb[8].mxu1  ;;  %v1661_v42 = vpop.f32.mrb[10].mxu0 }
 0x3a5   : > { %v9842_v43 = vpop.f32.mrb[9].mxu1  ;;  %9846 = vmatmul.mubr.msk.f32.vlgmr.msra.gmra.mrb[10].mxu1 %vm1406_vm3, %v1402_v41  ;;  %v9887_v44 = vpop.f32.mrb[11].mxu0  ;;  %v8420_v41 = vld [vmem:[%s15786_s6 + $0x120] sm:$0xff] }
 0x3a6   : > { %9849 = vmatpush3.msk.msra.mxu1 %vm1501_vm4, %v12900_v8  ;;  %9850 = vmatprep.mubr.msk.f32.mxu1 %vm12436_vm0, %v12437_v6  ;;  %v8422_v44 = vld [vmem:[%s15786_s6 + $0x130] sm:$0xff] }
 0x3a7   : > { %9888 = vmatprep.subr.mxu1 %v12437_v6 }
 0x3c4   : > { %v13360_v45 = vpop.f32.mrb[12].mxu0 }
 0x3c5   : > { %v9998_v46 = vpop.f32.mrb[13].mxu0 }
 0x3c6   : > { %v8423_v46 = vld [vmem:[%s15786_s6 + $0x138] sm:$0xff] }
 0x3c7   : > { %v11445_v47 = vpack.c.bf16 %v8423_v46, %v8422_v44 }
 0x478   : > { %v1479_v48 = vpop.f32.mrb[10].mxu1 }
 0x479   : > { %v1483_v51 = vmul.f32 0.25, %v1479_v48  ;;  %v9847_v52 = vpop.f32.mrb[11].mxu1  ;;  %v8424_v48 = vld [vmem:[%s15786_s6 + $0x140] sm:$0xff] }
 0x47a   : > { %v8426_v52 = vld [vmem:[%s15786_s6 + $0x150] sm:$0xff] }
 0x47b   : > { %v1484_v53 = vadd.f32 %v1483_v51, %v13364_v50  ;;  %v11448_v51 = vpack.c.bf16 %v8425_v49, %v8424_v48  ;;  %v8460_v49 = vld [vmem:[%s15789_s9 + $0x30] sm:$0xff] }
 0x47d   : > { %v1486_v54 = vsel %vm1485_vm6, %v1484_v53, -inf }
 0x47e   : > { %1487 = vmax.xlane.f32.xlu1 %v1486_v54 }
 0x50b   : > { %v1488_v55 = vpop.xlane.xlu1 %1487 }
 0x50c   : > { %v1489_v57 = vsub.f32 %v1484_v53, %v1488_v55  ;;  %v8427_v53 = vld [vmem:[%s15786_s6 + $0x158] sm:$0xff]  ;;  %v8428_v55 = vld [vmem:[%s15786_s6 + $0x160] sm:$0xff] }
 0x50d   : > { %v11451_v54 = vpack.c.bf16 %v8427_v53, %v8426_v52 }
 0x50e   : > { %v1490_v58 = vmul.f32 1.442695, %v1489_v57  ;;  %v8429_v57 = vld [vmem:[%s15786_s6 + $0x168] sm:$0xff] }
 0x510   : > { %12221 = vpow2.f32 %v1490_v58  ;;  %v11454_v58 = vpack.c.bf16 %v8429_v57, %v8428_v55 }
 0x51a   : > { %v12222_v59 = vpop.eup %12221 }
 0x51b   : > { %v1492_v60 = vsel %vm1485_vm6, %v12222_v59, 0.0 }
 0x51c   : > { %1493 = vadd.xlane.f32.xlu1 %v1492_v60  ;;  %v8431_v60 = vld [vmem:[%s15786_s6 + $0x178] sm:$0xff] }
 0x5a9   : > { %v1494_v62 = vpop.xlane.xlu1 %1493 }
 0x5aa   : > { %12223 = vrcp.f32 %v1494_v62 }
 0x5b4   : > { %v12224_v0 = vpop.eup %12223 }
 0x5b5   : > { %v1496_v1 = vmul.f32 %v12224_v0, %v12222_v59  ;;  %v8430_v59 = vld [vmem:[%s15786_s6 + $0x170] sm:$0xff] }
 0x5b6   : > { %v11457_v62 = vpack.c.bf16 %v8431_v60, %v8430_v59 }
 0x5b7   : > { %1577 = vst.msk [vmem:[%s13372_s16] sm:$0x1] %vm1485_vm6, %v1496_v1  ;;  %9851 = vmatmul.mubr.msk.f32.vlgmr.msra.gmra.mrb[12].mxu1 %vm1497_vm7, %v1496_v1 }
 0x5b8   : > { %9889 = vmatpush3.xpose.msk.msra.mxu1 %vm1406_vm3, %v13269_v56  ;;  %9890 = vmatprep.mubr.msk.f32.mxu1 %vm12436_vm0, %v12437_v6 }
 0x5b9   : > { %9893 = vmatprep.subr.mxu1 %v12437_v6 }
 0x5bb   : > { %9891 = vmatmul.mubr.msk.f32.vlgmr.msra.gmra.mrb[14].mxu1 %vm1406_vm3, %v1661_v42  ;;  %v8421_v42 = vld [vmem:[%s15786_s6 + $0x128] sm:$0xff] }
 0x5bc   : > { %9894 = vmatpush3.msk.msra.mxu1 %vm1501_vm4, %v13324_v27  ;;  %9895 = vmatprep.mubr.msk.f32.mxu1 %vm12436_vm0, %v12437_v6  ;;  %v11442_v43 = vpack.c.bf16 %v8421_v42, %v8420_v41 }
 0x5bd   : > { %11429 = vmatprep.subr.bf16.mxu1 %v12435_v3 }
 0x68a   : > { %v1571_v4 = vpop.f32.mrb[12].mxu1 }
 0x68b   : > { %v9852_v7 = vpop.f32.mrb[13].mxu1 }
 0x68e   : > { %v1737_v9 = vpop.f32.mrb[14].mxu1 }
 0x68f   : > { %v1741_v11 = vmul.f32 0.25, %v1737_v9  ;;  %v9892_v12 = vpop.f32.mrb[15].mxu1 }
 0x691   : > { %v1742_v14 = vadd.f32 %v1741_v11, %v13364_v50 }
 0x693   : > { %v1743_v17 = vsel %vm1485_vm6, %v1742_v14, -inf }
 0x694   : > { %1744 = vmax.xlane.f32.xlu0 %v1743_v17 }
 0x721   : > { %v1745_v18 = vpop.xlane.xlu0 %1744 }
 0x722   : > { %v1746_v19 = vsub.f32 %v1742_v14, %v1745_v18 }
 0x724   : > { %v1747_v20 = vmul.f32 1.442695, %v1746_v19 }
 0x726   : > { %12225 = vpow2.f32 %v1747_v20 }
 0x730   : > { %v12226_v21 = vpop.eup %12225 }
 0x731   : > { %v1749_v13 = vsel %vm1485_vm6, %v12226_v21, 0.0 }
 0x732   : > { %1750 = vadd.xlane.f32.xlu1 %v1749_v13 }
 0x7bf   : > { %v1751_v22 = vpop.xlane.xlu1 %1750 }
 0x7c0   : > { %12227 = vrcp.f32 %v1751_v22 }
 0x7ca   : > { %v12228_v28 = vpop.eup %12227 }
 0x7cb   : > { %v1753_v26 = vmul.f32 %v12228_v28, %v12226_v21 }
 0x7cd   : > { %8415 = vst.msk [vmem:[%s13372_s16 + $0x4] sm:$0x1] %vm1485_vm6, %v1753_v26  ;;  %9896 = vmatmul.mubr.msk.f32.vlgmr.msra.gmra.mrb[16].mxu1 %vm1497_vm7, %v1753_v26  ;;  %v8437_v26 = vld [vmem:[%s15789_s9 + $0x28] sm:$0xff] }
 0x7ce   : > { %11431 = vmatpush3.bf16.msra.mxu1 %v11430_v25  ;;  %9902 = vmatprep.mubr.msk.f32.mxu1 %vm12436_vm0, %v12437_v6  ;;  %v8436_v25 = vld [vmem:[%s15789_s9 + $0x20] sm:$0xff] }
 0x7cf   : > { %11432 = vmatprep.subr.bf16.mxu1 %v12435_v3  ;;  %v11460_v30 = vpack.c.bf16 %v8437_v26, %v8436_v25  ;;  %v2670_v25 = vld [vmem:[%s15790_s10 + $0x40] sm:$0xff]  ;;  %v2671_v26 = vld [vmem:[%s15790_s10 + $0x48] sm:$0xff] }
 0x8a0   : > { %v1826_v34 = vpop.f32.mrb[16].mxu1 }
 0x8a1   : > { %v9897_v35 = vpop.f32.mrb[17].mxu1  ;;  %9903 = vmatmul.mubr.msk.f32.vlgmr.msra.gmra.mrb[18].mxu1 %vm1406_vm3, %v1826_v34 }
 0x8a2   : > { %11434 = vmatpush3.bf16.msra.mxu1 %v11433_v31  ;;  %9909 = vmatprep.mubr.msk.f32.mxu1 %vm12436_vm0, %v12437_v6 }
 0x8a3   : > { %11435 = vmatprep.subr.bf16.mxu1 %v12435_v3 }
 0x8a5   : > { %9910 = vmatmul.mubr.msk.f32.vlgmr.msra.gmra.mrb[20].mxu1 %vm1406_vm3, %v1571_v4 }
 0x8a6   : > { %11437 = vmatpush3.bf16.msra.mxu1 %v11436_v36  ;;  %9944 = vmatprep.mubr.msk.f32.mxu1 %vm12436_vm0, %v12437_v6 }
 0x8a7   : > { %11438 = vmatprep.subr.bf16.mxu1 %v12435_v3 }
 0x8aa   : > { %11440 = vmatpush3.bf16.msra.mxu1 %v11439_v40 }
 0x8ab   : > { %11441 = vmatprep.subr.bf16.mxu1 %v12435_v3 }
 0x8ae   : > { %11443 = vmatpush3.bf16.msra.mxu1 %v11442_v43 }
 0x8af   : > { %11444 = vmatprep.subr.bf16.mxu1 %v12435_v3 }
 0x8b2   : > { %11446 = vmatpush3.bf16.msra.mxu1 %v11445_v47 }
 0x8b3   : > { %11447 = vmatprep.subr.bf16.mxu1 %v12435_v3 }
 0x8b6   : > { %11449 = vmatpush3.bf16.msra.mxu1 %v11448_v51  ;;  %v8461_v51 = vld [vmem:[%s15789_s9 + $0x38] sm:$0xff] }
 0x8b7   : > { %11450 = vmatprep.subr.bf16.mxu1 %v12435_v3  ;;  %v11487_v53 = vpack.c.bf16 %v8461_v51, %v8460_v49  ;;  %v2756_v49 = vld [vmem:[%s15792_s12 + $0x30] sm:$0xff]  ;;  %v2757_v51 = vld [vmem:[%s15792_s12 + $0x38] sm:$0xff] }
 0x8ba   : > { %11452 = vmatpush3.bf16.msra.mxu1 %v11451_v54 }
 0x8bb   : > { %11453 = vmatprep.subr.bf16.mxu1 %v12435_v3 }
 0x8be   : > { %11455 = vmatpush3.bf16.msra.mxu1 %v11454_v58 }
 0x8bf   : > { %11456 = vmatprep.subr.bf16.mxu1 %v12435_v3 }
 0x8c2   : > { %11458 = vmatpush3.bf16.msra.mxu1 %v11457_v62 }
 0x8c3   : > { %9947 = vmatprep.subr.mxu1 %v12437_v6 }
 0x8c5   : > { %9945 = vmatmul.mubr.f32.vlgmr.msra.gmra.mrb[22].mxu1 %v13286_v16 }
 0x8c6   : > { %9949 = vmatprep.mubr.msk.f32.mxu1 %vm12436_vm0, %v12437_v6 }
 0x8cb   : > { %9948 = vmatpush3.xpose.msk.msra.mxu1 %vm1406_vm3, %v12898_v5 }
 0x8cc   : > { %9952 = vmatprep.subr.mxu1 %v12437_v6 }
 0x974   : > { %v1902_v0 = vpop.f32.mrb[18].mxu1 }
 0x975   : > { %v9904_v1 = vpop.f32.mrb[19].mxu1 }
 0x976   : > { %v2662_v1 = vld [vmem:[%s15790_s10] sm:$0xff] }
 0x978   : > { %v1975_v4 = vpop.f32.mrb[20].mxu1 }
 0x979   : > { %v1976_v7 = vadd.f32 %v1975_v4, %v1902_v0  ;;  %v9911_v9 = vpop.f32.mrb[21].mxu1  ;;  %v2663_v4 = vld [vmem:[%s15790_s10 + $0x8] sm:$0xff] }
 0x97a   : > { %v11490_v9 = vpack.c.bf16 %v2663_v4, %v2662_v1 }
 0x998   : > { %v2064_v11 = vpop.f32.mrb[22].mxu1 }
 0x999   : > { %v9946_v12 = vpop.f32.mrb[23].mxu1  ;;  %9950 = vmatmul.mubr.msk.f32.vlgmr.msra.gmra.mrb[24].mxu1 %vm1406_vm3, %v2064_v11 }
 0x99a   : > { %9953 = vmatpush3.msk.msra.mxu1 %vm1501_vm4, %v12902_v10  ;;  %9954 = vmatprep.mubr.msk.f32.mxu1 %vm12436_vm0, %v12437_v6  ;;  %v2666_v12 = vld [vmem:[%s15790_s10 + $0x20] sm:$0xff] }
 0x99b   : > { %11459 = vmatprep.subr.bf16.mxu1 %v12435_v3 }
 0xa6c   : > { %v2140_v14 = vpop.f32.mrb[24].mxu1 }
 0xa6d   : > { %v2144_v17 = vmul.f32 0.25, %v2140_v14  ;;  %v9951_v18 = vpop.f32.mrb[25].mxu1  ;;  %v2667_v14 = vld [vmem:[%s15790_s10 + $0x28] sm:$0xff] }
 0xa6f   : > { %v2145_v19 = vadd.f32 %v2144_v17, %v13364_v50  ;;  %v11496_v17 = vpack.c.bf16 %v2667_v14, %v2666_v12  ;;  %v2645_v12 = vld [vmem:[%s15785_s5 + $0x3] sm:$0x1] }
 0xa71   : > { %v2146_v20 = vsel %vm1485_vm6, %v2145_v19, -inf }
 0xa72   : > { %2147 = vmax.xlane.f32.xlu0 %v2146_v20 }
 0xaff   : > { %v2148_v21 = vpop.xlane.xlu0 %2147 }
 0xb00   : > { %v2149_v13 = vsub.f32 %v2145_v19, %v2148_v21 }
 0xb02   : > { %v2150_v22 = vmul.f32 1.442695, %v2149_v13 }
 0xb04   : > { %12229 = vpow2.f32 %v2150_v22 }
 0xb0e   : > { %v12230_v23 = vpop.eup %12229 }
 0xb0f   : > { %v2152_v24 = vsel %vm1485_vm6, %v12230_v23, 0.0 }
 0xb10   : > { %2153 = vadd.xlane.f32.xlu1 %v2152_v24  ;;  %v2669_v24 = vld [vmem:[%s15790_s10 + $0x38] sm:$0xff] }
 0xb9d   : > { %v2154_v28 = vpop.xlane.xlu1 %2153 }
 0xb9e   : > { %12231 = vrcp.f32 %v2154_v28 }
 0xba8   : > { %v12232_v29 = vpop.eup %12231 }
 0xba9   : > { %v2156_v31 = vmul.f32 %v12232_v29, %v12230_v23  ;;  %v2668_v23 = vld [vmem:[%s15790_s10 + $0x30] sm:$0xff] }
 0xbaa   : > { %v11499_v28 = vpack.c.bf16 %v2669_v24, %v2668_v23  ;;  %v2672_v29 = vld [vmem:[%s15790_s10 + $0x50] sm:$0xff] }
 0xbab   : > { %8439 = vst.msk [vmem:[%s13372_s16 + $0x8] sm:$0x1] %vm1485_vm6, %v2156_v31  ;;  %9955 = vmatmul.mubr.msk.f32.vlgmr.msra.gmra.mrb[26].mxu1 %vm1497_vm7, %v2156_v31  ;;  %v2673_v31 = vld [vmem:[%s15790_s10 + $0x58] sm:$0xff] }
 0xbac   : > { %11461 = vmatpush3.bf16.msra.mxu1 %v11460_v30  ;;  %9961 = vmatprep.mubr.msk.f32.mxu1 %vm12436_vm0, %v12437_v6  ;;  %v11502_v30 = vpack.c.bf16 %v2671_v26, %v2670_v25 }
 0xbad   : > { %9999 = vmatprep.subr.mxu1 %v12437_v6 }
 0xc7e   : > { %v2229_v32 = vpop.f32.mrb[26].mxu1 }
 0xc7f   : > { %v9956_v33 = vpop.f32.mrb[27].mxu1  ;;  %9962 = vmatmul.mubr.msk.f32.vlgmr.msra.gmra.mrb[28].mxu1 %vm1406_vm3, %v2229_v32  ;;  %v11505_v32 = vpack.c.bf16 %v2673_v31, %v2672_v29 }
 0xc80   : > { %10000 = vmatpush3.xpose.msk.msra.mxu1 %vm1406_vm3, %v13271_v61  ;;  %10001 = vmatprep.mubr.msk.f32.mxu1 %vm12436_vm0, %v12437_v6  ;;  %v2674_v33 = vld [vmem:[%s15790_s10 + $0x60] sm:$0xff] }
 0xc81   : > { %10004 = vmatprep.subr.mxu1 %v12437_v6 }
 0xc83   : > { %10002 = vmatmul.mubr.msk.f32.vlgmr.msra.gmra.mrb[30].mxu1 %vm1406_vm3, %v13360_v45 }
 0xc84   : > { %10005 = vmatpush3.msk.msra.mxu1 %vm1501_vm4, %v13352_v39  ;;  %10006 = vmatprep.mubr.msk.f32.mxu1 %vm12436_vm0, %v12437_v6 }
 0xc85   : > { %11486 = vmatprep.subr.bf16.mxu1 %v12435_v3 }
 0xd52   : > { %v2305_v34 = vpop.f32.mrb[28].mxu1 }
 0xd53   : > { %v2309_v35 = vadd.f32 %v2305_v34, %v1976_v7  ;;  %v9963_v36 = vpop.f32.mrb[29].mxu1  ;;  %v2664_v7 = vld [vmem:[%s15790_s10 + $0x10] sm:$0xff]  ;;  %v2675_v34 = vld [vmem:[%s15790_s10 + $0x68] sm:$0xff] }
 0xd54   : > { %v2676_v36 = vld [vmem:[%s15790_s10 + $0x70] sm:$0xff] }
 0xd56   : > { %v2471_v37 = vpop.f32.mrb[30].mxu1 }
 0xd57   : > { %v2475_v38 = vmul.f32 0.25, %v2471_v37  ;;  %v10003_v40 = vpop.f32.mrb[31].mxu1  ;;  %v2677_v37 = vld [vmem:[%s15790_s10 + $0x78] sm:$0xff] }
 0xd58   : > { %v2750_v40 = vld [vmem:[%s15792_s12] sm:$0xff] }
 0xd59   : > { %v2476_v41 = vadd.f32 %v2475_v38, %v13364_v50  ;;  %v11511_v38 = vpack.c.bf16 %v2677_v37, %v2676_v36  ;;  %v2859_v36 = vld [vmem:[%s15793_s13 + $0x18] sm:$0xff] }
 0xd5b   : > { %v2477_v42 = vsel %vm1485_vm6, %v2476_v41, -inf }
 0xd5c   : > { %2478 = vmax.xlane.f32.xlu0 %v2477_v42  ;;  %v2752_v42 = vld [vmem:[%s15792_s12 + $0x10] sm:$0xff] }
 0xde9   : > { %v2479_v45 = vpop.xlane.xlu0 %2478 }
 0xdea   : > { %v2480_v43 = vsub.f32 %v2476_v41, %v2479_v45  ;;  %v2751_v41 = vld [vmem:[%s15792_s12 + $0x8] sm:$0xff] }
 0xdeb   : > { %v11514_v45 = vpack.c.bf16 %v2751_v41, %v2750_v40  ;;  %v2861_v40 = vld [vmem:[%s15793_s13 + $0x28] sm:$0xff] }
 0xdec   : > { %v2481_v44 = vmul.f32 1.442695, %v2480_v43  ;;  %v2753_v43 = vld [vmem:[%s15792_s12 + $0x18] sm:$0xff] }
 0xded   : > { %11515 = vmatpush3.bf16.msra.mxu0 %v11514_v45 }
 0xdee   : > { %12233 = vpow2.f32 %v2481_v44  ;;  %v11517_v44 = vpack.c.bf16 %v2753_v43, %v2752_v42  ;;  %11516 = vmatprep.subr.bf16.mxu0 %v12435_v3 }
 0xdf1   : > { %11518 = vmatpush3.bf16.msra.mxu0 %v11517_v44 }
 0xdf2   : > { %11519 = vmatprep.subr.bf16.mxu0 %v12435_v3 }
 0xdf8   : > { %v12234_v46 = vpop.eup %12233 }
 0xdf9   : > { %v2483_v47 = vsel %vm1485_vm6, %v12234_v46, 0.0 }
 0xdfa   : > { %2484 = vadd.xlane.f32.xlu1 %v2483_v47  ;;  %v2755_v47 = vld [vmem:[%s15792_s12 + $0x28] sm:$0xff] }
 0xe87   : > { %v2485_v48 = vpop.xlane.xlu1 %2484 }
 0xe88   : > { %12235 = vrcp.f32 %v2485_v48 }
 0xe92   : > { %v12236_v52 = vpop.eup %12235 }
 0xe93   : > { %v2487_v54 = vmul.f32 %v12236_v52, %v12234_v46  ;;  %v2754_v46 = vld [vmem:[%s15792_s12 + $0x20] sm:$0xff]  ;;  %v11523_v52 = vpack.c.bf16 %v2757_v51, %v2756_v49  ;;  %v2863_v49 = vld [vmem:[%s15793_s13 + $0x38] sm:$0xff] }
 0xe94   : > { %v11520_v48 = vpack.c.bf16 %v2755_v47, %v2754_v46 }
 0xe95   : > { %8463 = vst.msk [vmem:[%s13372_s16 + $0xc] sm:$0x1] %vm1485_vm6, %v2487_v54  ;;  %10007 = vmatmul.mubr.msk.f32.vlgmr.msra.gmra.mrb[32].mxu1 %vm1497_vm7, %v2487_v54  ;;  %v2759_v54 = vld [vmem:[%s15792_s12 + $0x48] sm:$0xff] }
 0xe96   : > { %11488 = vmatpush3.bf16.msra.mxu1 %v11487_v53  ;;  %10013 = vmatprep.mubr.msk.f32.mxu1 %vm12436_vm0, %v12437_v6  ;;  %v2758_v53 = vld [vmem:[%s15792_s12 + $0x40] sm:$0xff] }
 0xe97   : > { %11489 = vmatprep.subr.bf16.mxu1 %v12435_v3  ;;  %11521 = vmatpush3.bf16.msra.mxu0 %v11520_v48  ;;  %v2862_v48 = vld [vmem:[%s15793_s13 + $0x30] sm:$0xff] }
 0xe98   : > { %11522 = vmatprep.subr.bf16.mxu0 %v12435_v3  ;;  %v11547_v51 = vpack.c.bf16 %v2863_v49, %v2862_v48 }
 0xe9b   : > { %11524 = vmatpush3.bf16.msra.mxu0 %v11523_v52  ;;  %v2864_v52 = vld [vmem:[%s15793_s13 + $0x40] sm:$0xff] }
 0xe9c   : > { %11525 = vmatprep.subr.bf16.mxu0 %v12435_v3 }
 0xf68   : > { %v2560_v55 = vpop.f32.mrb[32].mxu1 }
 0xf69   : > { %v10008_v57 = vpop.f32.mrb[33].mxu1  ;;  %10014 = vmatmul.mubr.msk.f32.vlgmr.msra.gmra.mrb[34].mxu1 %vm1406_vm3, %v2560_v55  ;;  %v11526_v55 = vpack.c.bf16 %v2759_v54, %v2758_v53  ;;  %v2865_v53 = vld [vmem:[%s15793_s13 + $0x48] sm:$0xff]  ;;  %v2866_v54 = vld [vmem:[%s15793_s13 + $0x50] sm:$0xff] }
 0xf6a   : > { %10048 = vmatprep.mubr.msk.f32.mxu1 %vm12436_vm0, %v12437_v6  ;;  %11491 = vmatpush3.bf16.msra.mxu1 %v11490_v9  ;;  %v2760_v57 = vld [vmem:[%s15792_s12 + $0x50] sm:$0xff] }
 0xf6b   : > { %11492 = vmatprep.subr.bf16.mxu1 %v12435_v3  ;;  %11527 = vmatpush3.bf16.msra.mxu0 %v11526_v55  ;;  %v11550_v55 = vpack.c.bf16 %v2865_v53, %v2864_v52 }
 0xf6c   : > { %11528 = vmatprep.subr.bf16.mxu0 %v12435_v3 }
0x103c   : > { %v2636_v58 = vpop.f32.mrb[34].mxu1 }
0x103d   : > { %v2640_v59 = vadd.f32 %v2636_v58, %v2309_v35  ;;  %v10015_v60 = vpop.f32.mrb[35].mxu1  ;;  %v11508_v35 = vpack.c.bf16 %v2675_v34, %v2674_v33  ;;  %v2761_v58 = vld [vmem:[%s15792_s12 + $0x58] sm:$0xff]  ;;  %v2857_v33 = vld [vmem:[%s15793_s13 + $0x8] sm:$0xff]  ;;  %v2858_v34 = vld [vmem:[%s15793_s13 + $0x10] sm:$0xff] }
0x103e   : > { %v2762_v60 = vld [vmem:[%s15792_s12 + $0x60] sm:$0xff]  ;;  %v11541_v37 = vpack.c.bf16 %v2859_v36, %v2858_v34  ;;  %v2987_v36 = vld [vmem:[%s15784_s4 + $0x28] sm:$0xff] }
0x103f   : > { %v2643_v62 = vadd.f32 %v2640_v59, %v13286_v16  ;;  %v2665_v16 = vld [vmem:[%s15790_s10 + $0x18] sm:$0xff]  ;;  %v11529_v59 = vpack.c.bf16 %v2761_v58, %v2760_v57 }
0x1040   : > { %v11493_v11 = vpack.c.bf16 %v2665_v16, %v2664_v7  ;;  %v2644_v16 = vld [vmem:[%s15785_s5 + $0x2] sm:$0x1]  ;;  %v2867_v57 = vld [vmem:[%s15793_s13 + $0x58] sm:$0xff] }
0x1041   : > { %v2646_v0 = vsel %vm1303_vm1, %v2643_v62, 0.0  ;;  %11530 = vmatpush3.bf16.msra.mxu0 %v11529_v59  ;;  %v11553_v58 = vpack.c.bf16 %v2867_v57, %v2866_v54  ;;  %v2868_v59 = vld [vmem:[%s15793_s13 + $0x60] sm:$0xff] }
0x1042   : > { %2647 = vadd.xlane.f32.xlu0 %v2646_v0  ;;  %11494 = vmatpush3.bf16.msra.mxu1 %v11493_v11 }
0x1043   : > { %11495 = vmatprep.subr.bf16.mxu1 %v12435_v3  ;;  %11531 = vmatprep.subr.bf16.mxu0 %v12435_v3 }
0x1046   : > { %11497 = vmatpush3.bf16.msra.mxu1 %v11496_v17 }
0x1047   : > { %11498 = vmatprep.subr.bf16.mxu1 %v12435_v3 }
0x104a   : > { %11500 = vmatpush3.bf16.msra.mxu1 %v11499_v28  ;;  %v2766_v28 = vld [vmem:[%s15785_s5 + $0x6] sm:$0x1] }
0x104b   : > { %11501 = vmatprep.subr.bf16.mxu1 %v12435_v3 }
0x104e   : > { %11503 = vmatpush3.bf16.msra.mxu1 %v11502_v30 }
0x104f   : > { %11504 = vmatprep.subr.bf16.mxu1 %v12435_v3 }
0x1052   : > { %11506 = vmatpush3.bf16.msra.mxu1 %v11505_v32  ;;  %v2856_v32 = vld [vmem:[%s15793_s13] sm:$0xff] }
0x1053   : > { %11507 = vmatprep.subr.bf16.mxu1 %v12435_v3 }
0x1056   : > { %11509 = vmatpush3.bf16.msra.mxu1 %v11508_v35  ;;  %v11538_v35 = vpack.c.bf16 %v2857_v33, %v2856_v32  ;;  %v2985_v33 = vld [vmem:[%s15784_s4 + $0x18] sm:$0xff] }
0x1057   : > { %11510 = vmatprep.subr.bf16.mxu1 %v12435_v3 }
0x105a   : > { %11512 = vmatpush3.bf16.msra.mxu1 %v11511_v38  ;;  %v2860_v38 = vld [vmem:[%s15793_s13 + $0x20] sm:$0xff] }
0x105b   : > { %11537 = vmatprep.subr.bf16.mxu1 %v12435_v3  ;;  %v11544_v41 = vpack.c.bf16 %v2861_v40, %v2860_v38  ;;  %v2988_v38 = vld [vmem:[%s15784_s4 + $0x30] sm:$0xff]  ;;  %v2989_v40 = vld [vmem:[%s15784_s4 + $0x38] sm:$0xff] }
0x10cf   : > { %v2648_v18 = vpop.xlane.xlu0 %2647 }
0x10d0   : > { %v2649_v19 = vmul.f32 0.02631579, %v2648_v18  ;;  %v2764_v18 = vld [vmem:[%s15792_s12 + $0x70] sm:$0xff] }
0x10d2   : > { %v2650_v20 = vsub.f32 %v2643_v62, %v2649_v19  ;;  %v2763_v62 = vld [vmem:[%s15792_s12 + $0x68] sm:$0xff]  ;;  %v2765_v19 = vld [vmem:[%s15792_s12 + $0x78] sm:$0xff] }
0x10d3   : > { %v11532_v0 = vpack.c.bf16 %v2763_v62, %v2762_v60  ;;  %v2869_v60 = vld [vmem:[%s15793_s13 + $0x68] sm:$0xff] }
0x10d4   : > { %v13562_v21 = vmul.f32 %v13171_v15, %v2650_v20  ;;  %v11535_v20 = vpack.c.bf16 %v2765_v19, %v2764_v18  ;;  %v11556_v62 = vpack.c.bf16 %v2869_v60, %v2868_v59  ;;  %v2992_v59 = vld [vmem:[%s15784_s4 + $0x50] sm:$0xff]  ;;  %v2993_v60 = vld [vmem:[%s15784_s4 + $0x58] sm:$0xff] }
0x10d5   : > { %11533 = vmatpush3.bf16.msra.mxu0 %v11532_v0  ;;  %v2870_v0 = vld [vmem:[%s15793_s13 + $0x70] sm:$0xff] }
0x10d6   : > { %v2652_v13 = vmul.f32 %v13562_v21, %v13562_v21  ;;  %11534 = vmatprep.subr.bf16.mxu0 %v12435_v3 }
0x10d8   : > { %v2653_v22 = vsel %vm1303_vm1, %v2652_v13, 0.0 }
0x10d9   : > { %2654 = vadd.xlane.f32.xlu1 %v2653_v22  ;;  %11536 = vmatpush3.bf16.msra.mxu0 %v11535_v20 }
0x10da   : > { %11561 = vmatprep.subr.bf16.mxu0 %v12435_v3 }
0x1166   : > { %v2655_v1 = vpop.xlane.xlu1 %2654 }
0x1167   : > { %v2656_v4 = vmul.f32 0.02631579, %v2655_v1  ;;  %v2871_v1 = vld [vmem:[%s15793_s13 + $0x78] sm:$0xff] }
0x1169   : > { %v2657_v7 = vadd.f32 1e-05, %v2656_v4  ;;  %v11559_v4 = vpack.c.bf16 %v2871_v1, %v2870_v0  ;;  %v2994_v0 = vld [vmem:[%s15784_s4 + $0x60] sm:$0xff]  ;;  %v2995_v1 = vld [vmem:[%s15784_s4 + $0x68] sm:$0xff] }
0x116b   : > { %12237 = vrsqrt.f32 %v2657_v7 }
0x1175   : > { %v12238_v9 = vpop.eup %12237 }
0x1176   : > { %v2659_v11 = vmul.f32 %v12238_v9, %v13562_v21  ;;  %v2678_v21 = vld [vmem:[%s15791_s11] sm:$0x1] }
0x1178   : > { %v2660_v14 = vmul.f32 %v2659_v11, %v2644_v16 }
0x117a   : > { %v2661_v17 = vadd.f32 %v2660_v14, %v2645_v12  ;;  %v2838_v12 = vld [vmem:[%s15785_s5 + $0x4] sm:$0x1] }
0x117c   : > { %10049 = vmatmul.mubr.f32.vlgmr.msra.gmra.mrb[36].mxu1 %v2661_v17 }
0x117d   : > { %10118 = vmatprep.mubr.msk.f32.mxu1 %vm12436_vm0, %v12437_v6  ;;  %11539 = vmatpush3.bf16.msra.mxu1 %v11538_v35  ;;  %v2986_v35 = vld [vmem:[%s15784_s4 + $0x20] sm:$0xff] }
0x117e   : > { %11540 = vmatprep.subr.bf16.mxu1 %v12435_v3 }
0x1181   : > { %11542 = vmatpush3.bf16.msra.mxu1 %v11541_v37  ;;  %v11568_v37 = vpack.c.bf16 %v2987_v36, %v2986_v35 }
0x1182   : > { %11543 = vmatprep.subr.bf16.mxu1 %v12435_v3 }
0x1185   : > { %11545 = vmatpush3.bf16.msra.mxu1 %v11544_v41  ;;  %v11571_v41 = vpack.c.bf16 %v2989_v40, %v2988_v38  ;;  %v3086_v38 = vld [vmem:[%s15786_s6] sm:$0xff]  ;;  %v3087_v40 = vld [vmem:[%s15786_s6 + $0x8] sm:$0xff] }
0x1186   : > { %11546 = vmatprep.subr.bf16.mxu1 %v12435_v3 }
0x1189   : > { %11548 = vmatpush3.bf16.msra.mxu1 %v11547_v51 }
0x118a   : > { %11549 = vmatprep.subr.bf16.mxu1 %v12435_v3 }
0x118d   : > { %11551 = vmatpush3.bf16.msra.mxu1 %v11550_v55 }
0x118e   : > { %11552 = vmatprep.subr.bf16.mxu1 %v12435_v3 }
0x1191   : > { %11554 = vmatpush3.bf16.msra.mxu1 %v11553_v58 }
0x1192   : > { %11555 = vmatprep.subr.bf16.mxu1 %v12435_v3 }
0x1195   : > { %11557 = vmatpush3.bf16.msra.mxu1 %v11556_v62  ;;  %v11577_v62 = vpack.c.bf16 %v2993_v60, %v2992_v59  ;;  %v3094_v59 = vld [vmem:[%s15786_s6 + $0x40] sm:$0xff]  ;;  %v3095_v60 = vld [vmem:[%s15786_s6 + $0x48] sm:$0xff] }
0x1196   : > { %11558 = vmatprep.subr.bf16.mxu1 %v12435_v3 }
0x1199   : > { %11560 = vmatpush3.bf16.msra.mxu1 %v11559_v4  ;;  %v11580_v4 = vpack.c.bf16 %v2995_v1, %v2994_v0  ;;  %v3096_v0 = vld [vmem:[%s15786_s6 + $0x50] sm:$0xff]  ;;  %v3097_v1 = vld [vmem:[%s15786_s6 + $0x58] sm:$0xff] }
0x119a   : > { %11585 = vmatprep.subr.bf16.mxu1 %v12435_v3 }
0x124f   : > { %v2745_v13 = vpop.f32.mrb[36].mxu1 }
0x1250   : > { %v2746_v22 = vadd.f32 %v2745_v13, %v2678_v21  ;;  %v10050_v23 = vpop.f32.mrb[37].mxu1  ;;  %v12355_v13 = vld [vmem:[%s12648_s30] sm:$0x1]  ;;  %s8188_s30 = sshll.u32 %s13372_s16, 4  ;;  %s15728_s30 = int_to_ptr.vmem [resolvable:$true] %s8188_s30 }
0x1251   : > { %s12368_s22 = scalar_lea.vmem %s15728_s30, 256 }
0x1252   : > { %v2749_v24 = vmax.f32 %v2746_v22, 0.0  ;;  %p12369_p2 = scmp.ne.s32.totalorder %s15728_s30, %s12368_s22 }
0x1254   : > { %10084 = vmatmul.mubr.f32.vlgmr.msra.gmra.mrb[14].mxu0 %v2749_v24  ;;  %p12370_p3 = pnand %p12369_p2, %p12563_p10 }
0x1255   : > { %10153 = vmatprep.mubr.msk.f32.mxu0 %vm12436_vm0, %v12437_v6 }
0x1256   : > { %p12371_p4 = pneg %p12370_p3 }
0x1327   : > { %v2833_v25 = vpop.f32.mrb[14].mxu0 }
0x1328   : > { %v2834_v26 = vadd.f32 %v2833_v25, %v2766_v28  ;;  %v10085_v29 = vpop.f32.mrb[15].mxu0 }
0x1329   : > { %v2982_v29 = vld [vmem:[%s15784_s4] sm:$0xff] }
0x132a   : > { %v2837_v30 = vadd.f32 %v2834_v26, %v2661_v17  ;;  %v2839_v17 = vld [vmem:[%s15785_s5 + $0x5] sm:$0x1] }
0x132c   : > { %v2840_v31 = vsel %vm1303_vm1, %v2837_v30, 0.0 }
0x132d   : > { %2841 = vadd.xlane.f32.xlu0 %v2840_v31  ;;  %v2984_v31 = vld [vmem:[%s15784_s4 + $0x10] sm:$0xff] }
0x132e   : > { %v11565_v34 = vpack.c.bf16 %v2985_v33, %v2984_v31  ;;  %v2980_v31 = vld [vmem:[%s15782_s2 + $0x1] sm:$0x1] }
0x13ba   : > { %v2842_v42 = vpop.xlane.xlu0 %2841 }
0x13bb   : > { %v2843_v45 = vmul.f32 0.02631579, %v2842_v42  ;;  %v2990_v42 = vld [vmem:[%s15784_s4 + $0x40] sm:$0xff] }
0x13bd   : > { %v2844_v43 = vsub.f32 %v2837_v30, %v2843_v45  ;;  %v2983_v30 = vld [vmem:[%s15784_s4 + $0x8] sm:$0xff] }
0x13be   : > { %v11562_v32 = vpack.c.bf16 %v2983_v30, %v2982_v29  ;;  %v2991_v45 = vld [vmem:[%s15784_s4 + $0x48] sm:$0xff] }
0x13bf   : > { %v2845_v44 = vmul.f32 %v13171_v15, %v2844_v43  ;;  %v11574_v43 = vpack.c.bf16 %v2991_v45, %v2990_v42  ;;  %v11586_v42 = vpack.c.bf16 %v3087_v40, %v3086_v38  ;;  %v3089_v45 = vld [vmem:[%s15786_s6 + $0x18] sm:$0xff] }
0x13c0   : > { %11563 = vmatpush3.bf16.msra.mxu0 %v11562_v32 }
0x13c1   : > { %v2846_v46 = vmul.f32 %v2845_v44, %v2845_v44  ;;  %11564 = vmatprep.subr.bf16.mxu0 %v12435_v3 }
0x13c3   : > { %v2847_v47 = vsel %vm1303_vm1, %v2846_v46, 0.0 }
0x13c4   : > { %2848 = vadd.xlane.f32.xlu1 %v2847_v47  ;;  %11566 = vmatpush3.bf16.msra.mxu0 %v11565_v34 }
0x13c5   : > { %11567 = vmatprep.subr.bf16.mxu0 %v12435_v3 }
0x13c8   : > { %11569 = vmatpush3.bf16.msra.mxu0 %v11568_v37 }
0x13c9   : > { %11570 = vmatprep.subr.bf16.mxu0 %v12435_v3 }
0x13cc   : > { %11572 = vmatpush3.bf16.msra.mxu0 %v11571_v41  ;;  %v3088_v41 = vld [vmem:[%s15786_s6 + $0x10] sm:$0xff] }
0x13cd   : > { %11573 = vmatprep.subr.bf16.mxu0 %v12435_v3 }
0x13d0   : > { %11575 = vmatpush3.bf16.msra.mxu0 %v11574_v43  ;;  %v11589_v43 = vpack.c.bf16 %v3089_v45, %v3088_v41  ;;  %v8468_v45 = vld [vmem:[%s15786_s6 + $0x80] sm:$0xff] }
0x13d1   : > { %11576 = vmatprep.subr.bf16.mxu0 %v12435_v3 }
0x13d4   : > { %11578 = vmatpush3.bf16.msra.mxu0 %v11577_v62  ;;  %v11598_v62 = vpack.c.bf16 %v3095_v60, %v3094_v59  ;;  %v8476_v59 = vld [vmem:[%s15786_s6 + $0xc0] sm:$0xff]  ;;  %v8477_v60 = vld [vmem:[%s15786_s6 + $0xc8] sm:$0xff] }
0x13d5   : > { %11579 = vmatprep.subr.bf16.mxu0 %v12435_v3 }
0x13d8   : > { %11581 = vmatpush3.bf16.msra.mxu0 %v11580_v4  ;;  %v11601_v4 = vpack.c.bf16 %v3097_v1, %v3096_v0  ;;  %v8478_v0 = vld [vmem:[%s15786_s6 + $0xd0] sm:$0xff]  ;;  %v8479_v1 = vld [vmem:[%s15786_s6 + $0xd8] sm:$0xff] }
0x13d9   : > { %11582 = vmatprep.subr.bf16.mxu0 %v12435_v3 }
0x1451   : > { %v2849_v7 = vpop.xlane.xlu1 %2848 }
0x1452   : > { %v2850_v9 = vmul.f32 0.02631579, %v2849_v7  ;;  %v2996_v7 = vld [vmem:[%s15784_s4 + $0x70] sm:$0xff] }
0x1454   : > { %v2851_v16 = vadd.f32 1e-05, %v2850_v9  ;;  %v2997_v9 = vld [vmem:[%s15784_s4 + $0x78] sm:$0xff] }
0x1456   : > { %12239 = vrsqrt.f32 %v2851_v16  ;;  %v11583_v16 = vpack.c.bf16 %v2997_v9, %v2996_v7  ;;  %v3098_v7 = vld [vmem:[%s15786_s6 + $0x60] sm:$0xff]  ;;  %v3099_v9 = vld [vmem:[%s15786_s6 + $0x68] sm:$0xff] }
0x1458   : > { %11584 = vmatpush3.bf16.msra.mxu0 %v11583_v16  ;;  %v11604_v16 = vpack.c.bf16 %v3099_v9, %v3098_v7  ;;  %v8480_v7 = vld [vmem:[%s15786_s6 + $0xe0] sm:$0xff]  ;;  %v8481_v9 = vld [vmem:[%s15786_s6 + $0xe8] sm:$0xff] }
0x1459   : > { %10191 = vmatprep.subr.mxu0 %v12437_v6 }
0x1460   : > { %v12240_v11 = vpop.eup %12239 }
0x1461   : > { %v2853_v14 = vmul.f32 %v12240_v11, %v2845_v44 }
0x1463   : > { %v2854_v18 = vmul.f32 %v2853_v14, %v2838_v12 }
0x1465   : > { %v2855_v19 = vadd.f32 %v2854_v18, %v2839_v17 }
0x1467   : > { %10119 = vmatmul.mubr.f32.vlgmr.msra.gmra.mrb[38].mxu1 %v2855_v19 }
0x1468   : > { %10188 = vmatprep.mubr.msk.f32.mxu1 %vm12436_vm0, %v12437_v6  ;;  %11587 = vmatpush3.bf16.msra.mxu1 %v11586_v42 }
0x1469   : > { %11588 = vmatprep.subr.bf16.mxu1 %v12435_v3 }
0x146c   : > { %11590 = vmatpush3.bf16.msra.mxu1 %v11589_v43  ;;  %v8469_v43 = vld [vmem:[%s15786_s6 + $0x88] sm:$0xff] }
0x146d   : > { %11591 = vmatprep.subr.bf16.mxu1 %v12435_v3 }
0x153a   : > { %v2938_v20 = vpop.f32.mrb[38].mxu1 }
0x153b   : > { %v13750_v22 = vadd.f32 %v12355_v13, %v2938_v20  ;;  %v10120_v23 = vpop.f32.mrb[39].mxu1 }
0x153d   : > { %v2956_v24 = vsel %vm13744_vm10, %v13750_v22, -1e+30  ;;  %v2942_v28 = vsel %vm500_vm11, %v13750_v22, -1e+30  ;;  %v2971_v11 = vsub.f32 0.0, %v13750_v22 }
0x153e   : > { %v2957_v25 = vsel %vm1303_vm1, %v2956_v24, -inf  ;;  %v2943_v26 = vsel %vm1303_vm1, %v2942_v28, -inf }
0x153f   : > { %2958 = vmax.xlane.f32.xlu1 %v2957_v25  ;;  %2944 = vmax.xlane.f32.xlu0 %v2943_v26  ;;  %v2972_v12 = vmul.f32 1.442695, %v2971_v11  ;;  %v3100_v11 = vld [vmem:[%s15786_s6 + $0x70] sm:$0xff] }
0x15cc   : > { %v2959_v44 = vpop.xlane.xlu1 %2958  ;;  %v2945_v46 = vpop.xlane.xlu0 %2944 }
0x15cd   : > { %v2960_v47 = vsub.f32 %v2956_v24, %v2959_v44  ;;  %v2946_v48 = vsub.f32 %v2942_v28, %v2945_v46  ;;  %v3090_v44 = vld [vmem:[%s15786_s6 + $0x20] sm:$0xff]  ;;  %v3091_v46 = vld [vmem:[%s15786_s6 + $0x28] sm:$0xff] }
0x15cf   : > { %v2961_v49 = vmul.f32 1.442695, %v2960_v47  ;;  %v2947_v51 = vmul.f32 1.442695, %v2946_v48  ;;  %v11592_v47 = vpack.c.bf16 %v3091_v46, %v3090_v44  ;;  %v3092_v48 = vld [vmem:[%s15786_s6 + $0x30] sm:$0xff]  ;;  %v11610_v46 = vpack.c.bf16 %v8469_v43, %v8468_v45  ;;  %v3332_v45 = vld [vmem:[%s15789_s9 + $0x8] sm:$0xff] }
0x15d1   : > { %12241 = vpow2.f32 %v2961_v49  ;;  %v3093_v49 = vld [vmem:[%s15786_s6 + $0x38] sm:$0xff]  ;;  %11593 = vmatpush3.bf16.msra.mxu1 %v11592_v47 }
0x15d2   : > { %12243 = vpow2.f32 %v2947_v51  ;;  %v11595_v51 = vpack.c.bf16 %v3093_v49, %v3092_v48  ;;  %11594 = vmatprep.subr.bf16.mxu1 %v12435_v3  ;;  %v8470_v48 = vld [vmem:[%s15786_s6 + $0x90] sm:$0xff]  ;;  %v8471_v49 = vld [vmem:[%s15786_s6 + $0x98] sm:$0xff] }
0x15d3   : > { %12245 = vpow2.f32 %v2972_v12  ;;  %v3101_v12 = vld [vmem:[%s15786_s6 + $0x78] sm:$0xff] }
0x15d5   : > { %11596 = vmatpush3.bf16.msra.mxu1 %v11595_v51  ;;  %v11613_v51 = vpack.c.bf16 %v8471_v49, %v8470_v48 }
0x15d6   : > { %11597 = vmatprep.subr.bf16.mxu1 %v12435_v3 }
0x15d9   : > { %11599 = vmatpush3.bf16.msra.mxu1 %v11598_v62  ;;  %v11622_v62 = vpack.c.bf16 %v8477_v60, %v8476_v59  ;;  %v8500_v59 = vld [vmem:[%s15786_s6 + $0x138] sm:$0xff] }
0x15da   : > { %11600 = vmatprep.subr.bf16.mxu1 %v12435_v3 }
0x15db   : > { %v12242_v52 = vpop.eup %12241 }
0x15dc   : > { %v12244_v53 = vpop.eup %12243  ;;  %v2963_v54 = vsel %vm13744_vm10, %v12242_v52, 0.0 }
0x15dd   : > { %v2964_v55 = vsel %vm1303_vm1, %v2963_v54, 0.0  ;;  %v2949_v57 = vsel %vm500_vm11, %v12244_v53, 0.0  ;;  %v12246_v14 = vpop.eup %12245  ;;  %11602 = vmatpush3.bf16.msra.mxu1 %v11601_v4  ;;  %v11625_v4 = vpack.c.bf16 %v8479_v1, %v8478_v0  ;;  %v8502_v0 = vld [vmem:[%s15786_s6 + $0x148] sm:$0xff] }
0x15de   : > { %2965 = vadd.xlane.f32.xlu1 %v2964_v55  ;;  %v2950_v58 = vsel %vm1303_vm1, %v2949_v57, 0.0  ;;  %v2974_v17 = vadd.f32 1.0, %v12246_v14  ;;  %11603 = vmatprep.subr.bf16.mxu1 %v12435_v3  ;;  %v11607_v14 = vpack.c.bf16 %v3101_v12, %v3100_v11  ;;  %v8482_v11 = vld [vmem:[%s15786_s6 + $0xf0] sm:$0xff]  ;;  %v8483_v12 = vld [vmem:[%s15786_s6 + $0xf8] sm:$0xff] }
0x15df   : > { %2951 = vadd.xlane.f32.xlu0 %v2950_v58 }
0x15e1   : > { %11605 = vmatpush3.bf16.msra.mxu1 %v11604_v16  ;;  %v11628_v16 = vpack.c.bf16 %v8481_v9, %v8480_v7  ;;  %v8504_v7 = vld [vmem:[%s15786_s6 + $0x158] sm:$0xff] }
0x15e2   : > { %11606 = vmatprep.subr.bf16.mxu1 %v12435_v3 }
0x15e5   : > { %11608 = vmatpush3.bf16.msra.mxu1 %v11607_v14  ;;  %v11631_v14 = vpack.c.bf16 %v8483_v12, %v8482_v11  ;;  %v8506_v11 = vld [vmem:[%s15786_s6 + $0x168] sm:$0xff] }
0x15e6   : > { %10236 = vmatprep.subr.mxu1 %v12437_v6 }
0x166b   : > { %v2966_v18 = vpop.xlane.xlu1 %2965 }
0x166c   : > { %12247 = vrcp.f32 %v2966_v18  ;;  %v2952_v19 = vpop.xlane.xlu0 %2951 }
0x166d   : > { %12249 = vrcp.f32 %v2952_v19 }
0x166e   : > { %12251 = vrcp.f32 %v2974_v17 }
0x1676   : > { %v12248_v20 = vpop.eup %12247 }
0x1677   : > { %v12250_v13 = vpop.eup %12249  ;;  %v2968_v23 = vmul.f32 %v12248_v20, %v2963_v54 }
0x1678   : > { %v2954_v24 = vmul.f32 %v12250_v13, %v2949_v57  ;;  %v12252_v28 = vpop.eup %12251  ;;  %v3068_v13 = vld [vmem:[%s15785_s5] sm:$0x1] }
0x1679   : > { %v2969_v22 = vsel %vm13744_vm10, %v2968_v23, 0.0  ;;  %v2977_v30 = vsel %vm13827_vm14, %v12252_v28, 0.0 }
0x167a   : > { %v2955_v26 = vsel %vm500_vm11, %v2954_v24, 0.0  ;;  %v3069_v24 = vld [vmem:[%s15785_s5 + $0x1] sm:$0x1] }
0x167b   : > { %v2970_v29 = vadd.f32 %v2969_v22, %v2955_v26 }
0x167d   : > { %v13838_v32 = vadd.f32 %v2977_v30, %v2970_v29 }
0x167f   : > { %2979 = vst [vmem:[%s12655_s3 + $0x1] sm:$0x1] %v13838_v32  ;;  %v2981_v33 = vadd.f32 %v2980_v31, %v13838_v32 }
0x1681   : > { %10154 = vmatmul.mubr.f32.vlgmr.msra.gmra.mrb[16].mxu0 %v2981_v33 }
0x1682   : > { %10192 = vmatpush3.xpose.msk.msra.mxu0 %vm1406_vm3, %v12896_v2  ;;  %10193 = vmatprep.mubr.msk.f32.mxu0 %vm12436_vm0, %v12437_v6 }
0x1683   : > { %10196 = vmatprep.subr.mxu0 %v12437_v6 }
0x1754   : > { %v3064_v34 = vpop.f32.mrb[16].mxu0 }
0x1755   : > { %v3065_v35 = vadd.f32 %v3064_v34, %v2981_v33  ;;  %v10155_v36 = vpop.f32.mrb[17].mxu0 }
0x1757   : > { %v3070_v37 = vsel %vm1303_vm1, %v3065_v35, 0.0 }
0x1758   : > { %3071 = vadd.xlane.f32.xlu0 %v3070_v37 }
0x17e5   : > { %v3072_v52 = vpop.xlane.xlu0 %3071 }
0x17e6   : > { %v3073_v53 = vmul.f32 0.02631579, %v3072_v52  ;;  %v8472_v52 = vld [vmem:[%s15786_s6 + $0xa0] sm:$0xff] }
0x17e8   : > { %v3074_v54 = vsub.f32 %v3065_v35, %v3073_v53  ;;  %v8473_v53 = vld [vmem:[%s15786_s6 + $0xa8] sm:$0xff] }
0x17ea   : > { %v3075_v55 = vmul.f32 %v13171_v15, %v3074_v54  ;;  %v11616_v54 = vpack.c.bf16 %v8473_v53, %v8472_v52  ;;  %v8496_v52 = vld [vmem:[%s15786_s6 + $0x118] sm:$0xff] }
0x17ec   : > { %v3076_v57 = vmul.f32 %v3075_v55, %v3075_v55 }
0x17ee   : > { %v3077_v58 = vsel %vm1303_vm1, %v3076_v57, 0.0  ;;  %v8475_v57 = vld [vmem:[%s15786_s6 + $0xb8] sm:$0xff] }
0x17ef   : > { %3078 = vadd.xlane.f32.xlu1 %v3077_v58 }
0x187c   : > { %v3079_v17 = vpop.xlane.xlu1 %3078 }
0x187d   : > { %v3080_v18 = vmul.f32 0.02631579, %v3079_v17 }
0x187f   : > { %v3081_v19 = vadd.f32 1e-05, %v3080_v18 }
0x1881   : > { %12253 = vrsqrt.f32 %v3081_v19 }
0x188b   : > { %v12254_v20 = vpop.eup %12253 }
0x188c   : > { %v3083_v23 = vmul.f32 %v12254_v20, %v3075_v55  ;;  %v8474_v55 = vld [vmem:[%s15786_s6 + $0xb0] sm:$0xff] }
0x188d   : > { %v11619_v58 = vpack.c.bf16 %v8475_v57, %v8474_v55  ;;  %v8498_v55 = vld [vmem:[%s15786_s6 + $0x128] sm:$0xff] }
0x188e   : > { %v3084_v28 = vmul.f32 %v3083_v23, %v3068_v13 }
0x1890   : > { %v13913_v22 = vadd.f32 %v3084_v28, %v3069_v24 }
0x1892   : > { %10189 = vmatmul.mubr.f32.vlgmr.msra.gmra.mrb[40].mxu1 %v13913_v22 }
0x1893   : > { %10237 = vmatpush3.xpose.msk.msra.mxu1 %vm1406_vm3, %v13269_v56  ;;  %10238 = vmatprep.mubr.msk.f32.mxu1 %vm12436_vm0, %v12437_v6 }
0x1894   : > { %10241 = vmatprep.subr.mxu1 %v12437_v6 }
0x1965   : > { %v3168_v26 = vpop.f32.mrb[40].mxu1 }
0x1966   : > { %v10190_v29 = vpop.f32.mrb[41].mxu1  ;;  %10194 = vmatmul.mubr.msk.f32.vlgmr.msra.gmra.mrb[18].mxu0 %vm1406_vm3, %v3168_v26 }
0x1967   : > { %10197 = vmatpush3.msk.msra.mxu0 %vm1501_vm4, %v12900_v8  ;;  %10198 = vmatprep.mubr.msk.f32.mxu0 %vm12436_vm0, %v12437_v6 }
0x1968   : > { %11609 = vmatprep.subr.bf16.mxu0 %v12435_v3 }
0x1a39   : > { %v3241_v30 = vpop.f32.mrb[18].mxu0 }
0x1a3a   : > { %v3245_v31 = vmul.f32 0.25, %v3241_v30  ;;  %v10195_v33 = vpop.f32.mrb[19].mxu0 }
0x1a3c   : > { %v3246_v34 = vadd.f32 %v3245_v31, %v13364_v50 }
0x1a3e   : > { %v3247_v35 = vsel %vm1485_vm6, %v3246_v34, -inf }
0x1a3f   : > { %3248 = vmax.xlane.f32.xlu0 %v3247_v35 }
0x1acc   : > { %v3249_v36 = vpop.xlane.xlu0 %3248 }
0x1acd   : > { %v3250_v37 = vsub.f32 %v3246_v34, %v3249_v36  ;;  %v8488_v36 = vld [vmem:[%s15789_s9 + $0x10] sm:$0xff] }
0x1acf   : > { %v3251_v38 = vmul.f32 1.442695, %v3250_v37  ;;  %v8489_v37 = vld [vmem:[%s15789_s9 + $0x18] sm:$0xff] }
0x1ad1   : > { %12255 = vpow2.f32 %v3251_v38 }
0x1adb   : > { %v12256_v40 = vpop.eup %12255 }
0x1adc   : > { %v3253_v41 = vsel %vm1485_vm6, %v12256_v40, 0.0 }
0x1add   : > { %3254 = vadd.xlane.f32.xlu1 %v3253_v41 }
0x1b6a   : > { %v3255_v42 = vpop.xlane.xlu1 %3254 }
0x1b6b   : > { %12257 = vrcp.f32 %v3255_v42  ;;  %v3331_v42 = vld [vmem:[%s15789_s9] sm:$0xff] }
0x1b6c   : > { %v11637_v43 = vpack.c.bf16 %v3332_v45, %v3331_v42  ;;  %v8513_v42 = vld [vmem:[%s15789_s9 + $0x20] sm:$0xff]  ;;  %v8514_v45 = vld [vmem:[%s15789_s9 + $0x28] sm:$0xff] }
0x1b75   : > { %v12258_v44 = vpop.eup %12257 }
0x1b76   : > { %v3257_v47 = vmul.f32 %v12258_v44, %v12256_v40  ;;  %v11634_v40 = vpack.c.bf16 %v8489_v37, %v8488_v36  ;;  %v8493_v44 = vld [vmem:[%s15786_s6 + $0x100] sm:$0xff] }
0x1b78   : > { %3333 = vst.msk [vmem:[%s13372_s16 + $0x1] sm:$0x1] %vm1485_vm6, %v3257_v47  ;;  %10199 = vmatmul.mubr.msk.f32.vlgmr.msra.gmra.mrb[20].mxu0 %vm1497_vm7, %v3257_v47 }
0x1b79   : > { %11611 = vmatpush3.bf16.msra.mxu0 %v11610_v46  ;;  %10233 = vmatprep.mubr.msk.f32.mxu0 %vm12436_vm0, %v12437_v6  ;;  %v8494_v46 = vld [vmem:[%s15786_s6 + $0x108] sm:$0xff] }
0x1b7a   : > { %11612 = vmatprep.subr.bf16.mxu0 %v12435_v3  ;;  %v11640_v49 = vpack.c.bf16 %v8494_v46, %v8493_v44  ;;  %v11664_v44 = vpack.c.bf16 %v8514_v45, %v8513_v42  ;;  %v8537_v42 = vld [vmem:[%s15789_s9 + $0x30] sm:$0xff]  ;;  %v8538_v45 = vld [vmem:[%s15789_s9 + $0x38] sm:$0xff] }
0x1b7d   : > { %11614 = vmatpush3.bf16.msra.mxu0 %v11613_v51  ;;  %v8495_v51 = vld [vmem:[%s15786_s6 + $0x110] sm:$0xff] }
0x1b7e   : > { %11615 = vmatprep.subr.bf16.mxu0 %v12435_v3  ;;  %v11643_v53 = vpack.c.bf16 %v8496_v52, %v8495_v51  ;;  %v8519_v51 = vld [vmem:[%s15786_s6 + $0x190] sm:$0xff]  ;;  %v8520_v52 = vld [vmem:[%s15786_s6 + $0x198] sm:$0xff] }
0x1b81   : > { %11617 = vmatpush3.bf16.msra.mxu0 %v11616_v54  ;;  %v8497_v54 = vld [vmem:[%s15786_s6 + $0x120] sm:$0xff] }
0x1b82   : > { %11618 = vmatprep.subr.bf16.mxu0 %v12435_v3  ;;  %v11646_v57 = vpack.c.bf16 %v8498_v55, %v8497_v54  ;;  %v11670_v55 = vpack.c.bf16 %v8520_v52, %v8519_v51 }
0x1b85   : > { %11620 = vmatpush3.bf16.msra.mxu0 %v11619_v58  ;;  %v8499_v58 = vld [vmem:[%s15786_s6 + $0x130] sm:$0xff] }
0x1b86   : > { %11621 = vmatprep.subr.bf16.mxu0 %v12435_v3  ;;  %v11649_v60 = vpack.c.bf16 %v8500_v59, %v8499_v58  ;;  %v8522_v58 = vld [vmem:[%s15786_s6 + $0x1a8] sm:$0xff] }
0x1b89   : > { %11623 = vmatpush3.bf16.msra.mxu0 %v11622_v62  ;;  %v8501_v62 = vld [vmem:[%s15786_s6 + $0x140] sm:$0xff] }
0x1b8a   : > { %11624 = vmatprep.subr.bf16.mxu0 %v12435_v3  ;;  %v11652_v1 = vpack.c.bf16 %v8502_v0, %v8501_v62  ;;  %v8524_v62 = vld [vmem:[%s15786_s6 + $0x1b8] sm:$0xff] }
0x1b8d   : > { %11626 = vmatpush3.bf16.msra.mxu0 %v11625_v4  ;;  %v8503_v4 = vld [vmem:[%s15786_s6 + $0x150] sm:$0xff] }
0x1b8e   : > { %11627 = vmatprep.subr.bf16.mxu0 %v12435_v3  ;;  %v11655_v9 = vpack.c.bf16 %v8504_v7, %v8503_v4  ;;  %v8526_v4 = vld [vmem:[%s15786_s6 + $0x1c8] sm:$0xff] }
0x1b91   : > { %11629 = vmatpush3.bf16.msra.mxu0 %v11628_v16  ;;  %v8505_v16 = vld [vmem:[%s15786_s6 + $0x160] sm:$0xff] }
0x1b92   : > { %11630 = vmatprep.subr.bf16.mxu0 %v12435_v3  ;;  %v11658_v12 = vpack.c.bf16 %v8506_v11, %v8505_v16  ;;  %v8528_v16 = vld [vmem:[%s15786_s6 + $0x1d8] sm:$0xff] }
0x1b95   : > { %11632 = vmatpush3.bf16.msra.mxu0 %v11631_v14  ;;  %v8507_v14 = vld [vmem:[%s15786_s6 + $0x170] sm:$0xff] }
0x1b96   : > { %10295 = vmatprep.subr.mxu0 %v12437_v6 }
0x1b98   : > { %10234 = vmatmul.mubr.f32.vlgmr.msra.gmra.mrb[22].mxu0 %v13913_v22 }
0x1b99   : > { %10297 = vmatprep.mubr.msk.f32.mxu0 %vm12436_vm0, %v12437_v6 }
0x1b9e   : > { %10296 = vmatpush3.xpose.msk.msra.mxu0 %vm1406_vm3, %v12898_v5 }
0x1b9f   : > { %10300 = vmatprep.subr.mxu0 %v12437_v6 }
0x1c4b   : > { %v3327_v17 = vpop.f32.mrb[20].mxu0 }
0x1c4c   : > { %v10200_v18 = vpop.f32.mrb[21].mxu0 }
0x1c6b   : > { %v3416_v19 = vpop.f32.mrb[22].mxu0 }
0x1c6c   : > { %v10235_v20 = vpop.f32.mrb[23].mxu0  ;;  %10239 = vmatmul.mubr.msk.f32.vlgmr.msra.gmra.mrb[42].mxu1 %vm1406_vm3, %v3416_v19 }
0x1c6d   : > { %10242 = vmatpush3.msk.msra.mxu1 %vm1501_vm4, %v13324_v27  ;;  %10243 = vmatprep.mubr.msk.f32.mxu1 %vm12436_vm0, %v12437_v6 }
0x1c6e   : > { %11633 = vmatprep.subr.bf16.mxu1 %v12435_v3 }
0x1d3f   : > { %v3489_v13 = vpop.f32.mrb[42].mxu1 }
0x1d40   : > { %v3493_v23 = vmul.f32 0.25, %v3489_v13  ;;  %v10240_v24 = vpop.f32.mrb[43].mxu1 }
0x1d42   : > { %v3494_v28 = vadd.f32 %v3493_v23, %v13364_v50 }
0x1d44   : > { %v3495_v26 = vsel %vm1485_vm6, %v3494_v28, -inf }
0x1d45   : > { %3496 = vmax.xlane.f32.xlu0 %v3495_v26 }
0x1dd2   : > { %v3497_v29 = vpop.xlane.xlu0 %3496 }
0x1dd3   : > { %v3498_v30 = vsub.f32 %v3494_v28, %v3497_v29 }
0x1dd5   : > { %v3499_v31 = vmul.f32 1.442695, %v3498_v30 }
0x1dd7   : > { %12259 = vpow2.f32 %v3499_v31 }
0x1de1   : > { %v12260_v33 = vpop.eup %12259 }
0x1de2   : > { %v3501_v34 = vsel %vm1485_vm6, %v12260_v33, 0.0 }
0x1de3   : > { %3502 = vadd.xlane.f32.xlu1 %v3501_v34 }
0x1e70   : > { %v3503_v35 = vpop.xlane.xlu1 %3502 }
0x1e71   : > { %12261 = vrcp.f32 %v3503_v35 }
0x1e7b   : > { %v12262_v38 = vpop.eup %12261 }
0x1e7c   : > { %v3505_v41 = vmul.f32 %v12262_v38, %v12260_v33 }
0x1e7e   : > { %8492 = vst.msk [vmem:[%s13372_s16 + $0x5] sm:$0x1] %vm1485_vm6, %v3505_v41  ;;  %10244 = vmatmul.mubr.msk.f32.vlgmr.msra.gmra.mrb[44].mxu1 %vm1497_vm7, %v3505_v41 }
0x1e7f   : > { %11635 = vmatpush3.bf16.msra.mxu1 %v11634_v40  ;;  %10250 = vmatprep.mubr.msk.f32.mxu1 %vm12436_vm0, %v12437_v6 }
0x1e80   : > { %11636 = vmatprep.subr.bf16.mxu1 %v12435_v3 }
0x1f51   : > { %v3575_v47 = vpop.f32.mrb[44].mxu1 }
0x1f52   : > { %v10245_v48 = vpop.f32.mrb[45].mxu1  ;;  %10251 = vmatmul.mubr.msk.f32.vlgmr.msra.gmra.mrb[46].mxu1 %vm1406_vm3, %v3575_v47  ;;  %v8517_v47 = vld [vmem:[%s15786_s6 + $0x180] sm:$0xff] }
0x1f53   : > { %11638 = vmatpush3.bf16.msra.mxu1 %v11637_v43  ;;  %10257 = vmatprep.mubr.msk.f32.mxu1 %vm12436_vm0, %v12437_v6  ;;  %v8518_v48 = vld [vmem:[%s15786_s6 + $0x188] sm:$0xff] }
0x1f54   : > { %11639 = vmatprep.subr.bf16.mxu1 %v12435_v3 }
0x1f56   : > { %10258 = vmatmul.mubr.msk.f32.vlgmr.msra.gmra.mrb[48].mxu1 %vm1406_vm3, %v3327_v17  ;;  %v8508_v17 = vld [vmem:[%s15786_s6 + $0x178] sm:$0xff] }
0x1f57   : > { %11641 = vmatpush3.bf16.msra.mxu1 %v11640_v49  ;;  %10292 = vmatprep.mubr.msk.f32.mxu1 %vm12436_vm0, %v12437_v6  ;;  %v11661_v18 = vpack.c.bf16 %v8508_v17, %v8507_v14  ;;  %v11667_v49 = vpack.c.bf16 %v8518_v48, %v8517_v47  ;;  %v8530_v14 = vld [vmem:[%s15786_s6 + $0x1e8] sm:$0xff] }
0x1f58   : > { %11642 = vmatprep.subr.bf16.mxu1 %v12435_v3 }
0x1f5b   : > { %11644 = vmatpush3.bf16.msra.mxu1 %v11643_v53 }
0x1f5c   : > { %11645 = vmatprep.subr.bf16.mxu1 %v12435_v3 }
0x1f5f   : > { %11647 = vmatpush3.bf16.msra.mxu1 %v11646_v57  ;;  %v8521_v57 = vld [vmem:[%s15786_s6 + $0x1a0] sm:$0xff] }
0x1f60   : > { %11648 = vmatprep.subr.bf16.mxu1 %v12435_v3  ;;  %v11673_v59 = vpack.c.bf16 %v8522_v58, %v8521_v57  ;;  %v4392_v57 = vld [vmem:[%s15790_s10 + $0x8] sm:$0xff]  ;;  %v4393_v58 = vld [vmem:[%s15790_s10 + $0x10] sm:$0xff] }
0x1f63   : > { %11650 = vmatpush3.bf16.msra.mxu1 %v11649_v60  ;;  %v8523_v60 = vld [vmem:[%s15786_s6 + $0x1b0] sm:$0xff] }
0x1f64   : > { %11651 = vmatprep.subr.bf16.mxu1 %v12435_v3  ;;  %v11676_v0 = vpack.c.bf16 %v8524_v62, %v8523_v60  ;;  %v4395_v62 = vld [vmem:[%s15790_s10 + $0x20] sm:$0xff] }
0x1f67   : > { %11653 = vmatpush3.bf16.msra.mxu1 %v11652_v1  ;;  %v8525_v1 = vld [vmem:[%s15786_s6 + $0x1c0] sm:$0xff] }
0x1f68   : > { %11654 = vmatprep.subr.bf16.mxu1 %v12435_v3  ;;  %v11679_v7 = vpack.c.bf16 %v8526_v4, %v8525_v1 }
0x1f6b   : > { %11656 = vmatpush3.bf16.msra.mxu1 %v11655_v9  ;;  %v8527_v9 = vld [vmem:[%s15786_s6 + $0x1d0] sm:$0xff] }
0x1f6c   : > { %11657 = vmatprep.subr.bf16.mxu1 %v12435_v3  ;;  %v11682_v11 = vpack.c.bf16 %v8528_v16, %v8527_v9 }
0x1f6f   : > { %11659 = vmatpush3.bf16.msra.mxu1 %v11658_v12  ;;  %v8529_v12 = vld [vmem:[%s15786_s6 + $0x1e0] sm:$0xff] }
0x1f70   : > { %11660 = vmatprep.subr.bf16.mxu1 %v12435_v3  ;;  %v11685_v17 = vpack.c.bf16 %v8530_v14, %v8529_v12  ;;  %v4397_v14 = vld [vmem:[%s15790_s10 + $0x30] sm:$0xff] }
0x1f73   : > { %11662 = vmatpush3.bf16.msra.mxu1 %v11661_v18  ;;  %v8531_v18 = vld [vmem:[%s15786_s6 + $0x1f0] sm:$0xff] }
0x1f74   : > { %10347 = vmatprep.subr.mxu1 %v12437_v6 }
0x1f76   : > { %10293 = vmatmul.mubr.f32.vlgmr.msra.gmra.mrb[50].mxu1 %v13913_v22 }
0x1f77   : > { %10349 = vmatprep.mubr.msk.f32.mxu1 %vm12436_vm0, %v12437_v6 }
0x1f7c   : > { %10348 = vmatpush3.xpose.msk.msra.mxu1 %vm1406_vm3, %v13271_v61 }
0x1f7d   : > { %10352 = vmatprep.subr.mxu1 %v12437_v6 }
0x2025   : > { %v3650_v19 = vpop.f32.mrb[46].mxu1 }
0x2026   : > { %v10252_v20 = vpop.f32.mrb[47].mxu1 }
0x2029   : > { %v3723_v13 = vpop.f32.mrb[48].mxu1 }
0x202a   : > { %v14093_v23 = vadd.f32 %v3723_v13, %v3650_v19  ;;  %v10259_v24 = vpop.f32.mrb[49].mxu1  ;;  %v8532_v19 = vld [vmem:[%s15786_s6 + $0x1f8] sm:$0xff] }
0x202b   : > { %v11688_v20 = vpack.c.bf16 %v8532_v19, %v8531_v18  ;;  %v4399_v19 = vld [vmem:[%s15790_s10 + $0x40] sm:$0xff] }
0x2049   : > { %v3810_v28 = vpop.f32.mrb[50].mxu1 }
0x204a   : > { %v10294_v26 = vpop.f32.mrb[51].mxu1  ;;  %10298 = vmatmul.mubr.msk.f32.vlgmr.msra.gmra.mrb[24].mxu0 %vm1406_vm3, %v3810_v28 }
0x204b   : > { %10301 = vmatpush3.msk.msra.mxu0 %vm1501_vm4, %v12902_v10  ;;  %10302 = vmatprep.mubr.msk.f32.mxu0 %vm12436_vm0, %v12437_v6 }
0x204c   : > { %11663 = vmatprep.subr.bf16.mxu0 %v12435_v3 }
0x211d   : > { %v3883_v29 = vpop.f32.mrb[24].mxu0 }
0x211e   : > { %v3887_v30 = vmul.f32 0.25, %v3883_v29  ;;  %v10299_v31 = vpop.f32.mrb[25].mxu0 }
0x2120   : > { %v3888_v33 = vadd.f32 %v3887_v30, %v13364_v50 }
0x2122   : > { %v3889_v34 = vsel %vm1485_vm6, %v3888_v33, -inf }
0x2123   : > { %3890 = vmax.xlane.f32.xlu0 %v3889_v34 }
0x21b0   : > { %v3891_v35 = vpop.xlane.xlu0 %3890 }
0x21b1   : > { %v3892_v36 = vsub.f32 %v3888_v33, %v3891_v35 }
0x21b3   : > { %v3893_v37 = vmul.f32 1.442695, %v3892_v36 }
0x21b5   : > { %12263 = vpow2.f32 %v3893_v37 }
0x21bf   : > { %v12264_v38 = vpop.eup %12263 }
0x21c0   : > { %v3895_v40 = vsel %vm1485_vm6, %v12264_v38, 0.0 }
0x21c1   : > { %3896 = vadd.xlane.f32.xlu1 %v3895_v40 }
0x224e   : > { %v3897_v41 = vpop.xlane.xlu1 %3896 }
0x224f   : > { %12265 = vrcp.f32 %v3897_v41 }
0x2259   : > { %v12266_v43 = vpop.eup %12265 }
0x225a   : > { %v3899_v46 = vmul.f32 %v12266_v43, %v12264_v38 }
0x225c   : > { %8516 = vst.msk [vmem:[%s13372_s16 + $0x9] sm:$0x1] %vm1485_vm6, %v3899_v46  ;;  %10303 = vmatmul.mubr.msk.f32.vlgmr.msra.gmra.mrb[26].mxu0 %vm1497_vm7, %v3899_v46 }
0x225d   : > { %11665 = vmatpush3.bf16.msra.mxu0 %v11664_v44  ;;  %10309 = vmatprep.mubr.msk.f32.mxu0 %vm12436_vm0, %v12437_v6  ;;  %v11691_v44 = vpack.c.bf16 %v8538_v45, %v8537_v42  ;;  %v4483_v42 = vld [vmem:[%s15792_s12 + $0x20] sm:$0xff]  ;;  %v4484_v45 = vld [vmem:[%s15792_s12 + $0x28] sm:$0xff] }
0x225e   : > { %11666 = vmatprep.subr.bf16.mxu0 %v12435_v3 }
0x232f   : > { %v3969_v53 = vpop.f32.mrb[26].mxu0 }
0x2330   : > { %v10304_v54 = vpop.f32.mrb[27].mxu0  ;;  %10310 = vmatmul.mubr.msk.f32.vlgmr.msra.gmra.mrb[28].mxu0 %vm1406_vm3, %v3969_v53 }
0x2331   : > { %11668 = vmatpush3.bf16.msra.mxu0 %v11667_v49  ;;  %10344 = vmatprep.mubr.msk.f32.mxu0 %vm12436_vm0, %v12437_v6 }
0x2332   : > { %11669 = vmatprep.subr.bf16.mxu0 %v12435_v3 }
0x2335   : > { %11671 = vmatpush3.bf16.msra.mxu0 %v11670_v55  ;;  %v4391_v55 = vld [vmem:[%s15790_s10] sm:$0xff] }
0x2336   : > { %11672 = vmatprep.subr.bf16.mxu0 %v12435_v3 }
0x2339   : > { %11674 = vmatpush3.bf16.msra.mxu0 %v11673_v59  ;;  %v11694_v59 = vpack.c.bf16 %v4392_v57, %v4391_v55  ;;  %v4491_v55 = vld [vmem:[%s15792_s12 + $0x60] sm:$0xff]  ;;  %v4492_v57 = vld [vmem:[%s15792_s12 + $0x68] sm:$0xff] }
0x233a   : > { %11675 = vmatprep.subr.bf16.mxu0 %v12435_v3 }
0x233d   : > { %11677 = vmatpush3.bf16.msra.mxu0 %v11676_v0  ;;  %v4396_v0 = vld [vmem:[%s15790_s10 + $0x28] sm:$0xff] }
0x233e   : > { %11678 = vmatprep.subr.bf16.mxu0 %v12435_v3  ;;  %v11700_v1 = vpack.c.bf16 %v4396_v0, %v4395_v62  ;;  %v4373_v0 = vld [vmem:[%s15785_s5 + $0x2] sm:$0x1] }
0x2341   : > { %11680 = vmatpush3.bf16.msra.mxu0 %v11679_v7 }
0x2342   : > { %11681 = vmatprep.subr.bf16.mxu0 %v12435_v3 }
0x2345   : > { %11683 = vmatpush3.bf16.msra.mxu0 %v11682_v11 }
0x2346   : > { %11684 = vmatprep.subr.bf16.mxu0 %v12435_v3 }
0x2349   : > { %11686 = vmatpush3.bf16.msra.mxu0 %v11685_v17  ;;  %v4398_v17 = vld [vmem:[%s15790_s10 + $0x38] sm:$0xff] }
0x234a   : > { %11687 = vmatprep.subr.bf16.mxu0 %v12435_v3  ;;  %v11703_v18 = vpack.c.bf16 %v4398_v17, %v4397_v14 }
0x234d   : > { %11689 = vmatpush3.bf16.msra.mxu0 %v11688_v20  ;;  %v4400_v20 = vld [vmem:[%s15790_s10 + $0x48] sm:$0xff] }
0x234e   : > { %11717 = vmatprep.subr.bf16.mxu0 %v12435_v3 }
0x2350   : > { %10345 = vmatmul.mubr.f32.vlgmr.msra.gmra.mrb[30].mxu0 %v13913_v22 }
0x2351   : > { %10431 = vmatprep.mubr.msk.f32.mxu0 %vm12436_vm0, %v12437_v6 }
0x2403   : > { %v4044_v13 = vpop.f32.mrb[28].mxu0 }
0x2404   : > { %v4048_v24 = vadd.f32 %v4044_v13, %v14093_v23  ;;  %v10311_v28 = vpop.f32.mrb[29].mxu0  ;;  %v4401_v13 = vld [vmem:[%s15790_s10 + $0x50] sm:$0xff] }
0x2405   : > { %v4402_v28 = vld [vmem:[%s15790_s10 + $0x58] sm:$0xff] }
0x2423   : > { %v4132_v26 = vpop.f32.mrb[30].mxu0 }
0x2424   : > { %v10346_v29 = vpop.f32.mrb[31].mxu0  ;;  %10350 = vmatmul.mubr.msk.f32.vlgmr.msra.gmra.mrb[52].mxu1 %vm1406_vm3, %v4132_v26  ;;  %v11709_v26 = vpack.c.bf16 %v4402_v28, %v4401_v13  ;;  %v4495_v13 = vld [vmem:[%s15785_s5 + $0x6] sm:$0x1] }
0x2425   : > { %10353 = vmatpush3.msk.msra.mxu1 %vm1501_vm4, %v13352_v39  ;;  %10354 = vmatprep.mubr.msk.f32.mxu1 %vm12436_vm0, %v12437_v6  ;;  %v4403_v29 = vld [vmem:[%s15790_s10 + $0x60] sm:$0xff] }
0x2426   : > { %11690 = vmatprep.subr.bf16.mxu1 %v12435_v3 }
0x24f7   : > { %v4205_v30 = vpop.f32.mrb[52].mxu1 }
0x24f8   : > { %v4209_v31 = vmul.f32 0.25, %v4205_v30  ;;  %v10351_v33 = vpop.f32.mrb[53].mxu1  ;;  %v4404_v30 = vld [vmem:[%s15790_s10 + $0x68] sm:$0xff] }
0x24f9   : > { %v4405_v33 = vld [vmem:[%s15790_s10 + $0x70] sm:$0xff] }
0x24fa   : > { %v4210_v34 = vadd.f32 %v4209_v31, %v13364_v50  ;;  %v11712_v31 = vpack.c.bf16 %v4404_v30, %v4403_v29 }
0x24fc   : > { %v4211_v23 = vsel %vm1485_vm6, %v4210_v34, -inf }
0x24fd   : > { %4212 = vmax.xlane.f32.xlu0 %v4211_v23 }
0x258a   : > { %v4213_v35 = vpop.xlane.xlu0 %4212 }
0x258b   : > { %v4214_v36 = vsub.f32 %v4210_v34, %v4213_v35  ;;  %v4406_v34 = vld [vmem:[%s15790_s10 + $0x78] sm:$0xff]  ;;  %v4479_v35 = vld [vmem:[%s15792_s12] sm:$0xff] }
0x258c   : > { %v11715_v23 = vpack.c.bf16 %v4406_v34, %v4405_v33  ;;  %v4586_v33 = vld [vmem:[%s15793_s13 + $0x8] sm:$0xff]  ;;  %v4587_v34 = vld [vmem:[%s15793_s13 + $0x10] sm:$0xff] }
0x258d   : > { %v4215_v37 = vmul.f32 1.442695, %v4214_v36  ;;  %v4480_v36 = vld [vmem:[%s15792_s12 + $0x8] sm:$0xff] }
0x258f   : > { %12267 = vpow2.f32 %v4215_v37  ;;  %v4481_v37 = vld [vmem:[%s15792_s12 + $0x10] sm:$0xff] }
0x2599   : > { %v12268_v38 = vpop.eup %12267 }
0x259a   : > { %v4217_v40 = vsel %vm1485_vm6, %v12268_v38, 0.0 }
0x259b   : > { %4218 = vadd.xlane.f32.xlu1 %v4217_v40  ;;  %v4482_v40 = vld [vmem:[%s15792_s12 + $0x18] sm:$0xff] }
0x2628   : > { %v4219_v41 = vpop.xlane.xlu1 %4218 }
0x2629   : > { %12269 = vrcp.f32 %v4219_v41  ;;  %v11721_v41 = vpack.c.bf16 %v4482_v40, %v4481_v37  ;;  %v4589_v37 = vld [vmem:[%s15793_s13 + $0x20] sm:$0xff] }
0x2633   : > { %v12270_v43 = vpop.eup %12269 }
0x2634   : > { %v4221_v46 = vmul.f32 %v12270_v43, %v12268_v38  ;;  %v11718_v38 = vpack.c.bf16 %v4480_v36, %v4479_v35  ;;  %v11724_v43 = vpack.c.bf16 %v4484_v45, %v4483_v42  ;;  %v4588_v35 = vld [vmem:[%s15793_s13 + $0x18] sm:$0xff] }
0x2635   : > { %v11745_v36 = vpack.c.bf16 %v4588_v35, %v4587_v34  ;;  %v4716_v35 = vld [vmem:[%s15784_s4 + $0x28] sm:$0xff] }
0x2636   : > { %8540 = vst.msk [vmem:[%s13372_s16 + $0xd] sm:$0x1] %vm1485_vm6, %v4221_v46  ;;  %10355 = vmatmul.mubr.msk.f32.vlgmr.msra.gmra.mrb[54].mxu1 %vm1497_vm7, %v4221_v46  ;;  %11719 = vmatpush3.bf16.msra.mxu0 %v11718_v38  ;;  %v4486_v46 = vld [vmem:[%s15792_s12 + $0x38] sm:$0xff]  ;;  %v4590_v38 = vld [vmem:[%s15793_s13 + $0x28] sm:$0xff] }
0x2637   : > { %11692 = vmatpush3.bf16.msra.mxu1 %v11691_v44  ;;  %10361 = vmatprep.mubr.msk.f32.mxu1 %vm12436_vm0, %v12437_v6  ;;  %v4485_v44 = vld [vmem:[%s15792_s12 + $0x30] sm:$0xff]  ;;  %v11748_v40 = vpack.c.bf16 %v4590_v38, %v4589_v37  ;;  %v4718_v38 = vld [vmem:[%s15784_s4 + $0x38] sm:$0xff] }
0x2638   : > { %11693 = vmatprep.subr.bf16.mxu1 %v12435_v3  ;;  %11720 = vmatprep.subr.bf16.mxu0 %v12435_v3  ;;  %v4717_v37 = vld [vmem:[%s15784_s4 + $0x30] sm:$0xff] }
0x263a   : > { %11722 = vmatpush3.bf16.msra.mxu0 %v11721_v41 }
0x263b   : > { %11723 = vmatprep.subr.bf16.mxu0 %v12435_v3 }
0x263e   : > { %11725 = vmatpush3.bf16.msra.mxu0 %v11724_v43 }
0x263f   : > { %11726 = vmatprep.subr.bf16.mxu0 %v12435_v3 }
0x2709   : > { %v4291_v47 = vpop.f32.mrb[54].mxu1 }
0x270a   : > { %v10356_v48 = vpop.f32.mrb[55].mxu1  ;;  %10362 = vmatmul.mubr.msk.f32.vlgmr.msra.gmra.mrb[56].mxu1 %vm1406_vm3, %v4291_v47  ;;  %v11727_v47 = vpack.c.bf16 %v4486_v46, %v4485_v44 }
0x270b   : > { %10396 = vmatprep.mubr.msk.f32.mxu1 %vm12436_vm0, %v12437_v6  ;;  %11695 = vmatpush3.bf16.msra.mxu1 %v11694_v59  ;;  %v4487_v48 = vld [vmem:[%s15792_s12 + $0x40] sm:$0xff] }
0x270c   : > { %11696 = vmatprep.subr.bf16.mxu1 %v12435_v3  ;;  %11728 = vmatpush3.bf16.msra.mxu0 %v11727_v47  ;;  %v4591_v47 = vld [vmem:[%s15793_s13 + $0x30] sm:$0xff] }
0x270d   : > { %11729 = vmatprep.subr.bf16.mxu0 %v12435_v3 }
0x27dd   : > { %v4366_v49 = vpop.f32.mrb[56].mxu1 }
0x27de   : > { %v4370_v51 = vadd.f32 %v4366_v49, %v4048_v24  ;;  %v10363_v52 = vpop.f32.mrb[57].mxu1  ;;  %v11706_v24 = vpack.c.bf16 %v4400_v20, %v4399_v19  ;;  %v4488_v49 = vld [vmem:[%s15792_s12 + $0x48] sm:$0xff] }
0x27df   : > { %v4489_v52 = vld [vmem:[%s15792_s12 + $0x50] sm:$0xff] }
0x27e0   : > { %v4372_v53 = vadd.f32 %v4370_v51, %v13913_v22  ;;  %v4394_v22 = vld [vmem:[%s15790_s10 + $0x18] sm:$0xff]  ;;  %v11730_v51 = vpack.c.bf16 %v4488_v49, %v4487_v48 }
0x27e1   : > { %v11697_v60 = vpack.c.bf16 %v4394_v22, %v4393_v58  ;;  %v11736_v58 = vpack.c.bf16 %v4492_v57, %v4491_v55  ;;  %v4592_v48 = vld [vmem:[%s15793_s13 + $0x38] sm:$0xff] }
0x27e2   : > { %v4375_v54 = vsel %vm1303_vm1, %v4372_v53, 0.0  ;;  %11731 = vmatpush3.bf16.msra.mxu0 %v11730_v51  ;;  %v11751_v49 = vpack.c.bf16 %v4592_v48, %v4591_v47  ;;  %v4593_v51 = vld [vmem:[%s15793_s13 + $0x40] sm:$0xff]  ;;  %v4596_v55 = vld [vmem:[%s15793_s13 + $0x58] sm:$0xff] }
0x27e3   : > { %4376 = vadd.xlane.f32.xlu0 %v4375_v54  ;;  %11698 = vmatpush3.bf16.msra.mxu1 %v11697_v60 }
0x27e4   : > { %11699 = vmatprep.subr.bf16.mxu1 %v12435_v3  ;;  %11732 = vmatprep.subr.bf16.mxu0 %v12435_v3 }
0x27e7   : > { %11701 = vmatpush3.bf16.msra.mxu1 %v11700_v1 }
0x27e8   : > { %11702 = vmatprep.subr.bf16.mxu1 %v12435_v3 }
0x27eb   : > { %11704 = vmatpush3.bf16.msra.mxu1 %v11703_v18 }
0x27ec   : > { %11705 = vmatprep.subr.bf16.mxu1 %v12435_v3 }
0x27ef   : > { %11707 = vmatpush3.bf16.msra.mxu1 %v11706_v24 }
0x27f0   : > { %11708 = vmatprep.subr.bf16.mxu1 %v12435_v3 }
0x27f3   : > { %11710 = vmatpush3.bf16.msra.mxu1 %v11709_v26 }
0x27f4   : > { %11711 = vmatprep.subr.bf16.mxu1 %v12435_v3 }
0x27f7   : > { %11713 = vmatpush3.bf16.msra.mxu1 %v11712_v31  ;;  %v4585_v31 = vld [vmem:[%s15793_s13] sm:$0xff] }
0x27f8   : > { %11714 = vmatprep.subr.bf16.mxu1 %v12435_v3 }
0x27fb   : > { %11716 = vmatpush3.bf16.msra.mxu1 %v11715_v23  ;;  %v11742_v23 = vpack.c.bf16 %v4586_v33, %v4585_v31  ;;  %v4714_v33 = vld [vmem:[%s15784_s4 + $0x18] sm:$0xff] }
0x27fc   : > { %11741 = vmatprep.subr.bf16.mxu1 %v12435_v3 }
0x2870   : > { %v4377_v4 = vpop.xlane.xlu0 %4376 }
0x2871   : > { %v4378_v7 = vmul.f32 0.02631579, %v4377_v4  ;;  %v4374_v4 = vld [vmem:[%s15785_s5 + $0x3] sm:$0x1] }
0x2873   : > { %v4379_v9 = vsub.f32 %v4372_v53, %v4378_v7  ;;  %v4490_v53 = vld [vmem:[%s15792_s12 + $0x58] sm:$0xff] }
0x2874   : > { %v11733_v54 = vpack.c.bf16 %v4490_v53, %v4489_v52  ;;  %v4594_v52 = vld [vmem:[%s15793_s13 + $0x48] sm:$0xff]  ;;  %v4595_v53 = vld [vmem:[%s15793_s13 + $0x50] sm:$0xff] }
0x2875   : > { %v14227_v16 = vmul.f32 %v13171_v15, %v4379_v9  ;;  %v11757_v57 = vpack.c.bf16 %v4596_v55, %v4595_v53 }
0x2876   : > { %11734 = vmatpush3.bf16.msra.mxu0 %v11733_v54  ;;  %v11754_v54 = vpack.c.bf16 %v4594_v52, %v4593_v51 }
0x2877   : > { %v4381_v11 = vmul.f32 %v14227_v16, %v14227_v16  ;;  %11735 = vmatprep.subr.bf16.mxu0 %v12435_v3 }
0x2879   : > { %v4382_v12 = vsel %vm1303_vm1, %v4381_v11, 0.0  ;;  %v4493_v11 = vld [vmem:[%s15792_s12 + $0x70] sm:$0xff] }
0x287a   : > { %4383 = vadd.xlane.f32.xlu1 %v4382_v12  ;;  %11737 = vmatpush3.bf16.msra.mxu0 %v11736_v58  ;;  %v4494_v12 = vld [vmem:[%s15792_s12 + $0x78] sm:$0xff]  ;;  %v4597_v58 = vld [vmem:[%s15793_s13 + $0x60] sm:$0xff] }
0x287b   : > { %11738 = vmatprep.subr.bf16.mxu0 %v12435_v3  ;;  %v11739_v14 = vpack.c.bf16 %v4494_v12, %v4493_v11  ;;  %v4567_v11 = vld [vmem:[%s15785_s5 + $0x4] sm:$0x1] }
0x287e   : > { %11740 = vmatpush3.bf16.msra.mxu0 %v11739_v14  ;;  %v4568_v14 = vld [vmem:[%s15785_s5 + $0x5] sm:$0x1] }
0x287f   : > { %11765 = vmatprep.subr.bf16.mxu0 %v12435_v3 }
0x2907   : > { %v4384_v59 = vpop.xlane.xlu1 %4383 }
0x2908   : > { %v4385_v22 = vmul.f32 0.02631579, %v4384_v59  ;;  %v4598_v59 = vld [vmem:[%s15793_s13 + $0x68] sm:$0xff] }
0x290a   : > { %v4386_v60 = vadd.f32 1e-05, %v4385_v22  ;;  %v11760_v22 = vpack.c.bf16 %v4598_v59, %v4597_v58  ;;  %v4721_v58 = vld [vmem:[%s15784_s4 + $0x50] sm:$0xff]  ;;  %v4722_v59 = vld [vmem:[%s15784_s4 + $0x58] sm:$0xff] }
0x290c   : > { %12271 = vrsqrt.f32 %v4386_v60  ;;  %v4599_v60 = vld [vmem:[%s15793_s13 + $0x70] sm:$0xff] }
0x2916   : > { %v12272_v62 = vpop.eup %12271 }
0x2917   : > { %v4388_v1 = vmul.f32 %v12272_v62, %v14227_v16  ;;  %v4407_v16 = vld [vmem:[%s15791_s11] sm:$0x1]  ;;  %v4600_v62 = vld [vmem:[%s15793_s13 + $0x78] sm:$0xff] }
0x2919   : > { %v4389_v7 = vmul.f32 %v4388_v1, %v4373_v0  ;;  %v11763_v0 = vpack.c.bf16 %v4600_v62, %v4599_v60  ;;  %v4723_v60 = vld [vmem:[%s15784_s4 + $0x60] sm:$0xff]  ;;  %v4724_v62 = vld [vmem:[%s15784_s4 + $0x68] sm:$0xff] }
0x291b   : > { %v4390_v9 = vadd.f32 %v4389_v7, %v4374_v4 }
0x291d   : > { %10397 = vmatmul.mubr.f32.vlgmr.msra.gmra.mrb[58].mxu1 %v4390_v9 }
0x291e   : > { %10466 = vmatprep.mubr.msk.f32.mxu1 %vm12436_vm0, %v12437_v6  ;;  %11743 = vmatpush3.bf16.msra.mxu1 %v11742_v23  ;;  %v4715_v23 = vld [vmem:[%s15784_s4 + $0x20] sm:$0xff] }
0x291f   : > { %11744 = vmatprep.subr.bf16.mxu1 %v12435_v3 }
0x2922   : > { %11746 = vmatpush3.bf16.msra.mxu1 %v11745_v36  ;;  %v11772_v36 = vpack.c.bf16 %v4716_v35, %v4715_v23 }
0x2923   : > { %11747 = vmatprep.subr.bf16.mxu1 %v12435_v3 }
0x2926   : > { %11749 = vmatpush3.bf16.msra.mxu1 %v11748_v40  ;;  %v11775_v40 = vpack.c.bf16 %v4718_v38, %v4717_v37  ;;  %v4815_v37 = vld [vmem:[%s15786_s6] sm:$0xff]  ;;  %v4816_v38 = vld [vmem:[%s15786_s6 + $0x8] sm:$0xff] }
0x2927   : > { %11750 = vmatprep.subr.bf16.mxu1 %v12435_v3 }
0x292a   : > { %11752 = vmatpush3.bf16.msra.mxu1 %v11751_v49 }
0x292b   : > { %11753 = vmatprep.subr.bf16.mxu1 %v12435_v3 }
0x292e   : > { %11755 = vmatpush3.bf16.msra.mxu1 %v11754_v54 }
0x292f   : > { %11756 = vmatprep.subr.bf16.mxu1 %v12435_v3 }
0x2932   : > { %11758 = vmatpush3.bf16.msra.mxu1 %v11757_v57 }
0x2933   : > { %11759 = vmatprep.subr.bf16.mxu1 %v12435_v3 }
0x2936   : > { %11761 = vmatpush3.bf16.msra.mxu1 %v11760_v22  ;;  %v11781_v22 = vpack.c.bf16 %v4722_v59, %v4721_v58  ;;  %v4823_v58 = vld [vmem:[%s15786_s6 + $0x40] sm:$0xff]  ;;  %v4824_v59 = vld [vmem:[%s15786_s6 + $0x48] sm:$0xff] }
0x2937   : > { %11762 = vmatprep.subr.bf16.mxu1 %v12435_v3 }
0x293a   : > { %11764 = vmatpush3.bf16.msra.mxu1 %v11763_v0  ;;  %v11784_v0 = vpack.c.bf16 %v4724_v62, %v4723_v60  ;;  %v4825_v60 = vld [vmem:[%s15786_s6 + $0x50] sm:$0xff]  ;;  %v4826_v62 = vld [vmem:[%s15786_s6 + $0x58] sm:$0xff] }
0x293b   : > { %11789 = vmatprep.subr.bf16.mxu1 %v12435_v3 }
0x29f0   : > { %v4474_v17 = vpop.f32.mrb[58].mxu1 }
0x29f1   : > { %v4475_v18 = vadd.f32 %v4474_v17, %v4407_v16  ;;  %v10398_v19 = vpop.f32.mrb[59].mxu1 }
0x29f3   : > { %v4478_v20 = vmax.f32 %v4475_v18, 0.0 }
0x29f5   : > { %10432 = vmatmul.mubr.f32.vlgmr.msra.gmra.mrb[32].mxu0 %v4478_v20 }
0x29f6   : > { %10501 = vmatprep.mubr.msk.f32.mxu0 %vm12436_vm0, %v12437_v6 }
0x2ac8   : > { %v4562_v24 = vpop.f32.mrb[32].mxu0 }
0x2ac9   : > { %v4563_v28 = vadd.f32 %v4562_v24, %v4495_v13  ;;  %v10433_v26 = vpop.f32.mrb[33].mxu0 }
0x2acb   : > { %v4566_v29 = vadd.f32 %v4563_v28, %v4390_v9 }
0x2acd   : > { %v4569_v30 = vsel %vm1303_vm1, %v4566_v29, 0.0 }
0x2ace   : > { %4570 = vadd.xlane.f32.xlu0 %v4569_v30  ;;  %v4713_v30 = vld [vmem:[%s15784_s4 + $0x10] sm:$0xff] }
0x2acf   : > { %v11769_v34 = vpack.c.bf16 %v4714_v33, %v4713_v30  ;;  %v4709_v30 = vld [vmem:[%s15782_s2 + $0x2] sm:$0x1] }
0x2b5b   : > { %v4571_v41 = vpop.xlane.xlu0 %4570 }
0x2b5c   : > { %v4572_v42 = vmul.f32 0.02631579, %v4571_v41  ;;  %v4719_v41 = vld [vmem:[%s15784_s4 + $0x40] sm:$0xff] }
0x2b5e   : > { %v4573_v45 = vsub.f32 %v4566_v29, %v4572_v42  ;;  %v4712_v29 = vld [vmem:[%s15784_s4 + $0x8] sm:$0xff] }
0x2b5f   : > { %v4720_v42 = vld [vmem:[%s15784_s4 + $0x48] sm:$0xff] }
0x2b60   : > { %v4574_v43 = vmul.f32 %v13171_v15, %v4573_v45  ;;  %v11778_v45 = vpack.c.bf16 %v4720_v42, %v4719_v41  ;;  %v11790_v41 = vpack.c.bf16 %v4816_v38, %v4815_v37  ;;  %v4818_v42 = vld [vmem:[%s15786_s6 + $0x18] sm:$0xff] }
0x2b62   : > { %v4575_v44 = vmul.f32 %v4574_v43, %v4574_v43 }
0x2b64   : > { %v4576_v46 = vsel %vm1303_vm1, %v4575_v44, 0.0 }
0x2b65   : > { %4577 = vadd.xlane.f32.xlu1 %v4576_v46 }
0x2bf2   : > { %v4578_v1 = vpop.xlane.xlu1 %4577 }
0x2bf3   : > { %v4579_v4 = vmul.f32 0.02631579, %v4578_v1  ;;  %v4725_v1 = vld [vmem:[%s15784_s4 + $0x70] sm:$0xff] }
0x2bf5   : > { %v4580_v7 = vadd.f32 1e-05, %v4579_v4  ;;  %v4726_v4 = vld [vmem:[%s15784_s4 + $0x78] sm:$0xff] }
0x2bf7   : > { %12273 = vrsqrt.f32 %v4580_v7  ;;  %v11787_v7 = vpack.c.bf16 %v4726_v4, %v4725_v1  ;;  %v4827_v1 = vld [vmem:[%s15786_s6 + $0x60] sm:$0xff]  ;;  %v4828_v4 = vld [vmem:[%s15786_s6 + $0x68] sm:$0xff] }
0x2c01   : > { %v12274_v9 = vpop.eup %12273 }
0x2c02   : > { %v4582_v12 = vmul.f32 %v12274_v9, %v4574_v43 }
0x2c04   : > { %v4583_v16 = vmul.f32 %v4582_v12, %v4567_v11 }
0x2c06   : > { %v4584_v17 = vadd.f32 %v4583_v16, %v4568_v14 }
0x2c08   : > { %10467 = vmatmul.mubr.f32.vlgmr.msra.gmra.mrb[60].mxu1 %v4584_v17 }
0x2c09   : > { %10536 = vmatprep.mubr.msk.f32.mxu1 %vm12436_vm0, %v12437_v6  ;;  %11791 = vmatpush3.bf16.msra.mxu1 %v11790_v41 }
0x2c0a   : > { %11792 = vmatprep.subr.bf16.mxu1 %v12435_v3 }
0x2cdb   : > { %v4667_v18 = vpop.f32.mrb[60].mxu1 }
0x2cdc   : > { %v14408_v19 = vadd.f32 %v4667_v18, %v13838_v32  ;;  %v10468_v20 = vpop.f32.mrb[61].mxu1  ;;  %v4711_v32 = vld [vmem:[%s15784_s4] sm:$0xff] }
0x2cdd   : > { %v11766_v31 = vpack.c.bf16 %v4712_v29, %v4711_v32 }
0x2cde   : > { %v4685_v13 = vsel %vm13744_vm10, %v14408_v19, -1e+30  ;;  %v4671_v24 = vsel %vm500_vm11, %v14408_v19, -1e+30  ;;  %v4700_v9 = vsub.f32 0.0, %v14408_v19 }
0x2cdf   : > { %v4686_v28 = vsel %vm1303_vm1, %v4685_v13, -inf  ;;  %v4672_v26 = vsel %vm1303_vm1, %v4671_v24, -inf  ;;  %11767 = vmatpush3.bf16.msra.mxu0 %v11766_v31 }
0x2ce0   : > { %4687 = vmax.xlane.f32.xlu1 %v4686_v28  ;;  %4673 = vmax.xlane.f32.xlu0 %v4672_v26  ;;  %v4701_v11 = vmul.f32 1.442695, %v4700_v9  ;;  %v4829_v9 = vld [vmem:[%s15786_s6 + $0x70] sm:$0xff] }
0x2ce1   : > { %11768 = vmatprep.subr.bf16.mxu0 %v12435_v3 }
0x2ce3   : > { %11770 = vmatpush3.bf16.msra.mxu0 %v11769_v34 }
0x2ce4   : > { %11771 = vmatprep.subr.bf16.mxu0 %v12435_v3 }
0x2ce7   : > { %11773 = vmatpush3.bf16.msra.mxu0 %v11772_v36 }
0x2ce8   : > { %11774 = vmatprep.subr.bf16.mxu0 %v12435_v3 }
0x2ceb   : > { %11776 = vmatpush3.bf16.msra.mxu0 %v11775_v40  ;;  %v4817_v40 = vld [vmem:[%s15786_s6 + $0x10] sm:$0xff] }
0x2cec   : > { %11777 = vmatprep.subr.bf16.mxu0 %v12435_v3 }
0x2cef   : > { %11779 = vmatpush3.bf16.msra.mxu0 %v11778_v45  ;;  %v11793_v45 = vpack.c.bf16 %v4818_v42, %v4817_v40  ;;  %v8545_v42 = vld [vmem:[%s15786_s6 + $0x80] sm:$0xff] }
0x2cf0   : > { %11780 = vmatprep.subr.bf16.mxu0 %v12435_v3 }
0x2cf1   : > { %11794 = vmatpush3.bf16.msra.mxu1 %v11793_v45  ;;  %v8546_v45 = vld [vmem:[%s15786_s6 + $0x88] sm:$0xff] }
0x2cf2   : > { %11795 = vmatprep.subr.bf16.mxu1 %v12435_v3 }
0x2cf3   : > { %11782 = vmatpush3.bf16.msra.mxu0 %v11781_v22  ;;  %v11802_v22 = vpack.c.bf16 %v4824_v59, %v4823_v58  ;;  %v8553_v58 = vld [vmem:[%s15786_s6 + $0xc0] sm:$0xff]  ;;  %v8554_v59 = vld [vmem:[%s15786_s6 + $0xc8] sm:$0xff] }
0x2cf4   : > { %11783 = vmatprep.subr.bf16.mxu0 %v12435_v3 }
0x2cf7   : > { %11785 = vmatpush3.bf16.msra.mxu0 %v11784_v0  ;;  %v11805_v0 = vpack.c.bf16 %v4826_v62, %v4825_v60  ;;  %v8555_v60 = vld [vmem:[%s15786_s6 + $0xd0] sm:$0xff]  ;;  %v8556_v62 = vld [vmem:[%s15786_s6 + $0xd8] sm:$0xff] }
0x2cf8   : > { %11786 = vmatprep.subr.bf16.mxu0 %v12435_v3 }
0x2cfb   : > { %11788 = vmatpush3.bf16.msra.mxu0 %v11787_v7  ;;  %v11808_v7 = vpack.c.bf16 %v4828_v4, %v4827_v1  ;;  %v8557_v1 = vld [vmem:[%s15786_s6 + $0xe0] sm:$0xff]  ;;  %v8558_v4 = vld [vmem:[%s15786_s6 + $0xe8] sm:$0xff] }
0x2cfc   : > { %10539 = vmatprep.subr.mxu0 %v12437_v6 }
0x2d6d   : > { %v4688_v43 = vpop.xlane.xlu1 %4687  ;;  %v4674_v44 = vpop.xlane.xlu0 %4673 }
0x2d6e   : > { %v4689_v46 = vsub.f32 %v4685_v13, %v4688_v43  ;;  %v4675_v47 = vsub.f32 %v4671_v24, %v4674_v44  ;;  %v4819_v43 = vld [vmem:[%s15786_s6 + $0x20] sm:$0xff]  ;;  %v4820_v44 = vld [vmem:[%s15786_s6 + $0x28] sm:$0xff] }
0x2d70   : > { %v4690_v48 = vmul.f32 1.442695, %v4689_v46  ;;  %v4676_v49 = vmul.f32 1.442695, %v4675_v47  ;;  %v11796_v46 = vpack.c.bf16 %v4820_v44, %v4819_v43  ;;  %v4821_v47 = vld [vmem:[%s15786_s6 + $0x30] sm:$0xff]  ;;  %v11814_v44 = vpack.c.bf16 %v8546_v45, %v8545_v42  ;;  %v8585_v45 = vld [vmem:[%s15786_s6 + $0x178] sm:$0xff] }
0x2d71   : > { %v8584_v42 = vld [vmem:[%s15786_s6 + $0x170] sm:$0xff] }
0x2d72   : > { %12275 = vpow2.f32 %v4690_v48  ;;  %v4822_v48 = vld [vmem:[%s15786_s6 + $0x38] sm:$0xff]  ;;  %11797 = vmatpush3.bf16.msra.mxu1 %v11796_v46 }
0x2d73   : > { %12277 = vpow2.f32 %v4676_v49  ;;  %v11799_v49 = vpack.c.bf16 %v4822_v48, %v4821_v47  ;;  %11798 = vmatprep.subr.bf16.mxu1 %v12435_v3  ;;  %v8547_v47 = vld [vmem:[%s15786_s6 + $0x90] sm:$0xff]  ;;  %v8548_v48 = vld [vmem:[%s15786_s6 + $0x98] sm:$0xff] }
0x2d74   : > { %12279 = vpow2.f32 %v4701_v11  ;;  %v4830_v11 = vld [vmem:[%s15786_s6 + $0x78] sm:$0xff] }
0x2d76   : > { %11800 = vmatpush3.bf16.msra.mxu1 %v11799_v49  ;;  %v11817_v49 = vpack.c.bf16 %v8548_v48, %v8547_v47 }
0x2d77   : > { %11801 = vmatprep.subr.bf16.mxu1 %v12435_v3 }
0x2d7a   : > { %11803 = vmatpush3.bf16.msra.mxu1 %v11802_v22  ;;  %v11826_v22 = vpack.c.bf16 %v8554_v59, %v8553_v58 }
0x2d7b   : > { %11804 = vmatprep.subr.bf16.mxu1 %v12435_v3 }
0x2d7c   : > { %v12276_v51 = vpop.eup %12275 }
0x2d7d   : > { %v12278_v52 = vpop.eup %12277  ;;  %v4692_v53 = vsel %vm13744_vm10, %v12276_v51, 0.0 }
0x2d7e   : > { %v4693_v54 = vsel %vm1303_vm1, %v4692_v53, 0.0  ;;  %v4678_v55 = vsel %vm500_vm11, %v12278_v52, 0.0  ;;  %v12280_v12 = vpop.eup %12279  ;;  %11806 = vmatpush3.bf16.msra.mxu1 %v11805_v0  ;;  %v11829_v0 = vpack.c.bf16 %v8556_v62, %v8555_v60 }
0x2d7f   : > { %4694 = vadd.xlane.f32.xlu1 %v4693_v54  ;;  %v4679_v57 = vsel %vm1303_vm1, %v4678_v55, 0.0  ;;  %v4703_v14 = vadd.f32 1.0, %v12280_v12  ;;  %11807 = vmatprep.subr.bf16.mxu1 %v12435_v3  ;;  %v11811_v12 = vpack.c.bf16 %v4830_v11, %v4829_v9  ;;  %v8559_v9 = vld [vmem:[%s15786_s6 + $0xf0] sm:$0xff]  ;;  %v8560_v11 = vld [vmem:[%s15786_s6 + $0xf8] sm:$0xff] }
0x2d80   : > { %4680 = vadd.xlane.f32.xlu0 %v4679_v57 }
0x2d82   : > { %11809 = vmatpush3.bf16.msra.mxu1 %v11808_v7  ;;  %v11832_v7 = vpack.c.bf16 %v8558_v4, %v8557_v1  ;;  %v8565_v1 = vld [vmem:[%s15789_s9 + $0x10] sm:$0xff]  ;;  %v8566_v4 = vld [vmem:[%s15789_s9 + $0x18] sm:$0xff] }
0x2d83   : > { %11810 = vmatprep.subr.bf16.mxu1 %v12435_v3 }
0x2d86   : > { %11812 = vmatpush3.bf16.msra.mxu1 %v11811_v12  ;;  %v11835_v12 = vpack.c.bf16 %v8560_v11, %v8559_v9  ;;  %v11838_v9 = vpack.c.bf16 %v8566_v4, %v8565_v1  ;;  %v8604_v4 = vld [vmem:[%s15786_s6 + $0x1d0] sm:$0xff] }
0x2d87   : > { %10584 = vmatprep.subr.mxu1 %v12437_v6 }
0x2e0c   : > { %v4695_v16 = vpop.xlane.xlu1 %4694 }
0x2e0d   : > { %12281 = vrcp.f32 %v4695_v16  ;;  %v4681_v17 = vpop.xlane.xlu0 %4680 }
0x2e0e   : > { %12283 = vrcp.f32 %v4681_v17 }
0x2e0f   : > { %12285 = vrcp.f32 %v4703_v14 }
0x2e17   : > { %v12282_v18 = vpop.eup %12281 }
0x2e18   : > { %v12284_v20 = vpop.eup %12283  ;;  %v4697_v13 = vmul.f32 %v12282_v18, %v4692_v53 }
0x2e19   : > { %v4683_v24 = vmul.f32 %v12284_v20, %v4678_v55  ;;  %v12286_v28 = vpop.eup %12285  ;;  %v4797_v20 = vld [vmem:[%s15785_s5] sm:$0x1] }
0x2e1a   : > { %v4698_v26 = vsel %vm13744_vm10, %v4697_v13, 0.0  ;;  %v4706_v29 = vsel %vm13827_vm14, %v12286_v28, 0.0 }
0x2e1b   : > { %v4684_v19 = vsel %vm500_vm11, %v4683_v24, 0.0  ;;  %v4798_v24 = vld [vmem:[%s15785_s5 + $0x1] sm:$0x1] }
0x2e1c   : > { %v4699_v32 = vadd.f32 %v4698_v26, %v4684_v19 }
0x2e1e   : > { %v14490_v31 = vadd.f32 %v4706_v29, %v4699_v32 }
0x2e20   : > { %4708 = vst [vmem:[%s12655_s3 + $0x2] sm:$0x1] %v14490_v31  ;;  %v4710_v33 = vadd.f32 %v4709_v30, %v14490_v31 }
0x2e22   : > { %10502 = vmatmul.mubr.f32.vlgmr.msra.gmra.mrb[34].mxu0 %v4710_v33 }
0x2e23   : > { %10540 = vmatpush3.xpose.msk.msra.mxu0 %vm1406_vm3, %v12896_v2  ;;  %10541 = vmatprep.mubr.msk.f32.mxu0 %vm12436_vm0, %v12437_v6 }
0x2e24   : > { %10544 = vmatprep.subr.mxu0 %v12437_v6 }
0x2ef5   : > { %v4793_v34 = vpop.f32.mrb[34].mxu0 }
0x2ef6   : > { %v4794_v23 = vadd.f32 %v4793_v34, %v4710_v33  ;;  %v10503_v35 = vpop.f32.mrb[35].mxu0 }
0x2ef8   : > { %v4799_v36 = vsel %vm1303_vm1, %v4794_v23, 0.0 }
0x2ef9   : > { %4800 = vadd.xlane.f32.xlu0 %v4799_v36 }
0x2f86   : > { %v4801_v51 = vpop.xlane.xlu0 %4800 }
0x2f87   : > { %v4802_v52 = vmul.f32 0.02631579, %v4801_v51  ;;  %v8549_v51 = vld [vmem:[%s15786_s6 + $0xa0] sm:$0xff] }
0x2f89   : > { %v4803_v53 = vsub.f32 %v4794_v23, %v4802_v52  ;;  %v8550_v52 = vld [vmem:[%s15786_s6 + $0xa8] sm:$0xff] }
0x2f8b   : > { %v4804_v54 = vmul.f32 %v13171_v15, %v4803_v53  ;;  %v11820_v53 = vpack.c.bf16 %v8550_v52, %v8549_v51 }
0x2f8d   : > { %v4805_v55 = vmul.f32 %v4804_v54, %v4804_v54 }
0x2f8f   : > { %v4806_v57 = vsel %vm1303_vm1, %v4805_v55, 0.0  ;;  %v8552_v55 = vld [vmem:[%s15786_s6 + $0xb8] sm:$0xff] }
0x2f90   : > { %4807 = vadd.xlane.f32.xlu1 %v4806_v57 }
0x301d   : > { %v4808_v14 = vpop.xlane.xlu1 %4807 }
0x301e   : > { %v4809_v16 = vmul.f32 0.02631579, %v4808_v14  ;;  %v8570_v14 = vld [vmem:[%s15786_s6 + $0x100] sm:$0xff] }
0x3020   : > { %v4810_v17 = vadd.f32 1e-05, %v4809_v16  ;;  %v8571_v16 = vld [vmem:[%s15786_s6 + $0x108] sm:$0xff] }
0x3022   : > { %12287 = vrsqrt.f32 %v4810_v17  ;;  %v11844_v17 = vpack.c.bf16 %v8571_v16, %v8570_v14  ;;  %v5061_v14 = vld [vmem:[%s15789_s9 + $0x8] sm:$0xff] }
0x302c   : > { %v12288_v18 = vpop.eup %12287 }
0x302d   : > { %v4812_v13 = vmul.f32 %v12288_v18, %v4804_v54  ;;  %v8551_v54 = vld [vmem:[%s15786_s6 + $0xb0] sm:$0xff] }
0x302e   : > { %v11823_v57 = vpack.c.bf16 %v8552_v55, %v8551_v54  ;;  %v8572_v18 = vld [vmem:[%s15786_s6 + $0x110] sm:$0xff] }
0x302f   : > { %v4813_v28 = vmul.f32 %v4812_v13, %v4797_v20  ;;  %v8573_v20 = vld [vmem:[%s15786_s6 + $0x118] sm:$0xff] }
0x3030   : > { %v11847_v13 = vpack.c.bf16 %v8573_v20, %v8572_v18 }
0x3031   : > { %v14565_v26 = vadd.f32 %v4813_v28, %v4798_v24  ;;  %v8574_v24 = vld [vmem:[%s15786_s6 + $0x120] sm:$0xff]  ;;  %v8575_v28 = vld [vmem:[%s15786_s6 + $0x128] sm:$0xff] }
0x3033   : > { %10537 = vmatmul.mubr.f32.vlgmr.msra.gmra.mrb[62].mxu1 %v14565_v26 }
0x3034   : > { %10585 = vmatpush3.xpose.msk.msra.mxu1 %vm1406_vm3, %v13269_v56  ;;  %10586 = vmatprep.mubr.msk.f32.mxu1 %vm12436_vm0, %v12437_v6 }
0x3035   : > { %10589 = vmatprep.subr.mxu1 %v12437_v6 }
0x3106   : > { %v4897_v19 = vpop.f32.mrb[62].mxu1 }
0x3107   : > { %v10538_v32 = vpop.f32.mrb[63].mxu1  ;;  %10542 = vmatmul.mubr.msk.f32.vlgmr.msra.gmra.mrb[36].mxu0 %vm1406_vm3, %v4897_v19  ;;  %v11850_v19 = vpack.c.bf16 %v8575_v28, %v8574_v24 }
0x3108   : > { %10545 = vmatpush3.msk.msra.mxu0 %vm1501_vm4, %v12900_v8  ;;  %10546 = vmatprep.mubr.msk.f32.mxu0 %vm12436_vm0, %v12437_v6  ;;  %v8576_v32 = vld [vmem:[%s15786_s6 + $0x130] sm:$0xff] }
0x3109   : > { %11813 = vmatprep.subr.bf16.mxu0 %v12435_v3 }
0x31da   : > { %v4970_v29 = vpop.f32.mrb[36].mxu0 }
0x31db   : > { %v4974_v30 = vmul.f32 0.25, %v4970_v29  ;;  %v10543_v33 = vpop.f32.mrb[37].mxu0  ;;  %v8577_v29 = vld [vmem:[%s15786_s6 + $0x138] sm:$0xff] }
0x31dc   : > { %v8578_v33 = vld [vmem:[%s15786_s6 + $0x140] sm:$0xff] }
0x31dd   : > { %v4975_v34 = vadd.f32 %v4974_v30, %v13364_v50  ;;  %v11853_v30 = vpack.c.bf16 %v8577_v29, %v8576_v32 }
0x31df   : > { %v4976_v23 = vsel %vm1485_vm6, %v4975_v34, -inf }
0x31e0   : > { %4977 = vmax.xlane.f32.xlu0 %v4976_v23 }
0x326d   : > { %v4978_v35 = vpop.xlane.xlu0 %4977 }
0x326e   : > { %v4979_v36 = vsub.f32 %v4975_v34, %v4978_v35  ;;  %v8579_v34 = vld [vmem:[%s15786_s6 + $0x148] sm:$0xff]  ;;  %v8580_v35 = vld [vmem:[%s15786_s6 + $0x150] sm:$0xff] }
0x326f   : > { %v11856_v23 = vpack.c.bf16 %v8579_v34, %v8578_v33 }
0x3270   : > { %v4980_v37 = vmul.f32 1.442695, %v4979_v36  ;;  %v8581_v36 = vld [vmem:[%s15786_s6 + $0x158] sm:$0xff] }
0x3272   : > { %12289 = vpow2.f32 %v4980_v37  ;;  %v11859_v37 = vpack.c.bf16 %v8581_v36, %v8580_v35 }
0x327c   : > { %v12290_v38 = vpop.eup %12289 }
0x327d   : > { %v4982_v40 = vsel %vm1485_vm6, %v12290_v38, 0.0 }
0x327e   : > { %4983 = vadd.xlane.f32.xlu1 %v4982_v40  ;;  %v8583_v40 = vld [vmem:[%s15786_s6 + $0x168] sm:$0xff] }
0x330b   : > { %v4984_v41 = vpop.xlane.xlu1 %4983 }
0x330c   : > { %12291 = vrcp.f32 %v4984_v41 }
0x3316   : > { %v12292_v43 = vpop.eup %12291 }
0x3317   : > { %v4986_v46 = vmul.f32 %v12292_v43, %v12290_v38  ;;  %v8582_v38 = vld [vmem:[%s15786_s6 + $0x160] sm:$0xff]  ;;  %v11865_v43 = vpack.c.bf16 %v8585_v45, %v8584_v42  ;;  %v8591_v42 = vld [vmem:[%s15789_s9 + $0x28] sm:$0xff] }
0x3318   : > { %v11862_v41 = vpack.c.bf16 %v8583_v40, %v8582_v38 }
0x3319   : > { %5062 = vst.msk [vmem:[%s13372_s16 + $0x2] sm:$0x1] %vm1485_vm6, %v4986_v46  ;;  %10547 = vmatmul.mubr.msk.f32.vlgmr.msra.gmra.mrb[38].mxu0 %vm1497_vm7, %v4986_v46 }
0x331a   : > { %11815 = vmatpush3.bf16.msra.mxu0 %v11814_v44  ;;  %10581 = vmatprep.mubr.msk.f32.mxu0 %vm12436_vm0, %v12437_v6 }
0x331b   : > { %11816 = vmatprep.subr.bf16.mxu0 %v12435_v3 }
0x331e   : > { %11818 = vmatpush3.bf16.msra.mxu0 %v11817_v49 }
0x331f   : > { %11819 = vmatprep.subr.bf16.mxu0 %v12435_v3 }
0x3322   : > { %11821 = vmatpush3.bf16.msra.mxu0 %v11820_v53 }
0x3323   : > { %11822 = vmatprep.subr.bf16.mxu0 %v12435_v3 }
0x3326   : > { %11824 = vmatpush3.bf16.msra.mxu0 %v11823_v57 }
0x3327   : > { %11825 = vmatprep.subr.bf16.mxu0 %v12435_v3 }
0x332a   : > { %11827 = vmatpush3.bf16.msra.mxu0 %v11826_v22 }
0x332b   : > { %11828 = vmatprep.subr.bf16.mxu0 %v12435_v3 }
0x332e   : > { %11830 = vmatpush3.bf16.msra.mxu0 %v11829_v0 }
0x332f   : > { %11831 = vmatprep.subr.bf16.mxu0 %v12435_v3 }
0x3332   : > { %11833 = vmatpush3.bf16.msra.mxu0 %v11832_v7 }
0x3333   : > { %11834 = vmatprep.subr.bf16.mxu0 %v12435_v3 }
0x3336   : > { %11836 = vmatpush3.bf16.msra.mxu0 %v11835_v12  ;;  %v5060_v12 = vld [vmem:[%s15789_s9] sm:$0xff] }
0x3337   : > { %11843 = vmatprep.subr.bf16.mxu0 %v12435_v3  ;;  %v11841_v16 = vpack.c.bf16 %v5061_v14, %v5060_v12  ;;  %v8607_v12 = vld [vmem:[%s15786_s6 + $0x1e8] sm:$0xff] }
0x3339   : > { %10582 = vmatmul.mubr.f32.vlgmr.msra.gmra.mrb[40].mxu0 %v14565_v26 }
0x333a   : > { %11845 = vmatpush3.bf16.msra.mxu0 %v11844_v17  ;;  %10640 = vmatprep.mubr.msk.f32.mxu0 %vm12436_vm0, %v12437_v6 }
0x333b   : > { %11846 = vmatprep.subr.bf16.mxu0 %v12435_v3 }
0x333e   : > { %11848 = vmatpush3.bf16.msra.mxu0 %v11847_v13 }
0x333f   : > { %11849 = vmatprep.subr.bf16.mxu0 %v12435_v3 }
0x3342   : > { %11851 = vmatpush3.bf16.msra.mxu0 %v11850_v19 }
0x3343   : > { %11852 = vmatprep.subr.bf16.mxu0 %v12435_v3 }
0x3346   : > { %11854 = vmatpush3.bf16.msra.mxu0 %v11853_v30 }
0x3347   : > { %11855 = vmatprep.subr.bf16.mxu0 %v12435_v3 }
0x334a   : > { %11857 = vmatpush3.bf16.msra.mxu0 %v11856_v23 }
0x334b   : > { %11858 = vmatprep.subr.bf16.mxu0 %v12435_v3 }
0x334e   : > { %11860 = vmatpush3.bf16.msra.mxu0 %v11859_v37 }
0x334f   : > { %11861 = vmatprep.subr.bf16.mxu0 %v12435_v3 }
0x3352   : > { %11863 = vmatpush3.bf16.msra.mxu0 %v11862_v41  ;;  %v8590_v41 = vld [vmem:[%s15789_s9 + $0x20] sm:$0xff] }
0x3353   : > { %11864 = vmatprep.subr.bf16.mxu0 %v12435_v3 }
0x3356   : > { %11866 = vmatpush3.bf16.msra.mxu0 %v11865_v43  ;;  %v11868_v43 = vpack.c.bf16 %v8591_v42, %v8590_v41  ;;  %v8614_v41 = vld [vmem:[%s15789_s9 + $0x30] sm:$0xff]  ;;  %v8615_v42 = vld [vmem:[%s15789_s9 + $0x38] sm:$0xff] }
0x3357   : > { %10695 = vmatprep.subr.mxu0 %v12437_v6 }
0x3359   : > { %10641 = vmatmul.mubr.f32.vlgmr.msra.gmra.mrb[42].mxu0 %v14565_v26 }
0x335a   : > { %10697 = vmatprep.mubr.msk.f32.mxu0 %vm12436_vm0, %v12437_v6 }
0x335f   : > { %10696 = vmatpush3.xpose.msk.msra.mxu0 %vm1406_vm3, %v13271_v61 }
0x3360   : > { %10700 = vmatprep.subr.mxu0 %v12437_v6 }
0x33ec   : > { %v5056_v44 = vpop.f32.mrb[38].mxu0 }
0x33ed   : > { %v10548_v46 = vpop.f32.mrb[39].mxu0 }
0x33ee   : > { %v8594_v46 = vld [vmem:[%s15786_s6 + $0x180] sm:$0xff] }
0x340c   : > { %v5145_v47 = vpop.f32.mrb[40].mxu0 }
0x340d   : > { %v10583_v48 = vpop.f32.mrb[41].mxu0  ;;  %10587 = vmatmul.mubr.msk.f32.vlgmr.msra.gmra.mrb[64].mxu1 %vm1406_vm3, %v5145_v47  ;;  %v8595_v47 = vld [vmem:[%s15786_s6 + $0x188] sm:$0xff] }
0x340e   : > { %10590 = vmatpush3.msk.msra.mxu1 %vm1501_vm4, %v13324_v27  ;;  %10591 = vmatprep.mubr.msk.f32.mxu1 %vm12436_vm0, %v12437_v6  ;;  %v11871_v48 = vpack.c.bf16 %v8595_v47, %v8594_v46 }
0x340f   : > { %11837 = vmatprep.subr.bf16.mxu1 %v12435_v3 }
0x342c   : > { %v5539_v49 = vpop.f32.mrb[42].mxu0 }
0x342d   : > { %v10642_v51 = vpop.f32.mrb[43].mxu0 }
0x342e   : > { %v8597_v51 = vld [vmem:[%s15786_s6 + $0x198] sm:$0xff] }
0x34e0   : > { %v5218_v52 = vpop.f32.mrb[64].mxu1 }
0x34e1   : > { %v5222_v53 = vmul.f32 0.25, %v5218_v52  ;;  %v10588_v54 = vpop.f32.mrb[65].mxu1 }
0x34e3   : > { %v5223_v55 = vadd.f32 %v5222_v53, %v13364_v50 }
0x34e5   : > { %v5224_v57 = vsel %vm1485_vm6, %v5223_v55, -inf }
0x34e6   : > { %5225 = vmax.xlane.f32.xlu0 %v5224_v57  ;;  %v8599_v57 = vld [vmem:[%s15786_s6 + $0x1a8] sm:$0xff] }
0x3573   : > { %v5226_v58 = vpop.xlane.xlu0 %5225 }
0x3574   : > { %v5227_v59 = vsub.f32 %v5223_v55, %v5226_v58  ;;  %v8598_v55 = vld [vmem:[%s15786_s6 + $0x1a0] sm:$0xff] }
0x3575   : > { %v11877_v58 = vpack.c.bf16 %v8599_v57, %v8598_v55  ;;  %v6121_v55 = vld [vmem:[%s15790_s10 + $0x8] sm:$0xff]  ;;  %v6122_v57 = vld [vmem:[%s15790_s10 + $0x10] sm:$0xff] }
0x3576   : > { %v5228_v22 = vmul.f32 1.442695, %v5227_v59  ;;  %v8600_v59 = vld [vmem:[%s15786_s6 + $0x1b0] sm:$0xff] }
0x3578   : > { %12293 = vpow2.f32 %v5228_v22  ;;  %v8601_v22 = vld [vmem:[%s15786_s6 + $0x1b8] sm:$0xff] }
0x3582   : > { %v12294_v60 = vpop.eup %12293 }
0x3583   : > { %v5230_v62 = vsel %vm1485_vm6, %v12294_v60, 0.0 }
0x3584   : > { %5231 = vadd.xlane.f32.xlu1 %v5230_v62  ;;  %v8602_v62 = vld [vmem:[%s15786_s6 + $0x1c0] sm:$0xff] }
0x3611   : > { %v5232_v0 = vpop.xlane.xlu1 %5231 }
0x3612   : > { %12295 = vrcp.f32 %v5232_v0  ;;  %v8603_v0 = vld [vmem:[%s15786_s6 + $0x1c8] sm:$0xff] }
0x3613   : > { %v11883_v1 = vpack.c.bf16 %v8603_v0, %v8602_v62 }
0x361c   : > { %v12296_v7 = vpop.eup %12295 }
0x361d   : > { %v5234_v11 = vmul.f32 %v12296_v7, %v12294_v60  ;;  %v11880_v60 = vpack.c.bf16 %v8601_v22, %v8600_v59  ;;  %v8605_v7 = vld [vmem:[%s15786_s6 + $0x1d8] sm:$0xff]  ;;  %v6124_v22 = vld [vmem:[%s15790_s10 + $0x20] sm:$0xff] }
0x361f   : > { %8569 = vst.msk [vmem:[%s13372_s16 + $0x6] sm:$0x1] %vm1485_vm6, %v5234_v11  ;;  %10592 = vmatmul.mubr.msk.f32.vlgmr.msra.gmra.mrb[66].mxu1 %vm1497_vm7, %v5234_v11  ;;  %v8606_v11 = vld [vmem:[%s15786_s6 + $0x1e0] sm:$0xff] }
0x3620   : > { %11839 = vmatpush3.bf16.msra.mxu1 %v11838_v9  ;;  %10598 = vmatprep.mubr.msk.f32.mxu1 %vm12436_vm0, %v12437_v6  ;;  %v11886_v9 = vpack.c.bf16 %v8605_v7, %v8604_v4  ;;  %v11889_v14 = vpack.c.bf16 %v8607_v12, %v8606_v11  ;;  %v6126_v12 = vld [vmem:[%s15790_s10 + $0x30] sm:$0xff] }
0x3621   : > { %11840 = vmatprep.subr.bf16.mxu1 %v12435_v3 }
0x36f2   : > { %v5304_v17 = vpop.f32.mrb[66].mxu1 }
0x36f3   : > { %v10593_v18 = vpop.f32.mrb[67].mxu1  ;;  %10599 = vmatmul.mubr.msk.f32.vlgmr.msra.gmra.mrb[68].mxu1 %vm1406_vm3, %v5304_v17  ;;  %v8609_v17 = vld [vmem:[%s15786_s6 + $0x1f8] sm:$0xff] }
0x36f4   : > { %11842 = vmatpush3.bf16.msra.mxu1 %v11841_v16  ;;  %10605 = vmatprep.mubr.msk.f32.mxu1 %vm12436_vm0, %v12437_v6  ;;  %v8608_v16 = vld [vmem:[%s15786_s6 + $0x1f0] sm:$0xff] }
0x36f5   : > { %10643 = vmatprep.subr.mxu1 %v12437_v6  ;;  %v11892_v18 = vpack.c.bf16 %v8609_v17, %v8608_v16  ;;  %v6128_v17 = vld [vmem:[%s15790_s10 + $0x40] sm:$0xff] }
0x36f7   : > { %10606 = vmatmul.mubr.msk.f32.vlgmr.msra.gmra.mrb[70].mxu1 %vm1406_vm3, %v5056_v44 }
0x36f8   : > { %10645 = vmatprep.mubr.msk.f32.mxu1 %vm12436_vm0, %v12437_v6 }
0x36fd   : > { %10644 = vmatpush3.xpose.msk.msra.mxu1 %vm1406_vm3, %v12898_v5 }
0x36fe   : > { %10648 = vmatprep.subr.mxu1 %v12437_v6 }
0x3700   : > { %10646 = vmatmul.mubr.msk.f32.vlgmr.msra.gmra.mrb[72].mxu1 %vm1406_vm3, %v5539_v49  ;;  %v8596_v49 = vld [vmem:[%s15786_s6 + $0x190] sm:$0xff] }
0x3701   : > { %10649 = vmatpush3.msk.msra.mxu1 %vm1501_vm4, %v12902_v10  ;;  %10650 = vmatprep.mubr.msk.f32.mxu1 %vm12436_vm0, %v12437_v6  ;;  %v11874_v54 = vpack.c.bf16 %v8597_v51, %v8596_v49 }
0x3702   : > { %11867 = vmatprep.subr.bf16.mxu1 %v12435_v3 }
0x37c6   : > { %v5379_v20 = vpop.f32.mrb[68].mxu1 }
0x37c7   : > { %v10600_v13 = vpop.f32.mrb[69].mxu1 }
0x37ca   : > { %v5452_v24 = vpop.f32.mrb[70].mxu1 }
0x37cb   : > { %v14751_v28 = vadd.f32 %v5452_v24, %v5379_v20  ;;  %v10607_v19 = vpop.f32.mrb[71].mxu1 }
0x37d3   : > { %v5612_v32 = vpop.f32.mrb[72].mxu1 }
0x37d4   : > { %v5616_v29 = vmul.f32 0.25, %v5612_v32  ;;  %v10647_v30 = vpop.f32.mrb[73].mxu1 }
0x37d6   : > { %v5617_v33 = vadd.f32 %v5616_v29, %v13364_v50 }
0x37d8   : > { %v5618_v34 = vsel %vm1485_vm6, %v5617_v33, -inf }
0x37d9   : > { %5619 = vmax.xlane.f32.xlu0 %v5618_v34 }
0x3866   : > { %v5620_v23 = vpop.xlane.xlu0 %5619 }
0x3867   : > { %v5621_v35 = vsub.f32 %v5617_v33, %v5620_v23 }
0x3869   : > { %v5622_v36 = vmul.f32 1.442695, %v5621_v35 }
0x386b   : > { %12297 = vpow2.f32 %v5622_v36 }
0x3875   : > { %v12298_v37 = vpop.eup %12297 }
0x3876   : > { %v5624_v38 = vsel %vm1485_vm6, %v12298_v37, 0.0 }
0x3877   : > { %5625 = vadd.xlane.f32.xlu1 %v5624_v38 }
0x3904   : > { %v5626_v40 = vpop.xlane.xlu1 %5625 }
0x3905   : > { %12299 = vrcp.f32 %v5626_v40 }
0x390f   : > { %v12300_v45 = vpop.eup %12299 }
0x3910   : > { %v5628_v44 = vmul.f32 %v12300_v45, %v12298_v37 }
0x3912   : > { %8593 = vst.msk [vmem:[%s13372_s16 + $0xa] sm:$0x1] %vm1485_vm6, %v5628_v44  ;;  %10651 = vmatmul.mubr.msk.f32.vlgmr.msra.gmra.mrb[74].mxu1 %vm1497_vm7, %v5628_v44 }
0x3913   : > { %11869 = vmatpush3.bf16.msra.mxu1 %v11868_v43  ;;  %10657 = vmatprep.mubr.msk.f32.mxu1 %vm12436_vm0, %v12437_v6  ;;  %v11895_v43 = vpack.c.bf16 %v8615_v42, %v8614_v41  ;;  %v6212_v41 = vld [vmem:[%s15792_s12 + $0x20] sm:$0xff]  ;;  %v6213_v42 = vld [vmem:[%s15792_s12 + $0x28] sm:$0xff] }
0x3914   : > { %11870 = vmatprep.subr.bf16.mxu1 %v12435_v3 }
0x39e5   : > { %v5698_v52 = vpop.f32.mrb[74].mxu1 }
0x39e6   : > { %v10652_v53 = vpop.f32.mrb[75].mxu1  ;;  %10658 = vmatmul.mubr.msk.f32.vlgmr.msra.gmra.mrb[76].mxu1 %vm1406_vm3, %v5698_v52 }
0x39e7   : > { %11872 = vmatpush3.bf16.msra.mxu1 %v11871_v48  ;;  %10692 = vmatprep.mubr.msk.f32.mxu1 %vm12436_vm0, %v12437_v6 }
0x39e8   : > { %11873 = vmatprep.subr.bf16.mxu1 %v12435_v3 }
0x39eb   : > { %11875 = vmatpush3.bf16.msra.mxu1 %v11874_v54  ;;  %v6120_v54 = vld [vmem:[%s15790_s10] sm:$0xff] }
0x39ec   : > { %11876 = vmatprep.subr.bf16.mxu1 %v12435_v3 }
0x39ef   : > { %11878 = vmatpush3.bf16.msra.mxu1 %v11877_v58  ;;  %v11898_v58 = vpack.c.bf16 %v6121_v55, %v6120_v54  ;;  %v6220_v54 = vld [vmem:[%s15792_s12 + $0x60] sm:$0xff]  ;;  %v6221_v55 = vld [vmem:[%s15792_s12 + $0x68] sm:$0xff] }
0x39f0   : > { %11879 = vmatprep.subr.bf16.mxu1 %v12435_v3 }
0x39f3   : > { %11881 = vmatpush3.bf16.msra.mxu1 %v11880_v60  ;;  %v6125_v60 = vld [vmem:[%s15790_s10 + $0x28] sm:$0xff] }
0x39f4   : > { %11882 = vmatprep.subr.bf16.mxu1 %v12435_v3  ;;  %v11904_v62 = vpack.c.bf16 %v6125_v60, %v6124_v22  ;;  %v6102_v60 = vld [vmem:[%s15785_s5 + $0x2] sm:$0x1] }
0x39f7   : > { %11884 = vmatpush3.bf16.msra.mxu1 %v11883_v1 }
0x39f8   : > { %11885 = vmatprep.subr.bf16.mxu1 %v12435_v3 }
0x39fb   : > { %11887 = vmatpush3.bf16.msra.mxu1 %v11886_v9 }
0x39fc   : > { %11888 = vmatprep.subr.bf16.mxu1 %v12435_v3 }
0x39ff   : > { %11890 = vmatpush3.bf16.msra.mxu1 %v11889_v14  ;;  %v6127_v14 = vld [vmem:[%s15790_s10 + $0x38] sm:$0xff] }
0x3a00   : > { %11891 = vmatprep.subr.bf16.mxu1 %v12435_v3  ;;  %v11907_v16 = vpack.c.bf16 %v6127_v14, %v6126_v12 }
0x3a03   : > { %11893 = vmatpush3.bf16.msra.mxu1 %v11892_v18  ;;  %v6129_v18 = vld [vmem:[%s15790_s10 + $0x48] sm:$0xff] }
0x3a04   : > { %11921 = vmatprep.subr.bf16.mxu1 %v12435_v3 }
0x3a06   : > { %10693 = vmatmul.mubr.f32.vlgmr.msra.gmra.mrb[78].mxu1 %v14565_v26 }
0x3a07   : > { %10779 = vmatprep.mubr.msk.f32.mxu1 %vm12436_vm0, %v12437_v6 }
0x3ab9   : > { %v5773_v20 = vpop.f32.mrb[76].mxu1 }
0x3aba   : > { %v5777_v13 = vadd.f32 %v5773_v20, %v14751_v28  ;;  %v10659_v24 = vpop.f32.mrb[77].mxu1  ;;  %v6130_v20 = vld [vmem:[%s15790_s10 + $0x50] sm:$0xff] }
0x3abb   : > { %v6131_v24 = vld [vmem:[%s15790_s10 + $0x58] sm:$0xff] }
0x3ad9   : > { %v5861_v19 = vpop.f32.mrb[78].mxu1 }
0x3ada   : > { %v10694_v32 = vpop.f32.mrb[79].mxu1  ;;  %10698 = vmatmul.mubr.msk.f32.vlgmr.msra.gmra.mrb[44].mxu0 %vm1406_vm3, %v5861_v19  ;;  %v11913_v19 = vpack.c.bf16 %v6131_v24, %v6130_v20  ;;  %v6224_v20 = vld [vmem:[%s15785_s5 + $0x6] sm:$0x1] }
0x3adb   : > { %10701 = vmatpush3.msk.msra.mxu0 %vm1501_vm4, %v13352_v39  ;;  %10702 = vmatprep.mubr.msk.f32.mxu0 %vm12436_vm0, %v12437_v6  ;;  %v6132_v32 = vld [vmem:[%s15790_s10 + $0x60] sm:$0xff] }
0x3adc   : > { %11894 = vmatprep.subr.bf16.mxu0 %v12435_v3 }
0x3bad   : > { %v5934_v29 = vpop.f32.mrb[44].mxu0 }
0x3bae   : > { %v5938_v30 = vmul.f32 0.25, %v5934_v29  ;;  %v10699_v33 = vpop.f32.mrb[45].mxu0  ;;  %v6133_v29 = vld [vmem:[%s15790_s10 + $0x68] sm:$0xff] }
0x3baf   : > { %v6134_v33 = vld [vmem:[%s15790_s10 + $0x70] sm:$0xff] }
0x3bb0   : > { %v5939_v34 = vadd.f32 %v5938_v30, %v13364_v50  ;;  %v11916_v30 = vpack.c.bf16 %v6133_v29, %v6132_v32 }
0x3bb2   : > { %v5940_v28 = vsel %vm1485_vm6, %v5939_v34, -inf }
0x3bb3   : > { %5941 = vmax.xlane.f32.xlu0 %v5940_v28 }
0x3c40   : > { %v5942_v23 = vpop.xlane.xlu0 %5941 }
0x3c41   : > { %v5943_v35 = vsub.f32 %v5939_v34, %v5942_v23  ;;  %v6135_v34 = vld [vmem:[%s15790_s10 + $0x78] sm:$0xff]  ;;  %v6208_v23 = vld [vmem:[%s15792_s12] sm:$0xff] }
0x3c42   : > { %v11919_v28 = vpack.c.bf16 %v6135_v34, %v6134_v33  ;;  %v6315_v33 = vld [vmem:[%s15793_s13 + $0x8] sm:$0xff]  ;;  %v6316_v34 = vld [vmem:[%s15793_s13 + $0x10] sm:$0xff] }
0x3c43   : > { %v5944_v36 = vmul.f32 1.442695, %v5943_v35  ;;  %v6209_v35 = vld [vmem:[%s15792_s12 + $0x8] sm:$0xff] }
0x3c45   : > { %12301 = vpow2.f32 %v5944_v36  ;;  %v6210_v36 = vld [vmem:[%s15792_s12 + $0x10] sm:$0xff] }
0x3c4f   : > { %v12302_v37 = vpop.eup %12301 }
0x3c50   : > { %v5946_v38 = vsel %vm1485_vm6, %v12302_v37, 0.0 }
0x3c51   : > { %5947 = vadd.xlane.f32.xlu1 %v5946_v38  ;;  %v6211_v38 = vld [vmem:[%s15792_s12 + $0x18] sm:$0xff] }
0x3cde   : > { %v5948_v40 = vpop.xlane.xlu1 %5947 }
0x3cdf   : > { %12303 = vrcp.f32 %v5948_v40  ;;  %v11925_v40 = vpack.c.bf16 %v6211_v38, %v6210_v36  ;;  %v6318_v36 = vld [vmem:[%s15793_s13 + $0x20] sm:$0xff] }
0x3ce9   : > { %v12304_v45 = vpop.eup %12303 }
0x3cea   : > { %v5950_v44 = vmul.f32 %v12304_v45, %v12302_v37  ;;  %v11922_v37 = vpack.c.bf16 %v6209_v35, %v6208_v23  ;;  %v11928_v45 = vpack.c.bf16 %v6213_v42, %v6212_v41  ;;  %v6317_v23 = vld [vmem:[%s15793_s13 + $0x18] sm:$0xff] }
0x3ceb   : > { %v11949_v35 = vpack.c.bf16 %v6317_v23, %v6316_v34  ;;  %v6445_v23 = vld [vmem:[%s15784_s4 + $0x28] sm:$0xff] }
0x3cec   : > { %8617 = vst.msk [vmem:[%s13372_s16 + $0xe] sm:$0x1] %vm1485_vm6, %v5950_v44  ;;  %10703 = vmatmul.mubr.msk.f32.vlgmr.msra.gmra.mrb[46].mxu0 %vm1497_vm7, %v5950_v44  ;;  %11923 = vmatpush3.bf16.msra.mxu1 %v11922_v37  ;;  %v6215_v44 = vld [vmem:[%s15792_s12 + $0x38] sm:$0xff]  ;;  %v6319_v37 = vld [vmem:[%s15793_s13 + $0x28] sm:$0xff] }
0x3ced   : > { %11896 = vmatpush3.bf16.msra.mxu0 %v11895_v43  ;;  %10709 = vmatprep.mubr.msk.f32.mxu0 %vm12436_vm0, %v12437_v6  ;;  %v6214_v43 = vld [vmem:[%s15792_s12 + $0x30] sm:$0xff]  ;;  %v11952_v38 = vpack.c.bf16 %v6319_v37, %v6318_v36  ;;  %v6447_v37 = vld [vmem:[%s15784_s4 + $0x38] sm:$0xff] }
0x3cee   : > { %11897 = vmatprep.subr.bf16.mxu0 %v12435_v3  ;;  %11924 = vmatprep.subr.bf16.mxu1 %v12435_v3  ;;  %v6446_v36 = vld [vmem:[%s15784_s4 + $0x30] sm:$0xff] }
0x3cf0   : > { %11926 = vmatpush3.bf16.msra.mxu1 %v11925_v40 }
0x3cf1   : > { %11927 = vmatprep.subr.bf16.mxu1 %v12435_v3 }
0x3cf4   : > { %11929 = vmatpush3.bf16.msra.mxu1 %v11928_v45 }
0x3cf5   : > { %11930 = vmatprep.subr.bf16.mxu1 %v12435_v3 }
0x3dbf   : > { %v6020_v46 = vpop.f32.mrb[46].mxu0 }
0x3dc0   : > { %v10704_v47 = vpop.f32.mrb[47].mxu0  ;;  %10710 = vmatmul.mubr.msk.f32.vlgmr.msra.gmra.mrb[48].mxu0 %vm1406_vm3, %v6020_v46  ;;  %v11931_v46 = vpack.c.bf16 %v6215_v44, %v6214_v43 }
0x3dc1   : > { %10744 = vmatprep.mubr.msk.f32.mxu0 %vm12436_vm0, %v12437_v6  ;;  %11899 = vmatpush3.bf16.msra.mxu0 %v11898_v58  ;;  %v6216_v47 = vld [vmem:[%s15792_s12 + $0x40] sm:$0xff] }
0x3dc2   : > { %11900 = vmatprep.subr.bf16.mxu0 %v12435_v3  ;;  %11932 = vmatpush3.bf16.msra.mxu1 %v11931_v46  ;;  %v6320_v46 = vld [vmem:[%s15793_s13 + $0x30] sm:$0xff] }
0x3dc3   : > { %11933 = vmatprep.subr.bf16.mxu1 %v12435_v3 }
0x3e93   : > { %v6095_v48 = vpop.f32.mrb[48].mxu0 }
0x3e94   : > { %v6099_v49 = vadd.f32 %v6095_v48, %v5777_v13  ;;  %v10711_v51 = vpop.f32.mrb[49].mxu0  ;;  %v11910_v13 = vpack.c.bf16 %v6129_v18, %v6128_v17  ;;  %v6217_v48 = vld [vmem:[%s15792_s12 + $0x48] sm:$0xff] }
0x3e95   : > { %v6218_v51 = vld [vmem:[%s15792_s12 + $0x50] sm:$0xff] }
0x3e96   : > { %v6101_v52 = vadd.f32 %v6099_v49, %v14565_v26  ;;  %v6123_v26 = vld [vmem:[%s15790_s10 + $0x18] sm:$0xff]  ;;  %v11934_v49 = vpack.c.bf16 %v6217_v48, %v6216_v47 }
0x3e97   : > { %v11901_v59 = vpack.c.bf16 %v6123_v26, %v6122_v57  ;;  %v11940_v57 = vpack.c.bf16 %v6221_v55, %v6220_v54  ;;  %v6321_v47 = vld [vmem:[%s15793_s13 + $0x38] sm:$0xff] }
0x3e98   : > { %v6104_v53 = vsel %vm1303_vm1, %v6101_v52, 0.0  ;;  %11935 = vmatpush3.bf16.msra.mxu1 %v11934_v49  ;;  %v11955_v48 = vpack.c.bf16 %v6321_v47, %v6320_v46  ;;  %v6322_v49 = vld [vmem:[%s15793_s13 + $0x40] sm:$0xff]  ;;  %v6325_v54 = vld [vmem:[%s15793_s13 + $0x58] sm:$0xff] }
0x3e99   : > { %6105 = vadd.xlane.f32.xlu0 %v6104_v53  ;;  %11902 = vmatpush3.bf16.msra.mxu0 %v11901_v59 }
0x3e9a   : > { %11903 = vmatprep.subr.bf16.mxu0 %v12435_v3  ;;  %11936 = vmatprep.subr.bf16.mxu1 %v12435_v3 }
0x3e9d   : > { %11905 = vmatpush3.bf16.msra.mxu0 %v11904_v62 }
0x3e9e   : > { %11906 = vmatprep.subr.bf16.mxu0 %v12435_v3 }
0x3ea1   : > { %11908 = vmatpush3.bf16.msra.mxu0 %v11907_v16 }
0x3ea2   : > { %11909 = vmatprep.subr.bf16.mxu0 %v12435_v3 }
0x3ea5   : > { %11911 = vmatpush3.bf16.msra.mxu0 %v11910_v13 }
0x3ea6   : > { %11912 = vmatprep.subr.bf16.mxu0 %v12435_v3 }
0x3ea9   : > { %11914 = vmatpush3.bf16.msra.mxu0 %v11913_v19 }
0x3eaa   : > { %11915 = vmatprep.subr.bf16.mxu0 %v12435_v3 }
0x3ead   : > { %11917 = vmatpush3.bf16.msra.mxu0 %v11916_v30  ;;  %v6314_v30 = vld [vmem:[%s15793_s13] sm:$0xff] }
0x3eae   : > { %11918 = vmatprep.subr.bf16.mxu0 %v12435_v3 }
0x3eb1   : > { %11920 = vmatpush3.bf16.msra.mxu0 %v11919_v28  ;;  %v11946_v28 = vpack.c.bf16 %v6315_v33, %v6314_v30  ;;  %v6443_v33 = vld [vmem:[%s15784_s4 + $0x18] sm:$0xff] }
0x3eb2   : > { %11945 = vmatprep.subr.bf16.mxu0 %v12435_v3 }
0x3f26   : > { %v6106_v0 = vpop.xlane.xlu0 %6105 }
0x3f27   : > { %v6107_v1 = vmul.f32 0.02631579, %v6106_v0  ;;  %v6103_v0 = vld [vmem:[%s15785_s5 + $0x3] sm:$0x1] }
0x3f29   : > { %v6108_v4 = vsub.f32 %v6101_v52, %v6107_v1  ;;  %v6219_v52 = vld [vmem:[%s15792_s12 + $0x58] sm:$0xff] }
0x3f2a   : > { %v11937_v53 = vpack.c.bf16 %v6219_v52, %v6218_v51  ;;  %v6323_v51 = vld [vmem:[%s15793_s13 + $0x48] sm:$0xff]  ;;  %v6324_v52 = vld [vmem:[%s15793_s13 + $0x50] sm:$0xff] }
0x3f2b   : > { %v14879_v7 = vmul.f32 %v13171_v15, %v6108_v4  ;;  %v11961_v55 = vpack.c.bf16 %v6325_v54, %v6324_v52 }
0x3f2c   : > { %11938 = vmatpush3.bf16.msra.mxu1 %v11937_v53  ;;  %v11958_v53 = vpack.c.bf16 %v6323_v51, %v6322_v49 }
0x3f2d   : > { %v6110_v9 = vmul.f32 %v14879_v7, %v14879_v7  ;;  %11939 = vmatprep.subr.bf16.mxu1 %v12435_v3 }
0x3f2f   : > { %v6111_v11 = vsel %vm1303_vm1, %v6110_v9, 0.0  ;;  %v6222_v9 = vld [vmem:[%s15792_s12 + $0x70] sm:$0xff] }
0x3f30   : > { %6112 = vadd.xlane.f32.xlu1 %v6111_v11  ;;  %11941 = vmatpush3.bf16.msra.mxu1 %v11940_v57  ;;  %v6223_v11 = vld [vmem:[%s15792_s12 + $0x78] sm:$0xff]  ;;  %v6326_v57 = vld [vmem:[%s15793_s13 + $0x60] sm:$0xff] }
0x3f31   : > { %11942 = vmatprep.subr.bf16.mxu1 %v12435_v3  ;;  %v11943_v12 = vpack.c.bf16 %v6223_v11, %v6222_v9  ;;  %v6296_v9 = vld [vmem:[%s15785_s5 + $0x4] sm:$0x1] }
0x3f34   : > { %11944 = vmatpush3.bf16.msra.mxu1 %v11943_v12  ;;  %v6297_v12 = vld [vmem:[%s15785_s5 + $0x5] sm:$0x1] }
0x3f35   : > { %11969 = vmatprep.subr.bf16.mxu1 %v12435_v3 }
0x3fbd   : > { %v6113_v58 = vpop.xlane.xlu1 %6112 }
0x3fbe   : > { %v6114_v26 = vmul.f32 0.02631579, %v6113_v58  ;;  %v6327_v58 = vld [vmem:[%s15793_s13 + $0x68] sm:$0xff] }
0x3fc0   : > { %v6115_v59 = vadd.f32 1e-05, %v6114_v26  ;;  %v11964_v26 = vpack.c.bf16 %v6327_v58, %v6326_v57  ;;  %v6450_v57 = vld [vmem:[%s15784_s4 + $0x50] sm:$0xff]  ;;  %v6451_v58 = vld [vmem:[%s15784_s4 + $0x58] sm:$0xff] }
0x3fc2   : > { %12305 = vrsqrt.f32 %v6115_v59  ;;  %v6328_v59 = vld [vmem:[%s15793_s13 + $0x70] sm:$0xff] }
0x3fcc   : > { %v12306_v22 = vpop.eup %12305 }
0x3fcd   : > { %v6117_v62 = vmul.f32 %v12306_v22, %v14879_v7  ;;  %v6136_v7 = vld [vmem:[%s15791_s11] sm:$0x1]  ;;  %v6329_v22 = vld [vmem:[%s15793_s13 + $0x78] sm:$0xff] }
0x3fcf   : > { %v6118_v1 = vmul.f32 %v6117_v62, %v6102_v60  ;;  %v11967_v60 = vpack.c.bf16 %v6329_v22, %v6328_v59  ;;  %v6452_v59 = vld [vmem:[%s15784_s4 + $0x60] sm:$0xff]  ;;  %v6453_v22 = vld [vmem:[%s15784_s4 + $0x68] sm:$0xff] }
0x3fd1   : > { %v6119_v4 = vadd.f32 %v6118_v1, %v6103_v0 }
0x3fd3   : > { %10745 = vmatmul.mubr.f32.vlgmr.msra.gmra.mrb[50].mxu0 %v6119_v4 }
0x3fd4   : > { %10814 = vmatprep.mubr.msk.f32.mxu0 %vm12436_vm0, %v12437_v6  ;;  %11947 = vmatpush3.bf16.msra.mxu0 %v11946_v28  ;;  %v6444_v28 = vld [vmem:[%s15784_s4 + $0x20] sm:$0xff] }
0x3fd5   : > { %11948 = vmatprep.subr.bf16.mxu0 %v12435_v3 }
0x3fd8   : > { %11950 = vmatpush3.bf16.msra.mxu0 %v11949_v35  ;;  %v11976_v35 = vpack.c.bf16 %v6445_v23, %v6444_v28 }
0x3fd9   : > { %11951 = vmatprep.subr.bf16.mxu0 %v12435_v3 }
0x3fdc   : > { %11953 = vmatpush3.bf16.msra.mxu0 %v11952_v38  ;;  %v11979_v38 = vpack.c.bf16 %v6447_v37, %v6446_v36  ;;  %v6544_v36 = vld [vmem:[%s15786_s6] sm:$0xff]  ;;  %v6545_v37 = vld [vmem:[%s15786_s6 + $0x8] sm:$0xff] }
0x3fdd   : > { %11954 = vmatprep.subr.bf16.mxu0 %v12435_v3 }
0x3fe0   : > { %11956 = vmatpush3.bf16.msra.mxu0 %v11955_v48 }
0x3fe1   : > { %11957 = vmatprep.subr.bf16.mxu0 %v12435_v3 }
0x3fe4   : > { %11959 = vmatpush3.bf16.msra.mxu0 %v11958_v53 }
0x3fe5   : > { %11960 = vmatprep.subr.bf16.mxu0 %v12435_v3 }
0x3fe8   : > { %11962 = vmatpush3.bf16.msra.mxu0 %v11961_v55 }
0x3fe9   : > { %11963 = vmatprep.subr.bf16.mxu0 %v12435_v3 }
0x3fec   : > { %11965 = vmatpush3.bf16.msra.mxu0 %v11964_v26  ;;  %v11985_v26 = vpack.c.bf16 %v6451_v58, %v6450_v57  ;;  %v6553_v57 = vld [vmem:[%s15786_s6 + $0x48] sm:$0xff] }
0x3fed   : > { %11966 = vmatprep.subr.bf16.mxu0 %v12435_v3 }
0x3ff0   : > { %11968 = vmatpush3.bf16.msra.mxu0 %v11967_v60  ;;  %v11988_v60 = vpack.c.bf16 %v6453_v22, %v6452_v59  ;;  %v6555_v59 = vld [vmem:[%s15786_s6 + $0x58] sm:$0xff] }
0x3ff1   : > { %11993 = vmatprep.subr.bf16.mxu0 %v12435_v3 }
0x40a6   : > { %v6203_v14 = vpop.f32.mrb[50].mxu0 }
0x40a7   : > { %v6204_v16 = vadd.f32 %v6203_v14, %v6136_v7  ;;  %v10746_v17 = vpop.f32.mrb[51].mxu0 }
0x40a9   : > { %v6207_v18 = vmax.f32 %v6204_v16, 0.0 }
0x40ab   : > { %10780 = vmatmul.mubr.f32.vlgmr.msra.gmra.mrb[80].mxu1 %v6207_v18 }
0x40ac   : > { %10849 = vmatprep.mubr.msk.f32.mxu1 %vm12436_vm0, %v12437_v6 }
0x417e   : > { %v6291_v13 = vpop.f32.mrb[80].mxu1 }
0x417f   : > { %v6292_v24 = vadd.f32 %v6291_v13, %v6224_v20  ;;  %v10781_v19 = vpop.f32.mrb[81].mxu1 }
0x4181   : > { %v6295_v32 = vadd.f32 %v6292_v24, %v6119_v4 }
0x4183   : > { %v6298_v29 = vsel %vm1303_vm1, %v6295_v32, 0.0 }
0x4184   : > { %6299 = vadd.xlane.f32.xlu0 %v6298_v29  ;;  %v6442_v29 = vld [vmem:[%s15784_s4 + $0x10] sm:$0xff] }
0x4185   : > { %v11973_v34 = vpack.c.bf16 %v6443_v33, %v6442_v29  ;;  %v6438_v29 = vld [vmem:[%s15782_s2 + $0x3] sm:$0x1] }
0x4211   : > { %v6300_v40 = vpop.xlane.xlu0 %6299 }
0x4212   : > { %v6301_v41 = vmul.f32 0.02631579, %v6300_v40  ;;  %v6448_v40 = vld [vmem:[%s15784_s4 + $0x40] sm:$0xff] }
0x4214   : > { %v6302_v42 = vsub.f32 %v6295_v32, %v6301_v41  ;;  %v6441_v32 = vld [vmem:[%s15784_s4 + $0x8] sm:$0xff] }
0x4215   : > { %v6449_v41 = vld [vmem:[%s15784_s4 + $0x48] sm:$0xff] }
0x4216   : > { %v6303_v45 = vmul.f32 %v13171_v15, %v6302_v42  ;;  %v11982_v42 = vpack.c.bf16 %v6449_v41, %v6448_v40  ;;  %v6547_v40 = vld [vmem:[%s15786_s6 + $0x18] sm:$0xff] }
0x4218   : > { %v6304_v43 = vmul.f32 %v6303_v45, %v6303_v45 }
0x421a   : > { %v6305_v44 = vsel %vm1303_vm1, %v6304_v43, 0.0 }
0x421b   : > { %6306 = vadd.xlane.f32.xlu1 %v6305_v44 }
0x42a8   : > { %v6307_v62 = vpop.xlane.xlu1 %6306 }
0x42a9   : > { %v6308_v0 = vmul.f32 0.02631579, %v6307_v62  ;;  %v6454_v62 = vld [vmem:[%s15784_s4 + $0x70] sm:$0xff] }
0x42ab   : > { %v6309_v1 = vadd.f32 1e-05, %v6308_v0  ;;  %v6455_v0 = vld [vmem:[%s15784_s4 + $0x78] sm:$0xff] }
0x42ad   : > { %12307 = vrsqrt.f32 %v6309_v1  ;;  %v11991_v1 = vpack.c.bf16 %v6455_v0, %v6454_v62  ;;  %v6557_v62 = vld [vmem:[%s15786_s6 + $0x68] sm:$0xff] }
0x42b7   : > { %v12308_v4 = vpop.eup %12307 }
0x42b8   : > { %v6311_v11 = vmul.f32 %v12308_v4, %v6303_v45 }
0x42ba   : > { %v6312_v7 = vmul.f32 %v6311_v11, %v6296_v9 }
0x42bc   : > { %v6313_v14 = vadd.f32 %v6312_v7, %v6297_v12 }
0x42be   : > { %10815 = vmatmul.mubr.f32.vlgmr.msra.gmra.mrb[52].mxu0 %v6313_v14 }
0x42bf   : > { %10884 = vmatprep.mubr.msk.f32.mxu0 %vm12436_vm0, %v12437_v6 }
0x4391   : > { %v6396_v16 = vpop.f32.mrb[52].mxu0 }
0x4392   : > { %v15060_v17 = vadd.f32 %v6396_v16, %v14490_v31  ;;  %v10816_v18 = vpop.f32.mrb[53].mxu0  ;;  %v6440_v31 = vld [vmem:[%s15784_s4] sm:$0xff] }
0x4393   : > { %v11970_v30 = vpack.c.bf16 %v6441_v32, %v6440_v31 }
0x4394   : > { %v6414_v20 = vsel %vm13744_vm10, %v15060_v17, -1e+30  ;;  %v6400_v13 = vsel %vm500_vm11, %v15060_v17, -1e+30  ;;  %v6429_v4 = vsub.f32 0.0, %v15060_v17 }
0x4395   : > { %v6415_v24 = vsel %vm1303_vm1, %v6414_v20, -inf  ;;  %v6401_v19 = vsel %vm1303_vm1, %v6400_v13, -inf  ;;  %11971 = vmatpush3.bf16.msra.mxu1 %v11970_v30 }
0x4396   : > { %6416 = vmax.xlane.f32.xlu1 %v6415_v24  ;;  %6402 = vmax.xlane.f32.xlu0 %v6401_v19  ;;  %v6430_v9 = vmul.f32 1.442695, %v6429_v4  ;;  %v6559_v4 = vld [vmem:[%s15786_s6 + $0x78] sm:$0xff] }
0x4397   : > { %11972 = vmatprep.subr.bf16.mxu1 %v12435_v3 }
0x4399   : > { %11974 = vmatpush3.bf16.msra.mxu1 %v11973_v34 }
0x439a   : > { %11975 = vmatprep.subr.bf16.mxu1 %v12435_v3 }
0x439d   : > { %11977 = vmatpush3.bf16.msra.mxu1 %v11976_v35 }
0x439e   : > { %11978 = vmatprep.subr.bf16.mxu1 %v12435_v3 }
0x43a1   : > { %11980 = vmatpush3.bf16.msra.mxu1 %v11979_v38  ;;  %v11994_v38 = vpack.c.bf16 %v6545_v37, %v6544_v36  ;;  %v8622_v37 = vld [vmem:[%s15786_s6 + $0x80] sm:$0xff] }
0x43a2   : > { %11981 = vmatprep.subr.bf16.mxu1 %v12435_v3 }
0x43a3   : > { %11995 = vmatpush3.bf16.msra.mxu0 %v11994_v38 }
0x43a4   : > { %11996 = vmatprep.subr.bf16.mxu0 %v12435_v3 }
0x43a5   : > { %11983 = vmatpush3.bf16.msra.mxu1 %v11982_v42  ;;  %v6548_v42 = vld [vmem:[%s15786_s6 + $0x20] sm:$0xff] }
0x43a6   : > { %11984 = vmatprep.subr.bf16.mxu1 %v12435_v3 }
0x43a9   : > { %11986 = vmatpush3.bf16.msra.mxu1 %v11985_v26  ;;  %v6554_v26 = vld [vmem:[%s15786_s6 + $0x50] sm:$0xff] }
0x43aa   : > { %11987 = vmatprep.subr.bf16.mxu1 %v12435_v3  ;;  %v12009_v22 = vpack.c.bf16 %v6555_v59, %v6554_v26  ;;  %v8634_v26 = vld [vmem:[%s15786_s6 + $0xe0] sm:$0xff]  ;;  %v8635_v59 = vld [vmem:[%s15786_s6 + $0xe8] sm:$0xff] }
0x43ad   : > { %11989 = vmatpush3.bf16.msra.mxu1 %v11988_v60  ;;  %v6556_v60 = vld [vmem:[%s15786_s6 + $0x60] sm:$0xff] }
0x43ae   : > { %11990 = vmatprep.subr.bf16.mxu1 %v12435_v3  ;;  %v12012_v0 = vpack.c.bf16 %v6557_v62, %v6556_v60  ;;  %v8636_v60 = vld [vmem:[%s15786_s6 + $0xf0] sm:$0xff]  ;;  %v8637_v62 = vld [vmem:[%s15786_s6 + $0xf8] sm:$0xff] }
0x43b1   : > { %11992 = vmatpush3.bf16.msra.mxu1 %v11991_v1  ;;  %v6558_v1 = vld [vmem:[%s15786_s6 + $0x70] sm:$0xff] }
0x43b2   : > { %10887 = vmatprep.subr.mxu1 %v12437_v6 }
0x4423   : > { %v6417_v45 = vpop.xlane.xlu1 %6416  ;;  %v6403_v43 = vpop.xlane.xlu0 %6402 }
0x4424   : > { %v6418_v44 = vsub.f32 %v6414_v20, %v6417_v45  ;;  %v6404_v46 = vsub.f32 %v6400_v13, %v6403_v43  ;;  %v6549_v45 = vld [vmem:[%s15786_s6 + $0x28] sm:$0xff] }
0x4425   : > { %v12000_v43 = vpack.c.bf16 %v6549_v45, %v6548_v42  ;;  %v8624_v42 = vld [vmem:[%s15786_s6 + $0x90] sm:$0xff]  ;;  %v8625_v45 = vld [vmem:[%s15786_s6 + $0x98] sm:$0xff] }
0x4426   : > { %v6419_v47 = vmul.f32 1.442695, %v6418_v44  ;;  %v6405_v48 = vmul.f32 1.442695, %v6404_v46  ;;  %v6550_v44 = vld [vmem:[%s15786_s6 + $0x30] sm:$0xff]  ;;  %v6551_v46 = vld [vmem:[%s15786_s6 + $0x38] sm:$0xff] }
0x4428   : > { %12309 = vpow2.f32 %v6419_v47  ;;  %v12003_v47 = vpack.c.bf16 %v6551_v46, %v6550_v44  ;;  %v8626_v44 = vld [vmem:[%s15786_s6 + $0xa0] sm:$0xff]  ;;  %v8627_v46 = vld [vmem:[%s15786_s6 + $0xa8] sm:$0xff] }
0x4429   : > { %12311 = vpow2.f32 %v6405_v48 }
0x442a   : > { %12313 = vpow2.f32 %v6430_v9  ;;  %v12015_v9 = vpack.c.bf16 %v6559_v4, %v6558_v1  ;;  %v6789_v1 = vld [vmem:[%s15789_s9] sm:$0xff]  ;;  %v6790_v4 = vld [vmem:[%s15789_s9 + $0x8] sm:$0xff] }
0x4432   : > { %v12310_v49 = vpop.eup %12309 }
0x4433   : > { %v12312_v51 = vpop.eup %12311  ;;  %v6421_v52 = vsel %vm13744_vm10, %v12310_v49, 0.0 }
0x4434   : > { %v6422_v53 = vsel %vm1303_vm1, %v6421_v52, 0.0  ;;  %v6407_v54 = vsel %vm500_vm11, %v12312_v51, 0.0  ;;  %v12314_v11 = vpop.eup %12313 }
0x4435   : > { %6423 = vadd.xlane.f32.xlu1 %v6422_v53  ;;  %v6408_v55 = vsel %vm1303_vm1, %v6407_v54, 0.0  ;;  %v6432_v12 = vadd.f32 1.0, %v12314_v11 }
0x4436   : > { %6409 = vadd.xlane.f32.xlu0 %v6408_v55  ;;  %v6552_v55 = vld [vmem:[%s15786_s6 + $0x40] sm:$0xff] }
0x4437   : > { %v12006_v58 = vpack.c.bf16 %v6553_v57, %v6552_v55  ;;  %v8632_v55 = vld [vmem:[%s15786_s6 + $0xd0] sm:$0xff]  ;;  %v8633_v57 = vld [vmem:[%s15786_s6 + $0xd8] sm:$0xff] }
0x44c2   : > { %v6424_v7 = vpop.xlane.xlu1 %6423 }
0x44c3   : > { %12315 = vrcp.f32 %v6424_v7  ;;  %v6410_v14 = vpop.xlane.xlu0 %6409 }
0x44c4   : > { %12317 = vrcp.f32 %v6410_v14 }
0x44c5   : > { %12319 = vrcp.f32 %v6432_v12 }
0x44cd   : > { %v12316_v16 = vpop.eup %12315 }
0x44ce   : > { %v12318_v18 = vpop.eup %12317  ;;  %v6426_v20 = vmul.f32 %v12316_v16, %v6421_v52  ;;  %v6526_v16 = vld [vmem:[%s15785_s5] sm:$0x1] }
0x44cf   : > { %v6412_v13 = vmul.f32 %v12318_v18, %v6407_v54  ;;  %v12320_v24 = vpop.eup %12319 }
0x44d0   : > { %v6427_v19 = vsel %vm13744_vm10, %v6426_v20, 0.0  ;;  %v6435_v32 = vsel %vm13827_vm14, %v12320_v24, 0.0  ;;  %v6527_v20 = vld [vmem:[%s15785_s5 + $0x1] sm:$0x1] }
0x44d1   : > { %v6413_v17 = vsel %vm500_vm11, %v6412_v13, 0.0 }
0x44d2   : > { %v6428_v31 = vadd.f32 %v6427_v19, %v6413_v17 }
0x44d4   : > { %v15142_v30 = vadd.f32 %v6435_v32, %v6428_v31 }
0x44d6   : > { %6437 = vst [vmem:[%s12655_s3 + $0x3] sm:$0x1] %v15142_v30  ;;  %v6439_v33 = vadd.f32 %v6438_v29, %v15142_v30 }
0x44d8   : > { %10850 = vmatmul.mubr.f32.vlgmr.msra.gmra.mrb[82].mxu1 %v6439_v33 }
0x44d9   : > { %10888 = vmatpush3.xpose.msk.msra.mxu1 %vm1406_vm3, %v12896_v2  ;;  %10889 = vmatprep.mubr.msk.f32.mxu1 %vm12436_vm0, %v12437_v6  ;;  %v6546_v2 = vld [vmem:[%s15786_s6 + $0x10] sm:$0xff] }
0x44da   : > { %10892 = vmatprep.subr.mxu1 %v12437_v6  ;;  %v11997_v41 = vpack.c.bf16 %v6547_v40, %v6546_v2  ;;  %v8623_v2 = vld [vmem:[%s15786_s6 + $0x88] sm:$0xff] }
0x44db   : > { %v12018_v40 = vpack.c.bf16 %v8623_v2, %v8622_v37  ;;  %v8648_v37 = vld [vmem:[%s15786_s6 + $0x108] sm:$0xff] }
0x44dc   : > { %11998 = vmatpush3.bf16.msra.mxu0 %v11997_v41 }
0x44dd   : > { %11999 = vmatprep.subr.bf16.mxu0 %v12435_v3 }
0x44e0   : > { %12001 = vmatpush3.bf16.msra.mxu0 %v12000_v43  ;;  %v12021_v43 = vpack.c.bf16 %v8625_v45, %v8624_v42 }
0x44e1   : > { %12002 = vmatprep.subr.bf16.mxu0 %v12435_v3 }
0x44e4   : > { %12004 = vmatpush3.bf16.msra.mxu0 %v12003_v47  ;;  %v12024_v47 = vpack.c.bf16 %v8627_v46, %v8626_v44  ;;  %v8652_v44 = vld [vmem:[%s15786_s6 + $0x128] sm:$0xff] }
0x44e5   : > { %12005 = vmatprep.subr.bf16.mxu0 %v12435_v3 }
0x44e8   : > { %12007 = vmatpush3.bf16.msra.mxu0 %v12006_v58  ;;  %v12033_v58 = vpack.c.bf16 %v8633_v57, %v8632_v55  ;;  %v8658_v55 = vld [vmem:[%s15786_s6 + $0x158] sm:$0xff] }
0x44e9   : > { %12008 = vmatprep.subr.bf16.mxu0 %v12435_v3 }
0x44ec   : > { %12010 = vmatpush3.bf16.msra.mxu0 %v12009_v22  ;;  %v12036_v22 = vpack.c.bf16 %v8635_v59, %v8634_v26  ;;  %v8660_v26 = vld [vmem:[%s15786_s6 + $0x168] sm:$0xff] }
0x44ed   : > { %12011 = vmatprep.subr.bf16.mxu0 %v12435_v3 }
0x44f0   : > { %12013 = vmatpush3.bf16.msra.mxu0 %v12012_v0  ;;  %v12039_v0 = vpack.c.bf16 %v8637_v62, %v8636_v60  ;;  %v8662_v60 = vld [vmem:[%s15786_s6 + $0x178] sm:$0xff] }
0x44f1   : > { %12014 = vmatprep.subr.bf16.mxu0 %v12435_v3 }
0x44f4   : > { %12016 = vmatpush3.bf16.msra.mxu0 %v12015_v9  ;;  %v12045_v9 = vpack.c.bf16 %v6790_v4, %v6789_v1 }
0x44f5   : > { %10932 = vmatprep.subr.mxu0 %v12437_v6 }
0x45ab   : > { %v6522_v34 = vpop.f32.mrb[82].mxu1 }
0x45ac   : > { %v6523_v28 = vadd.f32 %v6522_v34, %v6439_v33  ;;  %v10851_v23 = vpop.f32.mrb[83].mxu1 }
0x45ae   : > { %v6528_v35 = vsel %vm1303_vm1, %v6523_v28, 0.0 }
0x45af   : > { %6529 = vadd.xlane.f32.xlu0 %v6528_v35 }
0x463c   : > { %v6530_v48 = vpop.xlane.xlu0 %6529 }
0x463d   : > { %v6531_v49 = vmul.f32 0.02631579, %v6530_v48  ;;  %v8628_v48 = vld [vmem:[%s15786_s6 + $0xb0] sm:$0xff] }
0x463f   : > { %v6532_v51 = vsub.f32 %v6523_v28, %v6531_v49  ;;  %v8629_v49 = vld [vmem:[%s15786_s6 + $0xb8] sm:$0xff] }
0x4641   : > { %v6533_v52 = vmul.f32 %v13171_v15, %v6532_v51  ;;  %v12027_v51 = vpack.c.bf16 %v8629_v49, %v8628_v48  ;;  %v8654_v48 = vld [vmem:[%s15786_s6 + $0x138] sm:$0xff] }
0x4643   : > { %v6534_v53 = vmul.f32 %v6533_v52, %v6533_v52 }
0x4645   : > { %v6535_v54 = vsel %vm1303_vm1, %v6534_v53, 0.0  ;;  %v8631_v53 = vld [vmem:[%s15786_s6 + $0xc8] sm:$0xff] }
0x4646   : > { %6536 = vadd.xlane.f32.xlu1 %v6535_v54 }
0x46d3   : > { %v6537_v11 = vpop.xlane.xlu1 %6536 }
0x46d4   : > { %v6538_v12 = vmul.f32 0.02631579, %v6537_v11 }
0x46d6   : > { %v6539_v7 = vadd.f32 1e-05, %v6538_v12 }
0x46d8   : > { %12321 = vrsqrt.f32 %v6539_v7 }
0x46e2   : > { %v12322_v14 = vpop.eup %12321 }
0x46e3   : > { %v6541_v18 = vmul.f32 %v12322_v14, %v6533_v52  ;;  %v8630_v52 = vld [vmem:[%s15786_s6 + $0xc0] sm:$0xff] }
0x46e4   : > { %v12030_v54 = vpack.c.bf16 %v8631_v53, %v8630_v52  ;;  %v8656_v52 = vld [vmem:[%s15786_s6 + $0x148] sm:$0xff] }
0x46e5   : > { %v6542_v13 = vmul.f32 %v6541_v18, %v6526_v16 }
0x46e7   : > { %v15217_v24 = vadd.f32 %v6542_v13, %v6527_v20 }
0x46e9   : > { %10885 = vmatmul.mubr.f32.vlgmr.msra.gmra.mrb[54].mxu0 %v15217_v24 }
0x46ea   : > { %10933 = vmatpush3.xpose.msk.msra.mxu0 %vm1406_vm3, %v13269_v56  ;;  %10934 = vmatprep.mubr.msk.f32.mxu0 %vm12436_vm0, %v12437_v6 }
0x46eb   : > { %10937 = vmatprep.subr.mxu0 %v12437_v6 }
0x47bc   : > { %v6626_v19 = vpop.f32.mrb[54].mxu0 }
0x47bd   : > { %v10886_v17 = vpop.f32.mrb[55].mxu0  ;;  %10890 = vmatmul.mubr.msk.f32.vlgmr.msra.gmra.mrb[84].mxu1 %vm1406_vm3, %v6626_v19 }
0x47be   : > { %10893 = vmatpush3.msk.msra.mxu1 %vm1501_vm4, %v12900_v8  ;;  %10894 = vmatprep.mubr.msk.f32.mxu1 %vm12436_vm0, %v12437_v6 }
0x47bf   : > { %12017 = vmatprep.subr.bf16.mxu1 %v12435_v3 }
0x4890   : > { %v6699_v31 = vpop.f32.mrb[84].mxu1 }
0x4891   : > { %v6703_v32 = vmul.f32 0.25, %v6699_v31  ;;  %v10891_v56 = vpop.f32.mrb[85].mxu1 }
0x4893   : > { %v6704_v29 = vadd.f32 %v6703_v32, %v13364_v50 }
0x4895   : > { %v6705_v33 = vsel %vm1485_vm6, %v6704_v29, -inf }
0x4896   : > { %6706 = vmax.xlane.f32.xlu0 %v6705_v33 }
0x4923   : > { %v6707_v34 = vpop.xlane.xlu0 %6706 }
0x4924   : > { %v6708_v28 = vsub.f32 %v6704_v29, %v6707_v34  ;;  %v8642_v34 = vld [vmem:[%s15789_s9 + $0x10] sm:$0xff] }
0x4926   : > { %v6709_v23 = vmul.f32 1.442695, %v6708_v28  ;;  %v8643_v28 = vld [vmem:[%s15789_s9 + $0x18] sm:$0xff] }
0x4928   : > { %12323 = vpow2.f32 %v6709_v23 }
0x4932   : > { %v12324_v35 = vpop.eup %12323 }
0x4933   : > { %v6711_v8 = vsel %vm1485_vm6, %v12324_v35, 0.0 }
0x4934   : > { %6712 = vadd.xlane.f32.xlu1 %v6711_v8 }
0x49c1   : > { %v6713_v36 = vpop.xlane.xlu1 %6712 }
0x49c2   : > { %12325 = vrcp.f32 %v6713_v36  ;;  %v8647_v36 = vld [vmem:[%s15786_s6 + $0x100] sm:$0xff] }
0x49c3   : > { %v12048_v2 = vpack.c.bf16 %v8648_v37, %v8647_v36  ;;  %v8675_v37 = vld [vmem:[%s15786_s6 + $0x1a0] sm:$0xff] }
0x49cc   : > { %v12326_v38 = vpop.eup %12325 }
0x49cd   : > { %v6715_v41 = vmul.f32 %v12326_v38, %v12324_v35  ;;  %v12042_v35 = vpack.c.bf16 %v8643_v28, %v8642_v34  ;;  %v8649_v38 = vld [vmem:[%s15786_s6 + $0x110] sm:$0xff] }
0x49ce   : > { %v8673_v28 = vld [vmem:[%s15786_s6 + $0x190] sm:$0xff] }
0x49cf   : > { %6791 = vst.msk [vmem:[%s13372_s16 + $0x3] sm:$0x1] %vm1485_vm6, %v6715_v41  ;;  %10895 = vmatmul.mubr.msk.f32.vlgmr.msra.gmra.mrb[86].mxu1 %vm1497_vm7, %v6715_v41 }
0x49d0   : > { %12019 = vmatpush3.bf16.msra.mxu1 %v12018_v40  ;;  %10929 = vmatprep.mubr.msk.f32.mxu1 %vm12436_vm0, %v12437_v6  ;;  %v8650_v40 = vld [vmem:[%s15786_s6 + $0x118] sm:$0xff] }
0x49d1   : > { %12020 = vmatprep.subr.bf16.mxu1 %v12435_v3  ;;  %v12051_v45 = vpack.c.bf16 %v8650_v40, %v8649_v38  ;;  %v8677_v40 = vld [vmem:[%s15786_s6 + $0x1b0] sm:$0xff] }
0x49d4   : > { %12022 = vmatpush3.bf16.msra.mxu1 %v12021_v43  ;;  %v8651_v43 = vld [vmem:[%s15786_s6 + $0x120] sm:$0xff] }
0x49d5   : > { %12023 = vmatprep.subr.bf16.mxu1 %v12435_v3  ;;  %v12054_v46 = vpack.c.bf16 %v8652_v44, %v8651_v43  ;;  %v8680_v43 = vld [vmem:[%s15786_s6 + $0x1c8] sm:$0xff] }
0x49d8   : > { %12025 = vmatpush3.bf16.msra.mxu1 %v12024_v47  ;;  %v8653_v47 = vld [vmem:[%s15786_s6 + $0x130] sm:$0xff] }
0x49d9   : > { %12026 = vmatprep.subr.bf16.mxu1 %v12435_v3  ;;  %v12057_v49 = vpack.c.bf16 %v8654_v48, %v8653_v47  ;;  %v8682_v47 = vld [vmem:[%s15786_s6 + $0x1d8] sm:$0xff] }
0x49dc   : > { %12028 = vmatpush3.bf16.msra.mxu1 %v12027_v51  ;;  %v8655_v51 = vld [vmem:[%s15786_s6 + $0x140] sm:$0xff] }
0x49dd   : > { %12029 = vmatprep.subr.bf16.mxu1 %v12435_v3  ;;  %v12060_v53 = vpack.c.bf16 %v8656_v52, %v8655_v51  ;;  %v8684_v51 = vld [vmem:[%s15786_s6 + $0x1e8] sm:$0xff] }
0x49e0   : > { %12031 = vmatpush3.bf16.msra.mxu1 %v12030_v54  ;;  %v8657_v54 = vld [vmem:[%s15786_s6 + $0x150] sm:$0xff] }
0x49e1   : > { %12032 = vmatprep.subr.bf16.mxu1 %v12435_v3  ;;  %v12063_v57 = vpack.c.bf16 %v8658_v55, %v8657_v54  ;;  %v8686_v54 = vld [vmem:[%s15786_s6 + $0x1f8] sm:$0xff] }
0x49e4   : > { %12034 = vmatpush3.bf16.msra.mxu1 %v12033_v58  ;;  %v8659_v58 = vld [vmem:[%s15786_s6 + $0x160] sm:$0xff] }
0x49e5   : > { %12035 = vmatprep.subr.bf16.mxu1 %v12435_v3  ;;  %v12066_v59 = vpack.c.bf16 %v8660_v26, %v8659_v58 }
0x49e8   : > { %12037 = vmatpush3.bf16.msra.mxu1 %v12036_v22  ;;  %v8661_v22 = vld [vmem:[%s15786_s6 + $0x170] sm:$0xff] }
0x49e9   : > { %12038 = vmatprep.subr.bf16.mxu1 %v12435_v3  ;;  %v12069_v62 = vpack.c.bf16 %v8662_v60, %v8661_v22 }
0x49ec   : > { %12040 = vmatpush3.bf16.msra.mxu1 %v12039_v0 }
0x49ed   : > { %12044 = vmatprep.subr.bf16.mxu1 %v12435_v3 }
0x49ef   : > { %10930 = vmatmul.mubr.f32.vlgmr.msra.gmra.mrb[88].mxu1 %v15217_v24 }
0x49f0   : > { %12046 = vmatpush3.bf16.msra.mxu1 %v12045_v9  ;;  %10953 = vmatprep.mubr.msk.f32.mxu1 %vm12436_vm0, %v12437_v6 }
0x49f1   : > { %10991 = vmatprep.subr.mxu1 %v12437_v6 }
0x4aa2   : > { %v6785_v11 = vpop.f32.mrb[86].mxu1 }
0x4aa3   : > { %v10896_v12 = vpop.f32.mrb[87].mxu1  ;;  %10954 = vmatmul.mubr.msk.f32.vlgmr.msra.gmra.mrb[90].mxu1 %vm1406_vm3, %v6785_v11 }
0x4aa4   : > { %10992 = vmatpush3.xpose.msk.msra.mxu1 %vm1406_vm3, %v12898_v5  ;;  %10993 = vmatprep.mubr.msk.f32.mxu1 %vm12436_vm0, %v12437_v6 }
0x4aa5   : > { %10996 = vmatprep.subr.mxu1 %v12437_v6 }
0x4ac2   : > { %v6874_v7 = vpop.f32.mrb[88].mxu1 }
0x4ac3   : > { %v10931_v14 = vpop.f32.mrb[89].mxu1  ;;  %10935 = vmatmul.mubr.msk.f32.vlgmr.msra.gmra.mrb[56].mxu0 %vm1406_vm3, %v6874_v7 }
0x4ac4   : > { %10938 = vmatpush3.msk.msra.mxu0 %vm1501_vm4, %v13324_v27  ;;  %10939 = vmatprep.mubr.msk.f32.mxu0 %vm12436_vm0, %v12437_v6 }
0x4ac5   : > { %12041 = vmatprep.subr.bf16.mxu0 %v12435_v3 }
0x4b76   : > { %v15317_v16 = vpop.f32.mrb[90].mxu1 }
0x4b77   : > { %v10955_v5 = vpop.f32.mrb[91].mxu1 }
0x4b96   : > { %v6947_v18 = vpop.f32.mrb[56].mxu0 }
0x4b97   : > { %v6951_v20 = vmul.f32 0.25, %v6947_v18  ;;  %v10936_v13 = vpop.f32.mrb[57].mxu0 }
0x4b99   : > { %v6952_v19 = vadd.f32 %v6951_v20, %v13364_v50 }
0x4b9b   : > { %v6953_v17 = vsel %vm1485_vm6, %v6952_v19, -inf }
0x4b9c   : > { %6954 = vmax.xlane.f32.xlu0 %v6953_v17  ;;  %v8667_v17 = vld [vmem:[%s15789_s9 + $0x20] sm:$0xff] }
0x4c29   : > { %v6955_v31 = vpop.xlane.xlu0 %6954 }
0x4c2a   : > { %v6956_v32 = vsub.f32 %v6952_v19, %v6955_v31  ;;  %v8668_v31 = vld [vmem:[%s15789_s9 + $0x28] sm:$0xff] }
0x4c2c   : > { %v6957_v27 = vmul.f32 1.442695, %v6956_v32 }
0x4c2e   : > { %12327 = vpow2.f32 %v6957_v27  ;;  %v12072_v27 = vpack.c.bf16 %v8668_v31, %v8667_v17 }
0x4c38   : > { %v12328_v56 = vpop.eup %12327 }
0x4c39   : > { %v6959_v29 = vsel %vm1485_vm6, %v12328_v56, 0.0 }
0x4c3a   : > { %6960 = vadd.xlane.f32.xlu1 %v6959_v29  ;;  %v8671_v29 = vld [vmem:[%s15786_s6 + $0x180] sm:$0xff] }
0x4cc7   : > { %v6961_v33 = vpop.xlane.xlu1 %6960 }
0x4cc8   : > { %12329 = vrcp.f32 %v6961_v33  ;;  %v8672_v33 = vld [vmem:[%s15786_s6 + $0x188] sm:$0xff] }
0x4cc9   : > { %v12075_v34 = vpack.c.bf16 %v8672_v33, %v8671_v29  ;;  %v7851_v29 = vld [vmem:[%s15790_s10 + $0x10] sm:$0xff] }
0x4cd2   : > { %v12330_v23 = vpop.eup %12329 }
0x4cd3   : > { %v6963_v8 = vmul.f32 %v12330_v23, %v12328_v56  ;;  %v8674_v23 = vld [vmem:[%s15786_s6 + $0x198] sm:$0xff] }
0x4cd4   : > { %v12078_v36 = vpack.c.bf16 %v8674_v23, %v8673_v28  ;;  %v7853_v28 = vld [vmem:[%s15790_s10 + $0x20] sm:$0xff]  ;;  %v7854_v23 = vld [vmem:[%s15790_s10 + $0x28] sm:$0xff] }
0x4cd5   : > { %8646 = vst.msk [vmem:[%s13372_s16 + $0x7] sm:$0x1] %vm1485_vm6, %v6963_v8  ;;  %10940 = vmatmul.mubr.msk.f32.vlgmr.msra.gmra.mrb[58].mxu0 %vm1497_vm7, %v6963_v8 }
0x4cd6   : > { %12043 = vmatpush3.bf16.msra.mxu0 %v12042_v35  ;;  %10946 = vmatprep.mubr.msk.f32.mxu0 %vm12436_vm0, %v12437_v6 }
0x4cd7   : > { %12047 = vmatprep.subr.bf16.mxu0 %v12435_v3 }
0x4da8   : > { %v7033_v41 = vpop.f32.mrb[58].mxu0 }
0x4da9   : > { %v10941_v42 = vpop.f32.mrb[59].mxu0  ;;  %10947 = vmatmul.mubr.msk.f32.vlgmr.msra.gmra.mrb[60].mxu0 %vm1406_vm3, %v7033_v41  ;;  %v8678_v41 = vld [vmem:[%s15786_s6 + $0x1b8] sm:$0xff] }
0x4daa   : > { %12049 = vmatpush3.bf16.msra.mxu0 %v12048_v2  ;;  %10988 = vmatprep.mubr.msk.f32.mxu0 %vm12436_vm0, %v12437_v6  ;;  %v8676_v2 = vld [vmem:[%s15786_s6 + $0x1a8] sm:$0xff]  ;;  %v12084_v42 = vpack.c.bf16 %v8678_v41, %v8677_v40  ;;  %v7855_v41 = vld [vmem:[%s15790_s10 + $0x30] sm:$0xff] }
0x4dab   : > { %12050 = vmatprep.subr.bf16.mxu0 %v12435_v3  ;;  %v12081_v38 = vpack.c.bf16 %v8676_v2, %v8675_v37 }
0x4dae   : > { %12052 = vmatpush3.bf16.msra.mxu0 %v12051_v45  ;;  %v8679_v45 = vld [vmem:[%s15786_s6 + $0x1c0] sm:$0xff] }
0x4daf   : > { %12053 = vmatprep.subr.bf16.mxu0 %v12435_v3  ;;  %v12087_v44 = vpack.c.bf16 %v8680_v43, %v8679_v45  ;;  %v7857_v43 = vld [vmem:[%s15790_s10 + $0x40] sm:$0xff] }
0x4db2   : > { %12055 = vmatpush3.bf16.msra.mxu0 %v12054_v46  ;;  %v8681_v46 = vld [vmem:[%s15786_s6 + $0x1d0] sm:$0xff] }
0x4db3   : > { %12056 = vmatprep.subr.bf16.mxu0 %v12435_v3  ;;  %v12090_v48 = vpack.c.bf16 %v8682_v47, %v8681_v46  ;;  %v7859_v46 = vld [vmem:[%s15790_s10 + $0x50] sm:$0xff] }
0x4db6   : > { %12058 = vmatpush3.bf16.msra.mxu0 %v12057_v49  ;;  %v8683_v49 = vld [vmem:[%s15786_s6 + $0x1e0] sm:$0xff] }
0x4db7   : > { %12059 = vmatprep.subr.bf16.mxu0 %v12435_v3  ;;  %v12093_v52 = vpack.c.bf16 %v8684_v51, %v8683_v49  ;;  %v7861_v51 = vld [vmem:[%s15790_s10 + $0x60] sm:$0xff] }
0x4dba   : > { %12061 = vmatpush3.bf16.msra.mxu0 %v12060_v53  ;;  %v8685_v53 = vld [vmem:[%s15786_s6 + $0x1f0] sm:$0xff] }
0x4dbb   : > { %12062 = vmatprep.subr.bf16.mxu0 %v12435_v3  ;;  %v12096_v55 = vpack.c.bf16 %v8686_v54, %v8685_v53  ;;  %v7863_v54 = vld [vmem:[%s15790_s10 + $0x70] sm:$0xff] }
0x4dbe   : > { %12064 = vmatpush3.bf16.msra.mxu0 %v12063_v57 }
0x4dbf   : > { %12065 = vmatprep.subr.bf16.mxu0 %v12435_v3 }
0x4dc2   : > { %12067 = vmatpush3.bf16.msra.mxu0 %v12066_v59 }
0x4dc3   : > { %12068 = vmatprep.subr.bf16.mxu0 %v12435_v3 }
0x4dc6   : > { %12070 = vmatpush3.bf16.msra.mxu0 %v12069_v62 }
0x4dc7   : > { %11043 = vmatprep.subr.mxu0 %v12437_v6 }
0x4dc9   : > { %10989 = vmatmul.mubr.f32.vlgmr.msra.gmra.mrb[62].mxu0 %v15217_v24 }
0x4dca   : > { %11045 = vmatprep.mubr.msk.f32.mxu0 %vm12436_vm0, %v12437_v6 }
0x4dcf   : > { %11044 = vmatpush3.xpose.msk.msra.mxu0 %vm1406_vm3, %v13271_v61 }
0x4dd0   : > { %11048 = vmatprep.subr.mxu0 %v12437_v6 }
0x4e7c   : > { %v7108_v0 = vpop.f32.mrb[60].mxu0 }
0x4e7d   : > { %v15400_v1 = vadd.f32 %v15317_v16, %v7108_v0  ;;  %v10948_v4 = vpop.f32.mrb[61].mxu0 }
0x4e9c   : > { %v7268_v9 = vpop.f32.mrb[62].mxu0 }
0x4e9d   : > { %v10990_v11 = vpop.f32.mrb[63].mxu0  ;;  %10994 = vmatmul.mubr.msk.f32.vlgmr.msra.gmra.mrb[92].mxu1 %vm1406_vm3, %v7268_v9 }
0x4e9e   : > { %10997 = vmatpush3.msk.msra.mxu1 %vm1501_vm4, %v12902_v10  ;;  %10998 = vmatprep.mubr.msk.f32.mxu1 %vm12436_vm0, %v12437_v6 }
0x4e9f   : > { %12071 = vmatprep.subr.bf16.mxu1 %v12435_v3 }
0x4f70   : > { %v7341_v61 = vpop.f32.mrb[92].mxu1 }
0x4f71   : > { %v7345_v12 = vmul.f32 0.25, %v7341_v61  ;;  %v10995_v7 = vpop.f32.mrb[93].mxu1 }
0x4f73   : > { %v7346_v14 = vadd.f32 %v7345_v12, %v13364_v50 }
0x4f75   : > { %v7347_v16 = vsel %vm1485_vm6, %v7346_v14, -inf }
0x4f76   : > { %7348 = vmax.xlane.f32.xlu0 %v7347_v16 }
0x5003   : > { %v7349_v5 = vpop.xlane.xlu0 %7348 }
0x5004   : > { %v7350_v18 = vsub.f32 %v7346_v14, %v7349_v5  ;;  %v8691_v14 = vld [vmem:[%s15789_s9 + $0x30] sm:$0xff] }
0x5006   : > { %v7351_v20 = vmul.f32 1.442695, %v7350_v18 }
0x5008   : > { %12331 = vpow2.f32 %v7351_v20 }
0x5012   : > { %v12332_v13 = vpop.eup %12331 }
0x5013   : > { %v7353_v10 = vsel %vm1485_vm6, %v12332_v13, 0.0 }
0x5014   : > { %7354 = vadd.xlane.f32.xlu1 %v7353_v10 }
0x50a1   : > { %v7355_v19 = vpop.xlane.xlu1 %7354 }
0x50a2   : > { %12333 = vrcp.f32 %v7355_v19 }
0x50ac   : > { %v12334_v32 = vpop.eup %12333 }
0x50ad   : > { %v7357_v56 = vmul.f32 %v12334_v32, %v12332_v13 }
0x50af   : > { %8670 = vst.msk [vmem:[%s13372_s16 + $0xb] sm:$0x1] %vm1485_vm6, %v7357_v56  ;;  %10999 = vmatmul.mubr.msk.f32.vlgmr.msra.gmra.mrb[94].mxu1 %vm1497_vm7, %v7357_v56  ;;  %v7850_v56 = vld [vmem:[%s15790_s10 + $0x8] sm:$0xff] }
0x50b0   : > { %12073 = vmatpush3.bf16.msra.mxu1 %v12072_v27  ;;  %11005 = vmatprep.mubr.msk.f32.mxu1 %vm12436_vm0, %v12437_v6  ;;  %v7849_v27 = vld [vmem:[%s15790_s10] sm:$0xff] }
0x50b1   : > { %12074 = vmatprep.subr.bf16.mxu1 %v12435_v3  ;;  %v12102_v33 = vpack.c.bf16 %v7850_v56, %v7849_v27  ;;  %v7832_v27 = vld [vmem:[%s15785_s5 + $0x3] sm:$0x1] }
0x5182   : > { %v7427_v35 = vpop.f32.mrb[94].mxu1 }
0x5183   : > { %v11000_v8 = vpop.f32.mrb[95].mxu1  ;;  %11006 = vmatmul.mubr.msk.f32.vlgmr.msra.gmra.mrb[96].mxu1 %vm1406_vm3, %v7427_v35  ;;  %v12108_v35 = vpack.c.bf16 %v7854_v23, %v7853_v28  ;;  %v7865_v28 = vld [vmem:[%s15791_s11] sm:$0x1] }
0x5184   : > { %12076 = vmatpush3.bf16.msra.mxu1 %v12075_v34  ;;  %11040 = vmatprep.mubr.msk.f32.mxu1 %vm12436_vm0, %v12437_v6 }
0x5185   : > { %12077 = vmatprep.subr.bf16.mxu1 %v12435_v3 }
0x5188   : > { %12079 = vmatpush3.bf16.msra.mxu1 %v12078_v36 }
0x5189   : > { %12080 = vmatprep.subr.bf16.mxu1 %v12435_v3 }
0x518c   : > { %12082 = vmatpush3.bf16.msra.mxu1 %v12081_v38 }
0x518d   : > { %12083 = vmatprep.subr.bf16.mxu1 %v12435_v3 }
0x5190   : > { %12085 = vmatpush3.bf16.msra.mxu1 %v12084_v42  ;;  %v7856_v42 = vld [vmem:[%s15790_s10 + $0x38] sm:$0xff] }
0x5191   : > { %12086 = vmatprep.subr.bf16.mxu1 %v12435_v3  ;;  %v12111_v45 = vpack.c.bf16 %v7856_v42, %v7855_v41  ;;  %v8043_v42 = vld [vmem:[%s15793_s13] sm:$0xff] }
0x5194   : > { %12088 = vmatpush3.bf16.msra.mxu1 %v12087_v44  ;;  %v7858_v44 = vld [vmem:[%s15790_s10 + $0x48] sm:$0xff] }
0x5195   : > { %12089 = vmatprep.subr.bf16.mxu1 %v12435_v3  ;;  %v12114_v47 = vpack.c.bf16 %v7858_v44, %v7857_v43  ;;  %v8045_v43 = vld [vmem:[%s15793_s13 + $0x10] sm:$0xff] }
0x5198   : > { %12091 = vmatpush3.bf16.msra.mxu1 %v12090_v48  ;;  %v7860_v48 = vld [vmem:[%s15790_s10 + $0x58] sm:$0xff] }
0x5199   : > { %12092 = vmatprep.subr.bf16.mxu1 %v12435_v3  ;;  %v12117_v49 = vpack.c.bf16 %v7860_v48, %v7859_v46  ;;  %v8046_v46 = vld [vmem:[%s15793_s13 + $0x18] sm:$0xff]  ;;  %v8047_v48 = vld [vmem:[%s15793_s13 + $0x20] sm:$0xff] }
0x519c   : > { %12094 = vmatpush3.bf16.msra.mxu1 %v12093_v52  ;;  %v7862_v52 = vld [vmem:[%s15790_s10 + $0x68] sm:$0xff] }
0x519d   : > { %12095 = vmatprep.subr.bf16.mxu1 %v12435_v3  ;;  %v12120_v53 = vpack.c.bf16 %v7862_v52, %v7861_v51 }
0x51a0   : > { %12097 = vmatpush3.bf16.msra.mxu1 %v12096_v55  ;;  %v7864_v55 = vld [vmem:[%s15790_s10 + $0x78] sm:$0xff] }
0x51a1   : > { %12125 = vmatprep.subr.bf16.mxu1 %v12435_v3 }
0x51a3   : > { %11041 = vmatmul.mubr.f32.vlgmr.msra.gmra.mrb[98].mxu1 %v15217_v24 }
0x51a4   : > { %11127 = vmatprep.mubr.msk.f32.mxu1 %vm12436_vm0, %v12437_v6 }
0x5256   : > { %v7502_v57 = vpop.f32.mrb[96].mxu1 }
0x5257   : > { %v7506_v58 = vadd.f32 %v7502_v57, %v15400_v1  ;;  %v11007_v26 = vpop.f32.mrb[97].mxu1  ;;  %v12123_v57 = vpack.c.bf16 %v7864_v55, %v7863_v54 }
0x5258   : > { %v7938_v26 = vld [vmem:[%s15792_s12 + $0x8] sm:$0xff] }
0x5276   : > { %v7590_v59 = vpop.f32.mrb[98].mxu1 }
0x5277   : > { %v11042_v22 = vpop.f32.mrb[99].mxu1  ;;  %11046 = vmatmul.mubr.msk.f32.vlgmr.msra.gmra.mrb[64].mxu0 %vm1406_vm3, %v7590_v59  ;;  %v7939_v59 = vld [vmem:[%s15792_s12 + $0x10] sm:$0xff] }
0x5278   : > { %11049 = vmatpush3.msk.msra.mxu0 %vm1501_vm4, %v13352_v39  ;;  %11050 = vmatprep.mubr.msk.f32.mxu0 %vm12436_vm0, %v12437_v6 }
0x5279   : > { %12098 = vmatprep.subr.bf16.mxu0 %v12435_v3 }
0x534a   : > { %v7663_v60 = vpop.f32.mrb[64].mxu0 }
0x534b   : > { %v7667_v62 = vmul.f32 0.25, %v7663_v60  ;;  %v11047_v0 = vpop.f32.mrb[65].mxu0  ;;  %v7940_v60 = vld [vmem:[%s15792_s12 + $0x18] sm:$0xff] }
0x534c   : > { %v7941_v0 = vld [vmem:[%s15792_s12 + $0x20] sm:$0xff] }
0x534d   : > { %v7668_v4 = vadd.f32 %v7667_v62, %v13364_v50  ;;  %v8692_v50 = vld [vmem:[%s15789_s9 + $0x38] sm:$0xff]  ;;  %v12129_v62 = vpack.c.bf16 %v7940_v60, %v7939_v59  ;;  %v8052_v60 = vld [vmem:[%s15793_s13 + $0x48] sm:$0xff] }
0x534e   : > { %v12099_v5 = vpack.c.bf16 %v8692_v50, %v8691_v14  ;;  %v7947_v14 = vld [vmem:[%s15792_s12 + $0x50] sm:$0xff]  ;;  %v7948_v50 = vld [vmem:[%s15792_s12 + $0x58] sm:$0xff] }
0x534f   : > { %v7669_v1 = vsel %vm1485_vm6, %v7668_v4, -inf  ;;  %v8050_v59 = vld [vmem:[%s15793_s13 + $0x38] sm:$0xff] }
0x5350   : > { %7670 = vmax.xlane.f32.xlu0 %v7669_v1 }
0x53dd   : > { %v7671_v9 = vpop.xlane.xlu0 %7670 }
0x53de   : > { %v7672_v11 = vsub.f32 %v7668_v4, %v7671_v9  ;;  %v7942_v4 = vld [vmem:[%s15792_s12 + $0x28] sm:$0xff]  ;;  %v7943_v9 = vld [vmem:[%s15792_s12 + $0x30] sm:$0xff] }
0x53df   : > { %v12132_v1 = vpack.c.bf16 %v7942_v4, %v7941_v0  ;;  %v8054_v4 = vld [vmem:[%s15793_s13 + $0x58] sm:$0xff] }
0x53e0   : > { %v7673_v61 = vmul.f32 1.442695, %v7672_v11  ;;  %v7944_v11 = vld [vmem:[%s15792_s12 + $0x38] sm:$0xff] }
0x53e2   : > { %12335 = vpow2.f32 %v7673_v61  ;;  %v12135_v61 = vpack.c.bf16 %v7944_v11, %v7943_v9  ;;  %v8055_v9 = vld [vmem:[%s15793_s13 + $0x60] sm:$0xff]  ;;  %v8056_v11 = vld [vmem:[%s15793_s13 + $0x68] sm:$0xff] }
0x53ec   : > { %v12336_v12 = vpop.eup %12335 }
0x53ed   : > { %v7675_v39 = vsel %vm1485_vm6, %v12336_v12, 0.0 }
0x53ee   : > { %7676 = vadd.xlane.f32.xlu1 %v7675_v39  ;;  %v7946_v39 = vld [vmem:[%s15792_s12 + $0x48] sm:$0xff] }
0x547b   : > { %v7677_v7 = vpop.xlane.xlu1 %7676 }
0x547c   : > { %12337 = vrcp.f32 %v7677_v7 }
0x5486   : > { %v12338_v16 = vpop.eup %12337 }
0x5487   : > { %v7679_v18 = vmul.f32 %v12338_v16, %v12336_v12  ;;  %v7945_v12 = vld [vmem:[%s15792_s12 + $0x40] sm:$0xff]  ;;  %v12141_v16 = vpack.c.bf16 %v7948_v50, %v7947_v14 }
0x5488   : > { %v12138_v7 = vpack.c.bf16 %v7946_v39, %v7945_v12  ;;  %v8057_v12 = vld [vmem:[%s15793_s13 + $0x70] sm:$0xff]  ;;  %v8058_v39 = vld [vmem:[%s15793_s13 + $0x78] sm:$0xff] }
0x5489   : > { %8694 = vst.msk [vmem:[%s13372_s16 + $0xf] sm:$0x1] %vm1485_vm6, %v7679_v18  ;;  %11051 = vmatmul.mubr.msk.f32.vlgmr.msra.gmra.mrb[66].mxu0 %vm1497_vm7, %v7679_v18  ;;  %v7950_v18 = vld [vmem:[%s15792_s12 + $0x68] sm:$0xff]  ;;  %s12372_s16 = sshll.u32 %s12439_s26, 4  ;;  %s12373_s16 = int_to_ptr.vmem [resolvable:$false] %s12372_s16 }
0x548a   : > { %12100 = vmatpush3.bf16.msra.mxu0 %v12099_v5  ;;  %11057 = vmatprep.mubr.msk.f32.mxu0 %vm12436_vm0, %v12437_v6  ;;  %v7949_v5 = vld [vmem:[%s15792_s12 + $0x60] sm:$0xff]  ;;  %s12374_s27 = scalar_lea.vmem %s12373_s16, 512  ;;  %p12375_p5 = scmp.lt.s32.totalorder %s15728_s30, %s12373_s16 }
0x548b   : > { %12101 = vmatprep.subr.bf16.mxu0 %v12435_v3  ;;  %p12376_p6 = scmp.lt.s32.totalorder %s12374_s27, %s12368_s22 }
0x548d   : > { %p12377_p7 = por %p12376_p6, %p12375_p5 }
0x548f   : > { %p12378_p8 = pnand %p12377_p7, %p12371_p4 }
0x555c   : > { %v7749_v20 = vpop.f32.mrb[66].mxu0 }
0x555d   : > { %v11052_v13 = vpop.f32.mrb[67].mxu0  ;;  %11058 = vmatmul.mubr.msk.f32.vlgmr.msra.gmra.mrb[68].mxu0 %vm1406_vm3, %v7749_v20  ;;  %v12144_v20 = vpack.c.bf16 %v7950_v18, %v7949_v5  ;;  %v8025_v18 = vld [vmem:[%s15785_s5 + $0x4] sm:$0x1] }
0x555e   : > { %11092 = vmatprep.mubr.msk.f32.mxu0 %vm12436_vm0, %v12437_v6  ;;  %12103 = vmatpush3.bf16.msra.mxu0 %v12102_v33  ;;  %v7951_v33 = vld [vmem:[%s15792_s12 + $0x70] sm:$0xff] }
0x555f   : > { %12104 = vmatprep.subr.bf16.mxu0 %v12435_v3 }
0x5630   : > { %v7824_v10 = vpop.f32.mrb[68].mxu0 }
0x5631   : > { %v7828_v19 = vadd.f32 %v7824_v10, %v7506_v58  ;;  %v11059_v17 = vpop.f32.mrb[69].mxu0  ;;  %v7937_v58 = vld [vmem:[%s15792_s12] sm:$0xff] }
0x5632   : > { %v12126_v22 = vpack.c.bf16 %v7938_v26, %v7937_v58  ;;  %v8049_v26 = vld [vmem:[%s15793_s13 + $0x30] sm:$0xff] }
0x5633   : > { %v7830_v31 = vadd.f32 %v7828_v19, %v15217_v24  ;;  %v7852_v24 = vld [vmem:[%s15790_s10 + $0x18] sm:$0xff] }
0x5634   : > { %v12105_v34 = vpack.c.bf16 %v7852_v24, %v7851_v29  ;;  %12127 = vmatpush3.bf16.msra.mxu1 %v12126_v22  ;;  %v7952_v24 = vld [vmem:[%s15792_s12 + $0x78] sm:$0xff]  ;;  %v12159_v22 = vpack.c.bf16 %v8050_v59, %v8049_v26 }
0x5635   : > { %v7833_v32 = vsel %vm1303_vm1, %v7830_v31, 0.0  ;;  %12128 = vmatprep.subr.bf16.mxu1 %v12435_v3 }
0x5636   : > { %7834 = vadd.xlane.f32.xlu0 %v7833_v32  ;;  %12106 = vmatpush3.bf16.msra.mxu0 %v12105_v34  ;;  %v12147_v34 = vpack.c.bf16 %v7952_v24, %v7951_v33 }
0x5637   : > { %12107 = vmatprep.subr.bf16.mxu0 %v12435_v3 }
0x5638   : > { %12130 = vmatpush3.bf16.msra.mxu1 %v12129_v62  ;;  %v8053_v62 = vld [vmem:[%s15793_s13 + $0x50] sm:$0xff] }
0x5639   : > { %12131 = vmatprep.subr.bf16.mxu1 %v12435_v3 }
0x563a   : > { %12109 = vmatpush3.bf16.msra.mxu0 %v12108_v35 }
0x563b   : > { %12110 = vmatprep.subr.bf16.mxu0 %v12435_v3 }
0x563c   : > { %12133 = vmatpush3.bf16.msra.mxu1 %v12132_v1  ;;  %v12165_v1 = vpack.c.bf16 %v8054_v4, %v8053_v62 }
0x563d   : > { %12134 = vmatprep.subr.bf16.mxu1 %v12435_v3 }
0x563e   : > { %12112 = vmatpush3.bf16.msra.mxu0 %v12111_v45  ;;  %v8044_v45 = vld [vmem:[%s15793_s13 + $0x8] sm:$0xff] }
0x563f   : > { %12113 = vmatprep.subr.bf16.mxu0 %v12435_v3  ;;  %v12150_v44 = vpack.c.bf16 %v8044_v45, %v8043_v42 }
0x5640   : > { %12136 = vmatpush3.bf16.msra.mxu1 %v12135_v61  ;;  %v12168_v61 = vpack.c.bf16 %v8056_v11, %v8055_v9 }
0x5641   : > { %12137 = vmatprep.subr.bf16.mxu1 %v12435_v3 }
0x5642   : > { %12115 = vmatpush3.bf16.msra.mxu0 %v12114_v47  ;;  %v12153_v47 = vpack.c.bf16 %v8046_v46, %v8045_v43 }
0x5643   : > { %12116 = vmatprep.subr.bf16.mxu0 %v12435_v3 }
0x5644   : > { %12139 = vmatpush3.bf16.msra.mxu1 %v12138_v7  ;;  %v12171_v7 = vpack.c.bf16 %v8058_v39, %v8057_v12 }
0x5645   : > { %12140 = vmatprep.subr.bf16.mxu1 %v12435_v3 }
0x5646   : > { %12118 = vmatpush3.bf16.msra.mxu0 %v12117_v49  ;;  %v8048_v49 = vld [vmem:[%s15793_s13 + $0x28] sm:$0xff] }
0x5647   : > { %12119 = vmatprep.subr.bf16.mxu0 %v12435_v3  ;;  %v12156_v51 = vpack.c.bf16 %v8048_v49, %v8047_v48 }
0x5648   : > { %12142 = vmatpush3.bf16.msra.mxu1 %v12141_v16 }
0x5649   : > { %12143 = vmatprep.subr.bf16.mxu1 %v12435_v3 }
0x564a   : > { %12121 = vmatpush3.bf16.msra.mxu0 %v12120_v53 }
0x564b   : > { %12122 = vmatprep.subr.bf16.mxu0 %v12435_v3 }
0x564c   : > { %12145 = vmatpush3.bf16.msra.mxu1 %v12144_v20 }
0x564d   : > { %12146 = vmatprep.subr.bf16.mxu1 %v12435_v3 }
0x564e   : > { %12124 = vmatpush3.bf16.msra.mxu0 %v12123_v57 }
0x564f   : > { %12149 = vmatprep.subr.bf16.mxu0 %v12435_v3 }
0x5650   : > { %12148 = vmatpush3.bf16.msra.mxu1 %v12147_v34 }
0x56c3   : > { %v7835_v8 = vpop.xlane.xlu0 %7834 }
0x56c4   : > { %v7836_v36 = vmul.f32 0.02631579, %v7835_v8 }
0x56c6   : > { %v7837_v37 = vsub.f32 %v7830_v31, %v7836_v36  ;;  %v7831_v31 = vld [vmem:[%s15785_s5 + $0x2] sm:$0x1] }
0x56c8   : > { %v15534_v2 = vmul.f32 %v13171_v15, %v7837_v37 }
0x56ca   : > { %v7839_v38 = vmul.f32 %v15534_v2, %v15534_v2 }
0x56cc   : > { %v7840_v40 = vsel %vm1303_vm1, %v7839_v38, 0.0 }
0x56cd   : > { %7841 = vadd.xlane.f32.xlu1 %v7840_v40 }
0x575a   : > { %v7842_v13 = vpop.xlane.xlu1 %7841 }
0x575b   : > { %v7843_v10 = vmul.f32 0.02631579, %v7842_v13  ;;  %v8026_v13 = vld [vmem:[%s15785_s5 + $0x5] sm:$0x1] }
0x575d   : > { %v7844_v19 = vadd.f32 1e-05, %v7843_v10 }
0x575f   : > { %12339 = vrsqrt.f32 %v7844_v19 }
0x5769   : > { %v12340_v17 = vpop.eup %12339 }
0x576a   : > { %v7846_v32 = vmul.f32 %v12340_v17, %v15534_v2 }
0x576c   : > { %v7847_v56 = vmul.f32 %v7846_v32, %v7831_v31 }
0x576e   : > { %v7848_v29 = vadd.f32 %v7847_v56, %v7832_v27 }
0x5770   : > { %11093 = vmatmul.mubr.f32.vlgmr.msra.gmra.mrb[70].mxu0 %v7848_v29 }
0x5771   : > { %11162 = vmatprep.mubr.msk.f32.mxu0 %vm12436_vm0, %v12437_v6  ;;  %v7953_v6 = vld [vmem:[%s15785_s5 + $0x6] sm:$0x1]  ;;  %12151 = vmatpush3.bf16.msra.mxu0 %v12150_v44 }
0x5772   : > { %12152 = vmatprep.subr.bf16.mxu0 %v12435_v3 }
0x5775   : > { %12154 = vmatpush3.bf16.msra.mxu0 %v12153_v47 }
0x5776   : > { %12155 = vmatprep.subr.bf16.mxu0 %v12435_v3 }
0x5779   : > { %12157 = vmatpush3.bf16.msra.mxu0 %v12156_v51 }
0x577a   : > { %12158 = vmatprep.subr.bf16.mxu0 %v12435_v3 }
0x577d   : > { %12160 = vmatpush3.bf16.msra.mxu0 %v12159_v22 }
0x577e   : > { %12161 = vmatprep.subr.bf16.mxu0 %v12435_v3 }
0x5843   : > { %v7932_v23 = vpop.f32.mrb[70].mxu0 }
0x5844   : > { %v7933_v35 = vadd.f32 %v7932_v23, %v7865_v28  ;;  %v11094_v8 = vpop.f32.mrb[71].mxu0 }
0x5846   : > { %v7936_v36 = vmax.f32 %v7933_v35, 0.0 }
0x5848   : > { %11128 = vmatmul.mubr.f32.vlgmr.msra.gmra.mrb[100].mxu1 %v7936_v36 }
0x591b   : > { %v8020_v37 = vpop.f32.mrb[100].mxu1 }
0x591c   : > { %v8021_v2 = vadd.f32 %v8020_v37, %v7953_v6  ;;  %v11129_v38 = vpop.f32.mrb[101].mxu1 }
0x591e   : > { %v8024_v40 = vadd.f32 %v8021_v2, %v7848_v29 }
0x5920   : > { %v8027_v41 = vsel %vm1303_vm1, %v8024_v40, 0.0 }
0x5921   : > { %8028 = vadd.xlane.f32.xlu0 %v8027_v41 }
0x59ae   : > { %v8029_v52 = vpop.xlane.xlu0 %8028 }
0x59af   : > { %v8030_v53 = vmul.f32 0.02631579, %v8029_v52 }
0x59b1   : > { %v8031_v54 = vsub.f32 %v8024_v40, %v8030_v53 }
0x59b3   : > { %v8032_v55 = vmul.f32 %v13171_v15, %v8031_v54  ;;  %v8051_v15 = vld [vmem:[%s15793_s13 + $0x40] sm:$0xff] }
0x59b4   : > { %v12162_v0 = vpack.c.bf16 %v8052_v60, %v8051_v15 }
0x59b5   : > { %v8033_v57 = vmul.f32 %v8032_v55, %v8032_v55 }
0x59b6   : > { %12163 = vmatpush3.bf16.msra.mxu0 %v12162_v0 }
0x59b7   : > { %v8034_v58 = vsel %vm1303_vm1, %v8033_v57, 0.0  ;;  %12164 = vmatprep.subr.bf16.mxu0 %v12435_v3 }
0x59b8   : > { %8035 = vadd.xlane.f32.xlu1 %v8034_v58 }
0x59ba   : > { %12166 = vmatpush3.bf16.msra.mxu0 %v12165_v1 }
0x59bb   : > { %12167 = vmatprep.subr.bf16.mxu0 %v12435_v3 }
0x59be   : > { %12169 = vmatpush3.bf16.msra.mxu0 %v12168_v61 }
0x59bf   : > { %12170 = vmatprep.subr.bf16.mxu0 %v12435_v3 }
0x59c2   : > { %12172 = vmatpush3.bf16.msra.mxu0 %v12171_v7 }
0x5a45   : > { %v8036_v14 = vpop.xlane.xlu1 %8035 }
0x5a46   : > { %v8037_v50 = vmul.f32 0.02631579, %v8036_v14 }
0x5a48   : > { %v8038_v16 = vadd.f32 1e-05, %v8037_v50 }
0x5a4a   : > { %12341 = vrsqrt.f32 %v8038_v16 }
0x5a54   : > { %v12342_v5 = vpop.eup %12341 }
0x5a55   : > { %v8040_v20 = vmul.f32 %v12342_v5, %v8032_v55 }
0x5a57   : > { %v8041_v10 = vmul.f32 %v8040_v20, %v8025_v18 }
0x5a59   : > { %v8042_v19 = vadd.f32 %v8041_v10, %v8026_v13 }
0x5a5b   : > { %11163 = vmatmul.mubr.f32.vlgmr.msra.gmra.mrb[72].mxu0 %v8042_v19 }
0x5b2e   : > { %v8125_v17 = vpop.f32.mrb[72].mxu0 }
0x5b2f   : > { %v8126_v3 = vadd.f32 %v8125_v17, %v15142_v30  ;;  %v11164_v31 = vpop.f32.mrb[73].mxu0 }
0x5b31   : > { %v8143_v32 = vsel %vm13744_vm10, %v8126_v3, -1e+30  ;;  %v8129_v27 = vsel %vm500_vm11, %v8126_v3, -1e+30 }
0x5b32   : > { %v8144_v56 = vsel %vm1303_vm1, %v8143_v32, -inf  ;;  %v8130_v29 = vsel %vm1303_vm1, %v8129_v27, -inf }
0x5b33   : > { %8145 = vmax.xlane.f32.xlu1 %v8144_v56  ;;  %8131 = vmax.xlane.f32.xlu0 %v8130_v29 }
0x5bc0   : > { %v8146_v33 = vpop.xlane.xlu1 %8145  ;;  %v8132_v24 = vpop.xlane.xlu0 %8131 }
0x5bc1   : > { %v8147_v34 = vsub.f32 %v8143_v32, %v8146_v33  ;;  %v8133_v28 = vsub.f32 %v8129_v27, %v8132_v24 }
0x5bc3   : > { %v8148_v30 = vmul.f32 1.442695, %v8147_v34  ;;  %v8134_v23 = vmul.f32 1.442695, %v8133_v28 }
0x5bc5   : > { %12343 = vpow2.f32 %v8148_v30 }
0x5bc6   : > { %12345 = vpow2.f32 %v8134_v23 }
0x5bcf   : > { %v12344_v35 = vpop.eup %12343 }
0x5bd0   : > { %v12346_v8 = vpop.eup %12345  ;;  %v8150_v36 = vsel %vm13744_vm10, %v12344_v35, 0.0 }
0x5bd1   : > { %v8151_v6 = vsel %vm1303_vm1, %v8150_v36, 0.0  ;;  %v8136_v37 = vsel %vm500_vm11, %v12346_v8, 0.0 }
0x5bd2   : > { %8152 = vadd.xlane.f32.xlu1 %v8151_v6  ;;  %v8137_v2 = vsel %vm1303_vm1, %v8136_v37, 0.0 }
0x5bd3   : > { %8138 = vadd.xlane.f32.xlu0 %v8137_v2 }
0x5bd4   : > { %12381 = shalt.err (!%p12378_p8)
}
0x5bd5   : > { %s12382_s29 = scalar_lea.hbm %s15726_s18, 256  ;;  %s12386_s20 = scalar_lea.hbm %s15795_s15, 512 }
0x5bd6   : > { %p12383_p9 = scmp.ne.s32.totalorder %s15726_s18, %s12382_s29  ;;  %p12387_p0 = scmp.lt.u32.totalorder %s15726_s18, %s15795_s15 }
0x5bd7   : > { %p12388_p1 = scmp.lt.u32.totalorder %s12386_s20, %s12382_s29  ;;  %p12390_p3 = scmp.lt.u32.totalorder %s12382_s29, %s15726_s18 }
0x5bd8   : > { %p12384_p12 = pnand %p12383_p9, %p12563_p10 }
0x5bd9   : > { %p12389_p2 = por %p12388_p1, %p12387_p0 }
0x5bda   : > { %p12385_p13 = pneg %p12384_p12 }
0x5bdb   : > { %p12391_p4 = por %p12390_p3, %p12389_p2 }
0x5bdd   : > { %p12392_p5 = pnand %p12391_p4, %p12385_p13 }
0x5bdf   : > { %12395 = shalt.err (!%p12392_p5)
}
0x5be0   : > { %s12440_s22 = smov 64   ;;  %s12441_s26 = smov 4   ;;  %v8158_v38 = vsub.f32 0.0, %v8126_v3 }
0x5be1   : > { %12173 = dma.vmem_to_hbm [thread:$0]  (%p12563_p10), %s15728_s30, 256, %s15726_s18, %s15732_s28, %s12440_s22, %s12440_s22, %s12441_s26  }
0x5be2   : > { %v8159_v40 = vmul.f32 1.442695, %v8158_v38 }
0x5be4   : > { %12347 = vpow2.f32 %v8159_v40 }
0x5bee   : > { %v12348_v41 = vpop.eup %12347 }
0x5bef   : > { %v8161_v42 = vadd.f32 1.0, %v12348_v41 }
0x5c5f   : > { %v8153_v45 = vpop.xlane.xlu1 %8152 }
0x5c60   : > { %12349 = vrcp.f32 %v8153_v45  ;;  %v8139_v43 = vpop.xlane.xlu0 %8138 }
0x5c61   : > { %12351 = vrcp.f32 %v8139_v43 }
0x5c62   : > { %12353 = vrcp.f32 %v8161_v42 }
0x5c6a   : > { %v12350_v44 = vpop.eup %12349 }
0x5c6b   : > { %v12352_v46 = vpop.eup %12351  ;;  %v8155_v47 = vmul.f32 %v12350_v44, %v8150_v36 }
0x5c6c   : > { %v8141_v48 = vmul.f32 %v12352_v46, %v8136_v37  ;;  %v12354_v49 = vpop.eup %12353 }
0x5c6d   : > { %v8156_v51 = vsel %vm13744_vm10, %v8155_v47, 0.0  ;;  %v8164_v54 = vsel %vm13827_vm14, %v12354_v49, 0.0 }
0x5c6e   : > { %v8142_v52 = vsel %vm500_vm11, %v8141_v48, 0.0 }
0x5c6f   : > { %v8157_v53 = vadd.f32 %v8156_v51, %v8142_v52 }
0x5c71   : > { %v8165_v55 = vadd.f32 %v8164_v54, %v8157_v53 }
0x5c73   : > { %8166 = vst [vmem:[%s12655_s3 + $0x4] sm:$0x1] %v8165_v55 }
0x5c74 PF: > { %s15816_s17 = sld [smem:[#allocation8_spill]]  ;;  %p12179_p10 = scmp.ge.s32.totalorder %s12432_s25, 2 }
0x5c76   : > { %p12176_p6 = pnand %p12179_p10, %p12567_p11 }
0x5c7a   : > { %s8210_s18 = sand.u32 1, %s15816_s17  }
0x5c7b   : > { %s8211_s28 = scalar_lea.sflag [#allocation5], %s8210_s18 }
0x5c7c   : > { %12415 = dma.done.wait (!%p12176_p6), %s8211_s28, 256  }
0x5c7d   : > { %12417 = vsyncadd (!%p12176_p6), %s8211_s28, 4294967040  ;;  %s15818_s25 = sld [smem:[#allocation10_spill]]  ;;  %s15819_s16 = sld [smem:[#allocation9_spill]] }
0x5c7e   : > { %s15820_s0 = sld [smem:[#allocation11_spill]]  ;;  %s15821_s23 = smov %s12424_s24 }
0x5c83   : > { %p32_p7 = scmp.ge.s32.totalorder %s15818_s25, 4   ;;  %s15822_s24 = smov %s15819_s16 }
0x5c85   :  { %34 = sbr.rel (!%p32_p7) target bundleno = 18 (0x12), region = 137 }
0x5c8c   :  { %8216 = vsyncpa [#allocation5], 1 }
0x5c8d   :  { %8218 = vsyncpa [#allocation5 + $0x1], 1 }

</bundles_post_ra>
